<compile_context>
chip_gen: v5e
topology: v5e:2x2
jax: 0.10.0
libtpu: 0.0.40
codegen_flags: <defaults>
</compile_context>

<pallas_src>
import functools
import math

import jax
import jax.numpy as jnp
from jax.experimental import pallas as pl
from jax.experimental.pallas import tpu as pltpu


# ----------------------------------------------------------------------------
# Fused Pallas kernel: one TwoWayAttentionBlock3D forward per grid step (batch)
# ----------------------------------------------------------------------------

def _twoway_block_kernel(
    q_ref, k_ref, qpe_ref, kpe_ref,
    sa_qkv_w_ref, sa_qkv_b_ref, sa_out_w_ref, sa_out_b_ref,
    t2i_qkv_w_ref, t2i_qkv_b_ref, t2i_out_w_ref, t2i_out_b_ref,
    i2t_qkv_w_ref, i2t_qkv_b_ref, i2t_out_w_ref, i2t_out_b_ref,
    norm_w_ref, norm_b_ref,
    mlp1_w_ref, mlp1_b_ref, mlp2_w_ref, mlp2_b_ref,
    out_q_ref, out_k_ref,
    *, num_heads, skip_first_layer_pe, eps):
    f32 = jnp.float32

    queries = q_ref[0].astype(f32)      # (Nq, C)
    keys = k_ref[0].astype(f32)         # (Nk, C)
    query_pe = qpe_ref[0].astype(f32)   # (Nq, C)
    key_pe = kpe_ref[0].astype(f32)     # (Nk, C)
    C = queries.shape[-1]

    def attention(q_in, k_in, v_in, qkv_w_ref, qkv_b_ref, out_w_ref, out_b_ref):
        """Attention with q/k/v projections, multi-head SDPA, output projection.

        qkv_w_ref: (3*C, internal) = [Wq; Wk; Wv] stacked along the input axis.
        qkv_b_ref: (3, internal).  out_w_ref: (internal, C).  out_b_ref: (1, C).
        """
        internal = qkv_w_ref.shape[1]
        dh = internal // num_heads
        scale = 1.0 / math.sqrt(dh)

        q = jnp.dot(q_in, qkv_w_ref[0:C, :],
                    preferred_element_type=f32) + qkv_b_ref[0:1, :]
        k = jnp.dot(k_in, qkv_w_ref[C:2 * C, :],
                    preferred_element_type=f32) + qkv_b_ref[1:2, :]
        v = jnp.dot(v_in, qkv_w_ref[2 * C:3 * C, :],
                    preferred_element_type=f32) + qkv_b_ref[2:3, :]

        # Static, unrolled per-head loop: everything stays in VMEM/vregs.
        head_outs = []
        for h in range(num_heads):
            qh = q[:, h * dh:(h + 1) * dh]          # (Nq_in, dh)
            kh = k[:, h * dh:(h + 1) * dh]          # (Nk_in, dh)
            vh = v[:, h * dh:(h + 1) * dh]          # (Nk_in, dh)
            s = jax.lax.dot_general(
                qh, kh, (((1,), (1,)), ((), ())),
                preferred_element_type=f32) * scale  # (Nq_in, Nk_in)
            s = s - jnp.max(s, axis=-1, keepdims=True)
            p = jnp.exp(s)
            p = p / jnp.sum(p, axis=-1, keepdims=True)
            head_outs.append(jnp.dot(p, vh, preferred_element_type=f32))
        o = jnp.concatenate(head_outs, axis=-1)      # (Nq_in, internal)

        return (jnp.dot(o, out_w_ref[...], preferred_element_type=f32)
                + out_b_ref[...])

    def layer_norm(x, idx):
        w = norm_w_ref[idx:idx + 1, :]               # (1, C)
        b = norm_b_ref[idx:idx + 1, :]               # (1, C)
        mu = jnp.mean(x, axis=-1, keepdims=True)
        xc = x - mu
        var = jnp.mean(xc * xc, axis=-1, keepdims=True)
        return xc * jax.lax.rsqrt(var + eps) * w + b

    # (1) Self-attention on sparse tokens.
    if skip_first_layer_pe:
        queries = attention(queries, queries, queries,
                            sa_qkv_w_ref, sa_qkv_b_ref, sa_out_w_ref, sa_out_b_ref)
    else:
        q = queries + query_pe
        attn_out = attention(q, q, queries,
                             sa_qkv_w_ref, sa_qkv_b_ref, sa_out_w_ref, sa_out_b_ref)
        queries = queries + attn_out
    queries = layer_norm(queries, 0)

    # (2) Cross-attention: tokens attend to image.
    q = queries + query_pe
    k = keys + key_pe
    attn_out = attention(q, k, keys,
                         t2i_qkv_w_ref, t2i_qkv_b_ref, t2i_out_w_ref, t2i_out_b_ref)
    queries = queries + attn_out
    queries = layer_norm(queries, 1)

    # (3) MLP block on tokens (ReLU activation fused in).
    h = jnp.dot(queries, mlp1_w_ref[...], preferred_element_type=f32) + mlp1_b_ref[...]
    h = jnp.maximum(h, 0.0)
    mlp_out = jnp.dot(h, mlp2_w_ref[...], preferred_element_type=f32) + mlp2_b_ref[...]
    queries = queries + mlp_out
    queries = layer_norm(queries, 2)

    # (4) Cross-attention: image attends to tokens.
    q = queries + query_pe
    k = keys + key_pe
    attn_out = attention(k, q, queries,
                         i2t_qkv_w_ref, i2t_qkv_b_ref, i2t_out_w_ref, i2t_out_b_ref)
    keys = keys + attn_out
    keys = layer_norm(keys, 3)

    out_q_ref[0] = queries.astype(out_q_ref.dtype)
    out_k_ref[0] = keys.astype(out_k_ref.dtype)


def twoway_attention_block(params, queries, keys, query_pe, key_pe, *,
                           num_heads=8, skip_first_layer_pe=False, eps=1e-5):
    """Fused TwoWayAttentionBlock3D forward.

    queries/query_pe: (B, Nq, C); keys/key_pe: (B, Nk, C) -> (queries', keys').
    """
    B, Nq, C = queries.shape
    Nk = keys.shape[1]
    sa, t2i, i2t = params["self_attn"], params["cross_t2i"], params["cross_i2t"]
    int_sa = sa["qkv_w"].shape[1]
    int_x = t2i["qkv_w"].shape[1]
    mlp_dim = params["mlp1_w"].shape[1]

    kernel = functools.partial(
        _twoway_block_kernel, num_heads=num_heads,
        skip_first_layer_pe=skip_first_layer_pe, eps=eps)

    def per_batch(n, c):
        return pl.BlockSpec((1, n, c), lambda b: (b, 0, 0))

    def resident(shape):
        # Full-array block, constant index_map -> fetched once, stays in VMEM.
        return pl.BlockSpec(shape, lambda b, _nd=len(shape): (0,) * _nd)

    def attn_specs(internal):
        return [resident((3 * C, internal)), resident((3, internal)),
                resident((internal, C)), resident((1, C))]

    in_specs = (
        [per_batch(Nq, C), per_batch(Nk, C), per_batch(Nq, C), per_batch(Nk, C)]
        + attn_specs(int_sa) + attn_specs(int_x) + attn_specs(int_x)
        + [resident((4, C)), resident((4, C))]
        + [resident((C, mlp_dim)), resident((1, mlp_dim)),
           resident((mlp_dim, C)), resident((1, C))]
    )

    out_q, out_k = pl.pallas_call(
        kernel,
        out_shape=(jax.ShapeDtypeStruct((B, Nq, C), jnp.float32),
                   jax.ShapeDtypeStruct((B, Nk, C), jnp.float32)),
        grid=(B,),
        in_specs=in_specs,
        out_specs=(per_batch(Nq, C), per_batch(Nk, C)),
        compiler_params=pltpu.CompilerParams(
            dimension_semantics=("parallel",)),
    )(queries, keys, query_pe, key_pe,
      sa["qkv_w"], sa["qkv_b"], sa["out_w"], sa["out_b"],
      t2i["qkv_w"], t2i["qkv_b"], t2i["out_w"], t2i["out_b"],
      i2t["qkv_w"], i2t["qkv_b"], i2t["out_w"], i2t["out_b"],
      params["norm_w"], params["norm_b"],
      params["mlp1_w"], params["mlp1_b"], params["mlp2_w"], params["mlp2_b"])
    return out_q, out_k


# ----------------------------------------------------------------------------
# Deterministic parameter initialization (weights stored (in, out))
# ----------------------------------------------------------------------------

def init_twoway_block_params(key, embedding_dim=32, num_heads=8, mlp_dim=128,
                             attention_downsample_rate=2):
    C = embedding_dim
    ks = iter(jax.random.split(key, 32))

    def w(shape, scale=0.02):
        return jax.random.normal(next(ks), shape, jnp.float32) * scale

    def attn_params(downsample_rate):
        internal = C // downsample_rate
        assert internal % num_heads == 0, "num_heads must divide internal dim"
        return {
            "qkv_w": w((3 * C, internal)),   # [Wq; Wk; Wv], each (C, internal)
            "qkv_b": w((3, internal)),
            "out_w": w((internal, C)),
            "out_b": w((1, C)),
        }

    return {
        "self_attn": attn_params(1),
        "cross_t2i": attn_params(attention_downsample_rate),
        "cross_i2t": attn_params(attention_downsample_rate),
        "norm_w": jnp.ones((4, C), jnp.float32),   # norm1..norm4 weights
        "norm_b": jnp.zeros((4, C), jnp.float32),  # norm1..norm4 biases
        "mlp1_w": w((C, mlp_dim)), "mlp1_b": w((1, mlp_dim)),
        "mlp2_w": w((mlp_dim, C)), "mlp2_b": w((1, C)),
    }


# ----------------------------------------------------------------------------
# Plain-JAX reference (mirrors the PyTorch forward) for a correctness check
# ----------------------------------------------------------------------------

def _reference_block(params, queries, keys, query_pe, key_pe, *,
                     num_heads, skip_first_layer_pe, eps=1e-5):
    C = queries.shape[-1]

    def attn(p, q, k, v):
        qw, kw, vw = p["qkv_w"][:C], p["qkv_w"][C:2 * C], p["qkv_w"][2 * C:]
        qb, kb, vb = p["qkv_b"][0], p["qkv_b"][1], p["qkv_b"][2]
        q = q @ qw + qb
        k = k @ kw + kb
        v = v @ vw + vb
        b, nq, internal = q.shape
        nk = k.shape[1]
        dh = internal // num_heads
        qh = q.reshape(b, nq, num_heads, dh).transpose(0, 2, 1, 3)
        kh = k.reshape(b, nk, num_heads, dh).transpose(0, 2, 1, 3)
        vh = v.reshape(b, nk, num_heads, dh).transpose(0, 2, 1, 3)
        s = jnp.einsum("bhqd,bhkd->bhqk", qh, kh) / math.sqrt(dh)
        pr = jax.nn.softmax(s, axis=-1)
        o = jnp.einsum("bhqk,bhkd->bhqd", pr, vh)
        o = o.transpose(0, 2, 1, 3).reshape(b, nq, internal)
        return o @ p["out_w"] + p["out_b"][0]

    def ln(x, i):
        mu = x.mean(-1, keepdims=True)
        var = ((x - mu) ** 2).mean(-1, keepdims=True)
        return (x - mu) / jnp.sqrt(var + eps) * params["norm_w"][i] + params["norm_b"][i]

    with jax.default_matmul_precision("float32"):
        if skip_first_layer_pe:
            queries = attn(params["self_attn"], queries, queries, queries)
        else:
            q = queries + query_pe
            queries = queries + attn(params["self_attn"], q, q, queries)
        queries = ln(queries, 0)

        q = queries + query_pe
        k = keys + key_pe
        queries = queries + attn(params["cross_t2i"], q, k, keys)
        queries = ln(queries, 1)

        h = jax.nn.relu(queries @ params["mlp1_w"] + params["mlp1_b"][0])
        queries = queries + (h @ params["mlp2_w"] + params["mlp2_b"][0])
        queries = ln(queries, 2)

        q = queries + query_pe
        k = keys + key_pe
        keys = keys + attn(params["cross_i2t"], k, q, queries)
        keys = ln(keys, 3)
    return queries, keys


# ----------------------------------------------------------------------------
# Main
# ----------------------------------------------------------------------------

if __name__ == "__main__":
    key = jax.random.PRNGKey(0)
    kp, kq, kk, kqpe, kkpe = jax.random.split(key, 5)

    B = 2
    C = 32            # embedding_dim (8 heads; cross-attn downsample_rate=2 -> dh=2)
    NUM_HEADS = 8
    MLP_DIM = 128
    Nq = 8            # sparse prompt tokens
    Nk = 4 * 4 * 4    # flattened 3D image-embedding tokens

    params = init_twoway_block_params(kp, embedding_dim=C, num_heads=NUM_HEADS,
                                      mlp_dim=MLP_DIM, attention_downsample_rate=2)

    queries = jax.random.normal(kq, (B, Nq, C), jnp.float32)
    keys = jax.random.normal(kk, (B, Nk, C), jnp.float32)
    query_pe = jax.random.normal(kqpe, (B, Nq, C), jnp.float32)
    key_pe = jax.random.normal(kkpe, (B, Nk, C), jnp.float32)

    # Standard path (skip_first_layer_pe=False).
    fwd = jax.jit(functools.partial(twoway_attention_block,
                                    num_heads=NUM_HEADS, skip_first_layer_pe=False))
    q_out, k_out = fwd(params, queries, keys, query_pe, key_pe)
    jax.block_until_ready((q_out, k_out))

    # First-layer path (skip_first_layer_pe=True).
    fwd0 = jax.jit(functools.partial(twoway_attention_block,
                                     num_heads=NUM_HEADS, skip_first_layer_pe=True))
    q0_out, k0_out = fwd0(params, queries, keys, query_pe, key_pe)
    jax.block_until_ready((q0_out, k0_out))

    assert q_out.shape == (B, Nq, C) and k_out.shape == (B, Nk, C)
    assert q0_out.shape == (B, Nq, C) and k0_out.shape == (B, Nk, C)

    # Correctness vs. plain-JAX reference of the PyTorch forward.
    rq, rk = _reference_block(params, queries, keys, query_pe, key_pe,
                              num_heads=NUM_HEADS, skip_first_layer_pe=False)
    rq0, rk0 = _reference_block(params, queries, keys, query_pe, key_pe,
                                num_heads=NUM_HEADS, skip_first_layer_pe=True)
    assert bool(jnp.all(jnp.isfinite(q_out))) and bool(jnp.all(jnp.isfinite(k_out)))
    assert bool(jnp.allclose(q_out, rq, atol=1e-2, rtol=1e-2))
    assert bool(jnp.allclose(k_out, rk, atol=1e-2, rtol=1e-2))
    assert bool(jnp.allclose(q0_out, rq0, atol=1e-2, rtol=1e-2))
    assert bool(jnp.allclose(k0_out, rk0, atol=1e-2, rtol=1e-2))

    print("KERNEL_OK")
</pallas_src>

<mosaic_0001>
module attributes {stable_mosaic.version = 11 : i64} {
  func.func @_twoway_block_kernel(%arg0: i32, %arg1: memref<1x8x32xf32, #tpu.memory_space<vmem>>, %arg2: memref<1x64x32xf32, #tpu.memory_space<vmem>>, %arg3: memref<1x8x32xf32, #tpu.memory_space<vmem>>, %arg4: memref<1x64x32xf32, #tpu.memory_space<vmem>>, %arg5: memref<96x32xf32, #tpu.memory_space<vmem>>, %arg6: memref<3x32xf32, #tpu.memory_space<vmem>>, %arg7: memref<32x32xf32, #tpu.memory_space<vmem>>, %arg8: memref<1x32xf32, #tpu.memory_space<vmem>>, %arg9: memref<96x16xf32, #tpu.memory_space<vmem>>, %arg10: memref<3x16xf32, #tpu.memory_space<vmem>>, %arg11: memref<16x32xf32, #tpu.memory_space<vmem>>, %arg12: memref<1x32xf32, #tpu.memory_space<vmem>>, %arg13: memref<96x16xf32, #tpu.memory_space<vmem>>, %arg14: memref<3x16xf32, #tpu.memory_space<vmem>>, %arg15: memref<16x32xf32, #tpu.memory_space<vmem>>, %arg16: memref<1x32xf32, #tpu.memory_space<vmem>>, %arg17: memref<4x32xf32, #tpu.memory_space<vmem>>, %arg18: memref<4x32xf32, #tpu.memory_space<vmem>>, %arg19: memref<32x128xf32, #tpu.memory_space<vmem>>, %arg20: memref<1x128xf32, #tpu.memory_space<vmem>>, %arg21: memref<128x32xf32, #tpu.memory_space<vmem>>, %arg22: memref<1x32xf32, #tpu.memory_space<vmem>>, %arg23: memref<1x8x32xf32, #tpu.memory_space<vmem>>, %arg24: memref<1x64x32xf32, #tpu.memory_space<vmem>>) attributes {dimension_semantics = [#tpu.dimension_semantics<parallel>], iteration_bounds = array<i64: 2>, scalar_prefetch = 0 : i64, scratch_operands = 0 : i64, tpu.core_type = #tpu.core_type<tc>, window_params = [{transform_indices = @transform_0, window_bounds = array<i64: 1, 8, 32>}, {transform_indices = @transform_1, window_bounds = array<i64: 1, 64, 32>}, {transform_indices = @transform_2, window_bounds = array<i64: 1, 8, 32>}, {transform_indices = @transform_3, window_bounds = array<i64: 1, 64, 32>}, {pipeline_mode = #tpu.pipeline_mode<synchronous>, transform_indices = @transform_4, window_bounds = array<i64: 96, 32>}, {pipeline_mode = #tpu.pipeline_mode<synchronous>, transform_indices = @transform_5, window_bounds = array<i64: 3, 32>}, {pipeline_mode = #tpu.pipeline_mode<synchronous>, transform_indices = @transform_6, window_bounds = array<i64: 32, 32>}, {pipeline_mode = #tpu.pipeline_mode<synchronous>, transform_indices = @transform_7, window_bounds = array<i64: 1, 32>}, {pipeline_mode = #tpu.pipeline_mode<synchronous>, transform_indices = @transform_8, window_bounds = array<i64: 96, 16>}, {pipeline_mode = #tpu.pipeline_mode<synchronous>, transform_indices = @transform_9, window_bounds = array<i64: 3, 16>}, {pipeline_mode = #tpu.pipeline_mode<synchronous>, transform_indices = @transform_10, window_bounds = array<i64: 16, 32>}, {pipeline_mode = #tpu.pipeline_mode<synchronous>, transform_indices = @transform_11, window_bounds = array<i64: 1, 32>}, {pipeline_mode = #tpu.pipeline_mode<synchronous>, transform_indices = @transform_12, window_bounds = array<i64: 96, 16>}, {pipeline_mode = #tpu.pipeline_mode<synchronous>, transform_indices = @transform_13, window_bounds = array<i64: 3, 16>}, {pipeline_mode = #tpu.pipeline_mode<synchronous>, transform_indices = @transform_14, window_bounds = array<i64: 16, 32>}, {pipeline_mode = #tpu.pipeline_mode<synchronous>, transform_indices = @transform_15, window_bounds = array<i64: 1, 32>}, {pipeline_mode = #tpu.pipeline_mode<synchronous>, transform_indices = @transform_16, window_bounds = array<i64: 4, 32>}, {pipeline_mode = #tpu.pipeline_mode<synchronous>, transform_indices = @transform_17, window_bounds = array<i64: 4, 32>}, {pipeline_mode = #tpu.pipeline_mode<synchronous>, transform_indices = @transform_18, window_bounds = array<i64: 32, 128>}, {pipeline_mode = #tpu.pipeline_mode<synchronous>, transform_indices = @transform_19, window_bounds = array<i64: 1, 128>}, {pipeline_mode = #tpu.pipeline_mode<synchronous>, transform_indices = @transform_20, window_bounds = array<i64: 128, 32>}, {pipeline_mode = #tpu.pipeline_mode<synchronous>, transform_indices = @transform_21, window_bounds = array<i64: 1, 32>}, {transform_indices = @transform_22, window_bounds = array<i64: 1, 8, 32>}, {transform_indices = @transform_23, window_bounds = array<i64: 1, 64, 32>}]} {
    %c0 = arith.constant 0 : index
    %c0_0 = arith.constant 0 : index
    %c0_1 = arith.constant 0 : index
    %0 = vector.load %arg1[%c0, %c0_0, %c0_1] : memref<1x8x32xf32, #tpu.memory_space<vmem>>, vector<1x8x32xf32>
    %1 = vector.shape_cast %0 : vector<1x8x32xf32> to vector<8x32xf32>
    %c0_2 = arith.constant 0 : index
    %c0_3 = arith.constant 0 : index
    %c0_4 = arith.constant 0 : index
    %2 = vector.load %arg2[%c0_2, %c0_3, %c0_4] : memref<1x64x32xf32, #tpu.memory_space<vmem>>, vector<1x64x32xf32>
    %3 = vector.shape_cast %2 : vector<1x64x32xf32> to vector<64x32xf32>
    %c0_5 = arith.constant 0 : index
    %c0_6 = arith.constant 0 : index
    %c0_7 = arith.constant 0 : index
    %4 = vector.load %arg3[%c0_5, %c0_6, %c0_7] : memref<1x8x32xf32, #tpu.memory_space<vmem>>, vector<1x8x32xf32>
    %5 = vector.shape_cast %4 : vector<1x8x32xf32> to vector<8x32xf32>
    %c0_8 = arith.constant 0 : index
    %c0_9 = arith.constant 0 : index
    %c0_10 = arith.constant 0 : index
    %6 = vector.load %arg4[%c0_8, %c0_9, %c0_10] : memref<1x64x32xf32, #tpu.memory_space<vmem>>, vector<1x64x32xf32>
    %7 = vector.shape_cast %6 : vector<1x64x32xf32> to vector<64x32xf32>
    %8 = arith.addf %1, %5 : vector<8x32xf32>
    %c0_11 = arith.constant 0 : index
    %c0_12 = arith.constant 0 : index
    %9 = vector.load %arg5[%c0_11, %c0_12] : memref<96x32xf32, #tpu.memory_space<vmem>>, vector<32x32xf32>
    %cst = arith.constant dense<0.000000e+00> : vector<8x32xf32>
    %10 = tpu.matmul %8, %9, %cst {dimension_numbers = #tpu.dot_dimension_numbers<[1], [0], [0], [1], [0, 0, 1, 1], [], []>} : vector<8x32xf32>, vector<32x32xf32>, vector<8x32xf32> -> vector<8x32xf32>
    %c0_13 = arith.constant 0 : index
    %c0_14 = arith.constant 0 : index
    %11 = vector.load %arg6[%c0_13, %c0_14] : memref<3x32xf32, #tpu.memory_space<vmem>>, vector<1x32xf32>
    %12 = vector.broadcast %11 : vector<1x32xf32> to vector<8x32xf32>
    %13 = arith.addf %10, %12 : vector<8x32xf32>
    %c32 = arith.constant 32 : index
    %c0_15 = arith.constant 0 : index
    %14 = vector.load %arg5[%c32, %c0_15] : memref<96x32xf32, #tpu.memory_space<vmem>>, vector<32x32xf32>
    %cst_16 = arith.constant dense<0.000000e+00> : vector<8x32xf32>
    %15 = tpu.matmul %8, %14, %cst_16 {dimension_numbers = #tpu.dot_dimension_numbers<[1], [0], [0], [1], [0, 0, 1, 1], [], []>} : vector<8x32xf32>, vector<32x32xf32>, vector<8x32xf32> -> vector<8x32xf32>
    %c1 = arith.constant 1 : index
    %c0_17 = arith.constant 0 : index
    %16 = vector.load %arg6[%c1, %c0_17] : memref<3x32xf32, #tpu.memory_space<vmem>>, vector<1x32xf32>
    %17 = vector.broadcast %16 : vector<1x32xf32> to vector<8x32xf32>
    %18 = arith.addf %15, %17 : vector<8x32xf32>
    %c64 = arith.constant 64 : index
    %c0_18 = arith.constant 0 : index
    %19 = vector.load %arg5[%c64, %c0_18] : memref<96x32xf32, #tpu.memory_space<vmem>>, vector<32x32xf32>
    %cst_19 = arith.constant dense<0.000000e+00> : vector<8x32xf32>
    %20 = tpu.matmul %1, %19, %cst_19 {dimension_numbers = #tpu.dot_dimension_numbers<[1], [0], [0], [1], [0, 0, 1, 1], [], []>} : vector<8x32xf32>, vector<32x32xf32>, vector<8x32xf32> -> vector<8x32xf32>
    %c2 = arith.constant 2 : index
    %c0_20 = arith.constant 0 : index
    %21 = vector.load %arg6[%c2, %c0_20] : memref<3x32xf32, #tpu.memory_space<vmem>>, vector<1x32xf32>
    %22 = vector.broadcast %21 : vector<1x32xf32> to vector<8x32xf32>
    %23 = arith.addf %20, %22 : vector<8x32xf32>
    %24 = vector.extract_strided_slice %13 {offsets = [0, 0], sizes = [8, 4], strides = [1, 1]} : vector<8x32xf32> to vector<8x4xf32>
    %25 = vector.extract_strided_slice %18 {offsets = [0, 0], sizes = [8, 4], strides = [1, 1]} : vector<8x32xf32> to vector<8x4xf32>
    %26 = vector.extract_strided_slice %23 {offsets = [0, 0], sizes = [8, 4], strides = [1, 1]} : vector<8x32xf32> to vector<8x4xf32>
    %cst_21 = arith.constant dense<0.000000e+00> : vector<8x8xf32>
    %27 = tpu.matmul %24, %25, %cst_21 {dimension_numbers = #tpu.dot_dimension_numbers<[1], [1], [0], [0], [0, 0, 1, 0], [], []>} : vector<8x4xf32>, vector<8x4xf32>, vector<8x8xf32> -> vector<8x8xf32>
    %cst_22 = arith.constant 5.000000e-01 : f32
    %28 = vector.broadcast %cst_22 : f32 to vector<8x8xf32>
    %29 = arith.mulf %27, %28 : vector<8x8xf32>
    %cst_23 = arith.constant dense<0xFF800000> : vector<8xf32>
    %30 = vector.multi_reduction <maximumf>, %29, %cst_23 [1] : vector<8x8xf32> to vector<8xf32>
    %31 = vector.shape_cast %30 : vector<8xf32> to vector<8x1xf32>
    %32 = vector.broadcast %31 : vector<8x1xf32> to vector<8x8xf32>
    %33 = arith.subf %29, %32 : vector<8x8xf32>
    %34 = math.exp %33 : vector<8x8xf32>
    %cst_24 = arith.constant dense<0.000000e+00> : vector<8xf32>
    %35 = vector.multi_reduction <add>, %34, %cst_24 [1] : vector<8x8xf32> to vector<8xf32>
    %36 = vector.shape_cast %35 : vector<8xf32> to vector<8x1xf32>
    %37 = vector.broadcast %36 : vector<8x1xf32> to vector<8x8xf32>
    %38 = arith.divf %34, %37 : vector<8x8xf32>
    %cst_25 = arith.constant dense<0.000000e+00> : vector<8x4xf32>
    %39 = tpu.matmul %38, %26, %cst_25 {dimension_numbers = #tpu.dot_dimension_numbers<[1], [0], [0], [1], [0, 0, 1, 1], [], []>} : vector<8x8xf32>, vector<8x4xf32>, vector<8x4xf32> -> vector<8x4xf32>
    %40 = vector.extract_strided_slice %13 {offsets = [0, 4], sizes = [8, 4], strides = [1, 1]} : vector<8x32xf32> to vector<8x4xf32>
    %41 = vector.extract_strided_slice %18 {offsets = [0, 4], sizes = [8, 4], strides = [1, 1]} : vector<8x32xf32> to vector<8x4xf32>
    %42 = vector.extract_strided_slice %23 {offsets = [0, 4], sizes = [8, 4], strides = [1, 1]} : vector<8x32xf32> to vector<8x4xf32>
    %cst_26 = arith.constant dense<0.000000e+00> : vector<8x8xf32>
    %43 = tpu.matmul %40, %41, %cst_26 {dimension_numbers = #tpu.dot_dimension_numbers<[1], [1], [0], [0], [0, 0, 1, 0], [], []>} : vector<8x4xf32>, vector<8x4xf32>, vector<8x8xf32> -> vector<8x8xf32>
    %cst_27 = arith.constant 5.000000e-01 : f32
    %44 = vector.broadcast %cst_27 : f32 to vector<8x8xf32>
    %45 = arith.mulf %43, %44 : vector<8x8xf32>
    %cst_28 = arith.constant dense<0xFF800000> : vector<8xf32>
    %46 = vector.multi_reduction <maximumf>, %45, %cst_28 [1] : vector<8x8xf32> to vector<8xf32>
    %47 = vector.shape_cast %46 : vector<8xf32> to vector<8x1xf32>
    %48 = vector.broadcast %47 : vector<8x1xf32> to vector<8x8xf32>
    %49 = arith.subf %45, %48 : vector<8x8xf32>
    %50 = math.exp %49 : vector<8x8xf32>
    %cst_29 = arith.constant dense<0.000000e+00> : vector<8xf32>
    %51 = vector.multi_reduction <add>, %50, %cst_29 [1] : vector<8x8xf32> to vector<8xf32>
    %52 = vector.shape_cast %51 : vector<8xf32> to vector<8x1xf32>
    %53 = vector.broadcast %52 : vector<8x1xf32> to vector<8x8xf32>
    %54 = arith.divf %50, %53 : vector<8x8xf32>
    %cst_30 = arith.constant dense<0.000000e+00> : vector<8x4xf32>
    %55 = tpu.matmul %54, %42, %cst_30 {dimension_numbers = #tpu.dot_dimension_numbers<[1], [0], [0], [1], [0, 0, 1, 1], [], []>} : vector<8x8xf32>, vector<8x4xf32>, vector<8x4xf32> -> vector<8x4xf32>
    %56 = vector.extract_strided_slice %13 {offsets = [0, 8], sizes = [8, 4], strides = [1, 1]} : vector<8x32xf32> to vector<8x4xf32>
    %57 = vector.extract_strided_slice %18 {offsets = [0, 8], sizes = [8, 4], strides = [1, 1]} : vector<8x32xf32> to vector<8x4xf32>
    %58 = vector.extract_strided_slice %23 {offsets = [0, 8], sizes = [8, 4], strides = [1, 1]} : vector<8x32xf32> to vector<8x4xf32>
    %cst_31 = arith.constant dense<0.000000e+00> : vector<8x8xf32>
    %59 = tpu.matmul %56, %57, %cst_31 {dimension_numbers = #tpu.dot_dimension_numbers<[1], [1], [0], [0], [0, 0, 1, 0], [], []>} : vector<8x4xf32>, vector<8x4xf32>, vector<8x8xf32> -> vector<8x8xf32>
    %cst_32 = arith.constant 5.000000e-01 : f32
    %60 = vector.broadcast %cst_32 : f32 to vector<8x8xf32>
    %61 = arith.mulf %59, %60 : vector<8x8xf32>
    %cst_33 = arith.constant dense<0xFF800000> : vector<8xf32>
    %62 = vector.multi_reduction <maximumf>, %61, %cst_33 [1] : vector<8x8xf32> to vector<8xf32>
    %63 = vector.shape_cast %62 : vector<8xf32> to vector<8x1xf32>
    %64 = vector.broadcast %63 : vector<8x1xf32> to vector<8x8xf32>
    %65 = arith.subf %61, %64 : vector<8x8xf32>
    %66 = math.exp %65 : vector<8x8xf32>
    %cst_34 = arith.constant dense<0.000000e+00> : vector<8xf32>
    %67 = vector.multi_reduction <add>, %66, %cst_34 [1] : vector<8x8xf32> to vector<8xf32>
    %68 = vector.shape_cast %67 : vector<8xf32> to vector<8x1xf32>
    %69 = vector.broadcast %68 : vector<8x1xf32> to vector<8x8xf32>
    %70 = arith.divf %66, %69 : vector<8x8xf32>
    %cst_35 = arith.constant dense<0.000000e+00> : vector<8x4xf32>
    %71 = tpu.matmul %70, %58, %cst_35 {dimension_numbers = #tpu.dot_dimension_numbers<[1], [0], [0], [1], [0, 0, 1, 1], [], []>} : vector<8x8xf32>, vector<8x4xf32>, vector<8x4xf32> -> vector<8x4xf32>
    %72 = vector.extract_strided_slice %13 {offsets = [0, 12], sizes = [8, 4], strides = [1, 1]} : vector<8x32xf32> to vector<8x4xf32>
    %73 = vector.extract_strided_slice %18 {offsets = [0, 12], sizes = [8, 4], strides = [1, 1]} : vector<8x32xf32> to vector<8x4xf32>
    %74 = vector.extract_strided_slice %23 {offsets = [0, 12], sizes = [8, 4], strides = [1, 1]} : vector<8x32xf32> to vector<8x4xf32>
    %cst_36 = arith.constant dense<0.000000e+00> : vector<8x8xf32>
    %75 = tpu.matmul %72, %73, %cst_36 {dimension_numbers = #tpu.dot_dimension_numbers<[1], [1], [0], [0], [0, 0, 1, 0], [], []>} : vector<8x4xf32>, vector<8x4xf32>, vector<8x8xf32> -> vector<8x8xf32>
    %cst_37 = arith.constant 5.000000e-01 : f32
    %76 = vector.broadcast %cst_37 : f32 to vector<8x8xf32>
    %77 = arith.mulf %75, %76 : vector<8x8xf32>
    %cst_38 = arith.constant dense<0xFF800000> : vector<8xf32>
    %78 = vector.multi_reduction <maximumf>, %77, %cst_38 [1] : vector<8x8xf32> to vector<8xf32>
    %79 = vector.shape_cast %78 : vector<8xf32> to vector<8x1xf32>
    %80 = vector.broadcast %79 : vector<8x1xf32> to vector<8x8xf32>
    %81 = arith.subf %77, %80 : vector<8x8xf32>
    %82 = math.exp %81 : vector<8x8xf32>
    %cst_39 = arith.constant dense<0.000000e+00> : vector<8xf32>
    %83 = vector.multi_reduction <add>, %82, %cst_39 [1] : vector<8x8xf32> to vector<8xf32>
    %84 = vector.shape_cast %83 : vector<8xf32> to vector<8x1xf32>
    %85 = vector.broadcast %84 : vector<8x1xf32> to vector<8x8xf32>
    %86 = arith.divf %82, %85 : vector<8x8xf32>
    %cst_40 = arith.constant dense<0.000000e+00> : vector<8x4xf32>
    %87 = tpu.matmul %86, %74, %cst_40 {dimension_numbers = #tpu.dot_dimension_numbers<[1], [0], [0], [1], [0, 0, 1, 1], [], []>} : vector<8x8xf32>, vector<8x4xf32>, vector<8x4xf32> -> vector<8x4xf32>
    %88 = vector.extract_strided_slice %13 {offsets = [0, 16], sizes = [8, 4], strides = [1, 1]} : vector<8x32xf32> to vector<8x4xf32>
    %89 = vector.extract_strided_slice %18 {offsets = [0, 16], sizes = [8, 4], strides = [1, 1]} : vector<8x32xf32> to vector<8x4xf32>
    %90 = vector.extract_strided_slice %23 {offsets = [0, 16], sizes = [8, 4], strides = [1, 1]} : vector<8x32xf32> to vector<8x4xf32>
    %cst_41 = arith.constant dense<0.000000e+00> : vector<8x8xf32>
    %91 = tpu.matmul %88, %89, %cst_41 {dimension_numbers = #tpu.dot_dimension_numbers<[1], [1], [0], [0], [0, 0, 1, 0], [], []>} : vector<8x4xf32>, vector<8x4xf32>, vector<8x8xf32> -> vector<8x8xf32>
    %cst_42 = arith.constant 5.000000e-01 : f32
    %92 = vector.broadcast %cst_42 : f32 to vector<8x8xf32>
    %93 = arith.mulf %91, %92 : vector<8x8xf32>
    %cst_43 = arith.constant dense<0xFF800000> : vector<8xf32>
    %94 = vector.multi_reduction <maximumf>, %93, %cst_43 [1] : vector<8x8xf32> to vector<8xf32>
    %95 = vector.shape_cast %94 : vector<8xf32> to vector<8x1xf32>
    %96 = vector.broadcast %95 : vector<8x1xf32> to vector<8x8xf32>
    %97 = arith.subf %93, %96 : vector<8x8xf32>
    %98 = math.exp %97 : vector<8x8xf32>
    %cst_44 = arith.constant dense<0.000000e+00> : vector<8xf32>
    %99 = vector.multi_reduction <add>, %98, %cst_44 [1] : vector<8x8xf32> to vector<8xf32>
    %100 = vector.shape_cast %99 : vector<8xf32> to vector<8x1xf32>
    %101 = vector.broadcast %100 : vector<8x1xf32> to vector<8x8xf32>
    %102 = arith.divf %98, %101 : vector<8x8xf32>
    %cst_45 = arith.constant dense<0.000000e+00> : vector<8x4xf32>
    %103 = tpu.matmul %102, %90, %cst_45 {dimension_numbers = #tpu.dot_dimension_numbers<[1], [0], [0], [1], [0, 0, 1, 1], [], []>} : vector<8x8xf32>, vector<8x4xf32>, vector<8x4xf32> -> vector<8x4xf32>
    %104 = vector.extract_strided_slice %13 {offsets = [0, 20], sizes = [8, 4], strides = [1, 1]} : vector<8x32xf32> to vector<8x4xf32>
    %105 = vector.extract_strided_slice %18 {offsets = [0, 20], sizes = [8, 4], strides = [1, 1]} : vector<8x32xf32> to vector<8x4xf32>
    %106 = vector.extract_strided_slice %23 {offsets = [0, 20], sizes = [8, 4], strides = [1, 1]} : vector<8x32xf32> to vector<8x4xf32>
    %cst_46 = arith.constant dense<0.000000e+00> : vector<8x8xf32>
    %107 = tpu.matmul %104, %105, %cst_46 {dimension_numbers = #tpu.dot_dimension_numbers<[1], [1], [0], [0], [0, 0, 1, 0], [], []>} : vector<8x4xf32>, vector<8x4xf32>, vector<8x8xf32> -> vector<8x8xf32>
    %cst_47 = arith.constant 5.000000e-01 : f32
    %108 = vector.broadcast %cst_47 : f32 to vector<8x8xf32>
    %109 = arith.mulf %107, %108 : vector<8x8xf32>
    %cst_48 = arith.constant dense<0xFF800000> : vector<8xf32>
    %110 = vector.multi_reduction <maximumf>, %109, %cst_48 [1] : vector<8x8xf32> to vector<8xf32>
    %111 = vector.shape_cast %110 : vector<8xf32> to vector<8x1xf32>
    %112 = vector.broadcast %111 : vector<8x1xf32> to vector<8x8xf32>
    %113 = arith.subf %109, %112 : vector<8x8xf32>
    %114 = math.exp %113 : vector<8x8xf32>
    %cst_49 = arith.constant dense<0.000000e+00> : vector<8xf32>
    %115 = vector.multi_reduction <add>, %114, %cst_49 [1] : vector<8x8xf32> to vector<8xf32>
    %116 = vector.shape_cast %115 : vector<8xf32> to vector<8x1xf32>
    %117 = vector.broadcast %116 : vector<8x1xf32> to vector<8x8xf32>
    %118 = arith.divf %114, %117 : vector<8x8xf32>
    %cst_50 = arith.constant dense<0.000000e+00> : vector<8x4xf32>
    %119 = tpu.matmul %118, %106, %cst_50 {dimension_numbers = #tpu.dot_dimension_numbers<[1], [0], [0], [1], [0, 0, 1, 1], [], []>} : vector<8x8xf32>, vector<8x4xf32>, vector<8x4xf32> -> vector<8x4xf32>
    %120 = vector.extract_strided_slice %13 {offsets = [0, 24], sizes = [8, 4], strides = [1, 1]} : vector<8x32xf32> to vector<8x4xf32>
    %121 = vector.extract_strided_slice %18 {offsets = [0, 24], sizes = [8, 4], strides = [1, 1]} : vector<8x32xf32> to vector<8x4xf32>
    %122 = vector.extract_strided_slice %23 {offsets = [0, 24], sizes = [8, 4], strides = [1, 1]} : vector<8x32xf32> to vector<8x4xf32>
    %cst_51 = arith.constant dense<0.000000e+00> : vector<8x8xf32>
    %123 = tpu.matmul %120, %121, %cst_51 {dimension_numbers = #tpu.dot_dimension_numbers<[1], [1], [0], [0], [0, 0, 1, 0], [], []>} : vector<8x4xf32>, vector<8x4xf32>, vector<8x8xf32> -> vector<8x8xf32>
    %cst_52 = arith.constant 5.000000e-01 : f32
    %124 = vector.broadcast %cst_52 : f32 to vector<8x8xf32>
    %125 = arith.mulf %123, %124 : vector<8x8xf32>
    %cst_53 = arith.constant dense<0xFF800000> : vector<8xf32>
    %126 = vector.multi_reduction <maximumf>, %125, %cst_53 [1] : vector<8x8xf32> to vector<8xf32>
    %127 = vector.shape_cast %126 : vector<8xf32> to vector<8x1xf32>
    %128 = vector.broadcast %127 : vector<8x1xf32> to vector<8x8xf32>
    %129 = arith.subf %125, %128 : vector<8x8xf32>
    %130 = math.exp %129 : vector<8x8xf32>
    %cst_54 = arith.constant dense<0.000000e+00> : vector<8xf32>
    %131 = vector.multi_reduction <add>, %130, %cst_54 [1] : vector<8x8xf32> to vector<8xf32>
    %132 = vector.shape_cast %131 : vector<8xf32> to vector<8x1xf32>
    %133 = vector.broadcast %132 : vector<8x1xf32> to vector<8x8xf32>
    %134 = arith.divf %130, %133 : vector<8x8xf32>
    %cst_55 = arith.constant dense<0.000000e+00> : vector<8x4xf32>
    %135 = tpu.matmul %134, %122, %cst_55 {dimension_numbers = #tpu.dot_dimension_numbers<[1], [0], [0], [1], [0, 0, 1, 1], [], []>} : vector<8x8xf32>, vector<8x4xf32>, vector<8x4xf32> -> vector<8x4xf32>
    %136 = vector.extract_strided_slice %13 {offsets = [0, 28], sizes = [8, 4], strides = [1, 1]} : vector<8x32xf32> to vector<8x4xf32>
    %137 = vector.extract_strided_slice %18 {offsets = [0, 28], sizes = [8, 4], strides = [1, 1]} : vector<8x32xf32> to vector<8x4xf32>
    %138 = vector.extract_strided_slice %23 {offsets = [0, 28], sizes = [8, 4], strides = [1, 1]} : vector<8x32xf32> to vector<8x4xf32>
    %cst_56 = arith.constant dense<0.000000e+00> : vector<8x8xf32>
    %139 = tpu.matmul %136, %137, %cst_56 {dimension_numbers = #tpu.dot_dimension_numbers<[1], [1], [0], [0], [0, 0, 1, 0], [], []>} : vector<8x4xf32>, vector<8x4xf32>, vector<8x8xf32> -> vector<8x8xf32>
    %cst_57 = arith.constant 5.000000e-01 : f32
    %140 = vector.broadcast %cst_57 : f32 to vector<8x8xf32>
    %141 = arith.mulf %139, %140 : vector<8x8xf32>
    %cst_58 = arith.constant dense<0xFF800000> : vector<8xf32>
    %142 = vector.multi_reduction <maximumf>, %141, %cst_58 [1] : vector<8x8xf32> to vector<8xf32>
    %143 = vector.shape_cast %142 : vector<8xf32> to vector<8x1xf32>
    %144 = vector.broadcast %143 : vector<8x1xf32> to vector<8x8xf32>
    %145 = arith.subf %141, %144 : vector<8x8xf32>
    %146 = math.exp %145 : vector<8x8xf32>
    %cst_59 = arith.constant dense<0.000000e+00> : vector<8xf32>
    %147 = vector.multi_reduction <add>, %146, %cst_59 [1] : vector<8x8xf32> to vector<8xf32>
    %148 = vector.shape_cast %147 : vector<8xf32> to vector<8x1xf32>
    %149 = vector.broadcast %148 : vector<8x1xf32> to vector<8x8xf32>
    %150 = arith.divf %146, %149 : vector<8x8xf32>
    %cst_60 = arith.constant dense<0.000000e+00> : vector<8x4xf32>
    %151 = tpu.matmul %150, %138, %cst_60 {dimension_numbers = #tpu.dot_dimension_numbers<[1], [0], [0], [1], [0, 0, 1, 1], [], []>} : vector<8x8xf32>, vector<8x4xf32>, vector<8x4xf32> -> vector<8x4xf32>
    %152 = tpu.concatenate %39, %55, %71, %87, %103, %119, %135, %151 in 1 : vector<8x4xf32>, vector<8x4xf32>, vector<8x4xf32>, vector<8x4xf32>, vector<8x4xf32>, vector<8x4xf32>, vector<8x4xf32>, vector<8x4xf32> -> vector<8x32xf32>
    %c0_61 = arith.constant 0 : index
    %c0_62 = arith.constant 0 : index
    %153 = vector.load %arg7[%c0_61, %c0_62] : memref<32x32xf32, #tpu.memory_space<vmem>>, vector<32x32xf32>
    %cst_63 = arith.constant dense<0.000000e+00> : vector<8x32xf32>
    %154 = tpu.matmul %152, %153, %cst_63 {dimension_numbers = #tpu.dot_dimension_numbers<[1], [0], [0], [1], [0, 0, 1, 1], [], []>} : vector<8x32xf32>, vector<32x32xf32>, vector<8x32xf32> -> vector<8x32xf32>
    %c0_64 = arith.constant 0 : index
    %c0_65 = arith.constant 0 : index
    %155 = vector.load %arg8[%c0_64, %c0_65] : memref<1x32xf32, #tpu.memory_space<vmem>>, vector<1x32xf32>
    %156 = vector.broadcast %155 : vector<1x32xf32> to vector<8x32xf32>
    %157 = arith.addf %154, %156 : vector<8x32xf32>
    %158 = arith.addf %1, %157 : vector<8x32xf32>
    %c0_66 = arith.constant 0 : index
    %c0_67 = arith.constant 0 : index
    %159 = vector.load %arg17[%c0_66, %c0_67] : memref<4x32xf32, #tpu.memory_space<vmem>>, vector<1x32xf32>
    %c0_68 = arith.constant 0 : index
    %c0_69 = arith.constant 0 : index
    %160 = vector.load %arg18[%c0_68, %c0_69] : memref<4x32xf32, #tpu.memory_space<vmem>>, vector<1x32xf32>
    %cst_70 = arith.constant dense<0.000000e+00> : vector<8xf32>
    %161 = vector.multi_reduction <add>, %158, %cst_70 [1] : vector<8x32xf32> to vector<8xf32>
    %162 = vector.shape_cast %161 : vector<8xf32> to vector<8x1xf32>
    %cst_71 = arith.constant 3.200000e+01 : f32
    %163 = vector.broadcast %cst_71 : f32 to vector<8x1xf32>
    %164 = arith.divf %162, %163 : vector<8x1xf32>
    %165 = vector.broadcast %164 : vector<8x1xf32> to vector<8x32xf32>
    %166 = arith.subf %158, %165 : vector<8x32xf32>
    %167 = arith.mulf %166, %166 : vector<8x32xf32>
    %cst_72 = arith.constant dense<0.000000e+00> : vector<8xf32>
    %168 = vector.multi_reduction <add>, %167, %cst_72 [1] : vector<8x32xf32> to vector<8xf32>
    %169 = vector.shape_cast %168 : vector<8xf32> to vector<8x1xf32>
    %cst_73 = arith.constant 3.200000e+01 : f32
    %170 = vector.broadcast %cst_73 : f32 to vector<8x1xf32>
    %171 = arith.divf %169, %170 : vector<8x1xf32>
    %cst_74 = arith.constant 9.99999974E-6 : f32
    %172 = vector.broadcast %cst_74 : f32 to vector<8x1xf32>
    %173 = arith.addf %171, %172 : vector<8x1xf32>
    %174 = math.rsqrt %173 : vector<8x1xf32>
    %175 = vector.broadcast %174 : vector<8x1xf32> to vector<8x32xf32>
    %176 = arith.mulf %166, %175 : vector<8x32xf32>
    %177 = vector.broadcast %159 : vector<1x32xf32> to vector<8x32xf32>
    %178 = arith.mulf %176, %177 : vector<8x32xf32>
    %179 = vector.broadcast %160 : vector<1x32xf32> to vector<8x32xf32>
    %180 = arith.addf %178, %179 : vector<8x32xf32>
    %181 = arith.addf %180, %5 : vector<8x32xf32>
    %182 = arith.addf %3, %7 : vector<64x32xf32>
    %c0_75 = arith.constant 0 : index
    %c0_76 = arith.constant 0 : index
    %183 = vector.load %arg9[%c0_75, %c0_76] : memref<96x16xf32, #tpu.memory_space<vmem>>, vector<32x16xf32>
    %cst_77 = arith.constant dense<0.000000e+00> : vector<8x16xf32>
    %184 = tpu.matmul %181, %183, %cst_77 {dimension_numbers = #tpu.dot_dimension_numbers<[1], [0], [0], [1], [0, 0, 1, 1], [], []>} : vector<8x32xf32>, vector<32x16xf32>, vector<8x16xf32> -> vector<8x16xf32>
    %c0_78 = arith.constant 0 : index
    %c0_79 = arith.constant 0 : index
    %185 = vector.load %arg10[%c0_78, %c0_79] : memref<3x16xf32, #tpu.memory_space<vmem>>, vector<1x16xf32>
    %186 = vector.broadcast %185 : vector<1x16xf32> to vector<8x16xf32>
    %187 = arith.addf %184, %186 : vector<8x16xf32>
    %c32_80 = arith.constant 32 : index
    %c0_81 = arith.constant 0 : index
    %188 = vector.load %arg9[%c32_80, %c0_81] : memref<96x16xf32, #tpu.memory_space<vmem>>, vector<32x16xf32>
    %cst_82 = arith.constant dense<0.000000e+00> : vector<64x16xf32>
    %189 = tpu.matmul %182, %188, %cst_82 {dimension_numbers = #tpu.dot_dimension_numbers<[1], [0], [0], [1], [0, 0, 1, 1], [], []>} : vector<64x32xf32>, vector<32x16xf32>, vector<64x16xf32> -> vector<64x16xf32>
    %c1_83 = arith.constant 1 : index
    %c0_84 = arith.constant 0 : index
    %190 = vector.load %arg10[%c1_83, %c0_84] : memref<3x16xf32, #tpu.memory_space<vmem>>, vector<1x16xf32>
    %191 = vector.broadcast %190 : vector<1x16xf32> to vector<64x16xf32>
    %192 = arith.addf %189, %191 : vector<64x16xf32>
    %c64_85 = arith.constant 64 : index
    %c0_86 = arith.constant 0 : index
    %193 = vector.load %arg9[%c64_85, %c0_86] : memref<96x16xf32, #tpu.memory_space<vmem>>, vector<32x16xf32>
    %cst_87 = arith.constant dense<0.000000e+00> : vector<64x16xf32>
    %194 = tpu.matmul %3, %193, %cst_87 {dimension_numbers = #tpu.dot_dimension_numbers<[1], [0], [0], [1], [0, 0, 1, 1], [], []>} : vector<64x32xf32>, vector<32x16xf32>, vector<64x16xf32> -> vector<64x16xf32>
    %c2_88 = arith.constant 2 : index
    %c0_89 = arith.constant 0 : index
    %195 = vector.load %arg10[%c2_88, %c0_89] : memref<3x16xf32, #tpu.memory_space<vmem>>, vector<1x16xf32>
    %196 = vector.broadcast %195 : vector<1x16xf32> to vector<64x16xf32>
    %197 = arith.addf %194, %196 : vector<64x16xf32>
    %198 = vector.extract_strided_slice %187 {offsets = [0, 0], sizes = [8, 2], strides = [1, 1]} : vector<8x16xf32> to vector<8x2xf32>
    %199 = vector.extract_strided_slice %192 {offsets = [0, 0], sizes = [64, 2], strides = [1, 1]} : vector<64x16xf32> to vector<64x2xf32>
    %200 = vector.extract_strided_slice %197 {offsets = [0, 0], sizes = [64, 2], strides = [1, 1]} : vector<64x16xf32> to vector<64x2xf32>
    %cst_90 = arith.constant dense<0.000000e+00> : vector<8x64xf32>
    %201 = tpu.matmul %198, %199, %cst_90 {dimension_numbers = #tpu.dot_dimension_numbers<[1], [1], [0], [0], [0, 0, 1, 0], [], []>} : vector<8x2xf32>, vector<64x2xf32>, vector<8x64xf32> -> vector<8x64xf32>
    %cst_91 = arith.constant 0.707106769 : f32
    %202 = vector.broadcast %cst_91 : f32 to vector<8x64xf32>
    %203 = arith.mulf %201, %202 : vector<8x64xf32>
    %cst_92 = arith.constant dense<0xFF800000> : vector<8xf32>
    %204 = vector.multi_reduction <maximumf>, %203, %cst_92 [1] : vector<8x64xf32> to vector<8xf32>
    %205 = vector.shape_cast %204 : vector<8xf32> to vector<8x1xf32>
    %206 = vector.broadcast %205 : vector<8x1xf32> to vector<8x64xf32>
    %207 = arith.subf %203, %206 : vector<8x64xf32>
    %208 = math.exp %207 : vector<8x64xf32>
    %cst_93 = arith.constant dense<0.000000e+00> : vector<8xf32>
    %209 = vector.multi_reduction <add>, %208, %cst_93 [1] : vector<8x64xf32> to vector<8xf32>
    %210 = vector.shape_cast %209 : vector<8xf32> to vector<8x1xf32>
    %211 = vector.broadcast %210 : vector<8x1xf32> to vector<8x64xf32>
    %212 = arith.divf %208, %211 : vector<8x64xf32>
    %cst_94 = arith.constant dense<0.000000e+00> : vector<8x2xf32>
    %213 = tpu.matmul %212, %200, %cst_94 {dimension_numbers = #tpu.dot_dimension_numbers<[1], [0], [0], [1], [0, 0, 1, 1], [], []>} : vector<8x64xf32>, vector<64x2xf32>, vector<8x2xf32> -> vector<8x2xf32>
    %214 = vector.extract_strided_slice %187 {offsets = [0, 2], sizes = [8, 2], strides = [1, 1]} : vector<8x16xf32> to vector<8x2xf32>
    %215 = vector.extract_strided_slice %192 {offsets = [0, 2], sizes = [64, 2], strides = [1, 1]} : vector<64x16xf32> to vector<64x2xf32>
    %216 = vector.extract_strided_slice %197 {offsets = [0, 2], sizes = [64, 2], strides = [1, 1]} : vector<64x16xf32> to vector<64x2xf32>
    %cst_95 = arith.constant dense<0.000000e+00> : vector<8x64xf32>
    %217 = tpu.matmul %214, %215, %cst_95 {dimension_numbers = #tpu.dot_dimension_numbers<[1], [1], [0], [0], [0, 0, 1, 0], [], []>} : vector<8x2xf32>, vector<64x2xf32>, vector<8x64xf32> -> vector<8x64xf32>
    %cst_96 = arith.constant 0.707106769 : f32
    %218 = vector.broadcast %cst_96 : f32 to vector<8x64xf32>
    %219 = arith.mulf %217, %218 : vector<8x64xf32>
    %cst_97 = arith.constant dense<0xFF800000> : vector<8xf32>
    %220 = vector.multi_reduction <maximumf>, %219, %cst_97 [1] : vector<8x64xf32> to vector<8xf32>
    %221 = vector.shape_cast %220 : vector<8xf32> to vector<8x1xf32>
    %222 = vector.broadcast %221 : vector<8x1xf32> to vector<8x64xf32>
    %223 = arith.subf %219, %222 : vector<8x64xf32>
    %224 = math.exp %223 : vector<8x64xf32>
    %cst_98 = arith.constant dense<0.000000e+00> : vector<8xf32>
    %225 = vector.multi_reduction <add>, %224, %cst_98 [1] : vector<8x64xf32> to vector<8xf32>
    %226 = vector.shape_cast %225 : vector<8xf32> to vector<8x1xf32>
    %227 = vector.broadcast %226 : vector<8x1xf32> to vector<8x64xf32>
    %228 = arith.divf %224, %227 : vector<8x64xf32>
    %cst_99 = arith.constant dense<0.000000e+00> : vector<8x2xf32>
    %229 = tpu.matmul %228, %216, %cst_99 {dimension_numbers = #tpu.dot_dimension_numbers<[1], [0], [0], [1], [0, 0, 1, 1], [], []>} : vector<8x64xf32>, vector<64x2xf32>, vector<8x2xf32> -> vector<8x2xf32>
    %230 = vector.extract_strided_slice %187 {offsets = [0, 4], sizes = [8, 2], strides = [1, 1]} : vector<8x16xf32> to vector<8x2xf32>
    %231 = vector.extract_strided_slice %192 {offsets = [0, 4], sizes = [64, 2], strides = [1, 1]} : vector<64x16xf32> to vector<64x2xf32>
    %232 = vector.extract_strided_slice %197 {offsets = [0, 4], sizes = [64, 2], strides = [1, 1]} : vector<64x16xf32> to vector<64x2xf32>
    %cst_100 = arith.constant dense<0.000000e+00> : vector<8x64xf32>
    %233 = tpu.matmul %230, %231, %cst_100 {dimension_numbers = #tpu.dot_dimension_numbers<[1], [1], [0], [0], [0, 0, 1, 0], [], []>} : vector<8x2xf32>, vector<64x2xf32>, vector<8x64xf32> -> vector<8x64xf32>
    %cst_101 = arith.constant 0.707106769 : f32
    %234 = vector.broadcast %cst_101 : f32 to vector<8x64xf32>
    %235 = arith.mulf %233, %234 : vector<8x64xf32>
    %cst_102 = arith.constant dense<0xFF800000> : vector<8xf32>
    %236 = vector.multi_reduction <maximumf>, %235, %cst_102 [1] : vector<8x64xf32> to vector<8xf32>
    %237 = vector.shape_cast %236 : vector<8xf32> to vector<8x1xf32>
    %238 = vector.broadcast %237 : vector<8x1xf32> to vector<8x64xf32>
    %239 = arith.subf %235, %238 : vector<8x64xf32>
    %240 = math.exp %239 : vector<8x64xf32>
    %cst_103 = arith.constant dense<0.000000e+00> : vector<8xf32>
    %241 = vector.multi_reduction <add>, %240, %cst_103 [1] : vector<8x64xf32> to vector<8xf32>
    %242 = vector.shape_cast %241 : vector<8xf32> to vector<8x1xf32>
    %243 = vector.broadcast %242 : vector<8x1xf32> to vector<8x64xf32>
    %244 = arith.divf %240, %243 : vector<8x64xf32>
    %cst_104 = arith.constant dense<0.000000e+00> : vector<8x2xf32>
    %245 = tpu.matmul %244, %232, %cst_104 {dimension_numbers = #tpu.dot_dimension_numbers<[1], [0], [0], [1], [0, 0, 1, 1], [], []>} : vector<8x64xf32>, vector<64x2xf32>, vector<8x2xf32> -> vector<8x2xf32>
    %246 = vector.extract_strided_slice %187 {offsets = [0, 6], sizes = [8, 2], strides = [1, 1]} : vector<8x16xf32> to vector<8x2xf32>
    %247 = vector.extract_strided_slice %192 {offsets = [0, 6], sizes = [64, 2], strides = [1, 1]} : vector<64x16xf32> to vector<64x2xf32>
    %248 = vector.extract_strided_slice %197 {offsets = [0, 6], sizes = [64, 2], strides = [1, 1]} : vector<64x16xf32> to vector<64x2xf32>
    %cst_105 = arith.constant dense<0.000000e+00> : vector<8x64xf32>
    %249 = tpu.matmul %246, %247, %cst_105 {dimension_numbers = #tpu.dot_dimension_numbers<[1], [1], [0], [0], [0, 0, 1, 0], [], []>} : vector<8x2xf32>, vector<64x2xf32>, vector<8x64xf32> -> vector<8x64xf32>
    %cst_106 = arith.constant 0.707106769 : f32
    %250 = vector.broadcast %cst_106 : f32 to vector<8x64xf32>
    %251 = arith.mulf %249, %250 : vector<8x64xf32>
    %cst_107 = arith.constant dense<0xFF800000> : vector<8xf32>
    %252 = vector.multi_reduction <maximumf>, %251, %cst_107 [1] : vector<8x64xf32> to vector<8xf32>
    %253 = vector.shape_cast %252 : vector<8xf32> to vector<8x1xf32>
    %254 = vector.broadcast %253 : vector<8x1xf32> to vector<8x64xf32>
    %255 = arith.subf %251, %254 : vector<8x64xf32>
    %256 = math.exp %255 : vector<8x64xf32>
    %cst_108 = arith.constant dense<0.000000e+00> : vector<8xf32>
    %257 = vector.multi_reduction <add>, %256, %cst_108 [1] : vector<8x64xf32> to vector<8xf32>
    %258 = vector.shape_cast %257 : vector<8xf32> to vector<8x1xf32>
    %259 = vector.broadcast %258 : vector<8x1xf32> to vector<8x64xf32>
    %260 = arith.divf %256, %259 : vector<8x64xf32>
    %cst_109 = arith.constant dense<0.000000e+00> : vector<8x2xf32>
    %261 = tpu.matmul %260, %248, %cst_109 {dimension_numbers = #tpu.dot_dimension_numbers<[1], [0], [0], [1], [0, 0, 1, 1], [], []>} : vector<8x64xf32>, vector<64x2xf32>, vector<8x2xf32> -> vector<8x2xf32>
    %262 = vector.extract_strided_slice %187 {offsets = [0, 8], sizes = [8, 2], strides = [1, 1]} : vector<8x16xf32> to vector<8x2xf32>
    %263 = vector.extract_strided_slice %192 {offsets = [0, 8], sizes = [64, 2], strides = [1, 1]} : vector<64x16xf32> to vector<64x2xf32>
    %264 = vector.extract_strided_slice %197 {offsets = [0, 8], sizes = [64, 2], strides = [1, 1]} : vector<64x16xf32> to vector<64x2xf32>
    %cst_110 = arith.constant dense<0.000000e+00> : vector<8x64xf32>
    %265 = tpu.matmul %262, %263, %cst_110 {dimension_numbers = #tpu.dot_dimension_numbers<[1], [1], [0], [0], [0, 0, 1, 0], [], []>} : vector<8x2xf32>, vector<64x2xf32>, vector<8x64xf32> -> vector<8x64xf32>
    %cst_111 = arith.constant 0.707106769 : f32
    %266 = vector.broadcast %cst_111 : f32 to vector<8x64xf32>
    %267 = arith.mulf %265, %266 : vector<8x64xf32>
    %cst_112 = arith.constant dense<0xFF800000> : vector<8xf32>
    %268 = vector.multi_reduction <maximumf>, %267, %cst_112 [1] : vector<8x64xf32> to vector<8xf32>
    %269 = vector.shape_cast %268 : vector<8xf32> to vector<8x1xf32>
    %270 = vector.broadcast %269 : vector<8x1xf32> to vector<8x64xf32>
    %271 = arith.subf %267, %270 : vector<8x64xf32>
    %272 = math.exp %271 : vector<8x64xf32>
    %cst_113 = arith.constant dense<0.000000e+00> : vector<8xf32>
    %273 = vector.multi_reduction <add>, %272, %cst_113 [1] : vector<8x64xf32> to vector<8xf32>
    %274 = vector.shape_cast %273 : vector<8xf32> to vector<8x1xf32>
    %275 = vector.broadcast %274 : vector<8x1xf32> to vector<8x64xf32>
    %276 = arith.divf %272, %275 : vector<8x64xf32>
    %cst_114 = arith.constant dense<0.000000e+00> : vector<8x2xf32>
    %277 = tpu.matmul %276, %264, %cst_114 {dimension_numbers = #tpu.dot_dimension_numbers<[1], [0], [0], [1], [0, 0, 1, 1], [], []>} : vector<8x64xf32>, vector<64x2xf32>, vector<8x2xf32> -> vector<8x2xf32>
    %278 = vector.extract_strided_slice %187 {offsets = [0, 10], sizes = [8, 2], strides = [1, 1]} : vector<8x16xf32> to vector<8x2xf32>
    %279 = vector.extract_strided_slice %192 {offsets = [0, 10], sizes = [64, 2], strides = [1, 1]} : vector<64x16xf32> to vector<64x2xf32>
    %280 = vector.extract_strided_slice %197 {offsets = [0, 10], sizes = [64, 2], strides = [1, 1]} : vector<64x16xf32> to vector<64x2xf32>
    %cst_115 = arith.constant dense<0.000000e+00> : vector<8x64xf32>
    %281 = tpu.matmul %278, %279, %cst_115 {dimension_numbers = #tpu.dot_dimension_numbers<[1], [1], [0], [0], [0, 0, 1, 0], [], []>} : vector<8x2xf32>, vector<64x2xf32>, vector<8x64xf32> -> vector<8x64xf32>
    %cst_116 = arith.constant 0.707106769 : f32
    %282 = vector.broadcast %cst_116 : f32 to vector<8x64xf32>
    %283 = arith.mulf %281, %282 : vector<8x64xf32>
    %cst_117 = arith.constant dense<0xFF800000> : vector<8xf32>
    %284 = vector.multi_reduction <maximumf>, %283, %cst_117 [1] : vector<8x64xf32> to vector<8xf32>
    %285 = vector.shape_cast %284 : vector<8xf32> to vector<8x1xf32>
    %286 = vector.broadcast %285 : vector<8x1xf32> to vector<8x64xf32>
    %287 = arith.subf %283, %286 : vector<8x64xf32>
    %288 = math.exp %287 : vector<8x64xf32>
    %cst_118 = arith.constant dense<0.000000e+00> : vector<8xf32>
    %289 = vector.multi_reduction <add>, %288, %cst_118 [1] : vector<8x64xf32> to vector<8xf32>
    %290 = vector.shape_cast %289 : vector<8xf32> to vector<8x1xf32>
    %291 = vector.broadcast %290 : vector<8x1xf32> to vector<8x64xf32>
    %292 = arith.divf %288, %291 : vector<8x64xf32>
    %cst_119 = arith.constant dense<0.000000e+00> : vector<8x2xf32>
    %293 = tpu.matmul %292, %280, %cst_119 {dimension_numbers = #tpu.dot_dimension_numbers<[1], [0], [0], [1], [0, 0, 1, 1], [], []>} : vector<8x64xf32>, vector<64x2xf32>, vector<8x2xf32> -> vector<8x2xf32>
    %294 = vector.extract_strided_slice %187 {offsets = [0, 12], sizes = [8, 2], strides = [1, 1]} : vector<8x16xf32> to vector<8x2xf32>
    %295 = vector.extract_strided_slice %192 {offsets = [0, 12], sizes = [64, 2], strides = [1, 1]} : vector<64x16xf32> to vector<64x2xf32>
    %296 = vector.extract_strided_slice %197 {offsets = [0, 12], sizes = [64, 2], strides = [1, 1]} : vector<64x16xf32> to vector<64x2xf32>
    %cst_120 = arith.constant dense<0.000000e+00> : vector<8x64xf32>
    %297 = tpu.matmul %294, %295, %cst_120 {dimension_numbers = #tpu.dot_dimension_numbers<[1], [1], [0], [0], [0, 0, 1, 0], [], []>} : vector<8x2xf32>, vector<64x2xf32>, vector<8x64xf32> -> vector<8x64xf32>
    %cst_121 = arith.constant 0.707106769 : f32
    %298 = vector.broadcast %cst_121 : f32 to vector<8x64xf32>
    %299 = arith.mulf %297, %298 : vector<8x64xf32>
    %cst_122 = arith.constant dense<0xFF800000> : vector<8xf32>
    %300 = vector.multi_reduction <maximumf>, %299, %cst_122 [1] : vector<8x64xf32> to vector<8xf32>
    %301 = vector.shape_cast %300 : vector<8xf32> to vector<8x1xf32>
    %302 = vector.broadcast %301 : vector<8x1xf32> to vector<8x64xf32>
    %303 = arith.subf %299, %302 : vector<8x64xf32>
    %304 = math.exp %303 : vector<8x64xf32>
    %cst_123 = arith.constant dense<0.000000e+00> : vector<8xf32>
    %305 = vector.multi_reduction <add>, %304, %cst_123 [1] : vector<8x64xf32> to vector<8xf32>
    %306 = vector.shape_cast %305 : vector<8xf32> to vector<8x1xf32>
    %307 = vector.broadcast %306 : vector<8x1xf32> to vector<8x64xf32>
    %308 = arith.divf %304, %307 : vector<8x64xf32>
    %cst_124 = arith.constant dense<0.000000e+00> : vector<8x2xf32>
    %309 = tpu.matmul %308, %296, %cst_124 {dimension_numbers = #tpu.dot_dimension_numbers<[1], [0], [0], [1], [0, 0, 1, 1], [], []>} : vector<8x64xf32>, vector<64x2xf32>, vector<8x2xf32> -> vector<8x2xf32>
    %310 = vector.extract_strided_slice %187 {offsets = [0, 14], sizes = [8, 2], strides = [1, 1]} : vector<8x16xf32> to vector<8x2xf32>
    %311 = vector.extract_strided_slice %192 {offsets = [0, 14], sizes = [64, 2], strides = [1, 1]} : vector<64x16xf32> to vector<64x2xf32>
    %312 = vector.extract_strided_slice %197 {offsets = [0, 14], sizes = [64, 2], strides = [1, 1]} : vector<64x16xf32> to vector<64x2xf32>
    %cst_125 = arith.constant dense<0.000000e+00> : vector<8x64xf32>
    %313 = tpu.matmul %310, %311, %cst_125 {dimension_numbers = #tpu.dot_dimension_numbers<[1], [1], [0], [0], [0, 0, 1, 0], [], []>} : vector<8x2xf32>, vector<64x2xf32>, vector<8x64xf32> -> vector<8x64xf32>
    %cst_126 = arith.constant 0.707106769 : f32
    %314 = vector.broadcast %cst_126 : f32 to vector<8x64xf32>
    %315 = arith.mulf %313, %314 : vector<8x64xf32>
    %cst_127 = arith.constant dense<0xFF800000> : vector<8xf32>
    %316 = vector.multi_reduction <maximumf>, %315, %cst_127 [1] : vector<8x64xf32> to vector<8xf32>
    %317 = vector.shape_cast %316 : vector<8xf32> to vector<8x1xf32>
    %318 = vector.broadcast %317 : vector<8x1xf32> to vector<8x64xf32>
    %319 = arith.subf %315, %318 : vector<8x64xf32>
    %320 = math.exp %319 : vector<8x64xf32>
    %cst_128 = arith.constant dense<0.000000e+00> : vector<8xf32>
    %321 = vector.multi_reduction <add>, %320, %cst_128 [1] : vector<8x64xf32> to vector<8xf32>
    %322 = vector.shape_cast %321 : vector<8xf32> to vector<8x1xf32>
    %323 = vector.broadcast %322 : vector<8x1xf32> to vector<8x64xf32>
    %324 = arith.divf %320, %323 : vector<8x64xf32>
    %cst_129 = arith.constant dense<0.000000e+00> : vector<8x2xf32>
    %325 = tpu.matmul %324, %312, %cst_129 {dimension_numbers = #tpu.dot_dimension_numbers<[1], [0], [0], [1], [0, 0, 1, 1], [], []>} : vector<8x64xf32>, vector<64x2xf32>, vector<8x2xf32> -> vector<8x2xf32>
    %326 = tpu.concatenate %213, %229, %245, %261, %277, %293, %309, %325 in 1 : vector<8x2xf32>, vector<8x2xf32>, vector<8x2xf32>, vector<8x2xf32>, vector<8x2xf32>, vector<8x2xf32>, vector<8x2xf32>, vector<8x2xf32> -> vector<8x16xf32>
    %c0_130 = arith.constant 0 : index
    %c0_131 = arith.constant 0 : index
    %327 = vector.load %arg11[%c0_130, %c0_131] : memref<16x32xf32, #tpu.memory_space<vmem>>, vector<16x32xf32>
    %cst_132 = arith.constant dense<0.000000e+00> : vector<8x32xf32>
    %328 = tpu.matmul %326, %327, %cst_132 {dimension_numbers = #tpu.dot_dimension_numbers<[1], [0], [0], [1], [0, 0, 1, 1], [], []>} : vector<8x16xf32>, vector<16x32xf32>, vector<8x32xf32> -> vector<8x32xf32>
    %c0_133 = arith.constant 0 : index
    %c0_134 = arith.constant 0 : index
    %329 = vector.load %arg12[%c0_133, %c0_134] : memref<1x32xf32, #tpu.memory_space<vmem>>, vector<1x32xf32>
    %330 = vector.broadcast %329 : vector<1x32xf32> to vector<8x32xf32>
    %331 = arith.addf %328, %330 : vector<8x32xf32>
    %332 = arith.addf %180, %331 : vector<8x32xf32>
    %c1_135 = arith.constant 1 : index
    %c0_136 = arith.constant 0 : index
    %333 = vector.load %arg17[%c1_135, %c0_136] : memref<4x32xf32, #tpu.memory_space<vmem>>, vector<1x32xf32>
    %c1_137 = arith.constant 1 : index
    %c0_138 = arith.constant 0 : index
    %334 = vector.load %arg18[%c1_137, %c0_138] : memref<4x32xf32, #tpu.memory_space<vmem>>, vector<1x32xf32>
    %cst_139 = arith.constant dense<0.000000e+00> : vector<8xf32>
    %335 = vector.multi_reduction <add>, %332, %cst_139 [1] : vector<8x32xf32> to vector<8xf32>
    %336 = vector.shape_cast %335 : vector<8xf32> to vector<8x1xf32>
    %cst_140 = arith.constant 3.200000e+01 : f32
    %337 = vector.broadcast %cst_140 : f32 to vector<8x1xf32>
    %338 = arith.divf %336, %337 : vector<8x1xf32>
    %339 = vector.broadcast %338 : vector<8x1xf32> to vector<8x32xf32>
    %340 = arith.subf %332, %339 : vector<8x32xf32>
    %341 = arith.mulf %340, %340 : vector<8x32xf32>
    %cst_141 = arith.constant dense<0.000000e+00> : vector<8xf32>
    %342 = vector.multi_reduction <add>, %341, %cst_141 [1] : vector<8x32xf32> to vector<8xf32>
    %343 = vector.shape_cast %342 : vector<8xf32> to vector<8x1xf32>
    %cst_142 = arith.constant 3.200000e+01 : f32
    %344 = vector.broadcast %cst_142 : f32 to vector<8x1xf32>
    %345 = arith.divf %343, %344 : vector<8x1xf32>
    %cst_143 = arith.constant 9.99999974E-6 : f32
    %346 = vector.broadcast %cst_143 : f32 to vector<8x1xf32>
    %347 = arith.addf %345, %346 : vector<8x1xf32>
    %348 = math.rsqrt %347 : vector<8x1xf32>
    %349 = vector.broadcast %348 : vector<8x1xf32> to vector<8x32xf32>
    %350 = arith.mulf %340, %349 : vector<8x32xf32>
    %351 = vector.broadcast %333 : vector<1x32xf32> to vector<8x32xf32>
    %352 = arith.mulf %350, %351 : vector<8x32xf32>
    %353 = vector.broadcast %334 : vector<1x32xf32> to vector<8x32xf32>
    %354 = arith.addf %352, %353 : vector<8x32xf32>
    %c0_144 = arith.constant 0 : index
    %c0_145 = arith.constant 0 : index
    %355 = vector.load %arg19[%c0_144, %c0_145] : memref<32x128xf32, #tpu.memory_space<vmem>>, vector<32x128xf32>
    %cst_146 = arith.constant dense<0.000000e+00> : vector<8x128xf32>
    %356 = tpu.matmul %354, %355, %cst_146 {dimension_numbers = #tpu.dot_dimension_numbers<[1], [0], [0], [1], [0, 0, 1, 1], [], []>} : vector<8x32xf32>, vector<32x128xf32>, vector<8x128xf32> -> vector<8x128xf32>
    %c0_147 = arith.constant 0 : index
    %c0_148 = arith.constant 0 : index
    %357 = vector.load %arg20[%c0_147, %c0_148] : memref<1x128xf32, #tpu.memory_space<vmem>>, vector<1x128xf32>
    %358 = vector.broadcast %357 : vector<1x128xf32> to vector<8x128xf32>
    %359 = arith.addf %356, %358 : vector<8x128xf32>
    %cst_149 = arith.constant 0.000000e+00 : f32
    %360 = vector.broadcast %cst_149 : f32 to vector<8x128xf32>
    %361 = arith.maximumf %359, %360 : vector<8x128xf32>
    %c0_150 = arith.constant 0 : index
    %c0_151 = arith.constant 0 : index
    %362 = vector.load %arg21[%c0_150, %c0_151] : memref<128x32xf32, #tpu.memory_space<vmem>>, vector<128x32xf32>
    %cst_152 = arith.constant dense<0.000000e+00> : vector<8x32xf32>
    %363 = tpu.matmul %361, %362, %cst_152 {dimension_numbers = #tpu.dot_dimension_numbers<[1], [0], [0], [1], [0, 0, 1, 1], [], []>} : vector<8x128xf32>, vector<128x32xf32>, vector<8x32xf32> -> vector<8x32xf32>
    %c0_153 = arith.constant 0 : index
    %c0_154 = arith.constant 0 : index
    %364 = vector.load %arg22[%c0_153, %c0_154] : memref<1x32xf32, #tpu.memory_space<vmem>>, vector<1x32xf32>
    %365 = vector.broadcast %364 : vector<1x32xf32> to vector<8x32xf32>
    %366 = arith.addf %363, %365 : vector<8x32xf32>
    %367 = arith.addf %354, %366 : vector<8x32xf32>
    %c2_155 = arith.constant 2 : index
    %c0_156 = arith.constant 0 : index
    %368 = vector.load %arg17[%c2_155, %c0_156] : memref<4x32xf32, #tpu.memory_space<vmem>>, vector<1x32xf32>
    %c2_157 = arith.constant 2 : index
    %c0_158 = arith.constant 0 : index
    %369 = vector.load %arg18[%c2_157, %c0_158] : memref<4x32xf32, #tpu.memory_space<vmem>>, vector<1x32xf32>
    %cst_159 = arith.constant dense<0.000000e+00> : vector<8xf32>
    %370 = vector.multi_reduction <add>, %367, %cst_159 [1] : vector<8x32xf32> to vector<8xf32>
    %371 = vector.shape_cast %370 : vector<8xf32> to vector<8x1xf32>
    %cst_160 = arith.constant 3.200000e+01 : f32
    %372 = vector.broadcast %cst_160 : f32 to vector<8x1xf32>
    %373 = arith.divf %371, %372 : vector<8x1xf32>
    %374 = vector.broadcast %373 : vector<8x1xf32> to vector<8x32xf32>
    %375 = arith.subf %367, %374 : vector<8x32xf32>
    %376 = arith.mulf %375, %375 : vector<8x32xf32>
    %cst_161 = arith.constant dense<0.000000e+00> : vector<8xf32>
    %377 = vector.multi_reduction <add>, %376, %cst_161 [1] : vector<8x32xf32> to vector<8xf32>
    %378 = vector.shape_cast %377 : vector<8xf32> to vector<8x1xf32>
    %cst_162 = arith.constant 3.200000e+01 : f32
    %379 = vector.broadcast %cst_162 : f32 to vector<8x1xf32>
    %380 = arith.divf %378, %379 : vector<8x1xf32>
    %cst_163 = arith.constant 9.99999974E-6 : f32
    %381 = vector.broadcast %cst_163 : f32 to vector<8x1xf32>
    %382 = arith.addf %380, %381 : vector<8x1xf32>
    %383 = math.rsqrt %382 : vector<8x1xf32>
    %384 = vector.broadcast %383 : vector<8x1xf32> to vector<8x32xf32>
    %385 = arith.mulf %375, %384 : vector<8x32xf32>
    %386 = vector.broadcast %368 : vector<1x32xf32> to vector<8x32xf32>
    %387 = arith.mulf %385, %386 : vector<8x32xf32>
    %388 = vector.broadcast %369 : vector<1x32xf32> to vector<8x32xf32>
    %389 = arith.addf %387, %388 : vector<8x32xf32>
    %390 = arith.addf %389, %5 : vector<8x32xf32>
    %391 = arith.addf %3, %7 : vector<64x32xf32>
    %c0_164 = arith.constant 0 : index
    %c0_165 = arith.constant 0 : index
    %392 = vector.load %arg13[%c0_164, %c0_165] : memref<96x16xf32, #tpu.memory_space<vmem>>, vector<32x16xf32>
    %cst_166 = arith.constant dense<0.000000e+00> : vector<64x16xf32>
    %393 = tpu.matmul %391, %392, %cst_166 {dimension_numbers = #tpu.dot_dimension_numbers<[1], [0], [0], [1], [0, 0, 1, 1], [], []>} : vector<64x32xf32>, vector<32x16xf32>, vector<64x16xf32> -> vector<64x16xf32>
    %c0_167 = arith.constant 0 : index
    %c0_168 = arith.constant 0 : index
    %394 = vector.load %arg14[%c0_167, %c0_168] : memref<3x16xf32, #tpu.memory_space<vmem>>, vector<1x16xf32>
    %395 = vector.broadcast %394 : vector<1x16xf32> to vector<64x16xf32>
    %396 = arith.addf %393, %395 : vector<64x16xf32>
    %c32_169 = arith.constant 32 : index
    %c0_170 = arith.constant 0 : index
    %397 = vector.load %arg13[%c32_169, %c0_170] : memref<96x16xf32, #tpu.memory_space<vmem>>, vector<32x16xf32>
    %cst_171 = arith.constant dense<0.000000e+00> : vector<8x16xf32>
    %398 = tpu.matmul %390, %397, %cst_171 {dimension_numbers = #tpu.dot_dimension_numbers<[1], [0], [0], [1], [0, 0, 1, 1], [], []>} : vector<8x32xf32>, vector<32x16xf32>, vector<8x16xf32> -> vector<8x16xf32>
    %c1_172 = arith.constant 1 : index
    %c0_173 = arith.constant 0 : index
    %399 = vector.load %arg14[%c1_172, %c0_173] : memref<3x16xf32, #tpu.memory_space<vmem>>, vector<1x16xf32>
    %400 = vector.broadcast %399 : vector<1x16xf32> to vector<8x16xf32>
    %401 = arith.addf %398, %400 : vector<8x16xf32>
    %c64_174 = arith.constant 64 : index
    %c0_175 = arith.constant 0 : index
    %402 = vector.load %arg13[%c64_174, %c0_175] : memref<96x16xf32, #tpu.memory_space<vmem>>, vector<32x16xf32>
    %cst_176 = arith.constant dense<0.000000e+00> : vector<8x16xf32>
    %403 = tpu.matmul %389, %402, %cst_176 {dimension_numbers = #tpu.dot_dimension_numbers<[1], [0], [0], [1], [0, 0, 1, 1], [], []>} : vector<8x32xf32>, vector<32x16xf32>, vector<8x16xf32> -> vector<8x16xf32>
    %c2_177 = arith.constant 2 : index
    %c0_178 = arith.constant 0 : index
    %404 = vector.load %arg14[%c2_177, %c0_178] : memref<3x16xf32, #tpu.memory_space<vmem>>, vector<1x16xf32>
    %405 = vector.broadcast %404 : vector<1x16xf32> to vector<8x16xf32>
    %406 = arith.addf %403, %405 : vector<8x16xf32>
    %407 = vector.extract_strided_slice %396 {offsets = [0, 0], sizes = [64, 2], strides = [1, 1]} : vector<64x16xf32> to vector<64x2xf32>
    %408 = vector.extract_strided_slice %401 {offsets = [0, 0], sizes = [8, 2], strides = [1, 1]} : vector<8x16xf32> to vector<8x2xf32>
    %409 = vector.extract_strided_slice %406 {offsets = [0, 0], sizes = [8, 2], strides = [1, 1]} : vector<8x16xf32> to vector<8x2xf32>
    %cst_179 = arith.constant dense<0.000000e+00> : vector<64x8xf32>
    %410 = tpu.matmul %407, %408, %cst_179 {dimension_numbers = #tpu.dot_dimension_numbers<[1], [1], [0], [0], [0, 0, 1, 0], [], []>} : vector<64x2xf32>, vector<8x2xf32>, vector<64x8xf32> -> vector<64x8xf32>
    %cst_180 = arith.constant 0.707106769 : f32
    %411 = vector.broadcast %cst_180 : f32 to vector<64x8xf32>
    %412 = arith.mulf %410, %411 : vector<64x8xf32>
    %cst_181 = arith.constant dense<0xFF800000> : vector<64xf32>
    %413 = vector.multi_reduction <maximumf>, %412, %cst_181 [1] : vector<64x8xf32> to vector<64xf32>
    %414 = vector.shape_cast %413 : vector<64xf32> to vector<64x1xf32>
    %415 = vector.broadcast %414 : vector<64x1xf32> to vector<64x8xf32>
    %416 = arith.subf %412, %415 : vector<64x8xf32>
    %417 = math.exp %416 : vector<64x8xf32>
    %cst_182 = arith.constant dense<0.000000e+00> : vector<64xf32>
    %418 = vector.multi_reduction <add>, %417, %cst_182 [1] : vector<64x8xf32> to vector<64xf32>
    %419 = vector.shape_cast %418 : vector<64xf32> to vector<64x1xf32>
    %420 = vector.broadcast %419 : vector<64x1xf32> to vector<64x8xf32>
    %421 = arith.divf %417, %420 : vector<64x8xf32>
    %cst_183 = arith.constant dense<0.000000e+00> : vector<64x2xf32>
    %422 = tpu.matmul %421, %409, %cst_183 {dimension_numbers = #tpu.dot_dimension_numbers<[1], [0], [0], [1], [0, 0, 1, 1], [], []>} : vector<64x8xf32>, vector<8x2xf32>, vector<64x2xf32> -> vector<64x2xf32>
    %423 = vector.extract_strided_slice %396 {offsets = [0, 2], sizes = [64, 2], strides = [1, 1]} : vector<64x16xf32> to vector<64x2xf32>
    %424 = vector.extract_strided_slice %401 {offsets = [0, 2], sizes = [8, 2], strides = [1, 1]} : vector<8x16xf32> to vector<8x2xf32>
    %425 = vector.extract_strided_slice %406 {offsets = [0, 2], sizes = [8, 2], strides = [1, 1]} : vector<8x16xf32> to vector<8x2xf32>
    %cst_184 = arith.constant dense<0.000000e+00> : vector<64x8xf32>
    %426 = tpu.matmul %423, %424, %cst_184 {dimension_numbers = #tpu.dot_dimension_numbers<[1], [1], [0], [0], [0, 0, 1, 0], [], []>} : vector<64x2xf32>, vector<8x2xf32>, vector<64x8xf32> -> vector<64x8xf32>
    %cst_185 = arith.constant 0.707106769 : f32
    %427 = vector.broadcast %cst_185 : f32 to vector<64x8xf32>
    %428 = arith.mulf %426, %427 : vector<64x8xf32>
    %cst_186 = arith.constant dense<0xFF800000> : vector<64xf32>
    %429 = vector.multi_reduction <maximumf>, %428, %cst_186 [1] : vector<64x8xf32> to vector<64xf32>
    %430 = vector.shape_cast %429 : vector<64xf32> to vector<64x1xf32>
    %431 = vector.broadcast %430 : vector<64x1xf32> to vector<64x8xf32>
    %432 = arith.subf %428, %431 : vector<64x8xf32>
    %433 = math.exp %432 : vector<64x8xf32>
    %cst_187 = arith.constant dense<0.000000e+00> : vector<64xf32>
    %434 = vector.multi_reduction <add>, %433, %cst_187 [1] : vector<64x8xf32> to vector<64xf32>
    %435 = vector.shape_cast %434 : vector<64xf32> to vector<64x1xf32>
    %436 = vector.broadcast %435 : vector<64x1xf32> to vector<64x8xf32>
    %437 = arith.divf %433, %436 : vector<64x8xf32>
    %cst_188 = arith.constant dense<0.000000e+00> : vector<64x2xf32>
    %438 = tpu.matmul %437, %425, %cst_188 {dimension_numbers = #tpu.dot_dimension_numbers<[1], [0], [0], [1], [0, 0, 1, 1], [], []>} : vector<64x8xf32>, vector<8x2xf32>, vector<64x2xf32> -> vector<64x2xf32>
    %439 = vector.extract_strided_slice %396 {offsets = [0, 4], sizes = [64, 2], strides = [1, 1]} : vector<64x16xf32> to vector<64x2xf32>
    %440 = vector.extract_strided_slice %401 {offsets = [0, 4], sizes = [8, 2], strides = [1, 1]} : vector<8x16xf32> to vector<8x2xf32>
    %441 = vector.extract_strided_slice %406 {offsets = [0, 4], sizes = [8, 2], strides = [1, 1]} : vector<8x16xf32> to vector<8x2xf32>
    %cst_189 = arith.constant dense<0.000000e+00> : vector<64x8xf32>
    %442 = tpu.matmul %439, %440, %cst_189 {dimension_numbers = #tpu.dot_dimension_numbers<[1], [1], [0], [0], [0, 0, 1, 0], [], []>} : vector<64x2xf32>, vector<8x2xf32>, vector<64x8xf32> -> vector<64x8xf32>
    %cst_190 = arith.constant 0.707106769 : f32
    %443 = vector.broadcast %cst_190 : f32 to vector<64x8xf32>
    %444 = arith.mulf %442, %443 : vector<64x8xf32>
    %cst_191 = arith.constant dense<0xFF800000> : vector<64xf32>
    %445 = vector.multi_reduction <maximumf>, %444, %cst_191 [1] : vector<64x8xf32> to vector<64xf32>
    %446 = vector.shape_cast %445 : vector<64xf32> to vector<64x1xf32>
    %447 = vector.broadcast %446 : vector<64x1xf32> to vector<64x8xf32>
    %448 = arith.subf %444, %447 : vector<64x8xf32>
    %449 = math.exp %448 : vector<64x8xf32>
    %cst_192 = arith.constant dense<0.000000e+00> : vector<64xf32>
    %450 = vector.multi_reduction <add>, %449, %cst_192 [1] : vector<64x8xf32> to vector<64xf32>
    %451 = vector.shape_cast %450 : vector<64xf32> to vector<64x1xf32>
    %452 = vector.broadcast %451 : vector<64x1xf32> to vector<64x8xf32>
    %453 = arith.divf %449, %452 : vector<64x8xf32>
    %cst_193 = arith.constant dense<0.000000e+00> : vector<64x2xf32>
    %454 = tpu.matmul %453, %441, %cst_193 {dimension_numbers = #tpu.dot_dimension_numbers<[1], [0], [0], [1], [0, 0, 1, 1], [], []>} : vector<64x8xf32>, vector<8x2xf32>, vector<64x2xf32> -> vector<64x2xf32>
    %455 = vector.extract_strided_slice %396 {offsets = [0, 6], sizes = [64, 2], strides = [1, 1]} : vector<64x16xf32> to vector<64x2xf32>
    %456 = vector.extract_strided_slice %401 {offsets = [0, 6], sizes = [8, 2], strides = [1, 1]} : vector<8x16xf32> to vector<8x2xf32>
    %457 = vector.extract_strided_slice %406 {offsets = [0, 6], sizes = [8, 2], strides = [1, 1]} : vector<8x16xf32> to vector<8x2xf32>
    %cst_194 = arith.constant dense<0.000000e+00> : vector<64x8xf32>
    %458 = tpu.matmul %455, %456, %cst_194 {dimension_numbers = #tpu.dot_dimension_numbers<[1], [1], [0], [0], [0, 0, 1, 0], [], []>} : vector<64x2xf32>, vector<8x2xf32>, vector<64x8xf32> -> vector<64x8xf32>
    %cst_195 = arith.constant 0.707106769 : f32
    %459 = vector.broadcast %cst_195 : f32 to vector<64x8xf32>
    %460 = arith.mulf %458, %459 : vector<64x8xf32>
    %cst_196 = arith.constant dense<0xFF800000> : vector<64xf32>
    %461 = vector.multi_reduction <maximumf>, %460, %cst_196 [1] : vector<64x8xf32> to vector<64xf32>
    %462 = vector.shape_cast %461 : vector<64xf32> to vector<64x1xf32>
    %463 = vector.broadcast %462 : vector<64x1xf32> to vector<64x8xf32>
    %464 = arith.subf %460, %463 : vector<64x8xf32>
    %465 = math.exp %464 : vector<64x8xf32>
    %cst_197 = arith.constant dense<0.000000e+00> : vector<64xf32>
    %466 = vector.multi_reduction <add>, %465, %cst_197 [1] : vector<64x8xf32> to vector<64xf32>
    %467 = vector.shape_cast %466 : vector<64xf32> to vector<64x1xf32>
    %468 = vector.broadcast %467 : vector<64x1xf32> to vector<64x8xf32>
    %469 = arith.divf %465, %468 : vector<64x8xf32>
    %cst_198 = arith.constant dense<0.000000e+00> : vector<64x2xf32>
    %470 = tpu.matmul %469, %457, %cst_198 {dimension_numbers = #tpu.dot_dimension_numbers<[1], [0], [0], [1], [0, 0, 1, 1], [], []>} : vector<64x8xf32>, vector<8x2xf32>, vector<64x2xf32> -> vector<64x2xf32>
    %471 = vector.extract_strided_slice %396 {offsets = [0, 8], sizes = [64, 2], strides = [1, 1]} : vector<64x16xf32> to vector<64x2xf32>
    %472 = vector.extract_strided_slice %401 {offsets = [0, 8], sizes = [8, 2], strides = [1, 1]} : vector<8x16xf32> to vector<8x2xf32>
    %473 = vector.extract_strided_slice %406 {offsets = [0, 8], sizes = [8, 2], strides = [1, 1]} : vector<8x16xf32> to vector<8x2xf32>
    %cst_199 = arith.constant dense<0.000000e+00> : vector<64x8xf32>
    %474 = tpu.matmul %471, %472, %cst_199 {dimension_numbers = #tpu.dot_dimension_numbers<[1], [1], [0], [0], [0, 0, 1, 0], [], []>} : vector<64x2xf32>, vector<8x2xf32>, vector<64x8xf32> -> vector<64x8xf32>
    %cst_200 = arith.constant 0.707106769 : f32
    %475 = vector.broadcast %cst_200 : f32 to vector<64x8xf32>
    %476 = arith.mulf %474, %475 : vector<64x8xf32>
    %cst_201 = arith.constant dense<0xFF800000> : vector<64xf32>
    %477 = vector.multi_reduction <maximumf>, %476, %cst_201 [1] : vector<64x8xf32> to vector<64xf32>
    %478 = vector.shape_cast %477 : vector<64xf32> to vector<64x1xf32>
    %479 = vector.broadcast %478 : vector<64x1xf32> to vector<64x8xf32>
    %480 = arith.subf %476, %479 : vector<64x8xf32>
    %481 = math.exp %480 : vector<64x8xf32>
    %cst_202 = arith.constant dense<0.000000e+00> : vector<64xf32>
    %482 = vector.multi_reduction <add>, %481, %cst_202 [1] : vector<64x8xf32> to vector<64xf32>
    %483 = vector.shape_cast %482 : vector<64xf32> to vector<64x1xf32>
    %484 = vector.broadcast %483 : vector<64x1xf32> to vector<64x8xf32>
    %485 = arith.divf %481, %484 : vector<64x8xf32>
    %cst_203 = arith.constant dense<0.000000e+00> : vector<64x2xf32>
    %486 = tpu.matmul %485, %473, %cst_203 {dimension_numbers = #tpu.dot_dimension_numbers<[1], [0], [0], [1], [0, 0, 1, 1], [], []>} : vector<64x8xf32>, vector<8x2xf32>, vector<64x2xf32> -> vector<64x2xf32>
    %487 = vector.extract_strided_slice %396 {offsets = [0, 10], sizes = [64, 2], strides = [1, 1]} : vector<64x16xf32> to vector<64x2xf32>
    %488 = vector.extract_strided_slice %401 {offsets = [0, 10], sizes = [8, 2], strides = [1, 1]} : vector<8x16xf32> to vector<8x2xf32>
    %489 = vector.extract_strided_slice %406 {offsets = [0, 10], sizes = [8, 2], strides = [1, 1]} : vector<8x16xf32> to vector<8x2xf32>
    %cst_204 = arith.constant dense<0.000000e+00> : vector<64x8xf32>
    %490 = tpu.matmul %487, %488, %cst_204 {dimension_numbers = #tpu.dot_dimension_numbers<[1], [1], [0], [0], [0, 0, 1, 0], [], []>} : vector<64x2xf32>, vector<8x2xf32>, vector<64x8xf32> -> vector<64x8xf32>
    %cst_205 = arith.constant 0.707106769 : f32
    %491 = vector.broadcast %cst_205 : f32 to vector<64x8xf32>
    %492 = arith.mulf %490, %491 : vector<64x8xf32>
    %cst_206 = arith.constant dense<0xFF800000> : vector<64xf32>
    %493 = vector.multi_reduction <maximumf>, %492, %cst_206 [1] : vector<64x8xf32> to vector<64xf32>
    %494 = vector.shape_cast %493 : vector<64xf32> to vector<64x1xf32>
    %495 = vector.broadcast %494 : vector<64x1xf32> to vector<64x8xf32>
    %496 = arith.subf %492, %495 : vector<64x8xf32>
    %497 = math.exp %496 : vector<64x8xf32>
    %cst_207 = arith.constant dense<0.000000e+00> : vector<64xf32>
    %498 = vector.multi_reduction <add>, %497, %cst_207 [1] : vector<64x8xf32> to vector<64xf32>
    %499 = vector.shape_cast %498 : vector<64xf32> to vector<64x1xf32>
    %500 = vector.broadcast %499 : vector<64x1xf32> to vector<64x8xf32>
    %501 = arith.divf %497, %500 : vector<64x8xf32>
    %cst_208 = arith.constant dense<0.000000e+00> : vector<64x2xf32>
    %502 = tpu.matmul %501, %489, %cst_208 {dimension_numbers = #tpu.dot_dimension_numbers<[1], [0], [0], [1], [0, 0, 1, 1], [], []>} : vector<64x8xf32>, vector<8x2xf32>, vector<64x2xf32> -> vector<64x2xf32>
    %503 = vector.extract_strided_slice %396 {offsets = [0, 12], sizes = [64, 2], strides = [1, 1]} : vector<64x16xf32> to vector<64x2xf32>
    %504 = vector.extract_strided_slice %401 {offsets = [0, 12], sizes = [8, 2], strides = [1, 1]} : vector<8x16xf32> to vector<8x2xf32>
    %505 = vector.extract_strided_slice %406 {offsets = [0, 12], sizes = [8, 2], strides = [1, 1]} : vector<8x16xf32> to vector<8x2xf32>
    %cst_209 = arith.constant dense<0.000000e+00> : vector<64x8xf32>
    %506 = tpu.matmul %503, %504, %cst_209 {dimension_numbers = #tpu.dot_dimension_numbers<[1], [1], [0], [0], [0, 0, 1, 0], [], []>} : vector<64x2xf32>, vector<8x2xf32>, vector<64x8xf32> -> vector<64x8xf32>
    %cst_210 = arith.constant 0.707106769 : f32
    %507 = vector.broadcast %cst_210 : f32 to vector<64x8xf32>
    %508 = arith.mulf %506, %507 : vector<64x8xf32>
    %cst_211 = arith.constant dense<0xFF800000> : vector<64xf32>
    %509 = vector.multi_reduction <maximumf>, %508, %cst_211 [1] : vector<64x8xf32> to vector<64xf32>
    %510 = vector.shape_cast %509 : vector<64xf32> to vector<64x1xf32>
    %511 = vector.broadcast %510 : vector<64x1xf32> to vector<64x8xf32>
    %512 = arith.subf %508, %511 : vector<64x8xf32>
    %513 = math.exp %512 : vector<64x8xf32>
    %cst_212 = arith.constant dense<0.000000e+00> : vector<64xf32>
    %514 = vector.multi_reduction <add>, %513, %cst_212 [1] : vector<64x8xf32> to vector<64xf32>
    %515 = vector.shape_cast %514 : vector<64xf32> to vector<64x1xf32>
    %516 = vector.broadcast %515 : vector<64x1xf32> to vector<64x8xf32>
    %517 = arith.divf %513, %516 : vector<64x8xf32>
    %cst_213 = arith.constant dense<0.000000e+00> : vector<64x2xf32>
    %518 = tpu.matmul %517, %505, %cst_213 {dimension_numbers = #tpu.dot_dimension_numbers<[1], [0], [0], [1], [0, 0, 1, 1], [], []>} : vector<64x8xf32>, vector<8x2xf32>, vector<64x2xf32> -> vector<64x2xf32>
    %519 = vector.extract_strided_slice %396 {offsets = [0, 14], sizes = [64, 2], strides = [1, 1]} : vector<64x16xf32> to vector<64x2xf32>
    %520 = vector.extract_strided_slice %401 {offsets = [0, 14], sizes = [8, 2], strides = [1, 1]} : vector<8x16xf32> to vector<8x2xf32>
    %521 = vector.extract_strided_slice %406 {offsets = [0, 14], sizes = [8, 2], strides = [1, 1]} : vector<8x16xf32> to vector<8x2xf32>
    %cst_214 = arith.constant dense<0.000000e+00> : vector<64x8xf32>
    %522 = tpu.matmul %519, %520, %cst_214 {dimension_numbers = #tpu.dot_dimension_numbers<[1], [1], [0], [0], [0, 0, 1, 0], [], []>} : vector<64x2xf32>, vector<8x2xf32>, vector<64x8xf32> -> vector<64x8xf32>
    %cst_215 = arith.constant 0.707106769 : f32
    %523 = vector.broadcast %cst_215 : f32 to vector<64x8xf32>
    %524 = arith.mulf %522, %523 : vector<64x8xf32>
    %cst_216 = arith.constant dense<0xFF800000> : vector<64xf32>
    %525 = vector.multi_reduction <maximumf>, %524, %cst_216 [1] : vector<64x8xf32> to vector<64xf32>
    %526 = vector.shape_cast %525 : vector<64xf32> to vector<64x1xf32>
    %527 = vector.broadcast %526 : vector<64x1xf32> to vector<64x8xf32>
    %528 = arith.subf %524, %527 : vector<64x8xf32>
    %529 = math.exp %528 : vector<64x8xf32>
    %cst_217 = arith.constant dense<0.000000e+00> : vector<64xf32>
    %530 = vector.multi_reduction <add>, %529, %cst_217 [1] : vector<64x8xf32> to vector<64xf32>
    %531 = vector.shape_cast %530 : vector<64xf32> to vector<64x1xf32>
    %532 = vector.broadcast %531 : vector<64x1xf32> to vector<64x8xf32>
    %533 = arith.divf %529, %532 : vector<64x8xf32>
    %cst_218 = arith.constant dense<0.000000e+00> : vector<64x2xf32>
    %534 = tpu.matmul %533, %521, %cst_218 {dimension_numbers = #tpu.dot_dimension_numbers<[1], [0], [0], [1], [0, 0, 1, 1], [], []>} : vector<64x8xf32>, vector<8x2xf32>, vector<64x2xf32> -> vector<64x2xf32>
    %535 = tpu.concatenate %422, %438, %454, %470, %486, %502, %518, %534 in 1 : vector<64x2xf32>, vector<64x2xf32>, vector<64x2xf32>, vector<64x2xf32>, vector<64x2xf32>, vector<64x2xf32>, vector<64x2xf32>, vector<64x2xf32> -> vector<64x16xf32>
    %c0_219 = arith.constant 0 : index
    %c0_220 = arith.constant 0 : index
    %536 = vector.load %arg15[%c0_219, %c0_220] : memref<16x32xf32, #tpu.memory_space<vmem>>, vector<16x32xf32>
    %cst_221 = arith.constant dense<0.000000e+00> : vector<64x32xf32>
    %537 = tpu.matmul %535, %536, %cst_221 {dimension_numbers = #tpu.dot_dimension_numbers<[1], [0], [0], [1], [0, 0, 1, 1], [], []>} : vector<64x16xf32>, vector<16x32xf32>, vector<64x32xf32> -> vector<64x32xf32>
    %c0_222 = arith.constant 0 : index
    %c0_223 = arith.constant 0 : index
    %538 = vector.load %arg16[%c0_222, %c0_223] : memref<1x32xf32, #tpu.memory_space<vmem>>, vector<1x32xf32>
    %539 = vector.broadcast %538 : vector<1x32xf32> to vector<64x32xf32>
    %540 = arith.addf %537, %539 : vector<64x32xf32>
    %541 = arith.addf %3, %540 : vector<64x32xf32>
    %c3 = arith.constant 3 : index
    %c0_224 = arith.constant 0 : index
    %542 = vector.load %arg17[%c3, %c0_224] : memref<4x32xf32, #tpu.memory_space<vmem>>, vector<1x32xf32>
    %c3_225 = arith.constant 3 : index
    %c0_226 = arith.constant 0 : index
    %543 = vector.load %arg18[%c3_225, %c0_226] : memref<4x32xf32, #tpu.memory_space<vmem>>, vector<1x32xf32>
    %cst_227 = arith.constant dense<0.000000e+00> : vector<64xf32>
    %544 = vector.multi_reduction <add>, %541, %cst_227 [1] : vector<64x32xf32> to vector<64xf32>
    %545 = vector.shape_cast %544 : vector<64xf32> to vector<64x1xf32>
    %cst_228 = arith.constant 3.200000e+01 : f32
    %546 = vector.broadcast %cst_228 : f32 to vector<64x1xf32>
    %547 = arith.divf %545, %546 : vector<64x1xf32>
    %548 = vector.broadcast %547 : vector<64x1xf32> to vector<64x32xf32>
    %549 = arith.subf %541, %548 : vector<64x32xf32>
    %550 = arith.mulf %549, %549 : vector<64x32xf32>
    %cst_229 = arith.constant dense<0.000000e+00> : vector<64xf32>
    %551 = vector.multi_reduction <add>, %550, %cst_229 [1] : vector<64x32xf32> to vector<64xf32>
    %552 = vector.shape_cast %551 : vector<64xf32> to vector<64x1xf32>
    %cst_230 = arith.constant 3.200000e+01 : f32
    %553 = vector.broadcast %cst_230 : f32 to vector<64x1xf32>
    %554 = arith.divf %552, %553 : vector<64x1xf32>
    %cst_231 = arith.constant 9.99999974E-6 : f32
    %555 = vector.broadcast %cst_231 : f32 to vector<64x1xf32>
    %556 = arith.addf %554, %555 : vector<64x1xf32>
    %557 = math.rsqrt %556 : vector<64x1xf32>
    %558 = vector.broadcast %557 : vector<64x1xf32> to vector<64x32xf32>
    %559 = arith.mulf %549, %558 : vector<64x32xf32>
    %560 = vector.broadcast %542 : vector<1x32xf32> to vector<64x32xf32>
    %561 = arith.mulf %559, %560 : vector<64x32xf32>
    %562 = vector.broadcast %543 : vector<1x32xf32> to vector<64x32xf32>
    %563 = arith.addf %561, %562 : vector<64x32xf32>
    %c0_232 = arith.constant 0 : index
    %c0_233 = arith.constant 0 : index
    %c0_234 = arith.constant 0 : index
    %564 = vector.load %arg23[%c0_232, %c0_233, %c0_234] : memref<1x8x32xf32, #tpu.memory_space<vmem>>, vector<1x8x32xf32>
    %565 = vector.shape_cast %564 : vector<1x8x32xf32> to vector<8x32xf32>
    %566 = vector.shape_cast %389 : vector<8x32xf32> to vector<1x8x32xf32>
    tpu.vector_store %arg23[%c0_232, %c0_233, %c0_234], %566 {strides = array<i32>} : memref<1x8x32xf32, #tpu.memory_space<vmem>>, vector<1x8x32xf32>,
    %c0_235 = arith.constant 0 : index
    %c0_236 = arith.constant 0 : index
    %c0_237 = arith.constant 0 : index
    %567 = vector.load %arg24[%c0_235, %c0_236, %c0_237] : memref<1x64x32xf32, #tpu.memory_space<vmem>>, vector<1x64x32xf32>
    %568 = vector.shape_cast %567 : vector<1x64x32xf32> to vector<64x32xf32>
    %569 = vector.shape_cast %563 : vector<64x32xf32> to vector<1x64x32xf32>
    tpu.vector_store %arg24[%c0_235, %c0_236, %c0_237], %569 {strides = array<i32>} : memref<1x64x32xf32, #tpu.memory_space<vmem>>, vector<1x64x32xf32>,
    return
  }
  func.func @transform_0(%arg0: i32) -> (i32, i32, i32) {
    %c0_i32 = arith.constant 0 : i32
    %c0_i32_0 = arith.constant 0 : i32
    %c0_i32_1 = arith.constant 0 : i32
    return %arg0, %c0_i32, %c0_i32_0 : i32, i32, i32
  }
  func.func @transform_1(%arg0: i32) -> (i32, i32, i32) {
    %c0_i32 = arith.constant 0 : i32
    %c0_i32_0 = arith.constant 0 : i32
    %c0_i32_1 = arith.constant 0 : i32
    return %arg0, %c0_i32, %c0_i32_0 : i32, i32, i32
  }
  func.func @transform_2(%arg0: i32) -> (i32, i32, i32) {
    %c0_i32 = arith.constant 0 : i32
    %c0_i32_0 = arith.constant 0 : i32
    %c0_i32_1 = arith.constant 0 : i32
    return %arg0, %c0_i32, %c0_i32_0 : i32, i32, i32
  }
  func.func @transform_3(%arg0: i32) -> (i32, i32, i32) {
    %c0_i32 = arith.constant 0 : i32
    %c0_i32_0 = arith.constant 0 : i32
    %c0_i32_1 = arith.constant 0 : i32
    return %arg0, %c0_i32, %c0_i32_0 : i32, i32, i32
  }
  func.func @transform_4(%arg0: i32) -> (i32, i32) {
    %c0_i32 = arith.constant 0 : i32
    %c0_i32_0 = arith.constant 0 : i32
    %c0_i32_1 = arith.constant 0 : i32
    return %c0_i32, %c0_i32_0 : i32, i32
  }
  func.func @transform_5(%arg0: i32) -> (i32, i32) {
    %c0_i32 = arith.constant 0 : i32
    %c0_i32_0 = arith.constant 0 : i32
    %c0_i32_1 = arith.constant 0 : i32
    return %c0_i32, %c0_i32_0 : i32, i32
  }
  func.func @transform_6(%arg0: i32) -> (i32, i32) {
    %c0_i32 = arith.constant 0 : i32
    %c0_i32_0 = arith.constant 0 : i32
    %c0_i32_1 = arith.constant 0 : i32
    return %c0_i32, %c0_i32_0 : i32, i32
  }
  func.func @transform_7(%arg0: i32) -> (i32, i32) {
    %c0_i32 = arith.constant 0 : i32
    %c0_i32_0 = arith.constant 0 : i32
    %c0_i32_1 = arith.constant 0 : i32
    return %c0_i32, %c0_i32_0 : i32, i32
  }
  func.func @transform_8(%arg0: i32) -> (i32, i32) {
    %c0_i32 = arith.constant 0 : i32
    %c0_i32_0 = arith.constant 0 : i32
    %c0_i32_1 = arith.constant 0 : i32
    return %c0_i32, %c0_i32_0 : i32, i32
  }
  func.func @transform_9(%arg0: i32) -> (i32, i32) {
    %c0_i32 = arith.constant 0 : i32
    %c0_i32_0 = arith.constant 0 : i32
    %c0_i32_1 = arith.constant 0 : i32
    return %c0_i32, %c0_i32_0 : i32, i32
  }
  func.func @transform_10(%arg0: i32) -> (i32, i32) {
    %c0_i32 = arith.constant 0 : i32
    %c0_i32_0 = arith.constant 0 : i32
    %c0_i32_1 = arith.constant 0 : i32
    return %c0_i32, %c0_i32_0 : i32, i32
  }
  func.func @transform_11(%arg0: i32) -> (i32, i32) {
    %c0_i32 = arith.constant 0 : i32
    %c0_i32_0 = arith.constant 0 : i32
    %c0_i32_1 = arith.constant 0 : i32
    return %c0_i32, %c0_i32_0 : i32, i32
  }
  func.func @transform_12(%arg0: i32) -> (i32, i32) {
    %c0_i32 = arith.constant 0 : i32
    %c0_i32_0 = arith.constant 0 : i32
    %c0_i32_1 = arith.constant 0 : i32
    return %c0_i32, %c0_i32_0 : i32, i32
  }
  func.func @transform_13(%arg0: i32) -> (i32, i32) {
    %c0_i32 = arith.constant 0 : i32
    %c0_i32_0 = arith.constant 0 : i32
    %c0_i32_1 = arith.constant 0 : i32
    return %c0_i32, %c0_i32_0 : i32, i32
  }
  func.func @transform_14(%arg0: i32) -> (i32, i32) {
    %c0_i32 = arith.constant 0 : i32
    %c0_i32_0 = arith.constant 0 : i32
    %c0_i32_1 = arith.constant 0 : i32
    return %c0_i32, %c0_i32_0 : i32, i32
  }
  func.func @transform_15(%arg0: i32) -> (i32, i32) {
    %c0_i32 = arith.constant 0 : i32
    %c0_i32_0 = arith.constant 0 : i32
    %c0_i32_1 = arith.constant 0 : i32
    return %c0_i32, %c0_i32_0 : i32, i32
  }
  func.func @transform_16(%arg0: i32) -> (i32, i32) {
    %c0_i32 = arith.constant 0 : i32
    %c0_i32_0 = arith.constant 0 : i32
    %c0_i32_1 = arith.constant 0 : i32
    return %c0_i32, %c0_i32_0 : i32, i32
  }
  func.func @transform_17(%arg0: i32) -> (i32, i32) {
    %c0_i32 = arith.constant 0 : i32
    %c0_i32_0 = arith.constant 0 : i32
    %c0_i32_1 = arith.constant 0 : i32
    return %c0_i32, %c0_i32_0 : i32, i32
  }
  func.func @transform_18(%arg0: i32) -> (i32, i32) {
    %c0_i32 = arith.constant 0 : i32
    %c0_i32_0 = arith.constant 0 : i32
    %c0_i32_1 = arith.constant 0 : i32
    return %c0_i32, %c0_i32_0 : i32, i32
  }
  func.func @transform_19(%arg0: i32) -> (i32, i32) {
    %c0_i32 = arith.constant 0 : i32
    %c0_i32_0 = arith.constant 0 : i32
    %c0_i32_1 = arith.constant 0 : i32
    return %c0_i32, %c0_i32_0 : i32, i32
  }
  func.func @transform_20(%arg0: i32) -> (i32, i32) {
    %c0_i32 = arith.constant 0 : i32
    %c0_i32_0 = arith.constant 0 : i32
    %c0_i32_1 = arith.constant 0 : i32
    return %c0_i32, %c0_i32_0 : i32, i32
  }
  func.func @transform_21(%arg0: i32) -> (i32, i32) {
    %c0_i32 = arith.constant 0 : i32
    %c0_i32_0 = arith.constant 0 : i32
    %c0_i32_1 = arith.constant 0 : i32
    return %c0_i32, %c0_i32_0 : i32, i32
  }
  func.func @transform_22(%arg0: i32) -> (i32, i32, i32) {
    %c0_i32 = arith.constant 0 : i32
    %c0_i32_0 = arith.constant 0 : i32
    %c0_i32_1 = arith.constant 0 : i32
    return %arg0, %c0_i32, %c0_i32_0 : i32, i32, i32
  }
  func.func @transform_23(%arg0: i32) -> (i32, i32, i32) {
    %c0_i32 = arith.constant 0 : i32
    %c0_i32_0 = arith.constant 0 : i32
    %c0_i32_1 = arith.constant 0 : i32
    return %arg0, %c0_i32, %c0_i32_0 : i32, i32, i32
  }
}

</mosaic_0001>

<bundles_post_ra>
// kernel: twoway_attention_block.1
= control target key start
LH: loop header
LB: loop body
LE: loop exit
PB: predicated region body
PF: predicated region fallthrough
CT: control target
= control target key end

     0   :  { %s11195_s0 = inlined_call_operand.vmem [shape: f32[2,8,32], index: 0, kind: input, shape index: {}]   ;;  %s11196_s1 = inlined_call_operand.vmem [shape: f32[2,64,32], index: 1, kind: input, shape index: {}]   ;;  %s11197_s2 = inlined_call_operand.vmem [shape: f32[2,8,32], index: 2, kind: input, shape index: {}]   ;;  %s11198_s3 = inlined_call_operand.vmem [shape: f32[2,64,32], index: 3, kind: input, shape index: {}]   ;;  %s11199_s4 = inlined_call_operand.vmem [shape: f32[96,32], index: 4, kind: input, shape index: {}]   ;;  %s11200_s5 = inlined_call_operand.vmem [shape: f32[3,32], index: 5, kind: input, shape index: {}]   ;;  %s11201_s6 = inlined_call_operand.vmem [shape: f32[32,32], index: 6, kind: input, shape index: {}]   ;;  %s11202_s7 = inlined_call_operand.vmem [shape: f32[1,32], index: 7, kind: input, shape index: {}]   ;;  %s11203_s8 = inlined_call_operand.vmem [shape: f32[96,16], index: 8, kind: input, shape index: {}]   ;;  %s11204_s9 = inlined_call_operand.vmem [shape: f32[3,16], index: 9, kind: input, shape index: {}]   ;;  %s11205_s10 = inlined_call_operand.vmem [shape: f32[16,32], index: 10, kind: input, shape index: {}]   ;;  %s11206_s11 = inlined_call_operand.vmem [shape: f32[1,32], index: 11, kind: input, shape index: {}]   ;;  %s11207_s12 = inlined_call_operand.vmem [shape: f32[96,16], index: 12, kind: input, shape index: {}]   ;;  %s11208_s13 = inlined_call_operand.vmem [shape: f32[3,16], index: 13, kind: input, shape index: {}]   ;;  %s11209_s14 = inlined_call_operand.vmem [shape: f32[16,32], index: 14, kind: input, shape index: {}]   ;;  %s11210_s15 = inlined_call_operand.vmem [shape: f32[1,32], index: 15, kind: input, shape index: {}]   ;;  %s11211_s16 = inlined_call_operand.vmem [shape: f32[4,32], index: 16, kind: input, shape index: {}]   ;;  %s11212_s17 = inlined_call_operand.vmem [shape: f32[4,32], index: 17, kind: input, shape index: {}]   ;;  %s11213_s18 = inlined_call_operand.vmem [shape: f32[32,128], index: 18, kind: input, shape index: {}]   ;;  %s11214_s19 = inlined_call_operand.vmem [shape: f32[1,128], index: 19, kind: input, shape index: {}]   ;;  %s11215_s20 = inlined_call_operand.vmem [shape: f32[128,32], index: 20, kind: input, shape index: {}]   ;;  %s11216_s21 = inlined_call_operand.vmem [shape: f32[1,32], index: 21, kind: input, shape index: {}]   ;;  %s11217_s22 = inlined_call_operand.hbm [shape: f32[2,8,32], index: 22, kind: output, shape index: {0}]   ;;  %s11218_s23 = inlined_call_operand.vmem [shape: f32[2,64,32], index: 23, kind: output, shape index: {1}]  }
   0x1   :  { %11290 = sst [smem:[#allocation30_spill]] %s11195_s0 }
   0x2   :  { %11291 = sst [smem:[#allocation31_spill]] %s11196_s1 }
   0x3   :  { %11292 = sst [smem:[#allocation32_spill]] %s11197_s2 }
   0x4   :  { %11293 = sst [smem:[#allocation33_spill]] %s11198_s3 }
   0x5   :  { %11294 = sst [smem:[#allocation34_spill]] %s11199_s4 }
   0x6   :  { %11295 = sst [smem:[#allocation35_spill]] %s11200_s5 }
   0x7   :  { %11296 = sst [smem:[#allocation36_spill]] %s11201_s6 }
   0x8   :  { %11297 = sst [smem:[#allocation37_spill]] %s11202_s7 }
   0x9   :  { %11298 = sst [smem:[#allocation38_spill]] %s11203_s8 }
   0xa   :  { %11299 = sst [smem:[#allocation39_spill]] %s11204_s9 }
   0xb   :  { %11300 = sst [smem:[#allocation40_spill]] %s11205_s10 }
   0xc   :  { %11301 = sst [smem:[#allocation41_spill]] %s11206_s11 }
   0xd   :  { %11302 = sst [smem:[#allocation42_spill]] %s11213_s18 }
   0xe   :  { %11303 = sst [smem:[#allocation43_spill]] %s11214_s19 }
   0xf   :  { %11304 = sst [smem:[#allocation44_spill]] %s11217_s22 }
  0x10   :  { %11305 = sst [smem:[#allocation45_spill]] %s11218_s23 }
  0x11   :  { %29 = vsyncpa [#allocation3], 0 }
  0x12   :  { %31 = vsyncpa [#allocation3 + $0x1], 0  ;;  %s7647_s4 = smov 0   ;;  %s7649_s30 = smov 0  }
  0x13   :  { %s7651_s24 = smov 0   ;;  %s7653_s25 = smov 0  }
  0x14 LB: > { %11306 = sst [smem:[#allocation5_spill]] %s7490_s4  ;;  %s7668_s5 = sadd.s32 4294967295, %s7502_s25   ;;  %s7502_s25 = sphi %s7653_s25, %s11494_s25   ;;  %s7498_s24 = sphi %s7651_s24, %s11496_s24   ;;  %s7494_s30 = sphi %s7649_s30, %s11498_s30   ;;  %s7490_s4 = sphi %s7647_s4, %s11497_s4  }
  0x15   : > { %11307 = sst [smem:[#allocation6_spill]] %s7498_s24  ;;  %s6558_s1 = sadd.s32 4294967294, %s7502_s25  }
  0x16   : > { %11308 = sst [smem:[#allocation7_spill]] %s7502_s25  ;;  %s7672_s26 = sadd.s32 1, %s7502_s25  }
  0x17   : > { %11309 = sst [smem:[#allocation8_spill]] %s7672_s26  ;;  %s526_s2 = sadd.s32 1, %s7498_s24 }
  0x18   : > { %s523_s6 = ssub.s32 %s7502_s25, %s7672_s26  ;;  %p536_p0 = scmp.ne.s32.totalorder %s7498_s24, %s7494_s30 }
  0x19   : > { %p524_p1 = scmp.eq.s32.totalorder %s523_s6, 0  ;;  %p537_p2 = scmp.eq.s32.totalorder %s7668_s5, 1 }
  0x1a   : > { %p542_p3 = scmp.ne.s32.totalorder %s7494_s30, %s7490_s4  ;;  %p543_p4 = scmp.eq.s32.totalorder %s6558_s1, 1 }
  0x1b   : > { %s7683_s27 = scalar_select %p524_p1, %s7498_s24, %s526_s2  }
  0x1c   : > { %p7685_p5 = por %p537_p2, %p536_p0  ;;  %p7689_p6 = por %p543_p4, %p542_p3 }
  0x1d   : > { %11310 = sst [smem:[#allocation9_spill]] %s7683_s27  ;;  %p6561_p7 = scmp.ge.s32.totalorder %s7502_s25, 1 }
  0x1e   : > { %s11311_s7 = scalar_select %p7685_p5, 1, 0 }
  0x1f   : > { %s11313_s28 = scalar_select %p7689_p6, 1, 0 }
  0x20   : > { %11312 = sst [smem:[#allocation10_spill]] %s11311_s7  ;;  %p671_p8 = scmp.lt.s32.totalorder %s7502_s25, 3 }
  0x21   : > { %11314 = sst [smem:[#allocation11_spill]] %s11313_s28 }
  0x22   : > { %p672_p9 = pnand %p6561_p7, %p671_p8 }
  0x24   : > { %675 = sbr.rel (%p672_p9) target bundleno = 6486 (0x1956), region = 108 }
  0x29   : > { %s11315_s0 = sld [smem:[#allocation34_spill]]  ;;  %p753_p10 = scmp.lt.s32.totalorder %s7668_s5, 1  ;;  %vm11280_vm0 = vcmask 261120   ;;  %vm880_vm1 = vcmask 31744   ;;  %vm908_vm2 = vcmask 64512  }
  0x2a   : > { %s11316_s6 = sld [smem:[#allocation30_spill]]  ;;  %s11241_s2 = smov 124  }
  0x2b   : > { %s7715_s1 = scalar_select %p753_p10, %s7668_s5, 1 }
  0x2c   : > { %s11317_s26 = sld [smem:[#allocation32_spill]]  ;;  %s11235_s27 = smov 120  }
  0x2d   : > { %s6563_s3 = sshll.u32 %s7715_s1, 3  ;;  %s11318_s29 = sld [smem:[#allocation35_spill]] }
  0x2e   : > { %s7509_s23 = smov 108   ;;  %s7510_s25 = smov 100  }
  0x2f   : > { %v798_v0 = vld [vmem:[%s11315_s0 + $0x18] sm:$0xff]  ;;  %v797_v2 = vld [vmem:[%s11315_s0 + $0x10] sm:$0xff]  ;;  %v796_v4 = vld [vmem:[%s11315_s0 + $0x8] sm:$0xff]  ;;  %s11231_s4 = smov 8   ;;  %s7517_s22 = smov 28  }
  0x30   : > { %v828_v1 = vld [vmem:[%s11315_s0 + $0x38] sm:$0xff]  ;;  %817 = vmatpush.msra.mxu0 %v798_v0  ;;  %v827_v3 = vld [vmem:[%s11315_s0 + $0x30] sm:$0xff]  ;;  %v826_v5 = vld [vmem:[%s11315_s0 + $0x28] sm:$0xff]  ;;  %s756_s24 = scalar_lea.vmem %s11316_s6, %s6563_s3  ;;  %s7506_s6 = smov 112  }
  0x31   : > { %843 = vmatpush.msra.mxu1 %v828_v1  ;;  %v854_v6 = vld [vmem:[%s11315_s0 + $0x58] sm:$0xff]  ;;  %v795_v7 = vld [vmem:[%s11315_s0] sm:$0xff]  ;;  %v853_v8 = vld [vmem:[%s11315_s0 + $0x50] sm:$0xff]  ;;  %s11321_s7 = sld [smem:[#allocation31_spill]] }
  0x32   : > { %818 = vmatpush.msra.mxu0 %v797_v2  ;;  %v825_v9 = vld [vmem:[%s11315_s0 + $0x20] sm:$0xff]  ;;  %872 = vmatpush.msra.mxu2 %v854_v6  ;;  %v852_v10 = vld [vmem:[%s11315_s0 + $0x48] sm:$0xff]  ;;  %s7739_s28 = scalar_lea.vmem %s11317_s26, %s6563_s3  ;;  %s7508_s26 = smov 104  }
  0x33   : > { %844 = vmatpush.msra.mxu1 %v827_v3  ;;  %v7741_v11 = vld [vmem:[%s756_s24] sm:$0xff]  ;;  %s11233_s24 = smov 116   ;;  %s7512_s3 = smov 16  }
  0x34   : > { %819 = vmatpush.msra.mxu0 %v796_v4  ;;  %873 = vmatpush.msra.mxu2 %v853_v8  ;;  %v7744_v12 = vld [vmem:[%s7739_s28] sm:$0xff]  ;;  %s11323_s8 = sld [smem:[#allocation38_spill]] }
  0x35   : > { %845 = vmatpush.msra.mxu1 %v826_v5  ;;  %v794_v13 = vadd.f32 %v7744_v12, %v7741_v11  ;;  %v851_v14 = vld [vmem:[%s11315_s0 + $0x40] sm:$0xff]  ;;  %s11325_s9 = sld [smem:[#allocation39_spill]]  ;;  %s11249_s0 = smov 114  }
  0x36   : > { %820 = vmatpush.msra.mxu0 %v795_v7  ;;  %874 = vmatpush.msra.mxu2 %v852_v10  ;;  %v7065_v15 = vld [vmem:[%s11318_s29] ss:$0 sm:$0xff]  ;;  %v7066_v16 = vld [vmem:[%s11318_s29 + $0x1] ss:$0 sm:$0xff]  ;;  %v7067_v21 = vld [vmem:[%s11318_s29 + $0x2] ss:$0 sm:$0xff] }
  0x37   : > { %846 = vmatpush.msra.mxu1 %v825_v9  ;;  %6571 = vmatmul.msk.f32.vlgmr.msra.gmra.mxu0 %vm11280_vm0, %v794_v13  ;;  %s11334_s10 = sld [smem:[#allocation40_spill]] }
  0x38   : > { %6572 = vmatmul.msk.f32.vlgmr.msra.gmra.mxu1 %vm11280_vm0, %v794_v13  ;;  %875 = vmatpush.msra.mxu2 %v851_v14  ;;  %s11335_s11 = sld [smem:[#allocation41_spill]] }
  0x39   : > { %6573 = vmatmul.msk.f32.vlgmr.msra.gmra.mxu2 %vm11280_vm0, %v7741_v11  ;;  %s11336_s18 = sld [smem:[#allocation42_spill]] }
  0x3a   : > { %s11337_s19 = sld [smem:[#allocation43_spill]] }
  0xb4   : > { %v822_v17 = vpop.f32.mrf.mxu0 }
  0xb5   : > { %v848_v18 = vpop.f32.mrf.mxu1  ;;  %v7761_v19 = vadd.f32 %v7065_v15, %v822_v17 }
  0xb6   : > { %v7763_v20 = vadd.f32 %v7066_v16, %v848_v18 }
  0xb7   : > { %956 = vrot.lane.b32.xlu2 %v7761_v19, %s11241_s2 }
  0xb8   : > { %958 = vrot.lane.b32.xlu1 %v7763_v20, %s11241_s2  ;;  %6574 = vmatpush.xpose.msk.msra.mxu3 %vm880_vm1, %v7763_v20 }
  0xbb   : > { %6575 = vmatmul.msk.f32.vlgmr.msra.gmra.mxu3 %vm880_vm1, %v7761_v19 }
  0xbc   : > { %v877_v22 = vpop.f32.mrf.mxu2 }
  0xbd   : > { %v7796_v23 = vadd.f32 %v7067_v21, %v877_v22 }
  0xbf   : > { %1036 = vrot.lane.b32.xlu2 %v7761_v19, %s11235_s27  ;;  %951 = vmatpush.msrb.mxu3 %v7796_v23 }
  0xc0   : > { %1038 = vrot.lane.b32.xlu1 %v7763_v20, %s11235_s27 }
  0xc7   : > { %1117 = vrot.lane.b32.xlu2 %v7763_v20, %s11233_s24 }
  0xc8   : > { %1194 = vrot.lane.b32.xlu1 %v7761_v19, %s7506_s6 }
  0xcf   : > { %1354 = vrot.lane.b32.xlu2 %v7763_v20, %s7508_s26 }
  0xd0   : > { %1115 = vrot.lane.b32.xlu1 %v7761_v19, %s11233_s24 }
  0xd7   : > { %1275 = vrot.lane.b32.xlu2 %v7763_v20, %s7509_s23 }
  0xd8   : > { %1352 = vrot.lane.b32.xlu1 %v7761_v19, %s7508_s26 }
  0xdf   : > { %1431 = vrot.lane.b32.xlu2 %v7761_v19, %s7510_s25 }
  0xe0   : > { %1433 = vrot.lane.b32.xlu1 %v7763_v20, %s7510_s25 }
 0x111   : > { %v7799_v24 = vpop.permute.xlu2 %956 }
 0x119   : > { %v1037_v25 = vpop.permute.xlu2 %1036 }
 0x121   : > { %v1118_v26 = vpop.permute.xlu2 %1117 }
 0x122   : > { %6583 = vmatpush.xpose.msk.msrb.mxu0 %vm880_vm1, %v1118_v26 }
 0x129   : > { %v1355_v28 = vpop.permute.xlu2 %1354 }
 0x12a   : > { %v959_v27 = vpop.permute.xlu1 %958 }
 0x12b   : > { %6577 = vmatpush.xpose.msk.msra.mxu3 %vm880_vm1, %v959_v27 }
 0x131   : > { %v1276_v30 = vpop.permute.xlu2 %1275 }
 0x132   : > { %v1039_v29 = vpop.permute.xlu1 %1038  ;;  %6589 = vmatpush.xpose.msk.msra.mxu0 %vm880_vm1, %v1276_v30 }
 0x133   : > { %6580 = vmatpush.xpose.msk.msrb.mxu2 %vm880_vm1, %v1039_v29 }
 0x136   : > { %6581 = vmatmul.msk.f32.vlgmr.msrb.gmra.mxu2 %vm880_vm1, %v1037_v25 }
 0x139   : > { %v1432_v63 = vpop.permute.xlu2 %1431 }
 0x13a   : > { %v1195_v31 = vpop.permute.xlu1 %1194 }
 0x13e   : > { %v904_v32 = vpop.f32.mrf.mxu3 }
 0x13f   : > { %v907_v33 = vmul.f32 0.5, %v904_v32 }
 0x141   : > { %v909_v34 = vsel %vm908_vm2, %v907_v33, -inf }
 0x142   : > { %v1116_v35 = vpop.permute.xlu1 %1115  ;;  %910 = vmax.xlane.f32.xlu0 %v909_v34 }
 0x143   : > { %6584 = vmatmul.msk.f32.vlgmr.msrb.gmra.mxu0 %vm880_vm1, %v1116_v35 }
 0x14a   : > { %v1353_v36 = vpop.permute.xlu1 %1352 }
 0x152   : > { %v1434_v37 = vpop.permute.xlu1 %1433 }
 0x153   : > { %6595 = vmatpush.xpose.msk.msrb.mxu0 %vm880_vm1, %v1434_v37 }
 0x1b5   : > { %v911_v38 = vpop.xlane.xlu0 %910 }
 0x1b6   : > { %v912_v39 = vsub.f32 %v907_v33, %v911_v38 }
 0x1b8   : > { %v913_v40 = vmul.f32 1.442695, %v912_v39 }
 0x1b9   : > { %v1061_v41 = vpop.f32.mrf.mxu2 }
 0x1ba   : > { %7087 = vpow2.f32 %v913_v40  ;;  %v1064_v42 = vmul.f32 0.5, %v1061_v41 }
 0x1bc   : > { %v1065_v43 = vsel %vm908_vm2, %v1064_v42, -inf }
 0x1bd   : > { %1066 = vmax.xlane.f32.xlu1 %v1065_v43 }
 0x1c0   : > { %v7088_v44 = vpop.eup %7087  ;;  %v1140_v45 = vpop.f32.mrf.mxu0 }
 0x1c1   : > { %v1143_v46 = vmul.f32 0.5, %v1140_v45  ;;  %v915_v47 = vsel %vm908_vm2, %v7088_v44, 0.0 }
 0x1c2   : > { %916 = vadd.xlane.f32.xlu0 %v915_v47 }
 0x1c3   : > { %v1144_v48 = vsel %vm908_vm2, %v1143_v46, -inf }
 0x1c4   : > { %1145 = vmax.xlane.f32.xlu2 %v1144_v48 }
 0x1d6   : > { %1196 = vrot.lane.b32.xlu0 %v7763_v20, %s7506_s6 }
 0x1de   : > { %1273 = vrot.lane.b32.xlu0 %v7761_v19, %s7509_s23 }
 0x230   : > { %v1067_v1 = vpop.xlane.xlu1 %1066 }
 0x231   : > { %v1068_v5 = vsub.f32 %v1064_v42, %v1067_v1 }
 0x233   : > { %v1069_v8 = vmul.f32 1.442695, %v1068_v5 }
 0x235   : > { %v917_v49 = vpop.xlane.xlu0 %916 }
 0x236   : > { %7089 = vrcp.f32 %v917_v49  ;;  %v929_v53 = vand.u32 2147483648, %v917_v49  ;;  %v927_v55 = vand.u32 2147483647, %v917_v49  ;;  %vm923_vm4 = vweird.f32 %v917_v49 }
 0x237   : > { %7091 = vpow2.f32 %v1069_v8  ;;  %v1146_v16 = vpop.xlane.xlu2 %1145 }
 0x238   : > { %v930_v57 = vor.u32 1.1754944e-38, %v929_v53  ;;  %vm928_vm6 = vcmp.eq.f32.partialorder %v927_v55, 8.507059e+37  ;;  %v1147_v18 = vsub.f32 %v1143_v46, %v1146_v16 }
 0x23a   : > { %v1148_v22 = vmul.f32 1.442695, %v1147_v18 }
 0x23c   : > { %v7090_v50 = vpop.eup %7089  ;;  %7093 = vpow2.f32 %v1148_v22 }
 0x23d   : > { %v919_v51 = vmul.f32 %v7090_v50, %v917_v49  ;;  %vm924_vm3 = vweird.f32 %v7090_v50  ;;  %v7830_v19 = vpop.eup %7091 }
 0x23e   : > { %vm925_vm5 = vmor %vm923_vm4, %vm924_vm3 }
 0x23f   : > { %v920_v52 = vsub.f32 1.0, %v919_v51 }
 0x241   : > { %v921_v54 = vmul.f32 %v7090_v50, %v920_v52 }
 0x242   : > { %v7836_v27 = vpop.eup %7093 }
 0x243   : > { %v922_v56 = vadd.f32 %v7090_v50, %v921_v54 }
 0x245   : > { %v926_v58 = vsel %vm925_vm5, %v7090_v50, %v922_v56 }
 0x246   : > { %v931_v59 = vsel %vm928_vm6, %v930_v57, %v926_v58 }
 0x247   : > { %v932_v60 = vmul.f32 %v7088_v44, %v931_v59 }
 0x248   : > { %v1197_v61 = vpop.permute.xlu0 %1196 }
 0x249   : > { %6576 = vmatmul.msk.f32.vlgmr.msrb.gmra.mxu3 %vm908_vm2, %v932_v60  ;;  %6586 = vmatpush.xpose.msk.msra.mxu2 %vm880_vm1, %v1197_v61 }
 0x24c   : > { %6587 = vmatmul.msk.f32.vlgmr.msra.gmra.mxu2 %vm880_vm1, %v1195_v31 }
 0x24d   : > { %6592 = vmatpush.xpose.msk.msrb.mxu2 %vm880_vm1, %v1355_v28  ;;  %v1150_v28 = vsel %vm908_vm2, %v7836_v27, 0.0 }
 0x250   : > { %v1274_v62 = vpop.permute.xlu0 %1273 }
 0x251   : > { %6578 = vmatmul.msk.f32.vlgmr.msra.gmra.mxu3 %vm880_vm1, %v7799_v24  ;;  %6590 = vmatmul.msk.f32.vlgmr.msra.gmra.mxu0 %vm880_vm1, %v1274_v62  ;;  %v1071_v24 = vsel %vm908_vm2, %v7830_v19, 0.0 }
 0x254   : > { %6593 = vmatmul.msk.f32.vlgmr.msrb.gmra.mxu2 %vm880_vm1, %v1353_v36 }
 0x259   : > { %6596 = vmatmul.msk.f32.vlgmr.msrb.gmra.mxu0 %vm880_vm1, %v1432_v63 }
 0x2cc   : > { %v7825_v0 = vpop.f32.mrf.mxu3 }
 0x2ce   : > { %v1298_v2 = vpop.f32.mrf.mxu0 }
 0x2cf   : > { %v1301_v3 = vmul.f32 0.5, %v1298_v2  ;;  %v1219_v4 = vpop.f32.mrf.mxu2 }
 0x2d0   : > { %v1222_v17 = vmul.f32 0.5, %v1219_v4 }
 0x2d1   : > { %v1302_v6 = vsel %vm908_vm2, %v1301_v3, -inf }
 0x2d2   : > { %1303 = vmax.xlane.f32.xlu2 %v1302_v6  ;;  %v1223_v20 = vsel %vm908_vm2, %v1222_v17, -inf }
 0x2d4   : > { %v981_v7 = vpop.f32.mrf.mxu3 }
 0x2d5   : > { %v984_v9 = vmul.f32 0.5, %v981_v7 }
 0x2d6   : > { %v1456_v21 = vpop.f32.mrf.mxu0 }
 0x2d7   : > { %v1377_v10 = vpop.f32.mrf.mxu2  ;;  %v985_v13 = vsel %vm908_vm2, %v984_v9, -inf  ;;  %v1459_v25 = vmul.f32 0.5, %v1456_v21 }
 0x2d8   : > { %v1380_v14 = vmul.f32 0.5, %v1377_v10  ;;  %986 = vmax.xlane.f32.xlu0 %v985_v13 }
 0x2d9   : > { %v1460_v26 = vsel %vm908_vm2, %v1459_v25, -inf }
 0x2da   : > { %v1381_v15 = vsel %vm908_vm2, %v1380_v14, -inf }
 0x2db   : > { %1382 = vmax.xlane.f32.xlu1 %v1381_v15 }
 0x2e0   : > { %1224 = vmax.xlane.f32.xlu0 %v1223_v20 }
 0x2e3   : > { %1072 = vadd.xlane.f32.xlu1 %v1071_v24 }
 0x2e8   : > { %1461 = vmax.xlane.f32.xlu0 %v1460_v26 }
 0x2f0   : > { %1151 = vadd.xlane.f32.xlu0 %v1150_v28 }
 0x345   : > { %v1304_v29 = vpop.xlane.xlu2 %1303 }
 0x346   : > { %v1305_v30 = vsub.f32 %v1301_v3, %v1304_v29 }
 0x348   : > { %v1306_v31 = vmul.f32 1.442695, %v1305_v30 }
 0x34a   : > { %7095 = vpow2.f32 %v1306_v31 }
 0x34b   : > { %v987_v32 = vpop.xlane.xlu0 %986 }
 0x34c   : > { %v988_v50 = vsub.f32 %v984_v9, %v987_v32 }
 0x34e   : > { %v1383_v33 = vpop.xlane.xlu1 %1382  ;;  %v989_v51 = vmul.f32 1.442695, %v988_v50 }
 0x34f   : > { %v1384_v34 = vsub.f32 %v1380_v14, %v1383_v33 }
 0x350   : > { %v7840_v35 = vpop.eup %7095 }
 0x351   : > { %v1385_v36 = vmul.f32 1.442695, %v1384_v34  ;;  %v1308_v37 = vsel %vm908_vm2, %v7840_v35, 0.0 }
 0x352   : > { %1309 = vadd.xlane.f32.xlu1 %v1308_v37 }
 0x353   : > { %7097 = vpow2.f32 %v1385_v36  ;;  %v1225_v38 = vpop.xlane.xlu0 %1224 }
 0x354   : > { %v1226_v39 = vsub.f32 %v1222_v17, %v1225_v38 }
 0x356   : > { %v1227_v40 = vmul.f32 1.442695, %v1226_v39  ;;  %v1073_v54 = vpop.xlane.xlu1 %1072 }
 0x357   : > { %v1085_v61 = vand.u32 2147483648, %v1073_v54  ;;  %vm1079_vm8 = vweird.f32 %v1073_v54  ;;  %v1083_v62 = vand.u32 2147483647, %v1073_v54 }
 0x358   : > { %7099 = vpow2.f32 %v1227_v40 }
 0x359   : > { %v7844_v41 = vpop.eup %7097  ;;  %v1086_v3 = vor.u32 1.1754944e-38, %v1085_v61  ;;  %vm1084_vm10 = vcmp.eq.f32.partialorder %v1083_v62, 8.507059e+37 }
 0x35a   : > { %v1387_v42 = vsel %vm908_vm2, %v7844_v41, 0.0 }
 0x35b   : > { %1388 = vadd.xlane.f32.xlu0 %v1387_v42  ;;  %v1462_v43 = vpop.xlane.xlu0 %1461 }
 0x35c   : > { %v1463_v44 = vsub.f32 %v1459_v25, %v1462_v43 }
 0x35e   : > { %v7848_v45 = vpop.eup %7099  ;;  %v1464_v46 = vmul.f32 1.442695, %v1463_v44 }
 0x35f   : > { %v1229_v47 = vsel %vm908_vm2, %v7848_v45, 0.0 }
 0x360   : > { %7101 = vpow2.f32 %v1464_v46  ;;  %1230 = vadd.xlane.f32.xlu2 %v1229_v47 }
 0x361   : > { %7103 = vpow2.f32 %v989_v51 }
 0x362   : > { %7105 = vrcp.f32 %v1073_v54 }
 0x363   : > { %v7876_v1 = vpop.xlane.xlu0 %1151 }
 0x364   : > { %v1162_v62 = vand.u32 2147483647, %v7876_v1 }
 0x366   : > { %v7852_v48 = vpop.eup %7101 }
 0x367   : > { %v1466_v49 = vsel %vm908_vm2, %v7852_v48, 0.0  ;;  %v7868_v52 = vpop.eup %7103 }
 0x368   : > { %1467 = vadd.xlane.f32.xlu0 %v1466_v49  ;;  %v991_v53 = vsel %vm908_vm2, %v7868_v52, 0.0  ;;  %v7106_v55 = vpop.eup %7105 }
 0x369   : > { %v1075_v56 = vmul.f32 %v7106_v55, %v1073_v54  ;;  %vm1080_vm7 = vweird.f32 %v7106_v55 }
 0x36a   : > { %vm1081_vm9 = vmor %vm1079_vm8, %vm1080_vm7 }
 0x36b   : > { %1089 = vrot.lane.b32.xlu1 %v7796_v23, %s11235_s27  ;;  %v1076_v57 = vsub.f32 1.0, %v1075_v56  ;;  %s11245_s27 = smov 6  }
 0x36d   : > { %v1077_v58 = vmul.f32 %v7106_v55, %v1076_v57 }
 0x36f   : > { %v1078_v59 = vadd.f32 %v7106_v55, %v1077_v58 }
 0x371   : > { %v1082_v2 = vsel %vm1081_vm9, %v7106_v55, %v1078_v59 }
 0x372   : > { %v1087_v4 = vsel %vm1084_vm10, %v1086_v3, %v1082_v2 }
 0x373   : > { %1326 = vrot.lane.b32.xlu1 %v7796_v23, %s7509_s23  ;;  %v1088_v9 = vmul.f32 %v7830_v19, %v1087_v4  ;;  %s7515_s23 = smov 24  }
 0x378   : > { %1010 = vrot.lane.b32.xlu2 %v7796_v23, %s11241_s2  ;;  %s11255_s2 = smov 126  }
 0x37c   : > { %1168 = vrot.lane.b32.xlu0 %v7796_v23, %s11233_s24  ;;  %s11322_s24 = sld [smem:[#allocation33_spill]] }
 0x380   : > { %1247 = vrot.lane.b32.xlu2 %v7796_v23, %s7506_s6  ;;  %s11237_s6 = smov 4  }
 0x384   : > { %1484 = vrot.lane.b32.xlu0 %v7796_v23, %s7510_s25  ;;  %s7516_s25 = smov 20  }
 0x3a9   : > { %992 = vadd.xlane.f32.xlu2 %v991_v53 }
 0x3c1   : > { %1405 = vrot.lane.b32.xlu2 %v7796_v23, %s7508_s26  ;;  %s11239_s26 = smov 12  }
 0x3c5   : > { %v7874_v63 = vpop.xlane.xlu1 %1309 }
 0x3ce   : > { %v1389_v10 = vpop.xlane.xlu0 %1388 }
 0x3cf   : > { %v1401_v31 = vand.u32 2147483648, %v1389_v10  ;;  %vm1395_vm3 = vweird.f32 %v1389_v10  ;;  %v1399_v33 = vand.u32 2147483647, %v1389_v10 }
 0x3d1   : > { %v1402_v38 = vor.u32 1.1754944e-38, %v1401_v31  ;;  %vm1400_vm5 = vcmp.eq.f32.partialorder %v1399_v33, 8.507059e+37 }
 0x3d3   : > { %v1231_v60 = vpop.xlane.xlu2 %1230 }
 0x3d4   : > { %7107 = vrcp.f32 %v1231_v60  ;;  %v1243_v13 = vand.u32 2147483648, %v1231_v60  ;;  %v1241_v15 = vand.u32 2147483647, %v1231_v60  ;;  %vm1237_vm12 = vweird.f32 %v1231_v60 }
 0x3d5   : > { %7109 = vrcp.f32 %v1389_v10 }
 0x3d6   : > { %v1244_v17 = vor.u32 1.1754944e-38, %v1243_v13  ;;  %vm1242_vm14 = vcmp.eq.f32.partialorder %v1241_v15, 8.507059e+37  ;;  %7111 = vrcp.f32 %v7876_v1 }
 0x3da   : > { %v7108_v23 = vpop.eup %7107 }
 0x3db   : > { %v1233_v5 = vmul.f32 %v7108_v23, %v1231_v60  ;;  %v1011_v6 = vpop.permute.xlu2 %1010  ;;  %vm1238_vm11 = vweird.f32 %v7108_v23  ;;  %v7881_v19 = vpop.xlane.xlu0 %1467  ;;  %v1164_v60 = vand.u32 2147483648, %v7876_v1 }
 0x3dc   : > { %1031 = vmatpush.msrb.mxu1 %v1011_v6  ;;  %vm1239_vm13 = vmor %vm1237_vm12, %vm1238_vm11  ;;  %v7110_v25 = vpop.eup %7109  ;;  %vm1158_vm11 = vweird.f32 %v7876_v1 }
 0x3dd   : > { %v1234_v7 = vsub.f32 1.0, %v1233_v5  ;;  %v1090_v8 = vpop.permute.xlu1 %1089  ;;  %v1391_v26 = vmul.f32 %v7110_v25, %v1389_v10  ;;  %vm1396_vm15 = vweird.f32 %v7110_v25  ;;  %v7112_v32 = vpop.eup %7111  ;;  %v1165_v6 = vor.u32 1.1754944e-38, %v1164_v60  ;;  %v1656_v60 = vld [vmem:[%s11323_s8 + $0x28] sm:$0xff] }
 0x3de   : > { %1110 = vmatpush.msrb.mxu3 %v1090_v8  ;;  %vm1397_vm4 = vmor %vm1395_vm3, %vm1396_vm15  ;;  %v1154_v37 = vmul.f32 %v7112_v32, %v7876_v1  ;;  %vm1159_vm8 = vweird.f32 %v7112_v32  ;;  %v1322_v10 = vand.u32 2147483648, %v7874_v63  ;;  %vm1316_vm15 = vweird.f32 %v7874_v63 }
 0x3df   : > { %v1235_v14 = vmul.f32 %v7108_v23, %v1234_v7  ;;  %6582 = vmatmul.msk.f32.vlgmr.msrb.gmra.mxu3 %vm908_vm2, %v1088_v9  ;;  %v1392_v28 = vsub.f32 1.0, %v1391_v26  ;;  %vm1160_vm12 = vmor %vm1158_vm11, %vm1159_vm8  ;;  %vm1544_vm11 = vcmask 162816  }
 0x3e0   : > { %v1155_v42 = vsub.f32 1.0, %v1154_v37 }
 0x3e1   : > { %v1236_v16 = vadd.f32 %v7108_v23, %v1235_v14  ;;  %v1393_v29 = vmul.f32 %v7110_v25, %v1392_v28 }
 0x3e2   : > { %v1156_v49 = vmul.f32 %v7112_v32, %v1155_v42 }
 0x3e3   : > { %v1240_v18 = vsel %vm1239_vm13, %v7108_v23, %v1236_v16  ;;  %v1248_v20 = vpop.permute.xlu2 %1247  ;;  %v1394_v30 = vadd.f32 %v7110_v25, %v1393_v29  ;;  %vm1163_vm13 = vcmp.eq.f32.partialorder %v1162_v62, 8.507059e+37  ;;  %v1323_v16 = vor.u32 1.1754944e-38, %v1322_v10  ;;  %v1655_v62 = vld [vmem:[%s11323_s8 + $0x20] sm:$0xff] }
 0x3e4   : > { %1268 = vmatpush.msra.mxu3 %v1248_v20  ;;  %v1245_v21 = vsel %vm1242_vm14, %v1244_v17, %v1240_v18  ;;  %v1480_v20 = vand.u32 2147483648, %v7881_v19 }
 0x3e5   : > { %v1246_v22 = vmul.f32 %v7848_v45, %v1245_v21  ;;  %v1398_v36 = vsel %vm1397_vm4, %v7110_v25, %v1394_v30  ;;  %v1327_v5 = vpop.permute.xlu1 %1326 }
 0x3e6   : > { %v1403_v39 = vsel %vm1400_vm5, %v1402_v38, %v1398_v36 }
 0x3e7   : > { %6588 = vmatmul.msk.f32.vlgmr.msra.gmra.mxu3 %vm908_vm2, %v1246_v22  ;;  %v1404_v45 = vmul.f32 %v7844_v41, %v1403_v39  ;;  %v1157_v41 = vadd.f32 %v7112_v32, %v1156_v49  ;;  %v1481_v22 = vor.u32 1.1754944e-38, %v1480_v20 }
 0x3e9   : > { %v1161_v3 = vsel %vm1160_vm12, %v7112_v32, %v1157_v41  ;;  %vm1546_vm12 = vcmask 195584   ;;  %v7518_v41 = vmov 32.0  }
 0x3ea   : > { %v1166_v7 = vsel %vm1163_vm13, %v1165_v6, %v1161_v3  ;;  %vm1548_vm13 = vcmask 228352  }
 0x3eb   : > { %v1167_v1 = vmul.f32 %v7836_v27, %v1166_v7 }
 0x3ee   : > { %v1169_v24 = vpop.permute.xlu0 %1168 }
 0x3ef   : > { %1189 = vmatpush.msra.mxu1 %v1169_v24 }
 0x3f6   : > { %v1485_v15 = vpop.permute.xlu0 %1484 }
 0x41c   : > { %v993_v34 = vpop.xlane.xlu2 %992 }
 0x41d   : > { %7113 = vrcp.f32 %v993_v34  ;;  %v1005_v50 = vand.u32 2147483648, %v993_v34  ;;  %v1003_v54 = vand.u32 2147483647, %v993_v34  ;;  %vm999_vm7 = vweird.f32 %v993_v34 }
 0x41e   : > { %7115 = vrcp.f32 %v7874_v63 }
 0x41f   : > { %7117 = vrcp.f32 %v7881_v19  ;;  %v1006_v56 = vor.u32 1.1754944e-38, %v1005_v50  ;;  %vm1004_vm10 = vcmp.eq.f32.partialorder %v1003_v54, 8.507059e+37 }
 0x420   : > { %7119 = vrcp.f32 %v7518_v41 }
 0x423   : > { %v7114_v40 = vpop.eup %7113 }
 0x424   : > { %v995_v43 = vmul.f32 %v7114_v40, %v993_v34  ;;  %v1406_v44 = vpop.permute.xlu2 %1405  ;;  %v7116_v46 = vpop.eup %7115  ;;  %vm1000_vm6 = vweird.f32 %v7114_v40 }
 0x425   : > { %1426 = vmatpush.msrb.mxu3 %v1406_v44  ;;  %v1312_v51 = vmul.f32 %v7116_v46, %v7874_v63  ;;  %vm1001_vm9 = vmor %vm999_vm7, %vm1000_vm6  ;;  %v7118_v59 = vpop.eup %7117  ;;  %vm1317_vm14 = vweird.f32 %v7116_v46  ;;  %vm1474_vm6 = vweird.f32 %v7881_v19 }
 0x426   : > { %v996_v47 = vsub.f32 1.0, %v995_v43  ;;  %6594 = vmatmul.msk.f32.vlgmr.msrb.gmra.mxu3 %vm908_vm2, %v1404_v45  ;;  %v1470_v4 = vmul.f32 %v7118_v59, %v7881_v19  ;;  %vm1318_vm3 = vmor %vm1316_vm15, %vm1317_vm14  ;;  %vm1475_vm5 = vweird.f32 %v7118_v59 }
 0x427   : > { %v1313_v57 = vsub.f32 1.0, %v1312_v51  ;;  %vm1476_vm7 = vmor %vm1474_vm6, %vm1475_vm5  ;;  %vm1797_vm5 = vcmask 15360   ;;  %vm1846_vm6 = vcmask 523264  }
 0x428   : > { %v997_v53 = vmul.f32 %v7114_v40, %v996_v47  ;;  %v1471_v9 = vsub.f32 1.0, %v1470_v4 }
 0x429   : > { %v1314_v23 = vmul.f32 %v7116_v46, %v1313_v57  ;;  %v1657_v57 = vld [vmem:[%s11323_s8 + $0x30] sm:$0xff] }
 0x42a   : > { %v998_v55 = vadd.f32 %v7114_v40, %v997_v53  ;;  %v1472_v14 = vmul.f32 %v7118_v59, %v1471_v9 }
 0x42b   : > { %v1315_v8 = vadd.f32 %v7116_v46, %v1314_v23 }
 0x42c   : > { %v1002_v58 = vsel %vm1001_vm9, %v7114_v40, %v998_v55  ;;  %v1473_v18 = vadd.f32 %v7118_v59, %v1472_v14  ;;  %vm1540_vm9 = vcmask 97280  }
 0x42d   : > { %v1007_v61 = vsel %vm1004_vm10, %v1006_v56, %v1002_v58  ;;  %v1319_v13 = vsel %vm1318_vm3, %v7116_v46, %v1315_v8  ;;  %vm1542_vm10 = vcmask 130048  }
 0x42e   : > { %v1008_v2 = vmul.f32 %v7868_v52, %v1007_v61  ;;  %v1320_v52 = vand.u32 2147483647, %v7874_v63  ;;  %v1478_v63 = vand.u32 2147483647, %v7881_v19  ;;  %v1477_v21 = vsel %vm1476_vm7, %v7118_v59, %v1473_v18  ;;  %v7120_v61 = vpop.eup %7119 }
 0x42f   : > { %v1588_v3 = vmul.f32 32.0, %v7120_v61  ;;  %vm1592_vm14 = vweird.f32 %v7120_v61 }
 0x430   : > { %6579 = vmatmul.msk.f32.vlgmr.msrb.gmra.mxu1 %vm908_vm2, %v1008_v2  ;;  %vm1321_vm4 = vcmp.eq.f32.partialorder %v1320_v52, 8.507059e+37  ;;  %vm1479_vm8 = vcmp.eq.f32.partialorder %v1478_v63, 8.507059e+37 }
 0x431   : > { %1347 = vmatpush.msrb.mxu1 %v1327_v5  ;;  %v1324_v17 = vsel %vm1321_vm4, %v1323_v16, %v1319_v13  ;;  %v1482_v24 = vsel %vm1479_vm8, %v1481_v22, %v1477_v21  ;;  %v1589_v5 = vsub.f32 1.0, %v1588_v3 }
 0x432   : > { %v1325_v27 = vmul.f32 %v7840_v35, %v1324_v17  ;;  %v1483_v25 = vmul.f32 %v7852_v48, %v1482_v24  ;;  %v1629_v24 = vld [vmem:[%s11323_s8 + $0x18] sm:$0xff] }
 0x433   : > { %v1590_v7 = vmul.f32 %v7120_v61, %v1589_v5  ;;  %1647 = vmatpush.msra.mxu3 %v1629_v24 }
 0x435   : > { %v1591_v8 = vadd.f32 %v7120_v61, %v1590_v7 }
 0x437   : > { %v7980_v9 = vsel %vm1592_vm14, %v7120_v61, %v1591_v8 }
 0x438   : > { %6585 = vmatmul.msk.f32.vlgmr.msra.gmra.mxu1 %vm908_vm2, %v1167_v1  ;;  %11324 = vst [vmem:[#allocation12_spill] sm:$0xff] %v7980_v9 }
 0x439   : > { %1505 = vmatpush.msra.mxu1 %v1485_v15 }
 0x440   : > { %6591 = vmatmul.msk.f32.vlgmr.msrb.gmra.mxu1 %vm908_vm2, %v1325_v27 }
 0x448   : > { %6597 = vmatmul.msk.f32.vlgmr.msra.gmra.mxu1 %vm908_vm2, %v1483_v25  ;;  %v1628_v25 = vld [vmem:[%s11323_s8 + $0x10] sm:$0xff] }
 0x449   : > { %1648 = vmatpush.msra.mxu3 %v1628_v25 }
 0x462   : > { %v1112_v26 = vpop.f32.mrf.mxu3 }
 0x463   : > { %1515 = vrot.lane.b32.xlu2 %v1112_v26, %s11231_s4  ;;  %s11320_s4 = sld [smem:[#allocation37_spill]] }
 0x46a   : > { %v1270_v28 = vpop.f32.mrf.mxu3 }
 0x46b   : > { %1523 = vrot.lane.b32.xlu1 %v1270_v28, %s7512_s3  ;;  %s11319_s3 = sld [smem:[#allocation36_spill]]  ;;  %v1627_v28 = vld [vmem:[%s11323_s8 + $0x8] sm:$0xff] }
 0x46c   : > { %1649 = vmatpush.msra.mxu3 %v1627_v28 }
 0x471   : > { %v1553_v31 = vld [vmem:[%s11319_s3 + $0x18] sm:$0xff]  ;;  %v1552_v32 = vld [vmem:[%s11319_s3 + $0x10] sm:$0xff]  ;;  %v1551_v33 = vld [vmem:[%s11319_s3 + $0x8] sm:$0xff] }
 0x472   : > { %1573 = vmatpush.msra.mxu2 %v1553_v31  ;;  %v1550_v34 = vld [vmem:[%s11319_s3] sm:$0xff]  ;;  %s11326_s3 = smov 124  }
 0x474   : > { %1574 = vmatpush.msra.mxu2 %v1552_v32 }
 0x476   : > { %1575 = vmatpush.msra.mxu2 %v1551_v33 }
 0x478   : > { %1576 = vmatpush.msra.mxu2 %v1550_v34 }
 0x4a9   : > { %v1428_v29 = vpop.f32.mrf.mxu3 }
 0x4ad   : > { %v1033_v19 = vpop.f32.mrf.mxu1 }
 0x4ae   : > { %1511 = vrot.lane.b32.xlu1 %v1033_v19, %s11237_s6  ;;  %s7936_s6 = sshll.u32 %s7715_s1, 6  ;;  %s11329_s1 = smov 8  }
 0x4b5   : > { %v1191_v35 = vpop.f32.mrf.mxu1 }
 0x4b6   : > { %1519 = vrot.lane.b32.xlu0 %v1191_v35, %s11239_s26  ;;  %s11330_s26 = smov 4  }
 0x4bd   : > { %v1349_v30 = vpop.f32.mrf.mxu1  ;;  %v1516_v40 = vpop.permute.xlu2 %1515 }
 0x4be   : > { %1531 = vrot.lane.b32.xlu0 %v1428_v29, %s7515_s23  ;;  %1527 = vrot.lane.b32.xlu2 %v1349_v30, %s7516_s25  ;;  %s7942_s23 = scalar_lea.vmem %s11321_s7, %s7936_s6  ;;  %v1626_v29 = vld [vmem:[%s11323_s8] sm:$0xff]  ;;  %s11327_s7 = smov 120  }
 0x4bf   : > { %v7957_v58 = vld [vmem:[%s7942_s23] sm:$0xff]  ;;  %v7972_v23 = vld [vmem:[%s7942_s23 + $0x8] sm:$0xff]  ;;  %v7985_v15 = vld [vmem:[%s7942_s23 + $0x10] sm:$0xff]  ;;  %1650 = vmatpush.msra.mxu3 %v1626_v29  ;;  %s11328_s25 = smov 116  }
 0x4c0   : > { %v7994_v18 = vld [vmem:[%s7942_s23 + $0x18] sm:$0xff]  ;;  %v781_v27 = vld [vmem:[%s7942_s23 + $0x20] sm:$0xff]  ;;  %v782_v26 = vld [vmem:[%s7942_s23 + $0x28] sm:$0xff] }
 0x4c5   : > { %v1507_v48 = vpop.f32.mrf.mxu1 }
 0x4c6   : > { %1535 = vrot.lane.b32.xlu1 %v1507_v48, %s7517_s22  ;;  %s11253_s22 = smov 122  }
 0x4dd   : > { %v1524_v36 = vpop.permute.xlu1 %1523 }
 0x518   : > { %v1528_v46 = vpop.permute.xlu2 %1527 }
 0x520   : > { %v1512_v37 = vpop.permute.xlu1 %1511 }
 0x521   : > { %v1538_v39 = vsel %vm880_vm1, %v7825_v0, %v1512_v37  ;;  %v7068_v0 = vld [vmem:[%s11320_s4] ss:$0 sm:$0xff]  ;;  %s7948_s4 = scalar_lea.vmem %s11322_s24, %s7936_s6  ;;  %v1728_v37 = vld [vmem:[%s11323_s8 + $0x50] sm:$0xff]  ;;  %s11247_s24 = smov 2  }
 0x522   : > { %v1539_v42 = vsel %vm908_vm2, %v1538_v39, %v1516_v40  ;;  %v786_v59 = vld [vmem:[%s7948_s4] sm:$0xff]  ;;  %v787_v4 = vld [vmem:[%s7948_s4 + $0x8] sm:$0xff]  ;;  %v788_v16 = vld [vmem:[%s7948_s4 + $0x10] sm:$0xff] }
 0x523   : > { %v7967_v2 = vadd.f32 %v786_v59, %v7957_v58  ;;  %v7976_v6 = vadd.f32 %v787_v4, %v7972_v23  ;;  %v7989_v17 = vadd.f32 %v788_v16, %v7985_v15  ;;  %v789_v20 = vld [vmem:[%s7948_s4 + $0x18] sm:$0xff]  ;;  %v790_v21 = vld [vmem:[%s7948_s4 + $0x20] sm:$0xff]  ;;  %v791_v19 = vld [vmem:[%s7948_s4 + $0x28] sm:$0xff] }
 0x524   : > { %v7998_v63 = vadd.f32 %v789_v20, %v7994_v18  ;;  %v8004_v22 = vadd.f32 %v790_v21, %v781_v27  ;;  %v8019_v35 = vadd.f32 %v791_v19, %v782_v26  ;;  %v1727_v39 = vld [vmem:[%s11323_s8 + $0x48] sm:$0xff]  ;;  %v7072_v20 = vld [vmem:[%s11325_s9] ss:$0 sm:$0xff] }
 0x528   : > { %v1520_v38 = vpop.permute.xlu0 %1519 }
 0x529   : > { %v1541_v43 = vsel %vm1540_vm9, %v1539_v42, %v1520_v38  ;;  %v1726_v42 = vld [vmem:[%s11323_s8 + $0x40] sm:$0xff] }
 0x52a   : > { %v1543_v44 = vsel %vm1542_vm10, %v1541_v43, %v1524_v36  ;;  %v1729_v36 = vld [vmem:[%s11323_s8 + $0x58] sm:$0xff] }
 0x52b   : > { %v1545_v47 = vsel %vm1544_vm11, %v1543_v44, %v1528_v46  ;;  %1768 = vmatpush.msrb.mxu1 %v1729_v36  ;;  %v7069_v44 = vld [vmem:[%s11211_s16] ss:$0 sm:$0xff] }
 0x52d   : > { %1769 = vmatpush.msrb.mxu1 %v1728_v37 }
 0x52f   : > { %1770 = vmatpush.msrb.mxu1 %v1727_v39 }
 0x530   : > { %v1532_v45 = vpop.permute.xlu0 %1531 }
 0x531   : > { %v1547_v49 = vsel %vm1546_vm12, %v1545_v47, %v1532_v45  ;;  %1771 = vmatpush.msrb.mxu1 %v1726_v42  ;;  %v7070_v47 = vld [vmem:[%s11212_s17] ss:$0 sm:$0xff] }
 0x532   : > { %6608 = vmatmul.msk.f32.vlgmr.msrb.gmra.mxu1 %vm11280_vm0, %v7957_v58 }
 0x538   : > { %v1536_v50 = vpop.permute.xlu1 %1535 }
 0x539   : > { %v1549_v51 = vsel %vm1548_vm13, %v1547_v49, %v1536_v50 }
 0x53a   : > { %6598 = vmatmul.msk.f32.vlgmr.msra.gmra.mxu2 %vm11280_vm0, %v1549_v51  ;;  %6609 = vmatmul.msk.f32.gmra.mxu1 %vm11280_vm0, %v7972_v23 }
 0x542   : > { %6610 = vmatmul.msk.f32.gmra.mxu1 %vm11280_vm0, %v7985_v15 }
 0x54a   : > { %6611 = vmatmul.msk.f32.gmra.mxu1 %vm11280_vm0, %v7994_v18 }
 0x552   : > { %6612 = vmatmul.msk.f32.gmra.mxu1 %vm11280_vm0, %v781_v27 }
 0x55a   : > { %6613 = vmatmul.msk.f32.gmra.mxu1 %vm11280_vm0, %v782_v26  ;;  %v7073_v26 = vld [vmem:[%s11325_s9 + $0x2] ss:$0 sm:$0xff] }
 0x5af   : > { %v1773_v4 = vpop.f32.mrf.mxu1 }
 0x5b7   : > { %v1776_v7 = vpop.f32.mrf.mxu1 }
 0x5bd   : > { %v1578_v53 = vpop.f32.mrf.mxu2 }
 0x5be   : > { %v1579_v54 = vadd.f32 %v7068_v0, %v1578_v53  ;;  %v783_v0 = vld [vmem:[%s7942_s23 + $0x30] sm:$0xff] }
 0x5bf   : > { %v792_v53 = vld [vmem:[%s7948_s4 + $0x30] sm:$0xff]  ;;  %6614 = vmatmul.msk.f32.gmra.mxu1 %vm11280_vm0, %v783_v0 }
 0x5c0   : > { %v1581_v55 = vadd.f32 %v1579_v54, %v7741_v11  ;;  %v1658_v11 = vld [vmem:[%s11323_s8 + $0x38] sm:$0xff]  ;;  %v8056_v54 = vadd.f32 %v792_v53, %v783_v0  ;;  %s743_s8 = sand.u32 1, %s7494_s30  }
 0x5c1   : > { %1697 = vmatpush.msra.mxu0 %v1658_v11  ;;  %6859 = vmatpush.msrb.mxu3 %v1658_v11 }
 0x5c2   : > { %v1584_v56 = vsel %vm11280_vm0, %v1581_v55, 0.0 }
 0x5c3   : > { %1585 = vadd.xlane.f32.xlu2 %v1584_v56  ;;  %1698 = vmatpush.msra.mxu0 %v1657_v57  ;;  %v793_v56 = vld [vmem:[%s7948_s4 + $0x38] sm:$0xff]  ;;  %s11251_s4 = smov 118  }
 0x5c4   : > { %6860 = vmatpush.msrb.mxu3 %v1657_v57 }
 0x5c5   : > { %1699 = vmatpush.msra.mxu0 %v1656_v60 }
 0x5c6   : > { %6861 = vmatpush.msrb.mxu3 %v1656_v60  ;;  %v7071_v60 = vld [vmem:[%s11325_s9 + $0x1] ss:$0 sm:$0xff] }
 0x5c7   : > { %1700 = vmatpush.msra.mxu0 %v1655_v62 }
 0x5c8   : > { %6600 = vmatmul.msk.f32.vlgmr.msra.gmra.mxu0 %vm11280_vm0, %v7967_v2  ;;  %6862 = vmatpush.msrb.mxu3 %v1655_v62 }
 0x5d0   : > { %6601 = vmatmul.msk.f32.gmra.mxu0 %vm11280_vm0, %v7976_v6 }
 0x5d8   : > { %6602 = vmatmul.msk.f32.gmra.mxu0 %vm11280_vm0, %v7989_v17 }
 0x5e0   : > { %6603 = vmatmul.msk.f32.gmra.mxu0 %vm11280_vm0, %v7998_v63 }
 0x5e8   : > { %6604 = vmatmul.msk.f32.gmra.mxu0 %vm11280_vm0, %v8004_v22 }
 0x5f0   : > { %6605 = vmatmul.msk.f32.gmra.mxu0 %vm11280_vm0, %v8019_v35 }
 0x636   : > { %v1586_v10 = vpop.xlane.xlu2 %1585 }
 0x637   : > { %v1594_v52 = vmul.f32 %v7980_v9, %v1586_v10 }
 0x639   : > { %v1595_v1 = vsub.f32 %v1581_v55, %v1594_v52  ;;  %v784_v55 = vld [vmem:[%s7942_s23 + $0x38] sm:$0xff]  ;;  %v1779_v52 = vpop.f32.mrf.mxu1 }
 0x63a   : > { %v8064_v41 = vadd.f32 %v793_v56, %v784_v55  ;;  %6615 = vmatmul.msk.f32.gmra.mxu1 %vm11280_vm0, %v784_v55 }
 0x63b   : > { %v1596_v13 = vmul.f32 %v1595_v1, %v1595_v1 }
 0x63d   : > { %v1597_v14 = vsel %vm11280_vm0, %v1596_v13, 0.0 }
 0x63e   : > { %1598 = vadd.xlane.f32.xlu0 %v1597_v14 }
 0x641   : > { %v1782_v14 = vpop.f32.mrf.mxu1 }
 0x649   : > { %v1785_v18 = vpop.f32.mrf.mxu1 }
 0x651   : > { %v1788_v21 = vpop.f32.mrf.mxu1 }
 0x659   : > { %v1791_v25 = vpop.f32.mrf.mxu1 }
 0x65a   : > { %v8137_v19 = vadd.f32 %v7073_v26, %v1791_v25 }
 0x6b1   : > { %v1599_v30 = vpop.xlane.xlu0 %1598 }
 0x6b2   : > { %v1600_v48 = vmul.f32 %v1599_v30, %v7980_v9  ;;  %v1789_v30 = vadd.f32 %v7073_v26, %v1788_v21 }
 0x6b4   : > { %v1601_v31 = vadd.f32 1e-05, %v1600_v48  ;;  %v1786_v48 = vadd.f32 %v7073_v26, %v1785_v18 }
 0x6b6   : > { %7121 = vrsqrt.f32 %v1601_v31  ;;  %vm1608_vm3 = vweird.f32 %v1601_v31  ;;  %v8149_v39 = vpack.i.bf16 %v1786_v48, %v1789_v30 }
 0x6b7   : > { %v1794_v28 = vpop.f32.mrf.mxu1 }
 0x6b8   : > { %v8139_v29 = vadd.f32 %v7073_v26, %v1794_v28 }
 0x6bc   : > { %v7122_v32 = vpop.eup %7121 }
 0x6bd   : > { %v1603_v33 = vmul.f32 %v7122_v32, %v1601_v31  ;;  %vm1609_vm15 = vweird.f32 %v7122_v32  ;;  %v1783_v31 = vadd.f32 %v7073_v26, %v1782_v14 }
 0x6be   : > { %vm1610_vm4 = vmor %vm1608_vm3, %vm1609_vm15 }
 0x6bf   : > { %v1604_v34 = vmul.f32 %v7122_v32, %v1603_v33  ;;  %v1777_v33 = vadd.f32 %v7073_v26, %v1776_v7 }
 0x6c1   : > { %v1605_v38 = vmul.f32 0.5, %v1604_v34  ;;  %v1774_v34 = vadd.f32 %v7073_v26, %v1773_v4 }
 0x6c3   : > { %v1606_v40 = vsub.f32 1.5, %v1605_v38  ;;  %v8145_v36 = vpack.i.bf16 %v1774_v34, %v1777_v33 }
 0x6c5   : > { %v1607_v43 = vmul.f32 %v7122_v32, %v1606_v40 }
 0x6c7   : > { %v1611_v45 = vsel %vm1610_vm4, %v7122_v32, %v1607_v43  ;;  %v1780_v32 = vadd.f32 %v7073_v26, %v1779_v52 }
 0x6c8   : > { %v1612_v46 = vmul.f32 %v1611_v45, %v1595_v1 }
 0x6c9   : > { %v8147_v37 = vpack.i.bf16 %v1780_v32, %v1783_v31 }
 0x6ca   : > { %v1614_v49 = vmul.f32 %v7069_v44, %v1612_v46 }
 0x6cc   : > { %v8047_v50 = vadd.f32 %v7070_v47, %v1614_v49 }
 0x6ce   : > { %v1617_v51 = vadd.f32 %v8047_v50, %v7744_v12  ;;  %v1702_v12 = vpop.f32.mrf.mxu0 }
 0x6cf   : > { %v8124_v24 = vadd.f32 %v7071_v60, %v1702_v12 }
 0x6d0   : > { %6599 = vmatmul.msk.f32.vlgmr.msra.gmra.mxu3 %vm11280_vm0, %v1617_v51 }
 0x6d1   : > { %1882 = vmatpush.msra.mxu3 %v8139_v29 }
 0x6d3   : > { %1883 = vmatpush.msra.mxu3 %v8137_v19 }
 0x6d5   : > { %1884 = vmatpush.msra.mxu3 %v1789_v30 }
 0x6d6   : > { %v1705_v11 = vpop.f32.mrf.mxu0 }
 0x6d7   : > { %v8105_v15 = vadd.f32 %v7071_v60, %v1705_v11  ;;  %1885 = vmatpush.msra.mxu3 %v1786_v48 }
 0x6d8   : > { %6606 = vmatmul.msk.f32.vlgmr.msrb.gmra.mxu3 %vm11280_vm0, %v8056_v54 }
 0x6d9   : > { %1886 = vmatpush.msra.mxu3 %v1783_v31 }
 0x6db   : > { %1887 = vmatpush.msra.mxu3 %v1780_v32 }
 0x6dd   : > { %1888 = vmatpush.msra.mxu3 %v1777_v33 }
 0x6de   : > { %v1708_v57 = vpop.f32.mrf.mxu0 }
 0x6df   : > { %v8081_v3 = vadd.f32 %v7071_v60, %v1708_v57  ;;  %1889 = vmatpush.msra.mxu3 %v1774_v34 }
 0x6e0   : > { %6607 = vmatmul.msk.f32.gmra.mxu3 %vm11280_vm0, %v8064_v41 }
 0x6e6   : > { %v1711_v58 = vpop.f32.mrf.mxu0 }
 0x6e7   : > { %v8107_v16 = vadd.f32 %v7071_v60, %v1711_v58 }
 0x6ee   : > { %v1714_v59 = vpop.f32.mrf.mxu0 }
 0x6ef   : > { %v8097_v13 = vadd.f32 %v7071_v60, %v1714_v59 }
 0x6f6   : > { %v1717_v61 = vpop.f32.mrf.mxu0 }
 0x6f7   : > { %v8077_v62 = vadd.f32 %v7071_v60, %v1717_v61 }
 0x6f9   : > { %1906 = vrot.lane.b32.xlu0 %v8077_v62, %s11255_s2 }
 0x701   : > { %1900 = vrot.lane.b32.xlu0 %v8081_v3, %s11255_s2 }
 0x753   : > { %v1652_v23 = vpop.f32.mrf.mxu3 }
 0x754   : > { %v8118_v27 = vadd.f32 %v7072_v20, %v1652_v23 }
 0x75b   : > { %v1720_v5 = vpop.f32.mrf.mxu3 }
 0x75c   : > { %v8093_v1 = vadd.f32 %v7071_v60, %v1720_v5 }
 0x763   : > { %v1723_v8 = vpop.f32.mrf.mxu3 }
 0x764   : > { %v8085_v10 = vadd.f32 %v7071_v60, %v1723_v8 }
 0x766   : > { %2046 = vrot.lane.b32.xlu0 %v8085_v10, %s11326_s3  ;;  %1910 = vrot.lane.b32.xlu2 %v8085_v10, %s11255_s2 }
 0x767   : > { %6616 = vmatpush.xpose.msk.msra.mxu1 %vm1797_vm5, %v8085_v10 }
 0x76b   : > { %6617 = vmatpush.xpose.msk.msra.mxu1 %vm1797_vm5, %v8093_v1  ;;  %v1907_v40 = vpop.permute.xlu0 %1906 }
 0x76e   : > { %1904 = vrot.lane.b32.xlu2 %v8097_v13, %s11255_s2 }
 0x76f   : > { %6618 = vmatpush.xpose.msk.msra.mxu1 %vm1797_vm5, %v8077_v62 }
 0x773   : > { %6619 = vmatpush.xpose.msk.msra.mxu1 %vm1797_vm5, %v8097_v13  ;;  %v1901_v43 = vpop.permute.xlu0 %1900 }
 0x776   : > { %1898 = vrot.lane.b32.xlu2 %v8105_v15, %s11255_s2 }
 0x777   : > { %6620 = vmatpush.xpose.msk.msra.mxu1 %vm1797_vm5, %v8107_v16 }
 0x77b   : > { %6621 = vmatpush.xpose.msk.msra.mxu1 %vm1797_vm5, %v8081_v3 }
 0x77e   : > { %1894 = vrot.lane.b32.xlu2 %v8118_v27, %s11255_s2 }
 0x77f   : > { %6622 = vmatpush.xpose.msk.msra.mxu1 %vm1797_vm5, %v8105_v15 }
 0x783   : > { %6623 = vmatpush.xpose.msk.msra.mxu1 %vm1797_vm5, %v8124_v24 }
 0x786   : > { %6624 = vmatmul.msk.f32.vlgmr.msra.gmra.mxu1 %vm1797_vm5, %v8118_v27  ;;  %2040 = vrot.lane.b32.xlu2 %v8097_v13, %s11326_s3 }
 0x78e   : > { %2034 = vrot.lane.b32.xlu2 %v8105_v15, %s11326_s3 }
 0x796   : > { %2174 = vrot.lane.b32.xlu2 %v8085_v10, %s11253_s22 }
 0x79e   : > { %6931 = vrot.lane.b32.xlu2 %v8149_v39, %s11255_s2 }
 0x7c0   : > { %v1911_v38 = vpop.permute.xlu2 %1910 }
 0x7c1   : > { %6626 = vmatpush.xpose.msk.msrb.mxu3 %vm1797_vm5, %v1911_v38 }
 0x7c8   : > { %v1905_v42 = vpop.permute.xlu2 %1904 }
 0x7d0   : > { %v1899_v44 = vpop.permute.xlu2 %1898 }
 0x7d8   : > { %v8154_v45 = vpop.permute.xlu2 %1894  ;;  %v2047_v46 = vpop.permute.xlu0 %2046 }
 0x7d9   : > { %6636 = vmatpush.xpose.msk.msrb.mxu0 %vm1797_vm5, %v2047_v46 }
 0x7e0   : > { %v2041_v47 = vpop.permute.xlu2 %2040 }
 0x7e8   : > { %v8157_v49 = vpop.permute.xlu2 %2034 }
 0x7f0   : > { %v2175_v51 = vpop.permute.xlu2 %2174 }
 0x7f1   : > { %6646 = vmatpush.xpose.msk.msrb.mxu1 %vm1797_vm5, %v2175_v51 }
 0x803   : > { %v1842_v0 = vpop.f32.mrf.mxu1 }
 0x804   : > { %v1845_v53 = vmul.f32 0.70710677, %v1842_v0 }
 0x806   : > { %v1847_v55 = vsel %vm1846_vm6, %v1845_v53, -inf }
 0x807   : > { %1848 = vmax.xlane.f32.xlu1 %v1847_v55 }
 0x820   : > { %1908 = vrot.lane.b32.xlu1 %v8093_v1, %s11255_s2 }
 0x828   : > { %1902 = vrot.lane.b32.xlu1 %v8107_v16, %s11255_s2 }
 0x830   : > { %1896 = vrot.lane.b32.xlu1 %v8124_v24, %s11255_s2 }
 0x838   : > { %2044 = vrot.lane.b32.xlu1 %v8093_v1, %s11326_s3 }
 0x840   : > { %2038 = vrot.lane.b32.xlu1 %v8107_v16, %s11326_s3 }
 0x848   : > { %2032 = vrot.lane.b32.xlu1 %v8124_v24, %s11326_s3 }
 0x87a   : > { %v1849_v56 = vpop.xlane.xlu1 %1848 }
 0x87b   : > { %v1850_v12 = vsub.f32 %v1845_v53, %v1849_v56 }
 0x87d   : > { %v1851_v11 = vmul.f32 1.442695, %v1850_v12 }
 0x87f   : > { %7123 = vpow2.f32 %v1851_v11 }
 0x885   : > { %v7124_v57 = vpop.eup %7123 }
 0x886   : > { %v1853_v58 = vsel %vm1846_vm6, %v7124_v57, 0.0 }
 0x887   : > { %1854 = vadd.xlane.f32.xlu0 %v1853_v58 }
 0x892   : > { %v1909_v59 = vpop.permute.xlu1 %1908 }
 0x893   : > { %6627 = vmatpush.xpose.msk.msrb.mxu3 %vm1797_vm5, %v1909_v59 }
 0x897   : > { %6628 = vmatpush.xpose.msk.msrb.mxu3 %vm1797_vm5, %v1907_v40 }
 0x89a   : > { %v1903_v60 = vpop.permute.xlu1 %1902 }
 0x89b   : > { %2042 = vrot.lane.b32.xlu0 %v8077_v62, %s11326_s3  ;;  %6629 = vmatpush.xpose.msk.msrb.mxu3 %vm1797_vm5, %v1905_v42 }
 0x89f   : > { %6630 = vmatpush.xpose.msk.msrb.mxu3 %vm1797_vm5, %v1903_v60 }
 0x8a2   : > { %v1897_v61 = vpop.permute.xlu1 %1896 }
 0x8a3   : > { %2036 = vrot.lane.b32.xlu0 %v8081_v3, %s11326_s3  ;;  %6631 = vmatpush.xpose.msk.msrb.mxu3 %vm1797_vm5, %v1901_v43 }
 0x8a7   : > { %6632 = vmatpush.xpose.msk.msrb.mxu3 %vm1797_vm5, %v1899_v44 }
 0x8aa   : > { %v2045_v23 = vpop.permute.xlu1 %2044 }
 0x8ab   : > { %2030 = vrot.lane.b32.xlu0 %v8118_v27, %s11326_s3  ;;  %6633 = vmatpush.xpose.msk.msrb.mxu3 %vm1797_vm5, %v1897_v61 }
 0x8ac   : > { %6637 = vmatpush.xpose.msk.msrb.mxu0 %vm1797_vm5, %v2045_v23 }
 0x8b2   : > { %v2039_v48 = vpop.permute.xlu1 %2038 }
 0x8b3   : > { %2172 = vrot.lane.b32.xlu0 %v8093_v1, %s11253_s22 }
 0x8ba   : > { %v2033_v33 = vpop.permute.xlu1 %2032 }
 0x8bb   : > { %2170 = vrot.lane.b32.xlu0 %v8077_v62, %s11253_s22 }
 0x8c3   : > { %6941 = vrot.lane.b32.xlu0 %v8145_v36, %s11255_s2 }
 0x8fa   : > { %v1855_v4 = vpop.xlane.xlu0 %1854 }
 0x8fb   : > { %7125 = vrcp.f32 %v1855_v4  ;;  %v1867_v52 = vand.u32 2147483648, %v1855_v4  ;;  %v1865_v18 = vand.u32 2147483647, %v1855_v4  ;;  %vm1861_vm8 = vweird.f32 %v1855_v4 }
 0x8fd   : > { %v1868_v21 = vor.u32 1.1754944e-38, %v1867_v52  ;;  %vm1866_vm12 = vcmp.eq.f32.partialorder %v1865_v18, 8.507059e+37 }
 0x901   : > { %v7126_v5 = vpop.eup %7125 }
 0x902   : > { %v1857_v7 = vmul.f32 %v7126_v5, %v1855_v4  ;;  %vm1862_vm7 = vweird.f32 %v7126_v5 }
 0x903   : > { %vm1863_vm11 = vmor %vm1861_vm8, %vm1862_vm7 }
 0x904   : > { %v1858_v8 = vsub.f32 1.0, %v1857_v7 }
 0x906   : > { %v1859_v14 = vmul.f32 %v7126_v5, %v1858_v8 }
 0x908   : > { %v1860_v20 = vadd.f32 %v7126_v5, %v1859_v14 }
 0x90a   : > { %v1864_v25 = vsel %vm1863_vm11, %v7126_v5, %v1860_v20 }
 0x90b   : > { %v1869_v26 = vsel %vm1866_vm12, %v1868_v21, %v1864_v25 }
 0x90c   : > { %v1870_v28 = vmul.f32 %v7124_v57, %v1869_v26 }
 0x90d   : > { %v2043_v30 = vpop.permute.xlu0 %2042 }
 0x90e   : > { %6625 = vmatmul.msk.f32.vlgmr.msra.gmra.mxu3 %vm1846_vm6, %v1870_v28  ;;  %6638 = vmatpush.xpose.msk.msrb.mxu0 %vm1797_vm5, %v2043_v30 }
 0x912   : > { %6639 = vmatpush.xpose.msk.msrb.mxu0 %vm1797_vm5, %v2041_v47 }
 0x915   : > { %v2037_v31 = vpop.permute.xlu0 %2036 }
 0x916   : > { %6634 = vmatmul.msk.f32.vlgmr.msrb.gmra.mxu3 %vm1797_vm5, %v8154_v45  ;;  %6640 = vmatpush.xpose.msk.msrb.mxu0 %vm1797_vm5, %v2039_v48 }
 0x91a   : > { %6641 = vmatpush.xpose.msk.msrb.mxu0 %vm1797_vm5, %v2037_v31 }
 0x91d   : > { %v2031_v32 = vpop.permute.xlu0 %2030 }
 0x91e   : > { %6642 = vmatpush.xpose.msk.msrb.mxu0 %vm1797_vm5, %v8157_v49  ;;  %v8217_v49 = vpack.i.bf16 %v8137_v19, %v8139_v29  ;;  %v6932_v19 = vpop.permute.xlu2 %6931 }
 0x91f   : > { %v6933_v7 = vunpack.i.l.bf16 %v6932_v19  ;;  %v6934_v8 = vunpack.i.h.bf16 %v6932_v19 }
 0x922   : > { %6643 = vmatpush.xpose.msk.msrb.mxu0 %vm1797_vm5, %v2033_v33 }
 0x925   : > { %6644 = vmatmul.msk.f32.vlgmr.msrb.gmra.mxu0 %vm1797_vm5, %v2031_v32  ;;  %v2173_v34 = vpop.permute.xlu0 %2172 }
 0x926   : > { %6647 = vmatpush.xpose.msk.msrb.mxu1 %vm1797_vm5, %v2173_v34 }
 0x92d   : > { %v2171_v38 = vpop.permute.xlu0 %2170 }
 0x92e   : > { %6648 = vmatpush.xpose.msk.msrb.mxu1 %vm1797_vm5, %v2171_v38 }
 0x935   : > { %v6942_v18 = vpop.permute.xlu0 %6941 }
 0x936   : > { %v6943_v21 = vunpack.i.l.bf16 %v6942_v18  ;;  %v6944_v26 = vunpack.i.h.bf16 %v6942_v18 }
 0x991   : > { %v8207_v40 = vpop.f32.mrf.mxu3 }
 0x999   : > { %v1947_v42 = vpop.f32.mrf.mxu3 }
 0x99a   : > { %v1950_v43 = vmul.f32 0.70710677, %v1947_v42 }
 0x99c   : > { %v1951_v44 = vsel %vm1846_vm6, %v1950_v43, -inf }
 0x99d   : > { %1952 = vmax.xlane.f32.xlu2 %v1951_v44 }
 0x9a2   : > { %v2083_v45 = vpop.f32.mrf.mxu0 }
 0x9a3   : > { %v2086_v46 = vmul.f32 0.70710677, %v2083_v45 }
 0x9a5   : > { %v2087_v47 = vsel %vm1846_vm6, %v2086_v46, -inf }
 0x9a6   : > { %2088 = vmax.xlane.f32.xlu1 %v2087_v47 }
 0x9b5   : > { %2168 = vrot.lane.b32.xlu2 %v8097_v13, %s11253_s22 }
 0x9bd   : > { %2302 = vrot.lane.b32.xlu2 %v8085_v10, %s11327_s7 }
 0x9bf   : > { %6926 = vrot.lane.b32.xlu1 %v8217_v49, %s11255_s2 }
 0x9c5   : > { %2300 = vrot.lane.b32.xlu2 %v8093_v1, %s11327_s7 }
 0x9c7   : > { %6936 = vrot.lane.b32.xlu1 %v8147_v37, %s11255_s2 }
 0x9cd   : > { %6946 = vrot.lane.b32.xlu2 %v8217_v49, %s11326_s3 }
 0x9cf   : > { %2166 = vrot.lane.b32.xlu1 %v8107_v16, %s11253_s22 }
 0x9d5   : > { %2160 = vrot.lane.b32.xlu2 %v8124_v24, %s11253_s22 }
 0x9d7   : > { %2164 = vrot.lane.b32.xlu1 %v8081_v3, %s11253_s22 }
 0x9dd   : > { %2296 = vrot.lane.b32.xlu2 %v8097_v13, %s11327_s7 }
 0x9df   : > { %2162 = vrot.lane.b32.xlu1 %v8105_v15, %s11253_s22 }
 0x9e5   : > { %6956 = vrot.lane.b32.xlu2 %v8147_v37, %s11326_s3 }
 0x9e7   : > { %2298 = vrot.lane.b32.xlu1 %v8077_v62, %s11327_s7 }
 0x9ed   : > { %2292 = vrot.lane.b32.xlu2 %v8081_v3, %s11327_s7 }
 0x9ef   : > { %6951 = vrot.lane.b32.xlu1 %v8149_v39, %s11326_s3 }
 0x9f5   : > { %2288 = vrot.lane.b32.xlu2 %v8124_v24, %s11327_s7 }
 0x9f7   : > { %2158 = vrot.lane.b32.xlu1 %v8118_v27, %s11253_s22 }
 0x9ff   : > { %6961 = vrot.lane.b32.xlu1 %v8145_v36, %s11326_s3 }
 0xa07   : > { %2290 = vrot.lane.b32.xlu1 %v8105_v15, %s11327_s7 }
 0xa0f   : > { %2286 = vrot.lane.b32.xlu1 %v8118_v27, %s11327_s7 }
 0xa10   : > { %v1953_v29 = vpop.xlane.xlu2 %1952 }
 0xa11   : > { %v1954_v55 = vsub.f32 %v1950_v43, %v1953_v29 }
 0xa13   : > { %v1955_v12 = vmul.f32 1.442695, %v1954_v55 }
 0xa18   : > { %v2169_v51 = vpop.permute.xlu2 %2168 }
 0xa19   : > { %v2089_v0 = vpop.xlane.xlu1 %2088  ;;  %6649 = vmatpush.xpose.msk.msrb.mxu1 %vm1797_vm5, %v2169_v51 }
 0xa1a   : > { %v2090_v53 = vsub.f32 %v2086_v46, %v2089_v0 }
 0xa1c   : > { %v2091_v56 = vmul.f32 1.442695, %v2090_v53 }
 0xa1e   : > { %7127 = vpow2.f32 %v2091_v56 }
 0xa1f   : > { %7129 = vpow2.f32 %v1955_v12 }
 0xa20   : > { %v8262_v59 = vpop.permute.xlu2 %2302 }
 0xa24   : > { %v8256_v11 = vpop.eup %7127 }
 0xa25   : > { %v2093_v57 = vsel %vm1846_vm6, %v8256_v11, 0.0  ;;  %v8260_v58 = vpop.eup %7129 }
 0xa26   : > { %2094 = vadd.xlane.f32.xlu0 %v2093_v57  ;;  %v1957_v60 = vsel %vm1846_vm6, %v8260_v58, 0.0 }
 0xa28   : > { %v8266_v4 = vpop.permute.xlu2 %2300 }
 0xa2e   : > { %1958 = vadd.xlane.f32.xlu0 %v1957_v60 }
 0xa30   : > { %v6947_v25 = vpop.permute.xlu2 %6946 }
 0xa31   : > { %v6927_v61 = vpop.permute.xlu1 %6926  ;;  %v6948_v28 = vunpack.i.l.bf16 %v6947_v25  ;;  %v6949_v48 = vunpack.i.h.bf16 %v6947_v25 }
 0xa32   : > { %v6928_v23 = vunpack.i.l.bf16 %v6927_v61  ;;  %v6929_v5 = vunpack.i.h.bf16 %v6927_v61 }
 0xa34   : > { %2018 = vmatpush.msrb.mxu2 %v6928_v23 }
 0xa36   : > { %2019 = vmatpush.msrb.mxu2 %v6929_v5 }
 0xa38   : > { %2020 = vmatpush.msrb.mxu2 %v6933_v7  ;;  %v2161_v32 = vpop.permute.xlu2 %2160 }
 0xa39   : > { %v6937_v52 = vpop.permute.xlu1 %6936 }
 0xa3a   : > { %v6938_v14 = vunpack.i.l.bf16 %v6937_v52  ;;  %2021 = vmatpush.msrb.mxu2 %v6934_v8  ;;  %v6939_v20 = vunpack.i.h.bf16 %v6937_v52 }
 0xa3c   : > { %2022 = vmatpush.msrb.mxu2 %v6938_v14 }
 0xa3e   : > { %2023 = vmatpush.msrb.mxu2 %v6939_v20 }
 0xa40   : > { %2024 = vmatpush.msrb.mxu2 %v6943_v21  ;;  %v8278_v34 = vpop.permute.xlu2 %2296 }
 0xa41   : > { %v2167_v30 = vpop.permute.xlu1 %2166 }
 0xa42   : > { %2294 = vrot.lane.b32.xlu0 %v8107_v16, %s11327_s7  ;;  %2025 = vmatpush.msrb.mxu2 %v6944_v26 }
 0xa43   : > { %6650 = vmatpush.xpose.msk.msrb.mxu1 %vm1797_vm5, %v2167_v30 }
 0xa44   : > { %2146 = vmatpush.msra.mxu2 %v6948_v28 }
 0xa46   : > { %2147 = vmatpush.msra.mxu2 %v6949_v48 }
 0xa48   : > { %v6957_v44 = vpop.permute.xlu2 %6956 }
 0xa49   : > { %v2165_v31 = vpop.permute.xlu1 %2164  ;;  %v6958_v46 = vunpack.i.l.bf16 %v6957_v44  ;;  %v6959_v47 = vunpack.i.h.bf16 %v6957_v44 }
 0xa4a   : > { %6971 = vrot.lane.b32.xlu0 %v8149_v39, %s11253_s22  ;;  %6651 = vmatpush.xpose.msk.msrb.mxu1 %vm1797_vm5, %v2165_v31 }
 0xa51   : > { %v2163_v33 = vpop.permute.xlu1 %2162 }
 0xa52   : > { %6981 = vrot.lane.b32.xlu0 %v8145_v36, %s11253_s22  ;;  %6652 = vmatpush.xpose.msk.msrb.mxu1 %vm1797_vm5, %v2163_v33 }
 0xa56   : > { %6653 = vmatpush.xpose.msk.msrb.mxu1 %vm1797_vm5, %v2161_v32 }
 0xa59   : > { %v2299_v38 = vpop.permute.xlu1 %2298 }
 0xa5a   : > { %2558 = vrot.lane.b32.xlu0 %v8085_v10, %s11328_s25 }
 0xa61   : > { %v6952_v42 = vpop.permute.xlu1 %6951 }
 0xa62   : > { %v6953_v43 = vunpack.i.l.bf16 %v6952_v42  ;;  %2422 = vrot.lane.b32.xlu0 %v8107_v16, %s11251_s4  ;;  %v6954_v45 = vunpack.i.h.bf16 %v6952_v42  ;;  %v2293_v42 = vpop.permute.xlu2 %2292 }
 0xa64   : > { %2148 = vmatpush.msra.mxu2 %v6953_v43 }
 0xa66   : > { %2149 = vmatpush.msra.mxu2 %v6954_v45 }
 0xa68   : > { %2150 = vmatpush.msra.mxu2 %v6958_v46 }
 0xa69   : > { %v2159_v19 = vpop.permute.xlu1 %2158 }
 0xa6a   : > { %2676 = vrot.lane.b32.xlu0 %v8081_v3, %s11249_s0  ;;  %2151 = vmatpush.msra.mxu2 %v6959_v47 }
 0xa6b   : > { %6654 = vmatmul.msk.f32.vlgmr.msrb.gmra.mxu1 %vm1797_vm5, %v2159_v19 }
 0xa71   : > { %v6962_v29 = vpop.permute.xlu1 %6961 }
 0xa72   : > { %v6963_v51 = vunpack.i.l.bf16 %v6962_v29  ;;  %2674 = vrot.lane.b32.xlu0 %v8105_v15, %s11249_s0  ;;  %v6964_v0 = vunpack.i.h.bf16 %v6962_v29 }
 0xa74   : > { %2152 = vmatpush.msra.mxu2 %v6963_v51 }
 0xa76   : > { %2153 = vmatpush.msra.mxu2 %v6964_v0 }
 0xa79   : > { %v2291_v43 = vpop.permute.xlu1 %2290 }
 0xa99   : > { %v2095_v53 = vpop.xlane.xlu0 %2094 }
 0xa9a   : > { %7131 = vrcp.f32 %v2095_v53  ;;  %v2107_v25 = vand.u32 2147483648, %v2095_v53  ;;  %vm2101_vm7 = vweird.f32 %v2095_v53  ;;  %v2105_v28 = vand.u32 2147483647, %v2095_v53 }
 0xa9c   : > { %v2108_v31 = vor.u32 1.1754944e-38, %v2107_v25  ;;  %vm2106_vm11 = vcmp.eq.f32.partialorder %v2105_v28, 8.507059e+37 }
 0xaa0   : > { %v7132_v56 = vpop.eup %7131 }
 0xaa1   : > { %v1959_v55 = vpop.xlane.xlu0 %1958  ;;  %v2097_v12 = vmul.f32 %v7132_v56, %v2095_v53  ;;  %vm2102_vm3 = vweird.f32 %v7132_v56 }
 0xaa2   : > { %7133 = vrcp.f32 %v1959_v55  ;;  %v1971_v5 = vand.u32 2147483648, %v1959_v55  ;;  %v1969_v52 = vand.u32 2147483647, %v1959_v55  ;;  %vm1965_vm14 = vweird.f32 %v1959_v55  ;;  %vm2103_vm8 = vmor %vm2101_vm7, %vm2102_vm3 }
 0xaa3   : > { %v2098_v60 = vsub.f32 1.0, %v2097_v12 }
 0xaa4   : > { %v1972_v18 = vor.u32 1.1754944e-38, %v1971_v5  ;;  %vm1970_vm4 = vcmp.eq.f32.partialorder %v1969_v52, 8.507059e+37 }
 0xaa5   : > { %v2099_v7 = vmul.f32 %v7132_v56, %v2098_v60 }
 0xaa7   : > { %v2100_v20 = vadd.f32 %v7132_v56, %v2099_v7 }
 0xaa8   : > { %v7134_v57 = vpop.eup %7133 }
 0xaa9   : > { %v1961_v61 = vmul.f32 %v7134_v57, %v1959_v55  ;;  %vm1966_vm13 = vweird.f32 %v7134_v57  ;;  %v2104_v48 = vsel %vm2103_vm8, %v7132_v56, %v2100_v20 }
 0xaaa   : > { %vm1967_vm15 = vmor %vm1965_vm14, %vm1966_vm13  ;;  %v2109_v32 = vsel %vm2106_vm11, %v2108_v31, %v2104_v48 }
 0xaab   : > { %v1962_v23 = vsub.f32 1.0, %v1961_v61  ;;  %v2110_v33 = vmul.f32 %v8256_v11, %v2109_v32  ;;  %v2287_v11 = vpop.permute.xlu1 %2286 }
 0xaad   : > { %v1963_v8 = vmul.f32 %v7134_v57, %v1962_v23 }
 0xaaf   : > { %v1964_v14 = vadd.f32 %v7134_v57, %v1963_v8 }
 0xab1   : > { %v1968_v21 = vsel %vm1967_vm15, %v7134_v57, %v1964_v14 }
 0xab2   : > { %v1973_v26 = vsel %vm1970_vm4, %v1972_v18, %v1968_v21 }
 0xab3   : > { %v1974_v30 = vmul.f32 %v8260_v58, %v1973_v26 }
 0xab4   : > { %v2295_v58 = vpop.permute.xlu0 %2294 }
 0xab5   : > { %6635 = vmatmul.msk.f32.vlgmr.msrb.gmra.mxu2 %vm1846_vm6, %v1974_v30 }
 0xab6   : > { %6656 = vmatpush.xpose.msk.msrb.mxu2 %vm1797_vm5, %v8262_v59  ;;  %v2289_v59 = vpop.permute.xlu2 %2288 }
 0xaba   : > { %6657 = vmatpush.xpose.msk.msrb.mxu2 %vm1797_vm5, %v8266_v4 }
 0xabd   : > { %6645 = vmatmul.msk.f32.vlgmr.msra.gmra.mxu2 %vm1846_vm6, %v2110_v33 }
 0xabe   : > { %6658 = vmatpush.xpose.msk.msrb.mxu2 %vm1797_vm5, %v2299_v38 }
 0xac2   : > { %6659 = vmatpush.xpose.msk.msrb.mxu2 %vm1797_vm5, %v8278_v34 }
 0xac6   : > { %6660 = vmatpush.xpose.msk.msrb.mxu2 %vm1797_vm5, %v2295_v58 }
 0xaca   : > { %6661 = vmatpush.xpose.msk.msrb.mxu2 %vm1797_vm5, %v2293_v42 }
 0xace   : > { %6662 = vmatpush.xpose.msk.msrb.mxu2 %vm1797_vm5, %v2291_v43 }
 0xad2   : > { %6663 = vmatpush.xpose.msk.msrb.mxu2 %vm1797_vm5, %v2289_v59 }
 0xad5   : > { %6664 = vmatmul.msk.f32.vlgmr.msrb.gmra.mxu2 %vm1797_vm5, %v2287_v11 }
 0xae8   : > { %v2211_v4 = vpop.f32.mrf.mxu1 }
 0xae9   : > { %v2214_v38 = vmul.f32 0.70710677, %v2211_v4 }
 0xaeb   : > { %v2215_v44 = vsel %vm1846_vm6, %v2214_v38, -inf }
 0xaec   : > { %2216 = vmax.xlane.f32.xlu2 %v2215_v44 }
 0xb04   : > { %6966 = vrot.lane.b32.xlu2 %v8217_v49, %s11253_s22 }
 0xb0c   : > { %2430 = vrot.lane.b32.xlu2 %v8085_v10, %s11251_s4 }
 0xb14   : > { %2428 = vrot.lane.b32.xlu2 %v8093_v1, %s11251_s4 }
 0xb1c   : > { %2684 = vrot.lane.b32.xlu2 %v8093_v1, %s11249_s0 }
 0xb24   : > { %6986 = vrot.lane.b32.xlu2 %v8217_v49, %s11327_s7 }
 0xb2c   : > { %2682 = vrot.lane.b32.xlu2 %v8077_v62, %s11249_s0 }
 0xb34   : > { %6991 = vrot.lane.b32.xlu2 %v8149_v39, %s11327_s7 }
 0xb38   : > { %v8324_v34 = vpop.f32.mrf.mxu2 }
 0xb3c   : > { %2680 = vrot.lane.b32.xlu2 %v8097_v13, %s11249_s0 }
 0xb40   : > { %v8328_v45 = vpop.f32.mrf.mxu2 }
 0xb44   : > { %2550 = vrot.lane.b32.xlu2 %v8107_v16, %s11328_s25 }
 0xb4c   : > { %2420 = vrot.lane.b32.xlu2 %v8081_v3, %s11251_s4 }
 0xb54   : > { %2548 = vrot.lane.b32.xlu2 %v8081_v3, %s11328_s25  ;;  %v6972_v3 = vpop.permute.xlu0 %6971 }
 0xb55   : > { %v6973_v60 = vunpack.i.l.bf16 %v6972_v3  ;;  %v6974_v61 = vunpack.i.h.bf16 %v6972_v3 }
 0xb58   : > { %v2339_v46 = vpop.f32.mrf.mxu2 }
 0xb59   : > { %v2342_v47 = vmul.f32 0.70710677, %v2339_v46 }
 0xb5b   : > { %v2343_v19 = vsel %vm1846_vm6, %v2342_v47, -inf }
 0xb5c   : > { %2546 = vrot.lane.b32.xlu2 %v8105_v15, %s11328_s25  ;;  %2344 = vmax.xlane.f32.xlu0 %v2343_v19  ;;  %v6982_v7 = vpop.permute.xlu0 %6981 }
 0xb5d   : > { %v6983_v11 = vunpack.i.l.bf16 %v6982_v7 }
 0xb5f   : > { %v2217_v29 = vpop.xlane.xlu2 %2216 }
 0xb60   : > { %v2218_v51 = vsub.f32 %v2214_v38, %v2217_v29  ;;  %v6984_v38 = vunpack.i.h.bf16 %v6982_v7 }
 0xb62   : > { %v2219_v0 = vmul.f32 1.442695, %v2218_v51 }
 0xb64   : > { %7135 = vpow2.f32 %v2219_v0  ;;  %2544 = vrot.lane.b32.xlu2 %v8124_v24, %s11328_s25  ;;  %v8357_v8 = vpop.permute.xlu0 %2558 }
 0xb67   : > { %v6967_v53 = vpop.permute.xlu2 %6966 }
 0xb68   : > { %v6968_v55 = vunpack.i.l.bf16 %v6967_v53  ;;  %v6969_v12 = vunpack.i.h.bf16 %v6967_v53 }
 0xb6a   : > { %v8337_v56 = vpop.eup %7135  ;;  %2274 = vmatpush.msra.mxu3 %v6968_v55 }
 0xb6b   : > { %v2221_v57 = vsel %vm1846_vm6, %v8337_v56, 0.0 }
 0xb6c   : > { %2542 = vrot.lane.b32.xlu2 %v8118_v27, %s11328_s25  ;;  %2222 = vadd.xlane.f32.xlu1 %v2221_v57  ;;  %v8361_v52 = vpop.permute.xlu0 %2422 }
 0xb6d   : > { %2275 = vmatpush.msra.mxu3 %v6969_v12 }
 0xb6f   : > { %2276 = vmatpush.msra.mxu3 %v6973_v60  ;;  %v2431_v23 = vpop.permute.xlu2 %2430 }
 0xb70   : > { %6666 = vmatpush.xpose.msk.msra.mxu0 %vm1797_vm5, %v2431_v23  ;;  %2414 = vrot.lane.b32.xlu0 %v8118_v27, %s11251_s4 }
 0xb71   : > { %2277 = vmatpush.msra.mxu3 %v6974_v61 }
 0xb77   : > { %v2429_v5 = vpop.permute.xlu2 %2428 }
 0xb78   : > { %6667 = vmatpush.xpose.msk.msra.mxu0 %vm1797_vm5, %v2429_v5 }
 0xb7f   : > { %v2685_v21 = vpop.permute.xlu2 %2684 }
 0xb85   : > { %6976 = vrot.lane.b32.xlu1 %v8147_v37, %s11253_s22  ;;  %s11340_s22 = smov 118  }
 0xb87   : > { %v6987_v28 = vpop.permute.xlu2 %6986 }
 0xb88   : > { %v6988_v46 = vunpack.i.l.bf16 %v6987_v28  ;;  %v6989_v19 = vunpack.i.h.bf16 %v6987_v28 }
 0xb8d   : > { %2686 = vrot.lane.b32.xlu1 %v8085_v10, %s11249_s0  ;;  %v8365_v10 = vpop.permute.xlu0 %2676 }
 0xb8f   : > { %v2683_v32 = vpop.permute.xlu2 %2682 }
 0xb95   : > { %2556 = vrot.lane.b32.xlu1 %v8093_v1, %s11328_s25  ;;  %v8371_v1 = vpop.permute.xlu0 %2674 }
 0xb9d   : > { %2426 = vrot.lane.b32.xlu1 %v8077_v62, %s11251_s4 }
 0xba5   : > { %2554 = vrot.lane.b32.xlu1 %v8077_v62, %s11328_s25 }
 0xbad   : > { %2424 = vrot.lane.b32.xlu1 %v8097_v13, %s11251_s4 }
 0xbb5   : > { %2552 = vrot.lane.b32.xlu1 %v8097_v13, %s11328_s25 }
 0xbbd   : > { %6996 = vrot.lane.b32.xlu1 %v8147_v37, %s11327_s7 }
 0xbc5   : > { %2678 = vrot.lane.b32.xlu1 %v8107_v16, %s11249_s0 }
 0xbcd   : > { %7001 = vrot.lane.b32.xlu1 %v8145_v36, %s11327_s7 }
 0xbcf   : > { %v2345_v62 = vpop.xlane.xlu0 %2344 }
 0xbd0   : > { %v2346_v14 = vsub.f32 %v2342_v47, %v2345_v62  ;;  %v6992_v47 = vpop.permute.xlu2 %6991 }
 0xbd1   : > { %v6993_v29 = vunpack.i.l.bf16 %v6992_v47  ;;  %v6994_v51 = vunpack.i.h.bf16 %v6992_v47 }
 0xbd2   : > { %v2347_v18 = vmul.f32 1.442695, %v2346_v14 }
 0xbd4   : > { %7137 = vpow2.f32 %v2347_v18 }
 0xbd5   : > { %2418 = vrot.lane.b32.xlu1 %v8105_v15, %s11251_s4 }
 0xbd8   : > { %v2681_v53 = vpop.permute.xlu2 %2680 }
 0xbda   : > { %v8377_v13 = vpop.eup %7137 }
 0xbdb   : > { %v2349_v20 = vsel %vm1846_vm6, %v8377_v13, 0.0 }
 0xbdc   : > { %2350 = vadd.xlane.f32.xlu0 %v2349_v20 }
 0xbdd   : > { %2416 = vrot.lane.b32.xlu1 %v8124_v24, %s11251_s4 }
 0xbdf   : > { %v2223_v16 = vpop.xlane.xlu1 %2222 }
 0xbe0   : > { %7139 = vrcp.f32 %v2223_v16  ;;  %v2235_v31 = vand.u32 2147483648, %v2223_v16  ;;  %vm2229_vm13 = vweird.f32 %v2223_v16  ;;  %v2233_v33 = vand.u32 2147483647, %v2223_v16  ;;  %v2551_v3 = vpop.permute.xlu2 %2550 }
 0xbe2   : > { %v2236_v59 = vor.u32 1.1754944e-38, %v2235_v31  ;;  %vm2234_vm15 = vcmp.eq.f32.partialorder %v2233_v33, 8.507059e+37  ;;  %v2415_v18 = vpop.permute.xlu0 %2414 }
 0xbe5   : > { %2672 = vrot.lane.b32.xlu1 %v8124_v24, %s11249_s0 }
 0xbe6   : > { %v7140_v25 = vpop.eup %7139 }
 0xbe7   : > { %v2225_v26 = vmul.f32 %v7140_v25, %v2223_v16  ;;  %vm2230_vm12 = vweird.f32 %v7140_v25 }
 0xbe8   : > { %vm2231_vm14 = vmor %vm2229_vm13, %vm2230_vm12  ;;  %v2421_v57 = vpop.permute.xlu2 %2420 }
 0xbe9   : > { %v2226_v30 = vsub.f32 1.0, %v2225_v26 }
 0xbeb   : > { %v2227_v15 = vmul.f32 %v7140_v25, %v2226_v30 }
 0xbed   : > { %v2228_v48 = vadd.f32 %v7140_v25, %v2227_v15 }
 0xbef   : > { %v2232_v43 = vsel %vm2231_vm14, %v7140_v25, %v2228_v48 }
 0xbf0   : > { %2670 = vrot.lane.b32.xlu0 %v8118_v27, %s11249_s0  ;;  %v2237_v4 = vsel %vm2234_vm15, %v2236_v59, %v2232_v43  ;;  %v2549_v16 = vpop.permute.xlu2 %2548 }
 0xbf1   : > { %v2238_v44 = vmul.f32 %v8337_v56, %v2237_v4 }
 0xbf7   : > { %v6977_v58 = vpop.permute.xlu1 %6976 }
 0xbf8   : > { %v6978_v42 = vunpack.i.l.bf16 %v6977_v58  ;;  %v6979_v24 = vunpack.i.h.bf16 %v6977_v58 }
 0xbfa   : > { %2278 = vmatpush.msra.mxu3 %v6978_v42 }
 0xbfc   : > { %2279 = vmatpush.msra.mxu3 %v6979_v24 }
 0xbfe   : > { %2280 = vmatpush.msra.mxu3 %v6983_v11 }
 0xbff   : > { %v2687_v27 = vpop.permute.xlu1 %2686 }
 0xc00   : > { %2281 = vmatpush.msra.mxu3 %v6984_v38  ;;  %6686 = vmatpush.xpose.msk.msra.mxu2 %vm1797_vm5, %v2687_v27 }
 0xc01   : > { %6655 = vmatmul.msk.f32.vlgmr.msra.gmra.mxu3 %vm1846_vm6, %v2238_v44 }
 0xc02   : > { %2402 = vmatpush.msrb.mxu3 %v6988_v46 }
 0xc04   : > { %2403 = vmatpush.msrb.mxu3 %v6989_v19  ;;  %6687 = vmatpush.xpose.msk.msra.mxu2 %vm1797_vm5, %v2685_v21 }
 0xc06   : > { %2404 = vmatpush.msrb.mxu3 %v6993_v29 }
 0xc07   : > { %v2557_v0 = vpop.permute.xlu1 %2556 }
 0xc08   : > { %2405 = vmatpush.msrb.mxu3 %v6994_v51  ;;  %6688 = vmatpush.xpose.msk.msra.mxu2 %vm1797_vm5, %v2683_v32 }
 0xc0c   : > { %6689 = vmatpush.xpose.msk.msra.mxu2 %vm1797_vm5, %v2681_v53 }
 0xc0f   : > { %v2427_v55 = vpop.permute.xlu1 %2426 }
 0xc10   : > { %6668 = vmatpush.xpose.msk.msra.mxu0 %vm1797_vm5, %v2427_v55 }
 0xc17   : > { %v2555_v56 = vpop.permute.xlu1 %2554 }
 0xc1f   : > { %v2425_v12 = vpop.permute.xlu1 %2424 }
 0xc20   : > { %6669 = vmatpush.xpose.msk.msra.mxu0 %vm1797_vm5, %v2425_v12 }
 0xc24   : > { %6670 = vmatpush.xpose.msk.msra.mxu0 %vm1797_vm5, %v8361_v52 }
 0xc27   : > { %v2553_v60 = vpop.permute.xlu1 %2552 }
 0xc28   : > { %6671 = vmatpush.xpose.msk.msra.mxu0 %vm1797_vm5, %v2421_v57 }
 0xc2f   : > { %v6997_v61 = vpop.permute.xlu1 %6996 }
 0xc30   : > { %v6998_v23 = vunpack.i.l.bf16 %v6997_v61  ;;  %v6999_v5 = vunpack.i.h.bf16 %v6997_v61 }
 0xc32   : > { %2406 = vmatpush.msrb.mxu3 %v6998_v23 }
 0xc34   : > { %2407 = vmatpush.msrb.mxu3 %v6999_v5 }
 0xc37   : > { %v2679_v7 = vpop.permute.xlu1 %2678 }
 0xc38   : > { %6690 = vmatpush.xpose.msk.msra.mxu2 %vm1797_vm5, %v2679_v7 }
 0xc3c   : > { %6691 = vmatpush.xpose.msk.msra.mxu2 %vm1797_vm5, %v8365_v10 }
 0xc3f   : > { %v7002_v62 = vpop.permute.xlu1 %7001 }
 0xc40   : > { %v7003_v14 = vunpack.i.l.bf16 %v7002_v62  ;;  %6692 = vmatpush.xpose.msk.msra.mxu2 %vm1797_vm5, %v8371_v1  ;;  %v7004_v52 = vunpack.i.h.bf16 %v7002_v62  ;;  %v2547_v1 = vpop.permute.xlu2 %2546 }
 0xc42   : > { %2408 = vmatpush.msrb.mxu3 %v7003_v14 }
 0xc44   : > { %2409 = vmatpush.msrb.mxu3 %v7004_v52 }
 0xc46   : > { %6676 = vmatpush.xpose.msk.msra.mxu3 %vm1797_vm5, %v8357_v8 }
 0xc47   : > { %v2419_v20 = vpop.permute.xlu1 %2418 }
 0xc48   : > { %6672 = vmatpush.xpose.msk.msra.mxu0 %vm1797_vm5, %v2419_v20  ;;  %v2545_v58 = vpop.permute.xlu2 %2544 }
 0xc4a   : > { %6677 = vmatpush.xpose.msk.msra.mxu3 %vm1797_vm5, %v2557_v0 }
 0xc4e   : > { %6678 = vmatpush.xpose.msk.msra.mxu3 %vm1797_vm5, %v2555_v56 }
 0xc4f   : > { %v2417_v10 = vpop.permute.xlu1 %2416  ;;  %v2351_v21 = vpop.xlane.xlu0 %2350 }
 0xc50   : > { %7141 = vrcp.f32 %v2351_v21  ;;  %6673 = vmatpush.xpose.msk.msra.mxu0 %vm1797_vm5, %v2417_v10  ;;  %v2363_v30 = vand.u32 2147483648, %v2351_v21  ;;  %v2361_v48 = vand.u32 2147483647, %v2351_v21  ;;  %vm2357_vm4 = vweird.f32 %v2351_v21  ;;  %v2543_v24 = vpop.permute.xlu2 %2542 }
 0xc52   : > { %6679 = vmatpush.xpose.msk.msra.mxu3 %vm1797_vm5, %v2553_v60  ;;  %v2364_v32 = vor.u32 1.1754944e-38, %v2363_v30  ;;  %vm2362_vm8 = vcmp.eq.f32.partialorder %v2361_v48, 8.507059e+37 }
 0xc53   : > { %6674 = vmatmul.msk.f32.vlgmr.msra.gmra.mxu0 %vm1797_vm5, %v2415_v18 }
 0xc56   : > { %6680 = vmatpush.xpose.msk.msra.mxu3 %vm1797_vm5, %v2551_v3  ;;  %v7142_v8 = vpop.eup %7141 }
 0xc57   : > { %v2353_v25 = vmul.f32 %v7142_v8, %v2351_v21  ;;  %v2673_v26 = vpop.permute.xlu1 %2672  ;;  %vm2358_vm3 = vweird.f32 %v7142_v8 }
 0xc58   : > { %6693 = vmatpush.xpose.msk.msra.mxu2 %vm1797_vm5, %v2673_v26  ;;  %vm2359_vm7 = vmor %vm2357_vm4, %vm2358_vm3 }
 0xc59   : > { %v2354_v28 = vsub.f32 1.0, %v2353_v25 }
 0xc5a   : > { %6681 = vmatpush.xpose.msk.msra.mxu3 %vm1797_vm5, %v2549_v16 }
 0xc5b   : > { %v2355_v15 = vmul.f32 %v7142_v8, %v2354_v28 }
 0xc5d   : > { %v2356_v31 = vadd.f32 %v7142_v8, %v2355_v15 }
 0xc5e   : > { %6682 = vmatpush.xpose.msk.msra.mxu3 %vm1797_vm5, %v2547_v1 }
 0xc5f   : > { %v2360_v33 = vsel %vm2359_vm7, %v7142_v8, %v2356_v31 }
 0xc60   : > { %v2365_v42 = vsel %vm2362_vm8, %v2364_v32, %v2360_v33 }
 0xc61   : > { %v2366_v43 = vmul.f32 %v8377_v13, %v2365_v42 }
 0xc62   : > { %6683 = vmatpush.xpose.msk.msra.mxu3 %vm1797_vm5, %v2545_v58  ;;  %v2671_v59 = vpop.permute.xlu0 %2670 }
 0xc63   : > { %6665 = vmatmul.msk.f32.vlgmr.msrb.gmra.mxu3 %vm1846_vm6, %v2366_v43  ;;  %6694 = vmatmul.msk.f32.vlgmr.msra.gmra.mxu2 %vm1797_vm5, %v2671_v59 }
 0xc6b   : > { %6684 = vmatmul.msk.f32.vlgmr.msra.gmra.mxu3 %vm1797_vm5, %v2543_v24 }
 0xc84   : > { %v2283_v27 = vpop.f32.mrf.mxu3 }
 0xcd0   : > { %v2467_v11 = vpop.f32.mrf.mxu0 }
 0xcd1   : > { %v2470_v4 = vmul.f32 0.70710677, %v2467_v11 }
 0xcd3   : > { %v2471_v38 = vsel %vm1846_vm6, %v2470_v4, -inf }
 0xcd4   : > { %2472 = vmax.xlane.f32.xlu1 %v2471_v38 }
 0xce6   : > { %v2411_v44 = vpop.f32.mrf.mxu3  ;;  %v2723_v46 = vpop.f32.mrf.mxu2 }
 0xce7   : > { %v2726_v47 = vmul.f32 0.70710677, %v2723_v46 }
 0xce9   : > { %v2727_v19 = vsel %vm1846_vm6, %v2726_v47, -inf }
 0xcea   : > { %2728 = vmax.xlane.f32.xlu0 %v2727_v19 }
 0xced   : > { %7006 = vrot.lane.b32.xlu1 %v8217_v49, %s11251_s4 }
 0xcee   : > { %v2595_v13 = vpop.f32.mrf.mxu3 }
 0xcef   : > { %v2598_v29 = vmul.f32 0.70710677, %v2595_v13 }
 0xcf1   : > { %v2599_v51 = vsel %vm1846_vm6, %v2598_v29, -inf }
 0xcf2   : > { %2600 = vmax.xlane.f32.xlu2 %v2599_v51 }
 0xcf5   : > { %7021 = vrot.lane.b32.xlu1 %v8217_v49, %s11328_s25 }
 0xcfd   : > { %7031 = vrot.lane.b32.xlu1 %v8145_v36, %s11251_s4 }
 0xd05   : > { %7046 = vrot.lane.b32.xlu1 %v8147_v37, %s11328_s25 }
 0xd0d   : > { %7061 = vrot.lane.b32.xlu1 %v8145_v36, %s11249_s0 }
 0xd15   : > { %2807 = vrot.lane.b32.xlu1 %v2283_v27, %s11245_s27  ;;  %s11259_s27 = smov 10  }
 0xd47   : > { %v2473_v0 = vpop.xlane.xlu1 %2472 }
 0xd48   : > { %v2474_v53 = vsub.f32 %v2470_v4, %v2473_v0 }
 0xd4a   : > { %v2475_v55 = vmul.f32 1.442695, %v2474_v53 }
 0xd4c   : > { %7143 = vpow2.f32 %v2475_v55 }
 0xd52   : > { %v8434_v56 = vpop.eup %7143 }
 0xd53   : > { %v2477_v3 = vsel %vm1846_vm6, %v8434_v56, 0.0 }
 0xd54   : > { %2478 = vadd.xlane.f32.xlu2 %v2477_v3 }
 0xd5d   : > { %v2729_v12 = vpop.xlane.xlu0 %2728 }
 0xd5e   : > { %v2730_v57 = vsub.f32 %v2726_v47, %v2729_v12 }
 0xd5f   : > { %v7007_v60 = vpop.permute.xlu1 %7006 }
 0xd60   : > { %v2731_v61 = vmul.f32 1.442695, %v2730_v57  ;;  %v7008_v23 = vunpack.i.l.bf16 %v7007_v60  ;;  %v7009_v5 = vunpack.i.h.bf16 %v7007_v60 }
 0xd62   : > { %7145 = vpow2.f32 %v2731_v61  ;;  %2530 = vmatpush.msra.mxu1 %v7008_v23 }
 0xd64   : > { %2531 = vmatpush.msra.mxu1 %v7009_v5 }
 0xd65   : > { %v2601_v14 = vpop.xlane.xlu2 %2600 }
 0xd67   : > { %v7022_v25 = vpop.permute.xlu1 %7021 }
 0xd68   : > { %v8438_v7 = vpop.eup %7145  ;;  %v7024_v55 = vunpack.i.h.bf16 %v7022_v25 }
 0xd69   : > { %v2733_v62 = vsel %vm1846_vm6, %v8438_v7, 0.0 }
 0xd6a   : > { %2734 = vadd.xlane.f32.xlu0 %v2733_v62 }
 0xd6c   : > { %7011 = vrot.lane.b32.xlu2 %v8149_v39, %s11251_s4 }
 0xd6f   : > { %v7032_v30 = vpop.permute.xlu1 %7031 }
 0xd70   : > { %v7033_v27 = vunpack.i.l.bf16 %v7032_v30  ;;  %v7034_v47 = vunpack.i.h.bf16 %v7032_v30 }
 0xd74   : > { %7026 = vrot.lane.b32.xlu2 %v8217_v49, %s11249_s0  ;;  %v2602_v49 = vsub.f32 %v2598_v29, %v2601_v14  ;;  %v7023_v29 = vunpack.i.l.bf16 %v7022_v25 }
 0xd76   : > { %v2603_v52 = vmul.f32 1.442695, %v2602_v49 }
 0xd77   : > { %v7047_v38 = vpop.permute.xlu1 %7046 }
 0xd78   : > { %7147 = vpow2.f32 %v2603_v52  ;;  %v7048_v52 = vunpack.i.l.bf16 %v7047_v38 }
 0xd7c   : > { %7036 = vrot.lane.b32.xlu2 %v8149_v39, %s11328_s25 }
 0xd7e   : > { %7016 = vrot.lane.b32.xlu0 %v8147_v37, %s11251_s4  ;;  %v8457_v18 = vpop.eup %7147  ;;  %s11341_s4 = smov 114  }
 0xd7f   : > { %v2605_v20 = vsel %vm1846_vm6, %v8457_v18, 0.0  ;;  %v7062_v23 = vpop.permute.xlu1 %7061 }
 0xd84   : > { %7051 = vrot.lane.b32.xlu2 %v8147_v37, %s11249_s0 }
 0xd86   : > { %7041 = vrot.lane.b32.xlu0 %v8149_v39, %s11249_s0  ;;  %s11333_s0 = smov 12  }
 0xd8c   : > { %2799 = vrot.lane.b32.xlu2 %v8324_v34, %s11247_s24  ;;  %s11257_s24 = smov 14  }
 0xd94   : > { %2811 = vrot.lane.b32.xlu2 %v2411_v44, %s11329_s1 }
 0xdb0   : > { %2606 = vadd.xlane.f32.xlu0 %v2605_v20  ;;  %v7063_v20 = vunpack.i.l.bf16 %v7062_v23 }
 0xdc4   : > { %7056 = vrot.lane.b32.xlu0 %v8145_v36, %s11328_s25 }
 0xdc7   : > { %v2479_v37 = vpop.xlane.xlu2 %2478 }
 0xdc8   : > { %7149 = vrcp.f32 %v2479_v37  ;;  %v2491_v32 = vand.u32 2147483648, %v2479_v37  ;;  %vm2485_vm12 = vweird.f32 %v2479_v37  ;;  %v2489_v33 = vand.u32 2147483647, %v2479_v37 }
 0xdca   : > { %v2492_v11 = vor.u32 1.1754944e-38, %v2491_v32  ;;  %vm2490_vm14 = vcmp.eq.f32.partialorder %v2489_v33, 8.507059e+37 }
 0xdcc   : > { %2803 = vrot.lane.b32.xlu0 %v8328_v45, %s11330_s26 }
 0xdce   : > { %v7150_v1 = vpop.eup %7149 }
 0xdcf   : > { %v7012_v39 = vpop.permute.xlu2 %7011  ;;  %v2481_v26 = vmul.f32 %v7150_v1, %v2479_v37  ;;  %vm2486_vm11 = vweird.f32 %v7150_v1 }
 0xdd0   : > { %v7013_v34 = vunpack.i.l.bf16 %v7012_v39  ;;  %v7014_v16 = vunpack.i.h.bf16 %v7012_v39  ;;  %vm2487_vm13 = vmor %vm2485_vm12, %vm2486_vm11  ;;  %v7049_v39 = vunpack.i.h.bf16 %v7047_v38 }
 0xdd1   : > { %v2482_v36 = vsub.f32 1.0, %v2481_v26 }
 0xdd2   : > { %2532 = vmatpush.msra.mxu1 %v7013_v34  ;;  %v7064_v34 = vunpack.i.h.bf16 %v7062_v23 }
 0xdd3   : > { %v2483_v15 = vmul.f32 %v7150_v1, %v2482_v36 }
 0xdd4   : > { %2533 = vmatpush.msra.mxu1 %v7014_v16 }
 0xdd5   : > { %v2484_v48 = vadd.f32 %v7150_v1, %v2483_v15 }
 0xdd7   : > { %v7027_v10 = vpop.permute.xlu2 %7026  ;;  %v2488_v59 = vsel %vm2487_vm13, %v7150_v1, %v2484_v48 }
 0xdd8   : > { %v7028_v21 = vunpack.i.l.bf16 %v7027_v10  ;;  %v7029_v8 = vunpack.i.h.bf16 %v7027_v10  ;;  %v2493_v44 = vsel %vm2490_vm14, %v2492_v11, %v2488_v59  ;;  %v2808_v11 = vpop.permute.xlu1 %2807  ;;  %vm2831_vm14 = vcmask 80896  }
 0xdd9   : > { %v2494_v13 = vmul.f32 %v8434_v56, %v2493_v44 }
 0xdda   : > { %2786 = vmatpush.msrb.mxu0 %v7028_v21 }
 0xddc   : > { %2787 = vmatpush.msrb.mxu0 %v7029_v8 }
 0xddd   : > { %v2735_v28 = vpop.xlane.xlu0 %2734 }
 0xdde   : > { %7151 = vrcp.f32 %v2735_v28  ;;  %v2747_v3 = vand.u32 2147483648, %v2735_v28  ;;  %vm2741_vm3 = vweird.f32 %v2735_v28  ;;  %v2745_v57 = vand.u32 2147483647, %v2735_v28 }
 0xddf   : > { %v7037_v58 = vpop.permute.xlu2 %7036 }
 0xde0   : > { %v7038_v56 = vunpack.i.l.bf16 %v7037_v58  ;;  %v2748_v62 = vor.u32 1.1754944e-38, %v2747_v3  ;;  %v7039_v14 = vunpack.i.h.bf16 %v7037_v58  ;;  %vm2746_vm7 = vcmp.eq.f32.partialorder %v2745_v57, 8.507059e+37 }
 0xde4   : > { %v7152_v45 = vpop.eup %7151 }
 0xde5   : > { %v2737_v31 = vmul.f32 %v7152_v45, %v2735_v28  ;;  %vm2742_vm15 = vweird.f32 %v7152_v45 }
 0xde6   : > { %vm8467_vm4 = vmor %vm2741_vm3, %vm2742_vm15  ;;  %vm2834_vm15 = vcmask 113664  }
 0xde7   : > { %v2738_v24 = vsub.f32 1.0, %v2737_v31  ;;  %v7052_v53 = vpop.permute.xlu2 %7051 }
 0xde8   : > { %v7053_v61 = vunpack.i.l.bf16 %v7052_v53  ;;  %v7054_v49 = vunpack.i.h.bf16 %v7052_v53 }
 0xde9   : > { %v2739_v46 = vmul.f32 %v7152_v45, %v2738_v24 }
 0xdeb   : > { %v2740_v0 = vadd.f32 %v7152_v45, %v2739_v46 }
 0xded   : > { %v2744_v5 = vsel %vm8467_vm4, %v7152_v45, %v2740_v0 }
 0xdee   : > { %v2749_v37 = vsel %vm2746_vm7, %v2748_v62, %v2744_v5  ;;  %v2897_v5 = vld [vmem:[%s11336_s18 + $0x18] sm:$0xff]  ;;  %v2895_v62 = vld [vmem:[%s11336_s18 + $0x8] sm:$0xff] }
 0xdef   : > { %v2750_v16 = vmul.f32 %v8438_v7, %v2749_v37  ;;  %v2800_v59 = vpop.permute.xlu2 %2799 }
 0xdf0   : > { %v7017_v42 = vpop.permute.xlu0 %7016 }
 0xdf1   : > { %v7018_v43 = vunpack.i.l.bf16 %v7017_v42  ;;  %v7019_v4 = vunpack.i.h.bf16 %v7017_v42 }
 0xdf3   : > { %2534 = vmatpush.msra.mxu1 %v7018_v43  ;;  %v2837_v43 = vld [vmem:[%s11334_s10 + $0x8] sm:$0xff] }
 0xdf5   : > { %2535 = vmatpush.msra.mxu1 %v7019_v4  ;;  %v2826_v4 = vsel %vm1797_vm5, %v8207_v40, %v2800_v59  ;;  %v7074_v40 = vld [vmem:[%s11335_s11] ss:$0 sm:$0xff]  ;;  %s11338_s11 = smov 126  }
 0xdf7   : > { %2536 = vmatpush.msra.mxu1 %v7033_v27  ;;  %v2812_v38 = vpop.permute.xlu2 %2811 }
 0xdf8   : > { %v7042_v19 = vpop.permute.xlu0 %7041 }
 0xdf9   : > { %v7043_v51 = vunpack.i.l.bf16 %v7042_v19  ;;  %2537 = vmatpush.msra.mxu1 %v7034_v47  ;;  %v7044_v12 = vunpack.i.h.bf16 %v7042_v19 }
 0xdfa   : > { %6675 = vmatmul.msk.f32.vlgmr.msra.gmra.mxu1 %vm1846_vm6, %v2494_v13 }
 0xdfb   : > { %2658 = vmatpush.msrb.mxu1 %v7023_v29  ;;  %2788 = vmatpush.msrb.mxu0 %v7043_v51 }
 0xdfd   : > { %2659 = vmatpush.msrb.mxu1 %v7024_v55  ;;  %2789 = vmatpush.msrb.mxu0 %v7044_v12 }
 0xdff   : > { %2660 = vmatpush.msrb.mxu1 %v7038_v56  ;;  %2790 = vmatpush.msrb.mxu0 %v7053_v61 }
 0xe01   : > { %2661 = vmatpush.msrb.mxu1 %v7039_v14  ;;  %2791 = vmatpush.msrb.mxu0 %v7054_v49  ;;  %v2894_v14 = vld [vmem:[%s11336_s18] sm:$0xff]  ;;  %v2941_v49 = vld [vmem:[%s11215_s20 + $0x78] sm:$0xff] }
 0xe02   : > { %2946 = vmatpush.msrb.mxu3 %v2941_v49 }
 0xe03   : > { %2662 = vmatpush.msrb.mxu1 %v7048_v52  ;;  %2792 = vmatpush.msrb.mxu0 %v7063_v20  ;;  %v2940_v52 = vld [vmem:[%s11215_s20 + $0x70] sm:$0xff]  ;;  %v2939_v20 = vld [vmem:[%s11215_s20 + $0x68] sm:$0xff] }
 0xe04   : > { %2947 = vmatpush.msrb.mxu3 %v2940_v52 }
 0xe05   : > { %2663 = vmatpush.msrb.mxu1 %v7049_v39  ;;  %2793 = vmatpush.msrb.mxu0 %v7064_v34  ;;  %v2938_v34 = vld [vmem:[%s11215_s20 + $0x60] sm:$0xff] }
 0xe06   : > { %6695 = vmatmul.msk.f32.vlgmr.msrb.gmra.mxu0 %vm1846_vm6, %v2750_v16  ;;  %2948 = vmatpush.msrb.mxu3 %v2939_v20 }
 0xe08   : > { %2949 = vmatpush.msrb.mxu3 %v2938_v34  ;;  %v3044_v34 = vld [vmem:[%s11207_s12 + $0x28] sm:$0xff] }
 0xe23   : > { %v2607_v10 = vpop.xlane.xlu0 %2606 }
 0xe24   : > { %7153 = vrcp.f32 %v2607_v10  ;;  %v2619_v28 = vand.u32 2147483648, %v2607_v10  ;;  %vm2613_vm11 = vweird.f32 %v2607_v10  ;;  %v2617_v36 = vand.u32 2147483647, %v2607_v10 }
 0xe26   : > { %v2620_v15 = vor.u32 1.1754944e-38, %v2619_v28  ;;  %vm2618_vm13 = vcmp.eq.f32.partialorder %v2617_v36, 8.507059e+37  ;;  %v2932_v36 = vld [vmem:[%s11215_s20 + $0x30] sm:$0xff] }
 0xe2a   : > { %v7154_v21 = vpop.eup %7153 }
 0xe2b   : > { %v2609_v8 = vmul.f32 %v7154_v21, %v2607_v10  ;;  %vm2614_vm8 = vweird.f32 %v7154_v21  ;;  %v2937_v10 = vld [vmem:[%s11215_s20 + $0x58] sm:$0xff] }
 0xe2c   : > { %vm2615_vm12 = vmor %vm2613_vm11, %vm2614_vm8  ;;  %2950 = vmatpush.msrb.mxu3 %v2937_v10  ;;  %v3075_v10 = vld [vmem:[%s11207_s12 + $0x58] sm:$0xff] }
 0xe2d   : > { %v2610_v1 = vsub.f32 1.0, %v2609_v8  ;;  %v2935_v8 = vld [vmem:[%s11215_s20 + $0x48] sm:$0xff] }
 0xe2f   : > { %v2611_v25 = vmul.f32 %v7154_v21, %v2610_v1  ;;  %v2934_v1 = vld [vmem:[%s11215_s20 + $0x40] sm:$0xff] }
 0xe31   : > { %v2612_v26 = vadd.f32 %v7154_v21, %v2611_v25 }
 0xe33   : > { %v2616_v30 = vsel %vm2615_vm12, %v7154_v21, %v2612_v26  ;;  %v2936_v21 = vld [vmem:[%s11215_s20 + $0x50] sm:$0xff]  ;;  %v2933_v26 = vld [vmem:[%s11215_s20 + $0x38] sm:$0xff] }
 0xe34   : > { %v2621_v48 = vsel %vm2618_vm13, %v2620_v15, %v2616_v30  ;;  %2951 = vmatpush.msrb.mxu3 %v2936_v21  ;;  %v2931_v15 = vld [vmem:[%s11215_s20 + $0x28] sm:$0xff] }
 0xe35   : > { %v2622_v32 = vmul.f32 %v8457_v18, %v2621_v48  ;;  %v2836_v18 = vld [vmem:[%s11334_s10] sm:$0xff] }
 0xe36   : > { %v7057_v7 = vpop.permute.xlu0 %7056  ;;  %2952 = vmatpush.msrb.mxu3 %v2935_v8 }
 0xe37   : > { %v7058_v45 = vunpack.i.l.bf16 %v7057_v7  ;;  %v7059_v31 = vunpack.i.h.bf16 %v7057_v7 }
 0xe38   : > { %2953 = vmatpush.msrb.mxu3 %v2934_v1  ;;  %v3074_v1 = vld [vmem:[%s11207_s12 + $0x50] sm:$0xff] }
 0xe39   : > { %2664 = vmatpush.msrb.mxu1 %v7058_v45  ;;  %v2930_v45 = vld [vmem:[%s11215_s20 + $0x20] sm:$0xff] }
 0xe3a   : > { %2954 = vmatpush.msrb.mxu3 %v2933_v26  ;;  %v3073_v26 = vld [vmem:[%s11207_s12 + $0x48] sm:$0xff] }
 0xe3b   : > { %2665 = vmatpush.msrb.mxu1 %v7059_v31  ;;  %v2929_v31 = vld [vmem:[%s11215_s20 + $0x18] sm:$0xff] }
 0xe3c   : > { %6685 = vmatmul.msk.f32.vlgmr.msrb.gmra.mxu1 %vm1846_vm6, %v2622_v32  ;;  %vm2828_vm6 = vcmask 48128   ;;  %2955 = vmatpush.msrb.mxu3 %v2932_v36 }
 0xe3d   : > { %2859 = vmatpush.msra.mxu1 %v2837_v43  ;;  %v7076_v43 = vld [vmem:[%s11212_s17 + $0x1] ss:$0 sm:$0xff] }
 0xe3e   : > { %v2804_v24 = vpop.permute.xlu0 %2803  ;;  %2956 = vmatpush.msrb.mxu3 %v2931_v15 }
 0xe3f   : > { %2860 = vmatpush.msra.mxu1 %v2836_v18  ;;  %v2827_v27 = vsel %vm880_vm1, %v2826_v4, %v2804_v24  ;;  %v2928_v24 = vld [vmem:[%s11215_s20 + $0x10] sm:$0xff]  ;;  %v2926_v4 = vld [vmem:[%s11215_s20] sm:$0xff] }
 0xe40   : > { %v2829_v44 = vsel %vm2828_vm6, %v2827_v27, %v2808_v11  ;;  %2957 = vmatpush.msrb.mxu3 %v2930_v45  ;;  %v2927_v11 = vld [vmem:[%s11215_s20 + $0x8] sm:$0xff]  ;;  %v2998_v27 = vld [vmem:[%s11207_s12 + $0x10] sm:$0xff] }
 0xe41   : > { %v2830_v47 = vsel %vm908_vm2, %v2829_v44, %v2812_v38  ;;  %2917 = vmatpush.msrb.mxu1 %v2897_v5  ;;  %v2999_v38 = vld [vmem:[%s11207_s12 + $0x18] sm:$0xff]  ;;  %v2997_v44 = vld [vmem:[%s11207_s12 + $0x8] sm:$0xff] }
 0xe42   : > { %2958 = vmatpush.msrb.mxu3 %v2929_v31  ;;  %3014 = vmatpush.msra.mxu0 %v2999_v38  ;;  %v7080_v31 = vld [vmem:[%s11211_s16 + $0x2] ss:$0 sm:$0xff] }
 0xe44   : > { %2959 = vmatpush.msrb.mxu3 %v2928_v24  ;;  %3015 = vmatpush.msra.mxu0 %v2998_v27 }
 0xe46   : > { %2960 = vmatpush.msrb.mxu3 %v2927_v11  ;;  %3016 = vmatpush.msra.mxu0 %v2997_v44 }
 0xe48   : > { %2961 = vmatpush.msrb.mxu3 %v2926_v4 }
 0xe77   : > { %v2539_v33 = vpop.f32.mrf.mxu1 }
 0xe78   : > { %2815 = vrot.lane.b32.xlu0 %v2539_v33, %s11259_s27  ;;  %v7075_v33 = vld [vmem:[%s11211_s16 + $0x1] ss:$0 sm:$0xff]  ;;  %s11482_s27 = sld [smem:[#allocation44_spill]] }
 0xe83   : > { %v2795_v58 = vpop.f32.mrf.mxu0 }
 0xe84   : > { %2823 = vrot.lane.b32.xlu2 %v2795_v58, %s11257_s24  ;;  %s11339_s24 = smov 122  }
 0xeb9   : > { %v2667_v42 = vpop.f32.mrf.mxu1 }
 0xeba   : > { %2819 = vrot.lane.b32.xlu1 %v2667_v42, %s11333_s0 }
 0xede   : > { %v2824_v29 = vpop.permute.xlu2 %2823 }
 0xeea   : > { %v2816_v46 = vpop.permute.xlu0 %2815 }
 0xeeb   : > { %v2832_v19 = vsel %vm2831_vm14, %v2830_v47, %v2816_v46  ;;  %v2996_v46 = vld [vmem:[%s11207_s12] sm:$0xff] }
 0xeec   : > { %3017 = vmatpush.msra.mxu0 %v2996_v46  ;;  %v7077_v47 = vld [vmem:[%s11337_s19] ss:$0 sm:$0xff]  ;;  %s8760_s19 = sshll.u32 %s743_s8, 3 }
 0xeed   : > { %6698 = vmatmul.msk.f32.vlgmr.msra.gmra.mxu0 %vm11280_vm0, %v7967_v2  ;;  %s745_s29 = scalar_lea.vmem [#allocation2], %s8760_s19 }
 0xeee   : > { %s6432_s9 = sshll.u32 %s745_s29, 4  ;;  %s6433_s9 = int_to_ptr.vmem [resolvable:$true] %s6432_s9 }
 0xef5   : > { %6699 = vmatmul.msk.f32.gmra.mxu0 %vm11280_vm0, %v7976_v6 }
 0xefd   : > { %6700 = vmatmul.msk.f32.gmra.mxu0 %vm11280_vm0, %v7989_v17  ;;  %v7079_v17 = vld [vmem:[%s11208_s13] ss:$0 sm:$0xff] }
 0xf05   : > { %6701 = vmatmul.msk.f32.gmra.mxu0 %vm11280_vm0, %v7998_v63 }
 0xf0d   : > { %6702 = vmatmul.msk.f32.gmra.mxu0 %vm11280_vm0, %v8004_v22 }
 0xf15   : > { %6703 = vmatmul.msk.f32.gmra.mxu0 %vm11280_vm0, %v8019_v35  ;;  %v7078_v35 = vld [vmem:[%s11216_s21] ss:$0 sm:$0xff] }
 0xf1d   : > { %6704 = vmatmul.msk.f32.gmra.mxu0 %vm11280_vm0, %v8056_v54 }
 0xf25   : > { %6705 = vmatmul.msk.f32.gmra.mxu0 %vm11280_vm0, %v8064_v41 }
 0xf2c   : > { %v2820_v13 = vpop.permute.xlu1 %2819 }
 0xf2d   : > { %v2833_v51 = vsel %vm1540_vm9, %v2832_v19, %v2820_v13 }
 0xf2e   : > { %v2835_v0 = vsel %vm2834_vm15, %v2833_v51, %v2824_v29 }
 0xf2f   : > { %6696 = vmatmul.msk.f32.vlgmr.msra.gmra.mxu1 %vm1542_vm10, %v2835_v0 }
 0xf6a   : > { %v3019_v2 = vpop.f32.mrf.mxu0 }
 0xf72   : > { %v3022_v6 = vpop.f32.mrf.mxu0 }
 0xf7a   : > { %v3025_v63 = vpop.f32.mrf.mxu0 }
 0xf7b   : > { %v8604_v51 = vadd.f32 %v7079_v17, %v3025_v63 }
 0xf82   : > { %v3028_v22 = vpop.f32.mrf.mxu0 }
 0xf8a   : > { %v3031_v41 = vpop.f32.mrf.mxu0 }
 0xfac   : > { %v2862_v53 = vpop.f32.mrf.mxu1 }
 0xfad   : > { %v2863_v55 = vadd.f32 %v7074_v40, %v2862_v53  ;;  %v8611_v40 = vadd.f32 %v7079_v17, %v3031_v41 }
 0xfaf   : > { %v2865_v3 = vadd.f32 %v2863_v55, %v8047_v50  ;;  %v2896_v50 = vld [vmem:[%s11336_s18 + $0x10] sm:$0xff] }
 0xfb0   : > { %2918 = vmatpush.msrb.mxu1 %v2896_v50 }
 0xfb1   : > { %v2868_v12 = vsel %vm11280_vm0, %v2865_v3, 0.0 }
 0xfb2   : > { %2869 = vadd.xlane.f32.xlu0 %v2868_v12  ;;  %2919 = vmatpush.msrb.mxu1 %v2895_v62 }
 0xfb4   : > { %2920 = vmatpush.msrb.mxu1 %v2894_v14 }
0x1025   : > { %v2870_v57 = vpop.xlane.xlu0 %2869 }
0x1026   : > { %v2871_v60 = vmul.f32 %v2870_v57, %v7980_v9 }
0x1028   : > { %v2872_v56 = vsub.f32 %v2865_v3, %v2871_v60  ;;  %v3034_v3 = vpop.f32.mrf.mxu0  ;;  %v8620_v60 = vadd.f32 %v7079_v17, %v3019_v2 }
0x102a   : > { %v2873_v61 = vmul.f32 %v2872_v56, %v2872_v56 }
0x102c   : > { %v2874_v23 = vsel %vm11280_vm0, %v2873_v61, 0.0  ;;  %v8628_v61 = vadd.f32 %v7079_v17, %v3028_v22 }
0x102d   : > { %2875 = vadd.xlane.f32.xlu1 %v2874_v23  ;;  %v8634_v23 = vadd.f32 %v7079_v17, %v3034_v3  ;;  %v7082_v3 = vld [vmem:[%s11208_s13 + $0x1] ss:$0 sm:$0xff] }
0x1030   : > { %v3037_v12 = vpop.f32.mrf.mxu0 }
0x1031   : > { %v8616_v57 = vadd.f32 %v7079_v17, %v3037_v12 }
0x1038   : > { %v3040_v5 = vpop.f32.mrf.mxu0 }
0x1039   : > { %v8642_v50 = vadd.f32 %v7079_v17, %v3040_v5 }
0x1046   : > { %3438 = vrot.lane.b32.xlu1 %v8604_v51, %s11338_s11 }
0x104e   : > { %3442 = vrot.lane.b32.xlu1 %v8611_v40, %s11338_s11 }
0x1056   : > { %3446 = vrot.lane.b32.xlu1 %v8616_v57, %s11338_s11 }
0x105e   : > { %3780 = vrot.lane.b32.xlu1 %v8620_v60, %s11326_s3 }
0x10a0   : > { %v2876_v37 = vpop.xlane.xlu1 %2875 }
0x10a1   : > { %v2877_v39 = vmul.f32 %v2876_v37, %v7980_v9  ;;  %v3046_v37 = vld [vmem:[%s11207_s12 + $0x38] sm:$0xff] }
0x10a2   : > { %3064 = vmatpush.msra.mxu1 %v3046_v37 }
0x10a3   : > { %v2878_v16 = vadd.f32 1e-05, %v2877_v39  ;;  %v3045_v39 = vld [vmem:[%s11207_s12 + $0x30] sm:$0xff] }
0x10a4   : > { %3065 = vmatpush.msra.mxu1 %v3045_v39 }
0x10a5   : > { %7155 = vrsqrt.f32 %v2878_v16  ;;  %vm2885_vm4 = vweird.f32 %v2878_v16 }
0x10a6   : > { %3066 = vmatpush.msra.mxu1 %v3044_v34 }
0x10ab   : > { %v7156_v25 = vpop.eup %7155 }
0x10ac   : > { %v2880_v28 = vmul.f32 %v7156_v25, %v2878_v16  ;;  %vm2886_vm3 = vweird.f32 %v7156_v25  ;;  %v3043_v16 = vld [vmem:[%s11207_s12 + $0x20] sm:$0xff] }
0x10ad   : > { %vm2887_vm7 = vmor %vm2885_vm4, %vm2886_vm3  ;;  %3067 = vmatpush.msra.mxu1 %v3043_v16 }
0x10ae   : > { %v2881_v30 = vmul.f32 %v7156_v25, %v2880_v28  ;;  %v3072_v28 = vld [vmem:[%s11207_s12 + $0x40] sm:$0xff] }
0x10b0   : > { %v2882_v7 = vmul.f32 0.5, %v2881_v30 }
0x10b2   : > { %v2883_v48 = vsub.f32 1.5, %v2882_v7 }
0x10b4   : > { %v2884_v32 = vmul.f32 %v7156_v25, %v2883_v48 }
0x10b6   : > { %v2888_v58 = vsel %vm2887_vm7, %v7156_v25, %v2884_v32 }
0x10b7   : > { %v2889_v42 = vmul.f32 %v2888_v58, %v2872_v56  ;;  %v8626_v56 = vadd.f32 %v7079_v17, %v3022_v6 }
0x10b8   : > { %v8775_v24 = vpop.permute.xlu1 %3438 }
0x10b9   : > { %v2891_v18 = vmul.f32 %v7075_v33, %v2889_v42  ;;  %3782 = vrot.lane.b32.xlu1 %v8626_v56, %s11326_s3  ;;  %v7081_v33 = vld [vmem:[%s11212_s17 + $0x2] ss:$0 sm:$0xff] }
0x10bb   : > { %v2893_v59 = vadd.f32 %v7076_v43, %v2891_v18  ;;  %v7431_v18 = vld [vmem:[%s7739_s28] sm:$0xff] }
0x10bd   : > { %6697 = vmatmul.msk.f32.vlgmr.msrb.gmra.mxu1 %vm11280_vm0, %v2893_v59 }
0x10be   : > { %3093 = vmatpush.msrb.mxu1 %v3075_v10 }
0x10c0   : > { %3094 = vmatpush.msrb.mxu1 %v3074_v1  ;;  %v8781_v11 = vpop.permute.xlu1 %3442 }
0x10c1   : > { %3784 = vrot.lane.b32.xlu1 %v8604_v51, %s11326_s3 }
0x10c2   : > { %3095 = vmatpush.msrb.mxu1 %v3073_v26 }
0x10c4   : > { %3096 = vmatpush.msrb.mxu1 %v3072_v28 }
0x10c8   : > { %v8785_v4 = vpop.permute.xlu1 %3446 }
0x10c9   : > { %4131 = vrot.lane.b32.xlu1 %v8628_v61, %s11339_s24 }
0x10d0   : > { %v8789_v27 = vpop.permute.xlu1 %3780 }
0x10d1   : > { %3788 = vrot.lane.b32.xlu1 %v8611_v40, %s11326_s3 }
0x10d9   : > { %3790 = vrot.lane.b32.xlu1 %v8634_v23, %s11326_s3 }
0x10e1   : > { %3792 = vrot.lane.b32.xlu1 %v8616_v57, %s11326_s3 }
0x10e9   : > { %3794 = vrot.lane.b32.xlu1 %v8642_v50, %s11326_s3 }
0x10f1   : > { %4815 = vrot.lane.b32.xlu1 %v8620_v60, %s11340_s22 }
0x10f9   : > { %4817 = vrot.lane.b32.xlu1 %v8626_v56, %s11340_s22 }
0x1101   : > { %4819 = vrot.lane.b32.xlu1 %v8604_v51, %s11340_s22 }
0x1109   : > { %4478 = vrot.lane.b32.xlu1 %v8611_v40, %s11327_s7 }
0x1111   : > { %4825 = vrot.lane.b32.xlu1 %v8634_v23, %s11340_s22 }
0x1119   : > { %4827 = vrot.lane.b32.xlu1 %v8616_v57, %s11340_s22 }
0x1121   : > { %4484 = vrot.lane.b32.xlu1 %v8642_v50, %s11327_s7 }
0x1129   : > { %4829 = vrot.lane.b32.xlu1 %v8642_v50, %s11340_s22 }
0x112b   : > { %v8793_v46 = vpop.permute.xlu1 %3782 }
0x1131   : > { %5160 = vrot.lane.b32.xlu1 %v8620_v60, %s11328_s25 }
0x1139   : > { %5511 = vrot.lane.b32.xlu1 %v8628_v61, %s11341_s4 }
0x113a   : > { %v2922_v19 = vpop.f32.mrf.mxu1 }
0x113b   : > { %v2923_v13 = vadd.f32 %v7077_v47, %v2922_v19  ;;  %v8797_v19 = vpop.permute.xlu1 %3784 }
0x113d   : > { %v2925_v29 = vmax.f32 %v2923_v13, 0.0 }
0x113f   : > { %2962 = vmatmul.f32.vlgmr.msrb.gmra.mxu3 %v2925_v29 }
0x1141   : > { %5513 = vrot.lane.b32.xlu1 %v8611_v40, %s11341_s4 }
0x1143   : > { %v8801_v29 = vpop.permute.xlu1 %4131 }
0x1149   : > { %5172 = vrot.lane.b32.xlu1 %v8616_v57, %s11328_s25 }
0x114b   : > { %v8805_v6 = vpop.permute.xlu1 %3788 }
0x1153   : > { %v8809_v63 = vpop.permute.xlu1 %3790 }
0x11c2   : > { %v2963_v54 = vpop.f32.mrf.mxu3 }
0x11c3   : > { %v2964_v0 = vadd.f32 %v7078_v35, %v2963_v54  ;;  %v8815_v54 = vpop.permute.xlu1 %3792 }
0x11c5   : > { %v2966_v53 = vadd.f32 %v2964_v0, %v2893_v59 }
0x11c7   : > { %v2969_v55 = vsel %vm11280_vm0, %v2966_v53, 0.0 }
0x11c8   : > { %2970 = vadd.xlane.f32.xlu2 %v2969_v55 }
0x11e0   : > { %3434 = vrot.lane.b32.xlu2 %v8620_v60, %s11338_s11 }
0x11e8   : > { %3440 = vrot.lane.b32.xlu2 %v8628_v61, %s11338_s11 }
0x11f0   : > { %3444 = vrot.lane.b32.xlu2 %v8634_v23, %s11338_s11 }
0x11f8   : > { %3448 = vrot.lane.b32.xlu2 %v8642_v50, %s11338_s11 }
0x1200   : > { %4125 = vrot.lane.b32.xlu2 %v8620_v60, %s11339_s24 }
0x1208   : > { %4127 = vrot.lane.b32.xlu2 %v8626_v56, %s11339_s24 }
0x1210   : > { %3786 = vrot.lane.b32.xlu2 %v8628_v61, %s11326_s3 }
0x1218   : > { %4476 = vrot.lane.b32.xlu2 %v8628_v61, %s11327_s7 }
0x1220   : > { %4823 = vrot.lane.b32.xlu2 %v8611_v40, %s11340_s22 }
0x1228   : > { %5505 = vrot.lane.b32.xlu2 %v8620_v60, %s11341_s4 }
0x1230   : > { %5168 = vrot.lane.b32.xlu2 %v8611_v40, %s11328_s25 }
0x1238   : > { %5517 = vrot.lane.b32.xlu2 %v8616_v57, %s11341_s4 }
0x123b   : > { %v2971_v62 = vpop.xlane.xlu2 %2970 }
0x123c   : > { %v2972_v14 = vmul.f32 %v2971_v62, %v7980_v9 }
0x123e   : > { %v2973_v49 = vsub.f32 %v2966_v53, %v2972_v14  ;;  %v8821_v53 = vpop.permute.xlu1 %3794 }
0x1240   : > { %v2974_v52 = vmul.f32 %v2973_v49, %v2973_v49 }
0x1242   : > { %v2975_v20 = vsel %vm11280_vm0, %v2974_v52, 0.0 }
0x1243   : > { %2976 = vadd.xlane.f32.xlu0 %v2975_v20  ;;  %v8813_v35 = vpop.permute.xlu2 %3434 }
0x1246   : > { %v8830_v14 = vpop.permute.xlu1 %4815 }
0x124b   : > { %v8819_v41 = vpop.permute.xlu2 %3440 }
0x124e   : > { %v8851_v34 = vpop.permute.xlu1 %4817 }
0x1253   : > { %v8828_v12 = vpop.permute.xlu2 %3444 }
0x1256   : > { %v8862_v10 = vpop.permute.xlu1 %4819 }
0x1257   : > { %3436 = vrot.lane.b32.xlu0 %v8626_v56, %s11338_s11 }
0x125b   : > { %v8842_v37 = vpop.permute.xlu2 %3448 }
0x125f   : > { %4129 = vrot.lane.b32.xlu0 %v8604_v51, %s11339_s24 }
0x1263   : > { %v8857_v16 = vpop.permute.xlu2 %4125 }
0x1267   : > { %4133 = vrot.lane.b32.xlu0 %v8611_v40, %s11339_s24 }
0x126f   : > { %4135 = vrot.lane.b32.xlu0 %v8634_v23, %s11339_s24 }
0x1277   : > { %4137 = vrot.lane.b32.xlu0 %v8616_v57, %s11339_s24 }
0x127f   : > { %4139 = vrot.lane.b32.xlu0 %v8642_v50, %s11339_s24 }
0x1287   : > { %4470 = vrot.lane.b32.xlu0 %v8620_v60, %s11327_s7 }
0x128f   : > { %4472 = vrot.lane.b32.xlu0 %v8626_v56, %s11327_s7 }
0x1297   : > { %4474 = vrot.lane.b32.xlu0 %v8604_v51, %s11327_s7 }
0x129f   : > { %4821 = vrot.lane.b32.xlu0 %v8628_v61, %s11340_s22 }
0x12a7   : > { %4480 = vrot.lane.b32.xlu0 %v8634_v23, %s11327_s7 }
0x12af   : > { %4482 = vrot.lane.b32.xlu0 %v8616_v57, %s11327_s7 }
0x12b6   : > { %v2977_v21 = vpop.xlane.xlu0 %2976 }
0x12b7   : > { %v2978_v8 = vmul.f32 %v2977_v21, %v7980_v9  ;;  %5162 = vrot.lane.b32.xlu0 %v8626_v56, %s11328_s25 }
0x12b9   : > { %v2979_v25 = vadd.f32 1e-05, %v2978_v8  ;;  %v8875_v8 = vpop.permute.xlu1 %4478 }
0x12bb   : > { %7157 = vrsqrt.f32 %v2979_v25  ;;  %vm2986_vm11 = vweird.f32 %v2979_v25 }
0x12bf   : > { %5507 = vrot.lane.b32.xlu0 %v8626_v56, %s11341_s4 }
0x12c1   : > { %v7158_v36 = vpop.eup %7157 }
0x12c2   : > { %v2981_v30 = vmul.f32 %v7158_v36, %v2979_v25  ;;  %vm2987_vm8 = vweird.f32 %v7158_v36  ;;  %v8884_v25 = vpop.permute.xlu1 %4825 }
0x12c3   : > { %vm2988_vm12 = vmor %vm2986_vm11, %vm2987_vm8 }
0x12c4   : > { %v2982_v15 = vmul.f32 %v7158_v36, %v2981_v30 }
0x12c6   : > { %v2983_v7 = vmul.f32 0.5, %v2982_v15 }
0x12c7   : > { %5164 = vrot.lane.b32.xlu0 %v8604_v51, %s11328_s25 }
0x12c8   : > { %v2984_v45 = vsub.f32 1.5, %v2983_v7 }
0x12c9   : > { %v8787_v38 = vpop.permute.xlu0 %3436 }
0x12ca   : > { %v2985_v48 = vmul.f32 %v7158_v36, %v2984_v45  ;;  %v8894_v28 = vpop.permute.xlu1 %4827 }
0x12cc   : > { %v2989_v32 = vsel %vm2988_vm12, %v7158_v36, %v2985_v48 }
0x12cd   : > { %v2990_v58 = vmul.f32 %v2989_v32, %v2973_v49  ;;  %v7083_v49 = vld [vmem:[%s11208_s13 + $0x2] ss:$0 sm:$0xff] }
0x12cf   : > { %v2992_v42 = vmul.f32 %v7080_v31, %v2990_v58  ;;  %5509 = vrot.lane.b32.xlu0 %v8604_v51, %s11341_s4 }
0x12d1   : > { %v2994_v43 = vadd.f32 %v7081_v33, %v2992_v42  ;;  %v8791_v44 = vpop.permute.xlu0 %4129 }
0x12d2   : > { %v8902_v30 = vpop.permute.xlu1 %4484 }
0x12d3   : > { %v2995_v59 = vadd.f32 %v7431_v18, %v2994_v43  ;;  %6405 = vst.msk [vmem:[%s745_s29] sm:$0xff] %vm11280_vm0, %v2994_v43 }
0x12d5   : > { %6706 = vmatmul.msk.f32.vlgmr.msra.gmra.mxu1 %vm11280_vm0, %v2995_v59 }
0x12d7   : > { %5166 = vrot.lane.b32.xlu0 %v8628_v61, %s11328_s25 }
0x12d9   : > { %v8795_v47 = vpop.permute.xlu0 %4133 }
0x12dd   : > { %6707 = vmatmul.msk.f32.vlgmr.msrb.gmra.mxu1 %vm11280_vm0, %v2994_v43 }
0x12df   : > { %5170 = vrot.lane.b32.xlu0 %v8634_v23, %s11328_s25 }
0x12e1   : > { %v8799_v13 = vpop.permute.xlu0 %4135 }
0x12e7   : > { %5515 = vrot.lane.b32.xlu0 %v8634_v23, %s11341_s4 }
0x12e9   : > { %v8803_v2 = vpop.permute.xlu0 %4137 }
0x12ef   : > { %5174 = vrot.lane.b32.xlu0 %v8642_v50, %s11328_s25 }
0x12f1   : > { %v8807_v17 = vpop.permute.xlu0 %4139 }
0x12f7   : > { %5519 = vrot.lane.b32.xlu0 %v8642_v50, %s11341_s4 }
0x12f9   : > { %v8811_v22 = vpop.permute.xlu0 %4470 }
0x1301   : > { %v8817_v0 = vpop.permute.xlu0 %4472 }
0x1309   : > { %v8823_v55 = vpop.permute.xlu0 %4474 }
0x1311   : > { %v8838_v52 = vpop.permute.xlu0 %4821 }
0x1352   : > { %v3069_v5 = vpop.f32.mrf.mxu1 }
0x1353   : > { %v3070_v62 = vadd.f32 %v7082_v3, %v3069_v5 }
0x1355   : > { %4141 = vrot.lane.b32.xlu2 %v3070_v62, %s11339_s24  ;;  %3450 = vrot.lane.b32.xlu1 %v3070_v62, %s11338_s11 }
0x1356   : > { %6708 = vmatpush.xpose.msk.msrb.mxu2 %vm1797_vm5, %v3070_v62 }
0x1359   : > { %6709 = vmatmul.msk.f32.vlgmr.msrb.gmra.mxu2 %vm1797_vm5, %v8620_v60  ;;  %v8855_v60 = vpop.permute.xlu0 %4480 }
0x135a   : > { %v3098_v20 = vpop.f32.mrf.mxu1 }
0x135b   : > { %v8844_v39 = vadd.f32 %v7083_v49, %v3098_v20 }
0x135d   : > { %11342 = vst [vmem:[#allocation13_spill] sm:$0xff] %v8844_v39  ;;  %4402 = vrot.lane.b32.xlu0 %v8844_v39, %s11339_s24  ;;  %3408 = vmatpush.msra.mxu1 %v8844_v39 }
0x135e   : > { %4831 = vrot.lane.b32.xlu2 %v3070_v62, %s11340_s22  ;;  %3796 = vrot.lane.b32.xlu1 %v3070_v62, %s11326_s3 }
0x1361   : > { %6710 = vmatmul.msk.f32.gmra.mxu2 %vm1797_vm5, %v8626_v56  ;;  %v8866_v21 = vpop.permute.xlu0 %4482  ;;  %v8871_v56 = vpop.permute.xlu2 %4127 }
0x1366   : > { %3712 = vrot.lane.b32.xlu2 %v8844_v39, %s11338_s11  ;;  %4486 = vrot.lane.b32.xlu1 %v3070_v62, %s11327_s7  ;;  %s11463_s11 = smov 14  }
0x1369   : > { %6711 = vmatmul.msk.f32.gmra.mxu2 %vm1797_vm5, %v8604_v51  ;;  %v8880_v51 = vpop.permute.xlu0 %5162  ;;  %v3787_v1 = vpop.permute.xlu2 %3786 }
0x136e   : > { %4057 = vrot.lane.b32.xlu2 %v8844_v39, %s11326_s3  ;;  %5176 = vrot.lane.b32.xlu1 %v3070_v62, %s11328_s25  ;;  %s11447_s3 = smov 2  }
0x1371   : > { %6712 = vmatmul.msk.f32.gmra.mxu2 %vm1797_vm5, %v8628_v61  ;;  %v8888_v26 = vpop.permute.xlu0 %5507  ;;  %v8892_v61 = vpop.permute.xlu2 %4476 }
0x1376   : > { %4747 = vrot.lane.b32.xlu2 %v8844_v39, %s11327_s7  ;;  %5521 = vrot.lane.b32.xlu1 %v3070_v62, %s11341_s4  ;;  %s11450_s7 = smov 6  }
0x1379   : > { %6713 = vmatmul.msk.f32.gmra.mxu2 %vm1797_vm5, %v8611_v40  ;;  %v8898_v36 = vpop.permute.xlu0 %5164  ;;  %v8900_v40 = vpop.permute.xlu2 %4823 }
0x137e   : > { %5092 = vrot.lane.b32.xlu1 %v8844_v39, %s11340_s22  ;;  %s7460_s22 = scalar_lea.hbm %s11482_s27, 16 }
0x1381   : > { %6714 = vmatmul.msk.f32.gmra.mxu2 %vm1797_vm5, %v8634_v23  ;;  %v8906_v15 = vpop.permute.xlu0 %5509  ;;  %v8908_v7 = vpop.permute.xlu2 %5505 }
0x1382   : > { %v8910_v23 = vpop.permute.xlu1 %4829 }
0x1389   : > { %6715 = vmatmul.msk.f32.gmra.mxu2 %vm1797_vm5, %v8616_v57  ;;  %v8912_v45 = vpop.permute.xlu2 %5168  ;;  %v8914_v48 = vpop.permute.xlu0 %5166 }
0x138a   : > { %v8916_v57 = vpop.permute.xlu1 %5160 }
0x1391   : > { %6716 = vmatmul.msk.f32.gmra.mxu2 %vm1797_vm5, %v8642_v50  ;;  %v8918_v31 = vpop.permute.xlu2 %5517  ;;  %v8920_v32 = vpop.permute.xlu0 %5170 }
0x1392   : > { %v8922_v33 = vpop.permute.xlu1 %5511 }
0x1399   : > { %v8924_v50 = vpop.permute.xlu0 %5515 }
0x139a   : > { %v8926_v42 = vpop.permute.xlu1 %5513 }
0x13a1   : > { %v8928_v18 = vpop.permute.xlu0 %5174 }
0x13a2   : > { %v8930_v59 = vpop.permute.xlu1 %5172 }
0x13a9   : > { %v8932_v5 = vpop.permute.xlu0 %5519 }
0x13af   : > { %v4142_v58 = vpop.permute.xlu2 %4141 }
0x13b8   : > { %v4832_v43 = vpop.permute.xlu2 %4831 }
0x13c0   : > { %v3713_v3 = vpop.permute.xlu2 %3712 }
0x13c1   : > { %3754 = vmatpush.msrb.mxu0 %v3713_v3 }
0x13c7   : > { %v3451_v62 = vpop.permute.xlu1 %3450 }
0x13c8   : > { %v4058_v49 = vpop.permute.xlu2 %4057  ;;  %6725 = vmatpush.xpose.msk.msra.mxu3 %vm1797_vm5, %v3451_v62 }
0x13c9   : > { %4099 = vmatpush.msrb.mxu1 %v4058_v49 }
0x13cb   : > { %6726 = vmatmul.msk.f32.vlgmr.msra.gmra.mxu3 %vm1797_vm5, %v8813_v35 }
0x13cc   : > { %6759 = vmatpush.xpose.msk.msrb.mxu3 %vm1797_vm5, %v4142_v58 }
0x13cf   : > { %v4403_v20 = vpop.permute.xlu0 %4402 }
0x13d0   : > { %6793 = vmatpush.xpose.msk.msra.mxu3 %vm1797_vm5, %v4832_v43  ;;  %v3797_v9 = vpop.permute.xlu1 %3796  ;;  %4444 = vmatpush.msra.mxu0 %v4403_v20 }
0x13d1   : > { %6742 = vmatpush.xpose.msk.msra.mxu2 %vm1797_vm5, %v3797_v9 }
0x13d3   : > { %6727 = vmatmul.msk.f32.gmra.mxu3 %vm1797_vm5, %v8787_v38 }
0x13d4   : > { %6743 = vmatmul.msk.f32.vlgmr.msra.gmra.mxu2 %vm1797_vm5, %v8789_v27 }
0x13d8   : > { %v4487_v3 = vpop.permute.xlu1 %4486 }
0x13d9   : > { %6776 = vmatpush.xpose.msk.msrb.mxu2 %vm1797_vm5, %v4487_v3 }
0x13db   : > { %6728 = vmatmul.msk.f32.gmra.mxu3 %vm1797_vm5, %v8775_v24 }
0x13dc   : > { %v3145_v35 = vpop.f32.mrf.mxu2  ;;  %6744 = vmatmul.msk.f32.gmra.mxu2 %vm1797_vm5, %v8793_v46 }
0x13dd   : > { %v8949_v58 = vmul.f32 0.70710677, %v3145_v35 }
0x13df   : > { %v3177_v9 = vsel %vm908_vm2, %v8949_v58, -inf }
0x13e0   : > { %3178 = vmax.xlane.f32.xlu1 %v3177_v9  ;;  %v5177_v38 = vpop.permute.xlu1 %5176 }
0x13e1   : > { %6810 = vmatpush.xpose.msk.msra.mxu2 %vm1797_vm5, %v5177_v38 }
0x13e3   : > { %6729 = vmatmul.msk.f32.gmra.mxu3 %vm1797_vm5, %v8819_v41 }
0x13e4   : > { %v3148_v27 = vpop.f32.mrf.mxu2  ;;  %6745 = vmatmul.msk.f32.gmra.mxu2 %vm1797_vm5, %v8797_v19 }
0x13e5   : > { %v8958_v24 = vmul.f32 0.70710677, %v3148_v27 }
0x13e7   : > { %v3180_v46 = vsel %vm908_vm2, %v8958_v24, -inf }
0x13e8   : > { %3181 = vmax.xlane.f32.xlu2 %v3180_v46 }
0x13eb   : > { %6730 = vmatmul.msk.f32.gmra.mxu3 %vm1797_vm5, %v8781_v11 }
0x13ec   : > { %v3151_v43 = vpop.f32.mrf.mxu2  ;;  %6746 = vmatmul.msk.f32.gmra.mxu2 %vm1797_vm5, %v3787_v1 }
0x13ed   : > { %v8965_v62 = vmul.f32 0.70710677, %v3151_v43 }
0x13ef   : > { %v3183_v41 = vsel %vm908_vm2, %v8965_v62, -inf }
0x13f0   : > { %3184 = vmax.xlane.f32.xlu0 %v3183_v41 }
0x13f3   : > { %6731 = vmatmul.msk.f32.gmra.mxu3 %vm1797_vm5, %v8828_v12 }
0x13f4   : > { %v3154_v19 = vpop.f32.mrf.mxu2  ;;  %6747 = vmatmul.msk.f32.gmra.mxu2 %vm1797_vm5, %v8805_v6 }
0x13f5   : > { %v8973_v49 = vmul.f32 0.70710677, %v3154_v19 }
0x13f7   : > { %v3186_v11 = vsel %vm908_vm2, %v8973_v49, -inf }
0x13f8   : > { %3187 = vmax.xlane.f32.xlu1 %v3186_v11 }
0x13fb   : > { %6732 = vmatmul.msk.f32.gmra.mxu3 %vm1797_vm5, %v8785_v4 }
0x13fc   : > { %v3157_v1 = vpop.f32.mrf.mxu2  ;;  %6748 = vmatmul.msk.f32.gmra.mxu2 %vm1797_vm5, %v8809_v63  ;;  %v5522_v63 = vpop.permute.xlu1 %5521 }
0x13fd   : > { %v8981_v20 = vmul.f32 0.70710677, %v3157_v1 }
0x13ff   : > { %v3189_v12 = vsel %vm908_vm2, %v8981_v20, -inf }
0x1400   : > { %3190 = vmax.xlane.f32.xlu2 %v3189_v12 }
0x1403   : > { %6733 = vmatmul.msk.f32.gmra.mxu3 %vm1797_vm5, %v8842_v37 }
0x1404   : > { %v3160_v6 = vpop.f32.mrf.mxu2  ;;  %6749 = vmatmul.msk.f32.gmra.mxu2 %vm1797_vm5, %v8815_v54 }
0x1405   : > { %v8989_v3 = vmul.f32 0.70710677, %v3160_v6 }
0x1407   : > { %v3192_v4 = vsel %vm908_vm2, %v8989_v3, -inf }
0x1408   : > { %3193 = vmax.xlane.f32.xlu0 %v3192_v4 }
0x140b   : > { %6760 = vmatmul.msk.f32.vlgmr.msrb.gmra.mxu3 %vm1797_vm5, %v8857_v16 }
0x140c   : > { %v3163_v35 = vpop.f32.mrf.mxu2  ;;  %6750 = vmatmul.msk.f32.gmra.mxu2 %vm1797_vm5, %v8821_v53  ;;  %6827 = vmatpush.xpose.msk.msrb.mxu3 %vm1797_vm5, %v5522_v63 }
0x140d   : > { %v8998_v37 = vmul.f32 0.70710677, %v3163_v35 }
0x140f   : > { %v3195_v54 = vsel %vm908_vm2, %v8998_v37, -inf }
0x1410   : > { %3196 = vmax.xlane.f32.xlu1 %v3195_v54 }
0x1413   : > { %6761 = vmatmul.msk.f32.gmra.mxu3 %vm1797_vm5, %v8871_v56 }
0x1414   : > { %v3166_v9 = vpop.f32.mrf.mxu2  ;;  %6777 = vmatmul.msk.f32.vlgmr.msrb.gmra.mxu2 %vm1797_vm5, %v8811_v22 }
0x1415   : > { %v9006_v16 = vmul.f32 0.70710677, %v3166_v9 }
0x1417   : > { %v3198_v53 = vsel %vm908_vm2, %v9006_v16, -inf }
0x1418   : > { %3199 = vmax.xlane.f32.xlu2 %v3198_v53 }
0x141b   : > { %6762 = vmatmul.msk.f32.gmra.mxu3 %vm1797_vm5, %v8791_v44  ;;  %v9038_v44 = vpop.permute.xlu1 %5092 }
0x141c   : > { %6778 = vmatmul.msk.f32.gmra.mxu2 %vm1797_vm5, %v8817_v0  ;;  %11343 = vst [vmem:[#allocation14_spill] sm:$0xff] %v9038_v44 }
0x1423   : > { %6763 = vmatmul.msk.f32.gmra.mxu3 %vm1797_vm5, %v8801_v29 }
0x1424   : > { %6779 = vmatmul.msk.f32.gmra.mxu2 %vm1797_vm5, %v8823_v55 }
0x142b   : > { %6764 = vmatmul.msk.f32.gmra.mxu3 %vm1797_vm5, %v8795_v47 }
0x142c   : > { %6780 = vmatmul.msk.f32.gmra.mxu2 %vm1797_vm5, %v8892_v61 }
0x1433   : > { %6765 = vmatmul.msk.f32.gmra.mxu3 %vm1797_vm5, %v8799_v13 }
0x1434   : > { %6781 = vmatmul.msk.f32.gmra.mxu2 %vm1797_vm5, %v8875_v8 }
0x143b   : > { %6766 = vmatmul.msk.f32.gmra.mxu3 %vm1797_vm5, %v8803_v2  ;;  %v9044_v2 = vpop.permute.xlu2 %4747 }
0x143c   : > { %6782 = vmatmul.msk.f32.gmra.mxu2 %vm1797_vm5, %v8855_v60 }
0x1443   : > { %6767 = vmatmul.msk.f32.gmra.mxu3 %vm1797_vm5, %v8807_v17 }
0x1444   : > { %6783 = vmatmul.msk.f32.gmra.mxu2 %vm1797_vm5, %v8866_v21 }
0x144b   : > { %6794 = vmatmul.msk.f32.vlgmr.msra.gmra.mxu3 %vm1797_vm5, %v8830_v14 }
0x144c   : > { %6784 = vmatmul.msk.f32.gmra.mxu2 %vm1797_vm5, %v8902_v30 }
0x144e   : > { %v3487_v47 = vpop.f32.mrf.mxu3 }
0x144f   : > { %v9040_v13 = vmul.f32 0.70710677, %v3487_v47 }
0x1451   : > { %v3519_v29 = vsel %vm908_vm2, %v9040_v13, -inf }
0x1452   : > { %3520 = vmax.xlane.f32.xlu2 %v3519_v29 }
0x1453   : > { %6795 = vmatmul.msk.f32.gmra.mxu3 %vm1797_vm5, %v8851_v34  ;;  %v3179_v17 = vpop.xlane.xlu1 %3178 }
0x1454   : > { %6811 = vmatmul.msk.f32.vlgmr.msra.gmra.mxu2 %vm1797_vm5, %v8916_v57  ;;  %v3201_v60 = vsub.f32 %v8949_v58, %v3179_v17 }
0x1456   : > { %v3490_v22 = vpop.f32.mrf.mxu3  ;;  %v3209_v61 = vmul.f32 1.442695, %v3201_v60 }
0x1457   : > { %v9050_v0 = vmul.f32 0.70710677, %v3490_v22  ;;  %v3833_v55 = vpop.f32.mrf.mxu2 }
0x1458   : > { %v9052_v14 = vmul.f32 0.70710677, %v3833_v55 }
0x1459   : > { %v3522_v21 = vsel %vm908_vm2, %v9050_v0, -inf }
0x145a   : > { %3523 = vmax.xlane.f32.xlu0 %v3522_v21  ;;  %v3865_v56 = vsel %vm908_vm2, %v9052_v14, -inf }
0x145b   : > { %v3182_v34 = vpop.xlane.xlu2 %3181  ;;  %3866 = vmax.xlane.f32.xlu1 %v3865_v56  ;;  %6796 = vmatmul.msk.f32.gmra.mxu3 %vm1797_vm5, %v8862_v10 }
0x145c   : > { %v3202_v8 = vsub.f32 %v8958_v24, %v3182_v34  ;;  %6812 = vmatmul.msk.f32.gmra.mxu2 %vm1797_vm5, %v8880_v51 }
0x145e   : > { %v3211_v30 = vmul.f32 1.442695, %v3202_v8  ;;  %v3493_v57 = vpop.f32.mrf.mxu3 }
0x145f   : > { %v9064_v58 = vmul.f32 0.70710677, %v3493_v57  ;;  %v3836_v38 = vpop.f32.mrf.mxu2 }
0x1460   : > { %7159 = vpow2.f32 %v3211_v30  ;;  %v9066_v27 = vmul.f32 0.70710677, %v3836_v38 }
0x1461   : > { %7161 = vpow2.f32 %v3209_v61  ;;  %v3525_v46 = vsel %vm908_vm2, %v9064_v58, -inf }
0x1462   : > { %3526 = vmax.xlane.f32.xlu2 %v3525_v46  ;;  %v3868_v10 = vsel %vm908_vm2, %v9066_v27, -inf }
0x1463   : > { %v3185_v24 = vpop.xlane.xlu0 %3184  ;;  %3869 = vmax.xlane.f32.xlu0 %v3868_v10  ;;  %6797 = vmatmul.msk.f32.gmra.mxu3 %vm1797_vm5, %v8838_v52 }
0x1464   : > { %v3203_v51 = vsub.f32 %v8965_v62, %v3185_v24  ;;  %6813 = vmatmul.msk.f32.gmra.mxu2 %vm1797_vm5, %v8898_v36 }
0x1466   : > { %v9077_v43 = vpop.eup %7159  ;;  %v3213_v41 = vmul.f32 1.442695, %v3203_v51  ;;  %v3496_v19 = vpop.f32.mrf.mxu3 }
0x1467   : > { %v9079_v11 = vpop.eup %7161  ;;  %v3839_v1 = vpop.f32.mrf.mxu2  ;;  %v3228_v12 = vsel %vm908_vm2, %v9077_v43, 0.0  ;;  %v9085_v6 = vmul.f32 0.70710677, %v3496_v19 }
0x1468   : > { %7163 = vpow2.f32 %v3213_v41  ;;  %3229 = vadd.xlane.f32.xlu1 %v3228_v12  ;;  %v3225_v52 = vsel %vm908_vm2, %v9079_v11, 0.0  ;;  %v9094_v63 = vmul.f32 0.70710677, %v3839_v1 }
0x1469   : > { %v3528_v47 = vsel %vm908_vm2, %v9085_v6, -inf }
0x146b   : > { %3226 = vadd.xlane.f32.xlu0 %v3225_v52  ;;  %v3188_v62 = vpop.xlane.xlu1 %3187  ;;  %6798 = vmatmul.msk.f32.gmra.mxu3 %vm1797_vm5, %v8900_v40  ;;  %v3871_v40 = vsel %vm908_vm2, %v9094_v63, -inf }
0x146c   : > { %v3204_v36 = vsub.f32 %v8973_v49, %v3188_v62  ;;  %6814 = vmatmul.msk.f32.gmra.mxu2 %vm1797_vm5, %v8914_v48 }
0x146e   : > { %v9092_v4 = vpop.eup %7163  ;;  %v3215_v35 = vmul.f32 1.442695, %v3204_v36  ;;  %v3499_v54 = vpop.f32.mrf.mxu3 }
0x146f   : > { %v3842_v9 = vpop.f32.mrf.mxu2  ;;  %v3231_v53 = vsel %vm908_vm2, %v9092_v4, 0.0  ;;  %v9102_v48 = vmul.f32 0.70710677, %v3499_v54 }
0x1470   : > { %3232 = vadd.xlane.f32.xlu2 %v3231_v53  ;;  %3529 = vmax.xlane.f32.xlu1 %v3528_v47  ;;  %7165 = vpow2.f32 %v3215_v35  ;;  %v9104_v49 = vmul.f32 0.70710677, %v3842_v9 }
0x1471   : > { %v3531_v56 = vsel %vm908_vm2, %v9102_v48, -inf }
0x1472   : > { %v3874_v34 = vsel %vm908_vm2, %v9104_v49, -inf }
0x1473   : > { %v3191_v29 = vpop.xlane.xlu2 %3190  ;;  %3872 = vmax.xlane.f32.xlu0 %v3871_v40  ;;  %6799 = vmatmul.msk.f32.gmra.mxu3 %vm1797_vm5, %v8884_v25 }
0x1474   : > { %v3205_v17 = vsub.f32 %v8981_v20, %v3191_v29  ;;  %6815 = vmatmul.msk.f32.gmra.mxu2 %vm1797_vm5, %v8912_v45 }
0x1476   : > { %v3217_v22 = vmul.f32 1.442695, %v3205_v17  ;;  %v3502_v55 = vpop.f32.mrf.mxu3  ;;  %v9111_v60 = vpop.eup %7165 }
0x1477   : > { %v3845_v21 = vpop.f32.mrf.mxu2  ;;  %v3234_v25 = vsel %vm908_vm2, %v9111_v60, 0.0  ;;  %v9119_v20 = vmul.f32 0.70710677, %v3502_v55 }
0x1478   : > { %3532 = vmax.xlane.f32.xlu2 %v3531_v56  ;;  %3875 = vmax.xlane.f32.xlu1 %v3874_v34  ;;  %7167 = vpow2.f32 %v3217_v22  ;;  %v9121_v45 = vmul.f32 0.70710677, %v3845_v21 }
0x1479   : > { %v3534_v38 = vsel %vm908_vm2, %v9119_v20, -inf }
0x147a   : > { %v3877_v46 = vsel %vm908_vm2, %v9121_v45, -inf }
0x147b   : > { %3235 = vadd.xlane.f32.xlu0 %v3234_v25  ;;  %6800 = vmatmul.msk.f32.gmra.mxu3 %vm1797_vm5, %v8894_v28  ;;  %v3194_v8 = vpop.xlane.xlu0 %3193 }
0x147c   : > { %6816 = vmatmul.msk.f32.gmra.mxu2 %vm1797_vm5, %v8920_v32  ;;  %v3206_v10 = vsub.f32 %v8989_v3, %v3194_v8 }
0x147e   : > { %v3505_v61 = vpop.f32.mrf.mxu3  ;;  %v9127_v30 = vpop.eup %7167  ;;  %v3219_v32 = vmul.f32 1.442695, %v3206_v10 }
0x147f   : > { %v3848_v57 = vpop.f32.mrf.mxu2  ;;  %v3237_v28 = vsel %vm908_vm2, %v9127_v30, 0.0  ;;  %v9142_v51 = vmul.f32 0.70710677, %v3505_v61 }
0x1480   : > { %3535 = vmax.xlane.f32.xlu1 %v3534_v38  ;;  %3878 = vmax.xlane.f32.xlu2 %v3877_v46  ;;  %v9136_v24 = vmul.f32 0.70710677, %v3848_v57  ;;  %7169 = vpow2.f32 %v3219_v32 }
0x1482   : > { %v3880_v3 = vsel %vm908_vm2, %v9136_v24, -inf }
0x1483   : > { %3238 = vadd.xlane.f32.xlu0 %v3237_v28  ;;  %6801 = vmatmul.msk.f32.gmra.mxu3 %vm1797_vm5, %v8910_v23  ;;  %v3197_v19 = vpop.xlane.xlu1 %3196 }
0x1484   : > { %6817 = vmatmul.msk.f32.gmra.mxu2 %vm1797_vm5, %v8930_v59  ;;  %v3207_v52 = vsub.f32 %v8998_v37, %v3197_v19  ;;  %v3537_v59 = vsel %vm908_vm2, %v9142_v51, -inf }
0x1486   : > { %v3508_v41 = vpop.f32.mrf.mxu3  ;;  %v3221_v62 = vmul.f32 1.442695, %v3207_v52  ;;  %v9159_v37 = vpop.eup %7169 }
0x1487   : > { %v3851_v1 = vpop.f32.mrf.mxu2  ;;  %v9157_v36 = vmul.f32 0.70710677, %v3508_v41 }
0x1488   : > { %v9146_v12 = vmul.f32 0.70710677, %v3851_v1  ;;  %3881 = vmax.xlane.f32.xlu1 %v3880_v3  ;;  %7171 = vpow2.f32 %v3221_v62 }
0x1489   : > { %v3540_v47 = vsel %vm908_vm2, %v9157_v36, -inf }
0x148a   : > { %v3883_v23 = vsel %vm908_vm2, %v9146_v12, -inf }
0x148b   : > { %3884 = vmax.xlane.f32.xlu2 %v3883_v23  ;;  %3538 = vmax.xlane.f32.xlu0 %v3537_v59  ;;  %v3200_v35 = vpop.xlane.xlu2 %3199 }
0x148c   : > { %6818 = vmatmul.msk.f32.gmra.mxu2 %vm1797_vm5, %v8928_v18  ;;  %6828 = vmatmul.msk.f32.vlgmr.msrb.gmra.mxu3 %vm1797_vm5, %v8908_v7  ;;  %v3208_v53 = vsub.f32 %v9006_v16, %v3200_v35  ;;  %v3240_v18 = vsel %vm908_vm2, %v9159_v37, 0.0 }
0x148e   : > { %v4178_v54 = vpop.f32.mrf.mxu3  ;;  %v3223_v7 = vmul.f32 1.442695, %v3208_v53  ;;  %v9170_v22 = vpop.eup %7171 }
0x148f   : > { %v3854_v9 = vpop.f32.mrf.mxu2  ;;  %v9184_v25 = vmul.f32 0.70710677, %v4178_v54 }
0x1490   : > { %v9168_v40 = vmul.f32 0.70710677, %v3854_v9  ;;  %7173 = vpow2.f32 %v3223_v7 }
0x1491   : > { %v4210_v46 = vsel %vm908_vm2, %v9184_v25, -inf }
0x1492   : > { %v3886_v21 = vsel %vm908_vm2, %v9168_v40, -inf }
0x1493   : > { %3541 = vmax.xlane.f32.xlu2 %v3540_v47  ;;  %3241 = vadd.xlane.f32.xlu0 %v3240_v18 }
0x1494   : > { %6829 = vmatmul.msk.f32.gmra.mxu3 %vm1797_vm5, %v8888_v26  ;;  %v3243_v26 = vsel %vm908_vm2, %v9170_v22, 0.0 }
0x1496   : > { %v4181_v29 = vpop.f32.mrf.mxu3  ;;  %v9182_v34 = vpop.eup %7173 }
0x1497   : > { %v4523_v17 = vpop.f32.mrf.mxu2  ;;  %v3246_v38 = vsel %vm908_vm2, %v9182_v34, 0.0  ;;  %v9198_v28 = vmul.f32 0.70710677, %v4181_v29 }
0x1498   : > { %v9172_v16 = vmul.f32 0.70710677, %v4523_v17 }
0x1499   : > { %v4213_v19 = vsel %vm908_vm2, %v9198_v28, -inf }
0x149a   : > { %v4555_v55 = vsel %vm908_vm2, %v9172_v16, -inf }
0x149b   : > { %4556 = vmax.xlane.f32.xlu1 %v4555_v55  ;;  %3887 = vmax.xlane.f32.xlu0 %v3886_v21 }
0x149c   : > { %3244 = vadd.xlane.f32.xlu2 %v3243_v26  ;;  %6830 = vmatmul.msk.f32.gmra.mxu3 %vm1797_vm5, %v8906_v15 }
0x149e   : > { %v4184_v56 = vpop.f32.mrf.mxu3 }
0x149f   : > { %v4526_v8 = vpop.f32.mrf.mxu2  ;;  %v9196_v15 = vmul.f32 0.70710677, %v4184_v56 }
0x14a0   : > { %v9186_v61 = vmul.f32 0.70710677, %v4526_v8 }
0x14a1   : > { %v4216_v41 = vsel %vm908_vm2, %v9196_v15, -inf }
0x14a2   : > { %v4558_v57 = vsel %vm908_vm2, %v9186_v61, -inf }
0x14a3   : > { %4559 = vmax.xlane.f32.xlu1 %v4558_v57  ;;  %3247 = vadd.xlane.f32.xlu0 %v3246_v38 }
0x14a4   : > { %4211 = vmax.xlane.f32.xlu2 %v4210_v46  ;;  %6831 = vmatmul.msk.f32.gmra.mxu3 %vm1797_vm5, %v8922_v33 }
0x14a6   : > { %v4187_v10 = vpop.f32.mrf.mxu3 }
0x14a7   : > { %v4529_v32 = vpop.f32.mrf.mxu2  ;;  %v9218_v35 = vmul.f32 0.70710677, %v4187_v10 }
0x14a8   : > { %v9206_v3 = vmul.f32 0.70710677, %v4529_v32 }
0x14a9   : > { %v4219_v53 = vsel %vm908_vm2, %v9218_v35, -inf }
0x14aa   : > { %v4561_v59 = vsel %vm908_vm2, %v9206_v3, -inf }
0x14ab   : > { %4217 = vmax.xlane.f32.xlu1 %v4216_v41 }
0x14ac   : > { %4214 = vmax.xlane.f32.xlu2 %v4213_v19  ;;  %6832 = vmatmul.msk.f32.gmra.mxu3 %vm1797_vm5, %v8926_v42 }
0x14ae   : > { %v4190_v1 = vpop.f32.mrf.mxu3 }
0x14af   : > { %v4532_v33 = vpop.f32.mrf.mxu2  ;;  %v9216_v62 = vmul.f32 0.70710677, %v4190_v1 }
0x14b0   : > { %v9208_v52 = vmul.f32 0.70710677, %v4532_v33 }
0x14b1   : > { %v4222_v9 = vsel %vm908_vm2, %v9216_v62, -inf }
0x14b2   : > { %v4564_v23 = vsel %vm908_vm2, %v9208_v52, -inf }
0x14b3   : > { %4565 = vmax.xlane.f32.xlu1 %v4564_v23 }
0x14b4   : > { %4562 = vmax.xlane.f32.xlu2 %v4561_v59  ;;  %6833 = vmatmul.msk.f32.gmra.mxu3 %vm1797_vm5, %v8924_v50 }
0x14b6   : > { %v4193_v42 = vpop.f32.mrf.mxu3 }
0x14b7   : > { %v4535_v54 = vpop.f32.mrf.mxu2  ;;  %v9228_v18 = vmul.f32 0.70710677, %v4193_v42 }
0x14b8   : > { %v9226_v47 = vmul.f32 0.70710677, %v4535_v54 }
0x14b9   : > { %v4225_v21 = vsel %vm908_vm2, %v9228_v18, -inf }
0x14ba   : > { %v4567_v17 = vsel %vm908_vm2, %v9226_v47, -inf }
0x14bb   : > { %4223 = vmax.xlane.f32.xlu1 %v4222_v9 }
0x14bc   : > { %4220 = vmax.xlane.f32.xlu2 %v4219_v53  ;;  %6834 = vmatmul.msk.f32.gmra.mxu3 %vm1797_vm5, %v8918_v31 }
0x14be   : > { %v4196_v50 = vpop.f32.mrf.mxu3 }
0x14bf   : > { %v4538_v7 = vpop.f32.mrf.mxu2  ;;  %v9240_v31 = vmul.f32 0.70710677, %v4196_v50 }
0x14c0   : > { %v9230_v29 = vmul.f32 0.70710677, %v4538_v7 }
0x14c1   : > { %v4228_v32 = vsel %vm908_vm2, %v9240_v31, -inf }
0x14c2   : > { %v4570_v55 = vsel %vm908_vm2, %v9230_v29, -inf }
0x14c3   : > { %4568 = vmax.xlane.f32.xlu1 %v4567_v17  ;;  %4571 = vmax.xlane.f32.xlu0 %v4570_v55 }
0x14c4   : > { %4226 = vmax.xlane.f32.xlu2 %v4225_v21  ;;  %6835 = vmatmul.msk.f32.gmra.mxu3 %vm1797_vm5, %v8932_v5 }
0x14c5   : > { %v3521_v26 = vpop.xlane.xlu2 %3520 }
0x14c6   : > { %v4199_v56 = vpop.f32.mrf.mxu3  ;;  %v3543_v46 = vsub.f32 %v9040_v13, %v3521_v26 }
0x14c7   : > { %v9242_v8 = vmul.f32 0.70710677, %v4199_v56  ;;  %v4541_v57 = vpop.f32.mrf.mxu2 }
0x14c8   : > { %v9244_v38 = vmul.f32 0.70710677, %v4541_v57  ;;  %v3551_v41 = vmul.f32 1.442695, %v3543_v46 }
0x14c9   : > { %v4231_v10 = vsel %vm908_vm2, %v9242_v8, -inf }
0x14ca   : > { %v4573_v5 = vsel %vm908_vm2, %v9244_v38, -inf  ;;  %7175 = vpow2.f32 %v3551_v41 }
0x14cb   : > { %4232 = vmax.xlane.f32.xlu1 %v4231_v10  ;;  %4229 = vmax.xlane.f32.xlu0 %v4228_v32 }
0x14cc   : > { %4574 = vmax.xlane.f32.xlu2 %v4573_v5 }
0x14cd   : > { %v3524_v19 = vpop.xlane.xlu0 %3523 }
0x14ce   : > { %v4868_v1 = vpop.f32.mrf.mxu3  ;;  %v3867_v33 = vpop.xlane.xlu1 %3866  ;;  %v3544_v42 = vsub.f32 %v9050_v0, %v3524_v19 }
0x14cf   : > { %v4544_v23 = vpop.f32.mrf.mxu2  ;;  %v9253_v59 = vmul.f32 0.70710677, %v4868_v1  ;;  %v3889_v9 = vsub.f32 %v9052_v14, %v3867_v33 }
0x14d0   : > { %v9255_v13 = vmul.f32 0.70710677, %v4544_v23  ;;  %v3553_v50 = vmul.f32 1.442695, %v3544_v42  ;;  %v9263_v21 = vpop.eup %7175 }
0x14d1   : > { %v4900_v54 = vsel %vm908_vm2, %v9253_v59, -inf  ;;  %v3897_v7 = vmul.f32 1.442695, %v3889_v9  ;;  %11345 = vst [vmem:[#allocation16_spill] sm:$0xff] %v9263_v21  ;;  %v3567_v14 = vsel %vm908_vm2, %v9263_v21, 0.0 }
0x14d2   : > { %11344 = vst [vmem:[#allocation15_spill] sm:$0xff] %v9255_v13  ;;  %v4576_v53 = vsel %vm908_vm2, %v9255_v13, -inf  ;;  %7177 = vpow2.f32 %v3553_v50 }
0x14d3   : > { %4577 = vmax.xlane.f32.xlu1 %v4576_v53  ;;  %7179 = vpow2.f32 %v3897_v7 }
0x14d4   : > { %4901 = vmax.xlane.f32.xlu2 %v4900_v54 }
0x14d5   : > { %v3527_v10 = vpop.xlane.xlu2 %3526 }
0x14d6   : > { %v3870_v17 = vpop.xlane.xlu0 %3869  ;;  %v4871_v55 = vpop.f32.mrf.mxu3  ;;  %v3545_v33 = vsub.f32 %v9064_v58, %v3527_v10 }
0x14d7   : > { %v3890_v26 = vsub.f32 %v9066_v27, %v3870_v17  ;;  %v5213_v56 = vpop.f32.mrf.mxu2  ;;  %v9303_v10 = vmul.f32 0.70710677, %v4871_v55 }
0x14d8   : > { %v9266_v0 = vmul.f32 0.70710677, %v5213_v56  ;;  %v9277_v41 = vpop.eup %7177 }
0x14d9   : > { %v3899_v57 = vmul.f32 1.442695, %v3890_v26  ;;  %11346 = vst [vmem:[#allocation17_spill] sm:$0xff] %v9277_v41  ;;  %v9279_v19 = vpop.eup %7179  ;;  %v3570_v54 = vsel %vm908_vm2, %v9277_v41, 0.0  ;;  %v3555_v26 = vmul.f32 1.442695, %v3545_v33 }
0x14da   : > { %v5245_v46 = vsel %vm908_vm2, %v9266_v0, -inf  ;;  %11347 = vst [vmem:[#allocation18_spill] sm:$0xff] %v9279_v19  ;;  %v3913_v7 = vsel %vm908_vm2, %v9279_v19, 0.0 }
0x14db   : > { %7181 = vpow2.f32 %v3899_v57  ;;  %3568 = vadd.xlane.f32.xlu1 %v3567_v14  ;;  %5246 = vmax.xlane.f32.xlu0 %v5245_v46  ;;  %v9272_v32 = vpop.xlane.xlu1 %3229  ;;  %11350 = vst [vmem:[#allocation21_spill] sm:$0xff] %v9303_v10 }
0x14dc   : > { %7183 = vrcp.f32 %v9272_v32  ;;  %vm3269_vm11 = vweird.f32 %v9272_v32 }
0x14de   : > { %v3227_v27 = vpop.xlane.xlu0 %3226  ;;  %v9275_v5 = vpop.f32.mrf.mxu3 }
0x14df   : > { %7185 = vrcp.f32 %v3227_v27  ;;  %v5216_v42 = vpop.f32.mrf.mxu2  ;;  %v3260_v33 = vand.u32 2147483648, %v3227_v27  ;;  %vm3254_vm3 = vweird.f32 %v3227_v27 }
0x14e0   : > { %v9299_v57 = vmul.f32 0.70710677, %v5216_v42 }
0x14e1   : > { %v9281_v1 = vpop.eup %7181 }
0x14e2   : > { %11348 = vst [vmem:[#allocation19_spill] sm:$0xff] %v9281_v1  ;;  %v9284_v23 = vpop.eup %7183  ;;  %v3916_v9 = vsel %vm908_vm2, %v9281_v1, 0.0  ;;  %v3258_v1 = vand.u32 2147483647, %v3227_v27  ;;  %v5248_v42 = vsel %vm908_vm2, %v9299_v57, -inf }
0x14e3   : > { %v3265_v53 = vmul.f32 %v9284_v23, %v9272_v32  ;;  %v9292_v50 = vpop.xlane.xlu2 %3232  ;;  %3571 = vadd.xlane.f32.xlu0 %v3570_v54  ;;  %3917 = vadd.xlane.f32.xlu2 %v3916_v9  ;;  %v9296_v58 = vpop.xlane.xlu1 %3529  ;;  %11349 = vst [vmem:[#allocation20_spill] sm:$0xff] %v9299_v57  ;;  %vm3270_vm8 = vweird.f32 %v9284_v23 }
0x14e4   : > { %7187 = vrcp.f32 %v9292_v50  ;;  %3914 = vadd.xlane.f32.xlu1 %v3913_v7  ;;  %vm3259_vm7 = vcmp.eq.f32.partialorder %v3258_v1, 8.507059e+37  ;;  %vm9335_vm12 = vmor %vm3269_vm11, %vm3270_vm8 }
0x14e5   : > { %v7186_v17 = vpop.eup %7185  ;;  %v3266_v54 = vsub.f32 1.0, %v3265_v53  ;;  %7189 = vpow2.f32 %v3555_v26 }
0x14e6   : > { %v3250_v56 = vmul.f32 %v7186_v17, %v3227_v27  ;;  %v3873_v14 = vpop.xlane.xlu0 %3872  ;;  %v9301_v46 = vpop.f32.mrf.mxu3  ;;  %vm3255_vm13 = vweird.f32 %v7186_v17  ;;  %v3275_v27 = vand.u32 2147483648, %v9272_v32 }
0x14e7   : > { %v3891_v9 = vsub.f32 %v9094_v63, %v3873_v14  ;;  %v4903_v63 = vsel %vm908_vm2, %v9303_v10, -inf  ;;  %v3267_v26 = vmul.f32 %v9284_v23, %v3266_v54  ;;  %vm3256_vm4 = vmor %vm3254_vm3, %vm3255_vm13 }
0x14e8   : > { %v3251_v39 = vsub.f32 1.0, %v3250_v56 }
0x14e9   : > { %v3901_v19 = vmul.f32 1.442695, %v3891_v9 }
0x14ea   : > { %v9306_v41 = vpop.eup %7187  ;;  %v3252_v7 = vmul.f32 %v7186_v17, %v3251_v39 }
0x14eb   : > { %v3280_v44 = vmul.f32 %v9306_v41, %v9292_v50  ;;  %7191 = vpow2.f32 %v3901_v19  ;;  %v3533_v55 = vpop.xlane.xlu2 %3532  ;;  %5249 = vmax.xlane.f32.xlu0 %v5248_v42  ;;  %v3876_v53 = vpop.xlane.xlu1 %3875  ;;  %v3261_v19 = vor.u32 1.1754944e-38, %v3260_v33  ;;  %vm3285_vm3 = vweird.f32 %v9306_v41 }
0x14ec   : > { %v3253_v56 = vadd.f32 %v7186_v17, %v3252_v7  ;;  %v3547_v39 = vsub.f32 %v9102_v48, %v3533_v55  ;;  %4904 = vmax.xlane.f32.xlu1 %v4903_v63  ;;  %v3892_v14 = vsub.f32 %v9104_v49, %v3876_v53  ;;  %v9320_v13 = vpop.eup %7189  ;;  %v3268_v48 = vadd.f32 %v9284_v23, %v3267_v26 }
0x14ed   : > { %v3281_v54 = vsub.f32 1.0, %v3280_v44  ;;  %v3273_v7 = vand.u32 2147483647, %v9272_v32  ;;  %v3546_v44 = vsub.f32 %v9085_v6, %v9296_v58  ;;  %v3276_v58 = vor.u32 1.1754944e-38, %v3275_v27 }
0x14ee   : > { %v3257_v9 = vsel %vm3256_vm4, %v7186_v17, %v3253_v56  ;;  %v3559_v57 = vmul.f32 1.442695, %v3547_v39  ;;  %v3903_v42 = vmul.f32 1.442695, %v3892_v14  ;;  %v9318_v21 = vpop.xlane.xlu0 %3235  ;;  %v4880_v10 = vpop.f32.mrf.mxu3  ;;  %v3272_v32 = vsel %vm9335_vm12, %v9284_v23, %v3268_v48 }
0x14ef   : > { %7193 = vrcp.f32 %v9318_v21  ;;  %v3262_v49 = vsel %vm3259_vm7, %v3261_v19, %v3257_v9  ;;  %v3282_v6 = vmul.f32 %v9306_v41, %v3281_v54  ;;  %vm3274_vm13 = vcmp.eq.f32.partialorder %v3273_v7, 8.507059e+37 }
0x14f0   : > { %7195 = vpow2.f32 %v3559_v57  ;;  %v3263_v17 = vmul.f32 %v9079_v11, %v3262_v49  ;;  %v3573_v11 = vsel %vm908_vm2, %v9320_v13, 0.0  ;;  %v3557_v26 = vmul.f32 1.442695, %v3546_v44 }
0x14f1   : > { %v9326_v1 = vpop.eup %7191  ;;  %7197 = vpow2.f32 %v3903_v42  ;;  %v3277_v23 = vsel %vm3274_vm13, %v3276_v58, %v3272_v32  ;;  %v3283_v42 = vadd.f32 %v9306_v41, %v3282_v6  ;;  %v3290_v49 = vand.u32 2147483648, %v9292_v50 }
0x14f2   : > { %v3919_v33 = vsel %vm908_vm2, %v9326_v1, 0.0  ;;  %6717 = vmatmul.msk.f32.vlgmr.msra.gmra.mxu1 %vm908_vm2, %v3263_v17  ;;  %v3278_v27 = vmul.f32 %v9077_v43, %v3277_v23  ;;  %vm3284_vm4 = vweird.f32 %v9292_v50  ;;  %v9391_v58 = vmul.f32 0.70710677, %v4880_v10 }
0x14f3   : > { %3920 = vadd.xlane.f32.xlu0 %v3919_v33  ;;  %v9342_v55 = vpop.xlane.xlu1 %3535  ;;  %4789 = vmatpush.msra.mxu1 %v9044_v2  ;;  %v9355_v39 = vpop.xlane.xlu2 %3878  ;;  %v9362_v2 = vmul.f32 0.70710677, %v9275_v5  ;;  %v3288_v5 = vand.u32 2147483647, %v9292_v50  ;;  %vm9375_vm7 = vmor %vm3284_vm4, %vm3285_vm3  ;;  %v3291_v32 = vor.u32 1.1754944e-38, %v3290_v49  ;;  %vm3299_vm11 = vweird.f32 %v9318_v21 }
0x14f4   : > { %3574 = vadd.xlane.f32.xlu1 %v3573_v11  ;;  %v3287_v50 = vsel %vm9375_vm7, %v9306_v41, %v3283_v42  ;;  %v3305_v10 = vand.u32 2147483648, %v9318_v21 }
0x14f5   : > { %v9349_v63 = vpop.eup %7193  ;;  %v4906_v33 = vsel %vm908_vm2, %v9362_v2, -inf  ;;  %vm3289_vm8 = vcmp.eq.f32.partialorder %v3288_v5, 8.507059e+37  ;;  %v3893_v5 = vsub.f32 %v9121_v45, %v9355_v39 }
0x14f6   : > { %v9351_v53 = vpop.eup %7195  ;;  %v3295_v56 = vmul.f32 %v9349_v63, %v9318_v21  ;;  %v9357_v14 = vpop.xlane.xlu0 %3238  ;;  %vm3300_vm12 = vweird.f32 %v9349_v63 }
0x14f7   : > { %v9359_v9 = vpop.eup %7197  ;;  %7199 = vrcp.f32 %v9357_v14  ;;  %v4883_v19 = vpop.f32.mrf.mxu3  ;;  %v3579_v48 = vsel %vm908_vm2, %v9351_v53, 0.0  ;;  %vm9412_vm13 = vmor %vm3299_vm11, %vm3300_vm12  ;;  %vm3314_vm7 = vweird.f32 %v9357_v14 }
0x14f8   : > { %v3296_v54 = vsub.f32 1.0, %v3295_v56  ;;  %3580 = vadd.xlane.f32.xlu2 %v3579_v48  ;;  %7201 = vpow2.f32 %v3557_v26  ;;  %v3922_v17 = vsel %vm908_vm2, %v9359_v9, 0.0  ;;  %v9386_v57 = vmul.f32 0.70710677, %v4883_v19 }
0x14f9   : > { %v3292_v48 = vsel %vm3289_vm8, %v3291_v32, %v3287_v50  ;;  %v3905_v50 = vmul.f32 1.442695, %v3893_v5 }
0x14fa   : > { %v3297_v44 = vmul.f32 %v9349_v63, %v3296_v54  ;;  %6718 = vmatmul.msk.f32.gmra.mxu1 %vm908_vm2, %v3278_v27  ;;  %v4915_v49 = vsel %vm908_vm2, %v9386_v57, -inf  ;;  %v3303_v27 = vand.u32 2147483647, %v9318_v21  ;;  %v3306_v21 = vor.u32 1.1754944e-38, %v3305_v10 }
0x14fb   : > { %3923 = vadd.xlane.f32.xlu0 %v3922_v17  ;;  %v3882_v43 = vpop.xlane.xlu1 %3881 }
0x14fc   : > { %4907 = vmax.xlane.f32.xlu1 %v4906_v33  ;;  %v3894_v11 = vsub.f32 %v9136_v24, %v3882_v43  ;;  %v3298_v24 = vadd.f32 %v9349_v63, %v3297_v44  ;;  %v4912_v43 = vsel %vm908_vm2, %v9391_v58, -inf  ;;  %vm3304_vm3 = vcmp.eq.f32.partialorder %v3303_v27, 8.507059e+37 }
0x14fd   : > { %v9389_v6 = vpop.eup %7199 }
0x14fe   : > { %v3310_v26 = vmul.f32 %v9389_v6, %v9357_v14  ;;  %v3907_v56 = vmul.f32 1.442695, %v3894_v11  ;;  %v3885_v23 = vpop.xlane.xlu2 %3884  ;;  %v3539_v54 = vpop.xlane.xlu0 %3538  ;;  %vm3315_vm4 = vweird.f32 %v9389_v6 }
0x14ff   : > { %v3549_v41 = vsub.f32 %v9142_v51, %v3539_v54  ;;  %v9399_v19 = vpop.eup %7201  ;;  %v9407_v7 = vpop.f32.mrf.mxu3  ;;  %v3293_v51 = vmul.f32 %v9092_v4, %v3292_v48  ;;  %v3895_v33 = vsub.f32 %v9146_v12, %v3885_v23  ;;  %v3302_v4 = vsel %vm9412_vm13, %v9349_v63, %v3298_v24  ;;  %vm9446_vm8 = vmor %vm3314_vm7, %vm3315_vm4 }
0x1500   : > { %v3311_v42 = vsub.f32 1.0, %v3310_v26  ;;  %7203 = vpow2.f32 %v3907_v56  ;;  %4916 = vmax.xlane.f32.xlu2 %v4915_v49  ;;  %v3576_v39 = vsel %vm908_vm2, %v9399_v19, 0.0  ;;  %v3307_v26 = vsel %vm3304_vm3, %v3306_v21, %v3302_v4 }
0x1501   : > { %v3563_v17 = vmul.f32 1.442695, %v3549_v41  ;;  %v3909_v12 = vmul.f32 1.442695, %v3895_v33  ;;  %v9433_v23 = vmul.f32 0.70710677, %v9301_v46  ;;  %v3548_v54 = vsub.f32 %v9119_v20, %v9342_v55 }
0x1502   : > { %v3312_v45 = vmul.f32 %v9389_v6, %v3311_v42  ;;  %6719 = vmatmul.msk.f32.gmra.mxu1 %vm908_vm2, %v3293_v51  ;;  %v3320_v48 = vand.u32 2147483648, %v9357_v14  ;;  %v3308_v41 = vmul.f32 %v9111_v60, %v3307_v26  ;;  %v3318_v24 = vand.u32 2147483647, %v9357_v14 }
0x1503   : > { %4913 = vmax.xlane.f32.xlu0 %v4912_v43  ;;  %7205 = vpow2.f32 %v3563_v17  ;;  %v4909_v60 = vsel %vm908_vm2, %v9433_v23, -inf  ;;  %v3561_v5 = vmul.f32 1.442695, %v3548_v54 }
0x1504   : > { %3577 = vadd.xlane.f32.xlu1 %v3576_v39  ;;  %v3313_v63 = vadd.f32 %v9389_v6, %v3312_v45  ;;  %v3321_v49 = vor.u32 1.1754944e-38, %v3320_v48  ;;  %vm3319_vm11 = vcmp.eq.f32.partialorder %v3318_v24, 8.507059e+37 }
0x1506   : > { %v9426_v11 = vpop.xlane.xlu2 %3541  ;;  %v9428_v32 = vpop.xlane.xlu0 %3241  ;;  %v3317_v14 = vsel %vm9446_vm8, %v9389_v6, %v3313_v63 }
0x1507   : > { %v9430_v56 = vpop.eup %7203  ;;  %7207 = vrcp.f32 %v9428_v32  ;;  %v4889_v20 = vpop.f32.mrf.mxu3  ;;  %v3322_v43 = vsel %vm3319_vm11, %v3321_v49, %v3317_v14  ;;  %v3335_v63 = vand.u32 2147483648, %v9428_v32  ;;  %vm3329_vm13 = vweird.f32 %v9428_v32 }
0x1508   : > { %7209 = vpow2.f32 %v3905_v50  ;;  %v3928_v42 = vsel %vm908_vm2, %v9430_v56, 0.0  ;;  %v9461_v51 = vmul.f32 0.70710677, %v4889_v20 }
0x1509   : > { %v9444_v46 = vpop.eup %7205  ;;  %7211 = vpow2.f32 %v3909_v12  ;;  %v3323_v12 = vmul.f32 %v9127_v30, %v3322_v43  ;;  %v3336_v10 = vor.u32 1.1754944e-38, %v3335_v63 }
0x150a   : > { %6720 = vmatmul.msk.f32.gmra.mxu1 %vm908_vm2, %v3308_v41  ;;  %v3585_v55 = vsel %vm908_vm2, %v9444_v46, 0.0  ;;  %v4921_v54 = vsel %vm908_vm2, %v9461_v51, -inf  ;;  %v3333_v41 = vand.u32 2147483647, %v9428_v32 }
0x150b   : > { %3929 = vadd.xlane.f32.xlu0 %v3928_v42  ;;  %3586 = vadd.xlane.f32.xlu2 %v3585_v55 }
0x150c   : > { %4910 = vmax.xlane.f32.xlu1 %v4909_v60  ;;  %vm3334_vm4 = vcmp.eq.f32.partialorder %v3333_v41, 8.507059e+37 }
0x150d   : > { %v7208_v27 = vpop.eup %7207 }
0x150e   : > { %v3325_v17 = vmul.f32 %v7208_v27, %v9428_v32  ;;  %v9463_v44 = vpop.xlane.xlu0 %3887  ;;  %v4557_v33 = vpop.xlane.xlu1 %4556  ;;  %vm3330_vm12 = vweird.f32 %v7208_v27  ;;  %v3550_v32 = vsub.f32 %v9157_v36, %v9426_v11 }
0x150f   : > { %v9465_v45 = vpop.eup %7209  ;;  %v3245_v39 = vpop.xlane.xlu2 %3244  ;;  %v4579_v4 = vsub.f32 %v9172_v16, %v4557_v33  ;;  %vm3331_vm3 = vmor %vm3329_vm13, %vm3330_vm12 }
0x1510   : > { %v9468_v6 = vpop.eup %7211  ;;  %v3326_v21 = vsub.f32 1.0, %v3325_v17  ;;  %7213 = vrcp.f32 %v3245_v39  ;;  %v3925_v48 = vsel %vm908_vm2, %v9465_v45, 0.0  ;;  %v3348_v11 = vand.u32 2147483647, %v3245_v39 }
0x1511   : > { %7215 = vpow2.f32 %v3561_v5  ;;  %v4587_v50 = vmul.f32 1.442695, %v4579_v4  ;;  %v3931_v16 = vsel %vm908_vm2, %v9468_v6, 0.0  ;;  %vm3344_vm8 = vweird.f32 %v3245_v39 }
0x1512   : > { %v3327_v26 = vmul.f32 %v7208_v27, %v3326_v21  ;;  %6721 = vmatmul.msk.f32.gmra.mxu1 %vm908_vm2, %v3323_v12  ;;  %v3350_v21 = vand.u32 2147483648, %v3245_v39  ;;  %vm3349_vm12 = vcmp.eq.f32.partialorder %v3348_v11, 8.507059e+37 }
0x1513   : > { %4922 = vmax.xlane.f32.xlu0 %v4921_v54  ;;  %7217 = vpow2.f32 %v4587_v50  ;;  %3932 = vadd.xlane.f32.xlu2 %v3931_v16 }
0x1514   : > { %3926 = vadd.xlane.f32.xlu1 %v3925_v48  ;;  %v3328_v30 = vadd.f32 %v7208_v27, %v3327_v26  ;;  %v3351_v63 = vor.u32 1.1754944e-38, %v3350_v21  ;;  %v9499_v48 = vmul.f32 0.70710677, %v9407_v7  ;;  %v5558_v7 = vpop.f32.mrf.mxu3 }
0x1516   : > { %v7214_v24 = vpop.eup %7213  ;;  %v9481_v42 = vpop.xlane.xlu0 %3247  ;;  %v3332_v55 = vsel %vm3331_vm3, %v7208_v27, %v3328_v30 }
0x1517   : > { %v4560_v20 = vpop.xlane.xlu1 %4559  ;;  %v9483_v60 = vpop.eup %7215  ;;  %v3340_v14 = vmul.f32 %v7214_v24, %v3245_v39  ;;  %7219 = vrcp.f32 %v9481_v42  ;;  %v3337_v17 = vsel %vm3334_vm4, %v3336_v10, %v3332_v55  ;;  %vm3345_vm7 = vweird.f32 %v7214_v24 }
0x1518   : > { %v4212_v49 = vpop.xlane.xlu2 %4211  ;;  %v3338_v43 = vmul.f32 %v9159_v37, %v3337_v17  ;;  %v3582_v50 = vsel %vm908_vm2, %v9483_v60, 0.0  ;;  %vm3346_vm11 = vmor %vm3344_vm8, %vm3345_vm7  ;;  %v3896_v39 = vsub.f32 %v9168_v40, %v9463_v44  ;;  %v4918_v40 = vsel %vm908_vm2, %v9499_v48, -inf }
0x1519   : > { %v4234_v5 = vsub.f32 %v9184_v25, %v4212_v49  ;;  %v3341_v33 = vsub.f32 1.0, %v3340_v14  ;;  %v9490_v4 = vpop.eup %7217  ;;  %v3565_v25 = vmul.f32 1.442695, %v3550_v32  ;;  %v3365_v49 = vand.u32 2147483648, %v9481_v42 }
0x151a   : > { %6722 = vmatmul.msk.f32.gmra.mxu1 %vm908_vm2, %v3338_v43  ;;  %v4603_v36 = vsel %vm908_vm2, %v9490_v4, 0.0  ;;  %v4580_v32 = vsub.f32 %v9186_v61, %v4560_v20  ;;  %v3363_v43 = vand.u32 2147483647, %v9481_v42  ;;  %vm3359_vm3 = vweird.f32 %v9481_v42 }
0x151b   : > { %v4242_v27 = vmul.f32 1.442695, %v4234_v5  ;;  %v3342_v12 = vmul.f32 %v7214_v24, %v3341_v33  ;;  %4604 = vadd.xlane.f32.xlu0 %v4603_v36  ;;  %v3911_v61 = vmul.f32 1.442695, %v3896_v39  ;;  %v3366_v44 = vor.u32 1.1754944e-38, %v3365_v49 }
0x151c   : > { %3583 = vadd.xlane.f32.xlu1 %v3582_v50  ;;  %v4589_v21 = vmul.f32 1.442695, %v4580_v32  ;;  %vm3364_vm7 = vcmp.eq.f32.partialorder %v3363_v43, 8.507059e+37 }
0x151d   : > { %7221 = vpow2.f32 %v4242_v27  ;;  %v7220_v37 = vpop.eup %7219  ;;  %v3343_v26 = vadd.f32 %v7214_v24, %v3342_v12  ;;  %v9518_v12 = vmul.f32 0.70710677, %v5558_v7  ;;  %v9545_v7 = vpop.f32.mrf.mxu2 }
0x151e   : > { %v3355_v54 = vmul.f32 %v7220_v37, %v9481_v42  ;;  %7223 = vpow2.f32 %v3565_v25  ;;  %vm3360_vm13 = vweird.f32 %v7220_v37 }
0x151f   : > { %v4218_v16 = vpop.xlane.xlu1 %4217  ;;  %v3347_v30 = vsel %vm3346_vm11, %v7214_v24, %v3343_v26  ;;  %vm3361_vm4 = vmor %vm3359_vm3, %vm3360_vm13 }
0x1520   : > { %v4215_v41 = vpop.xlane.xlu2 %4214  ;;  %v3356_v10 = vsub.f32 1.0, %v3355_v54  ;;  %v3352_v14 = vsel %vm3349_vm12, %v3351_v63, %v3347_v30  ;;  %v4236_v26 = vsub.f32 %v9196_v15, %v4218_v16 }
0x1521   : > { %v4235_v55 = vsub.f32 %v9198_v28, %v4215_v41  ;;  %v3353_v5 = vmul.f32 %v9170_v22, %v3352_v14 }
0x1522   : > { %v3357_v33 = vmul.f32 %v7220_v37, %v3356_v10  ;;  %v4246_v30 = vmul.f32 1.442695, %v4236_v26 }
0x1523   : > { %v9507_v17 = vpop.eup %7221  ;;  %v4244_v24 = vmul.f32 1.442695, %v4235_v55  ;;  %6723 = vmatmul.msk.f32.gmra.mxu1 %vm908_vm2, %v3353_v5 }
0x1524   : > { %v4258_v28 = vsel %vm908_vm2, %v9507_v17, 0.0  ;;  %4919 = vmax.xlane.f32.xlu1 %v4918_v40  ;;  %v3358_v22 = vadd.f32 %v7220_v37, %v3357_v33  ;;  %v9516_v20 = vpop.eup %7223 }
0x1525   : > { %7225 = vpow2.f32 %v4244_v24  ;;  %4259 = vadd.xlane.f32.xlu2 %v4258_v28  ;;  %v3588_v54 = vsel %vm908_vm2, %v9516_v20, 0.0 }
0x1526   : > { %v3362_v50 = vsel %vm3361_vm4, %v7220_v37, %v3358_v22  ;;  %7227 = vpow2.f32 %v3911_v61  ;;  %v5590_v37 = vsel %vm908_vm2, %v9518_v12, -inf }
0x1527   : > { %v4566_v27 = vpop.xlane.xlu1 %4565  ;;  %v3367_v11 = vsel %vm3364_vm7, %v3366_v44, %v3362_v50  ;;  %7229 = vpow2.f32 %v4589_v21 }
0x1528   : > { %v4563_v36 = vpop.xlane.xlu2 %4562  ;;  %v3368_v25 = vmul.f32 %v9182_v34, %v3367_v11  ;;  %v4582_v63 = vsub.f32 %v9208_v52, %v4566_v27  ;;  %v5561_v34 = vpop.f32.mrf.mxu3  ;;  %7231 = vpow2.f32 %v4246_v30 }
0x1529   : > { %v9536_v14 = vmul.f32 0.70710677, %v5561_v34  ;;  %v4581_v39 = vsub.f32 %v9206_v3, %v4563_v36 }
0x152a   : > { %v4593_v52 = vmul.f32 1.442695, %v4582_v63 }
0x152b   : > { %v9521_v42 = vpop.eup %7225  ;;  %6724 = vmatmul.msk.f32.gmra.mxu1 %vm908_vm2, %v3368_v25  ;;  %v5593_v5 = vsel %vm908_vm2, %v9536_v14, -inf  ;;  %v4591_v24 = vmul.f32 1.442695, %v4581_v39 }
0x152c   : > { %v4261_v41 = vsel %vm908_vm2, %v9521_v42, 0.0  ;;  %3589 = vadd.xlane.f32.xlu1 %v3588_v54  ;;  %v9532_v15 = vpop.eup %7227  ;;  %7233 = vpow2.f32 %v4593_v52 }
0x152d   : > { %5591 = vmax.xlane.f32.xlu2 %v5590_v37  ;;  %4262 = vadd.xlane.f32.xlu0 %v4261_v41  ;;  %v9534_v55 = vpop.eup %7229  ;;  %v3934_v49 = vsel %vm908_vm2, %v9532_v15, 0.0  ;;  %7235 = vpow2.f32 %v4591_v24 }
0x152e   : > { %v4606_v32 = vsel %vm908_vm2, %v9534_v55, 0.0  ;;  %v9547_v40 = vpop.eup %7231 }
0x152f   : > { %v4224_v10 = vpop.xlane.xlu1 %4223  ;;  %v4264_v50 = vsel %vm908_vm2, %v9547_v40, 0.0 }
0x1530   : > { %v4221_v16 = vpop.xlane.xlu2 %4220  ;;  %v5564_v33 = vpop.f32.mrf.mxu3  ;;  %v4238_v54 = vsub.f32 %v9216_v62, %v4224_v10 }
0x1531   : > { %v4237_v44 = vsub.f32 %v9218_v35, %v4221_v16  ;;  %v5222_v35 = vpop.f32.mrf.mxu2  ;;  %v9562_v63 = vmul.f32 0.70710677, %v5564_v33 }
0x1532   : > { %v9550_v61 = vpop.eup %7233  ;;  %v4250_v16 = vmul.f32 1.442695, %v4238_v54  ;;  %v9579_v10 = vmul.f32 0.70710677, %v5222_v35 }
0x1533   : > { %v4612_v36 = vsel %vm908_vm2, %v9550_v61, 0.0  ;;  %v4248_v11 = vmul.f32 1.442695, %v4237_v44  ;;  %v9560_v26 = vpop.eup %7235  ;;  %v5596_v52 = vsel %vm908_vm2, %v9562_v63, -inf }
0x1534   : > { %3935 = vadd.xlane.f32.xlu1 %v3934_v49  ;;  %v4609_v30 = vsel %vm908_vm2, %v9560_v26, 0.0 }
0x1535   : > { %4607 = vadd.xlane.f32.xlu2 %v4606_v32  ;;  %5594 = vmax.xlane.f32.xlu0 %v5593_v5 }
0x1536   : > { %v4572_v28 = vpop.xlane.xlu0 %4571 }
0x1537   : > { %v4569_v43 = vpop.xlane.xlu1 %4568  ;;  %v4584_v21 = vsub.f32 %v9230_v29, %v4572_v28 }
0x1538   : > { %v4227_v3 = vpop.xlane.xlu2 %4226  ;;  %v5567_v29 = vpop.f32.mrf.mxu3  ;;  %v4583_v24 = vsub.f32 %v9226_v47, %v4569_v43 }
0x1539   : > { %v4239_v22 = vsub.f32 %v9228_v18, %v4227_v3  ;;  %v4597_v25 = vmul.f32 1.442695, %v4584_v21  ;;  %v9581_v5 = vpop.f32.mrf.mxu2 }
0x153a   : > { %v4595_v43 = vmul.f32 1.442695, %v4583_v24  ;;  %v9612_v24 = vmul.f32 0.70710677, %v9545_v7 }
0x153b   : > { %v4252_v27 = vmul.f32 1.442695, %v4239_v22  ;;  %v5254_v22 = vsel %vm908_vm2, %v9579_v10, -inf }
0x153c   : > { %4265 = vadd.xlane.f32.xlu1 %v4264_v50 }
0x153d   : > { %7237 = vpow2.f32 %v4252_v27  ;;  %4613 = vadd.xlane.f32.xlu0 %v4612_v36 }
0x153e   : > { %7239 = vpow2.f32 %v4248_v11  ;;  %v4230_v39 = vpop.xlane.xlu0 %4229 }
0x153f   : > { %v9558_v18 = vpop.xlane.xlu1 %4232  ;;  %7241 = vpow2.f32 %v4597_v25  ;;  %v4240_v44 = vsub.f32 %v9240_v31, %v4230_v39  ;;  %v9596_v25 = vmul.f32 0.70710677, %v5567_v29 }
0x1540   : > { %v4575_v41 = vpop.xlane.xlu2 %4574  ;;  %7243 = vpow2.f32 %v4250_v16  ;;  %v5570_v33 = vpop.f32.mrf.mxu3 }
0x1541   : > { %v4585_v27 = vsub.f32 %v9244_v38, %v4575_v41  ;;  %v9592_v47 = vmul.f32 0.70710677, %v5570_v33  ;;  %11362 = vst [vmem:[#allocation25_spill] sm:$0xff] %v9596_v25  ;;  %v4254_v35 = vmul.f32 1.442695, %v4240_v44  ;;  %v5228_v41 = vpop.f32.mrf.mxu2 }
0x1543   : > { %v9564_v37 = vpop.eup %7237  ;;  %11361 = vst [vmem:[#allocation24_spill] sm:$0xff] %v9592_v47  ;;  %v4599_v54 = vmul.f32 1.442695, %v4585_v27  ;;  %v5602_v31 = vsel %vm908_vm2, %v9592_v47, -inf }
0x1544   : > { %11359 = vst [vmem:[#allocation22_spill] sm:$0xff] %v9564_v37  ;;  %v4273_v34 = vsel %vm908_vm2, %v9564_v37, 0.0  ;;  %4610 = vadd.xlane.f32.xlu1 %v4609_v30  ;;  %v9575_v32 = vpop.eup %7239  ;;  %v5599_v30 = vsel %vm908_vm2, %v9596_v25, -inf }
0x1545   : > { %4274 = vadd.xlane.f32.xlu2 %v4273_v34  ;;  %5597 = vmax.xlane.f32.xlu0 %v5596_v52  ;;  %v9577_v62 = vpop.eup %7241  ;;  %v4267_v3 = vsel %vm908_vm2, %v9575_v32, 0.0 }
0x1546   : > { %11360 = vst [vmem:[#allocation23_spill] sm:$0xff] %v9577_v62  ;;  %v4618_v28 = vsel %vm908_vm2, %v9577_v62, 0.0  ;;  %v9594_v11 = vpop.eup %7243 }
0x1547   : > { %v9573_v49 = vpop.xlane.xlu1 %4577  ;;  %v4270_v38 = vsel %vm908_vm2, %v9594_v11, 0.0 }
0x1548   : > { %v4902_v21 = vpop.xlane.xlu2 %4901  ;;  %v9605_v29 = vpop.f32.mrf.mxu3 }
0x1549   : > { %v4924_v34 = vsub.f32 %v9253_v59, %v4902_v21 }
0x154b   : > { %v4932_v59 = vmul.f32 1.442695, %v4924_v34  ;;  %v5251_v34 = vsel %vm908_vm2, %v9612_v24, -inf }
0x154c   : > { %4268 = vadd.xlane.f32.xlu1 %v4267_v3  ;;  %v4241_v3 = vsub.f32 %v9242_v8, %v9558_v18 }
0x154d   : > { %4619 = vadd.xlane.f32.xlu2 %v4618_v28  ;;  %5255 = vmax.xlane.f32.xlu0 %v5254_v22  ;;  %v9614_v28 = vmul.f32 0.70710677, %v5228_v41 }
0x154e   : > { %v5247_v50 = vpop.xlane.xlu0 %5246  ;;  %v4256_v8 = vmul.f32 1.442695, %v4241_v3 }
0x154f   : > { %v3569_v36 = vpop.xlane.xlu1 %3568  ;;  %v5269_v27 = vsub.f32 %v9266_v0, %v5247_v50  ;;  %v5260_v18 = vsel %vm908_vm2, %v9614_v28, -inf }
0x1550   : > { %7245 = vrcp.f32 %v3569_v36  ;;  %vm3596_vm11 = vweird.f32 %v3569_v36  ;;  %v9649_v47 = vpop.f32.mrf.mxu3 }
0x1551   : > { %7247 = vpow2.f32 %v4595_v43  ;;  %v3602_v43 = vand.u32 2147483648, %v3569_v36  ;;  %v5277_v41 = vmul.f32 1.442695, %v5269_v27 }
0x1552   : > { %7249 = vpow2.f32 %v4254_v35  ;;  %v3600_v35 = vand.u32 2147483647, %v3569_v36 }
0x1553   : > { %7251 = vpow2.f32 %v4599_v54 }
0x1554   : > { %4271 = vadd.xlane.f32.xlu1 %v4270_v38  ;;  %vm3601_vm13 = vcmp.eq.f32.partialorder %v3600_v35, 8.507059e+37 }
0x1555   : > { %5603 = vmax.xlane.f32.xlu2 %v5602_v31  ;;  %5600 = vmax.xlane.f32.xlu0 %v5599_v30  ;;  %v3603_v30 = vor.u32 1.1754944e-38, %v3602_v43 }
0x1556   : > { %v7246_v52 = vpop.eup %7245  ;;  %v9607_v39 = vpop.xlane.xlu0 %3571 }
0x1557   : > { %v3592_v16 = vmul.f32 %v7246_v52, %v3569_v36  ;;  %v9609_v33 = vpop.xlane.xlu2 %3917  ;;  %7253 = vrcp.f32 %v9607_v39  ;;  %v9619_v22 = vpop.xlane.xlu1 %3914  ;;  %vm3597_vm8 = vweird.f32 %v7246_v52  ;;  %v11366_v36 = vld [vmem:[#allocation15_spill] sm:$0xff]  ;;  %v3615_v37 = vand.u32 2147483647, %v9607_v39 }
0x1558   : > { %7255 = vrcp.f32 %v9609_v33  ;;  %v9622_v21 = vpop.eup %7247  ;;  %vm3598_vm12 = vmor %vm3596_vm11, %vm3597_vm8  ;;  %v3948_v25 = vand.u32 2147483648, %v9619_v22  ;;  %vm3611_vm4 = vweird.f32 %v9607_v39  ;;  %vm3942_vm11 = vweird.f32 %v9619_v22 }
0x1559   : > { %v3593_v44 = vsub.f32 1.0, %v3592_v16  ;;  %11363 = vst [vmem:[#allocation26_spill] sm:$0xff] %v9622_v21  ;;  %7257 = vrcp.f32 %v9619_v22  ;;  %v9626_v54 = vpop.eup %7249  ;;  %v4615_v0 = vsel %vm908_vm2, %v9622_v21, 0.0  ;;  %v3617_v21 = vand.u32 2147483648, %v9607_v39 }
0x155a   : > { %7259 = vpow2.f32 %v4932_v59  ;;  %11364 = vst [vmem:[#allocation27_spill] sm:$0xff] %v9626_v54  ;;  %v9632_v31 = vpop.eup %7251 }
0x155b   : > { %v3594_v7 = vmul.f32 %v7246_v52, %v3593_v44  ;;  %11365 = vst [vmem:[#allocation28_spill] sm:$0xff] %v9632_v31  ;;  %7261 = vpow2.f32 %v4256_v8  ;;  %v4621_v8 = vsel %vm908_vm2, %v9632_v31, 0.0 }
0x155c   : > { %5252 = vmax.xlane.f32.xlu1 %v5251_v34  ;;  %7263 = vpow2.f32 %v5277_v41 }
0x155d   : > { %v3595_v38 = vadd.f32 %v7246_v52, %v3594_v7  ;;  %5261 = vmax.xlane.f32.xlu2 %v5260_v18  ;;  %v7254_v50 = vpop.eup %7253  ;;  %4616 = vadd.xlane.f32.xlu0 %v4615_v0  ;;  %v4586_v18 = vsub.f32 %v11366_v36, %v9573_v49  ;;  %v11367_v36 = vld [vmem:[#allocation16_spill] sm:$0xff] }
0x155e   : > { %v9636_v59 = vpop.eup %7255  ;;  %v3607_v3 = vmul.f32 %v7254_v50, %v9607_v39  ;;  %v9639_v44 = vpop.xlane.xlu0 %5249  ;;  %vm3612_vm3 = vweird.f32 %v7254_v50 }
0x155f   : > { %v3599_v16 = vsel %vm3598_vm12, %v7246_v52, %v3595_v38  ;;  %v7258_v7 = vpop.eup %7257  ;;  %v3953_v34 = vmul.f32 %v9636_v59, %v9609_v33  ;;  %v9645_v27 = vpop.xlane.xlu1 %4904  ;;  %v4276_v38 = vsel %vm908_vm2, %v9626_v54, 0.0  ;;  %v4601_v54 = vmul.f32 1.442695, %v4586_v18  ;;  %vm3613_vm8 = vmor %vm3611_vm4, %vm3612_vm3 }
0x1560   : > { %v3604_v43 = vsel %vm3601_vm13, %v3603_v30, %v3599_v16  ;;  %v9647_v0 = vpop.eup %7259  ;;  %v3608_v52 = vsub.f32 1.0, %v3607_v3  ;;  %v3938_v35 = vmul.f32 %v7258_v7, %v9619_v22  ;;  %v3946_v3 = vand.u32 2147483647, %v9619_v22 }
0x1561   : > { %v3954_v49 = vsub.f32 1.0, %v3953_v34  ;;  %v3605_v62 = vmul.f32 %v11367_v36, %v3604_v43  ;;  %v4948_v31 = vsel %vm908_vm2, %v9647_v0, 0.0  ;;  %vm3943_vm7 = vweird.f32 %v7258_v7  ;;  %v11368_v43 = vld [vmem:[#allocation14_spill] sm:$0xff] }
0x1562   : > { %v3939_v30 = vsub.f32 1.0, %v3938_v35  ;;  %v3609_v16 = vmul.f32 %v7254_v50, %v3608_v52  ;;  %v9667_v35 = vpop.eup %7261  ;;  %v9670_v36 = vmul.f32 0.70710677, %v9581_v5  ;;  %vm3616_vm12 = vcmp.eq.f32.partialorder %v3615_v37, 8.507059e+37  ;;  %vm3944_vm13 = vmor %vm3942_vm11, %vm3943_vm7 }
0x1563   : > { %6734 = vmatmul.msk.f32.vlgmr.msrb.gmra.mxu0 %vm908_vm2, %v3605_v62  ;;  %v3955_v41 = vmul.f32 %v9636_v59, %v3954_v49  ;;  %v3618_v62 = vor.u32 1.1754944e-38, %v3617_v21  ;;  %vm3947_vm0 = vcmp.eq.f32.partialorder %v3946_v3, 8.507059e+37  ;;  %v3949_v5 = vor.u32 1.1754944e-38, %v3948_v25  ;;  %v5579_v3 = vpop.f32.mrf.mxu3 }
0x1564   : > { %v3940_v34 = vmul.f32 %v7258_v7, %v3939_v30  ;;  %5134 = vmatpush.msrb.mxu0 %v11368_v43  ;;  %v3610_v52 = vadd.f32 %v7254_v50, %v3609_v16  ;;  %4277 = vadd.xlane.f32.xlu1 %v4276_v38  ;;  %vm3958_vm3 = vweird.f32 %v9636_v59  ;;  %v3963_v37 = vand.u32 2147483648, %v9609_v33 }
0x1565   : > { %4949 = vadd.xlane.f32.xlu2 %v4948_v31  ;;  %4622 = vadd.xlane.f32.xlu0 %v4621_v8  ;;  %v9676_v31 = vpop.eup %7263  ;;  %v3956_v21 = vadd.f32 %v9636_v59, %v3955_v41  ;;  %v11370_v8 = vld [vmem:[#allocation17_spill] sm:$0xff]  ;;  %vm3957_vm4 = vweird.f32 %v9609_v33  ;;  %v3961_v25 = vand.u32 2147483647, %v9609_v33  ;;  %v5257_v33 = vsel %vm908_vm2, %v9670_v36, -inf }
0x1566   : > { %v3941_v39 = vadd.f32 %v7258_v7, %v3940_v34  ;;  %v9674_v49 = vpop.xlane.xlu0 %3920  ;;  %v3614_v30 = vsel %vm3613_vm8, %v7254_v50, %v3610_v52  ;;  %11369 = vst [vmem:[#allocation15_spill] sm:$0xff] %v9676_v31  ;;  %v11371_v34 = vld [vmem:[#allocation18_spill] sm:$0xff]  ;;  %vm9690_vm7 = vmor %vm3957_vm4, %vm3958_vm3  ;;  %v11374_v52 = vld [vmem:[#allocation21_spill] sm:$0xff] }
0x1567   : > { %7265 = vrcp.f32 %v9674_v49  ;;  %v9680_v18 = vpop.xlane.xlu1 %3574  ;;  %v3619_v38 = vsel %vm3616_vm12, %v3618_v62, %v3614_v30  ;;  %v4925_v62 = vsub.f32 %v11374_v52, %v9645_v27  ;;  %v3964_v27 = vor.u32 1.1754944e-38, %v3963_v37 }
0x1568   : > { %v3945_v22 = vsel %vm3944_vm13, %v7258_v7, %v3941_v39  ;;  %7267 = vrcp.f32 %v9680_v18  ;;  %v3620_v16 = vmul.f32 %v11370_v8, %v3619_v38  ;;  %v5293_v7 = vsel %vm908_vm2, %v9676_v31, 0.0 }
0x1569   : > { %v3950_v50 = vsel %vm3947_vm0, %v3949_v5, %v3945_v22  ;;  %7269 = vpow2.f32 %v4601_v54  ;;  %v4279_v54 = vsel %vm908_vm2, %v9667_v35, 0.0  ;;  %v3960_v39 = vsel %vm9690_vm7, %v9636_v59, %v3956_v21 }
0x156a   : > { %v3951_v43 = vmul.f32 %v11371_v34, %v3950_v50  ;;  %v9708_v5 = vmul.f32 0.70710677, %v9605_v29  ;;  %v9710_v38 = vmul.f32 0.70710677, %v5579_v3  ;;  %vm3962_vm0 = vcmp.eq.f32.partialorder %v3961_v25, 8.507059e+37 }
0x156b   : > { %6735 = vmatmul.msk.f32.gmra.mxu0 %vm908_vm2, %v3620_v16  ;;  %v9713_v8 = vpop.xlane.xlu2 %3580  ;;  %v3965_v29 = vsel %vm3962_vm0, %v3964_v27, %v3960_v39  ;;  %v4934_v3 = vmul.f32 1.442695, %v4925_v62  ;;  %v3976_v31 = vand.u32 2147483647, %v9674_v49  ;;  %vm3972_vm12 = vweird.f32 %v9674_v49 }
0x156c   : > { %6751 = vmatmul.msk.f32.vlgmr.msrb.gmra.mxu1 %vm908_vm2, %v3951_v43  ;;  %11375 = vst [vmem:[#allocation16_spill] sm:$0xff] %v9708_v5  ;;  %5258 = vmax.xlane.f32.xlu1 %v5257_v33  ;;  %v3978_v43 = vand.u32 2147483648, %v9674_v49  ;;  %v5611_v25 = vsel %vm908_vm2, %v9710_v38, -inf  ;;  %v11377_v33 = vld [vmem:[#allocation19_spill] sm:$0xff]  ;;  %vm3626_vm3 = vweird.f32 %v9680_v18 }
0x156d   : > { %5294 = vadd.xlane.f32.xlu2 %v5293_v7  ;;  %v7266_v30 = vpop.eup %7265  ;;  %11376 = vst [vmem:[#allocation14_spill] sm:$0xff] %v9710_v38  ;;  %4280 = vadd.xlane.f32.xlu0 %v4279_v54  ;;  %v5605_v7 = vsel %vm908_vm2, %v9708_v5, -inf  ;;  %v3966_v54 = vmul.f32 %v11377_v33, %v3965_v29  ;;  %v5231_v29 = vpop.f32.mrf.mxu2  ;;  %vm3977_vm7 = vcmp.eq.f32.partialorder %v3976_v31, 8.507059e+37 }
0x156e   : > { %v7268_v22 = vpop.eup %7267  ;;  %v3968_v50 = vmul.f32 %v7266_v30, %v9674_v49  ;;  %v9715_v16 = vpop.xlane.xlu0 %3923  ;;  %vm3973_vm8 = vweird.f32 %v7266_v30  ;;  %v3630_v49 = vand.u32 2147483647, %v9680_v18 }
0x156f   : > { %v3622_v34 = vmul.f32 %v7268_v22, %v9680_v18  ;;  %7271 = vrcp.f32 %v9715_v16  ;;  %v4908_v59 = vpop.xlane.xlu1 %4907  ;;  %v9719_v21 = vpop.eup %7269  ;;  %vm3627_vm11 = vweird.f32 %v7268_v22  ;;  %vm9735_vm13 = vmor %vm3972_vm12, %vm3973_vm8 }
0x1570   : > { %v3969_v37 = vsub.f32 1.0, %v3968_v50  ;;  %v4926_v27 = vsub.f32 %v9362_v2, %v4908_v59  ;;  %v4624_v62 = vsel %vm908_vm2, %v9719_v21, 0.0  ;;  %7273 = vpow2.f32 %v4934_v3  ;;  %vm9744_vm4 = vmor %vm3626_vm3, %vm3627_vm11 }
0x1571   : > { %v3623_v41 = vsub.f32 1.0, %v3622_v34  ;;  %v3632_v50 = vand.u32 2147483648, %v9680_v18  ;;  %v3979_v2 = vor.u32 1.1754944e-38, %v3978_v43  ;;  %7275 = vrcp.f32 %v9713_v8 }
0x1572   : > { %v3970_v52 = vmul.f32 %v7266_v30, %v3969_v37  ;;  %v4936_v43 = vmul.f32 1.442695, %v4926_v27  ;;  %vm3631_vm0 = vcmp.eq.f32.partialorder %v3630_v49, 8.507059e+37  ;;  %vm3987_vm11 = vweird.f32 %v9715_v16 }
0x1573   : > { %v3624_v39 = vmul.f32 %v7268_v22, %v3623_v41  ;;  %v9756_v38 = vpop.xlane.xlu2 %4916 }
0x1574   : > { %6752 = vmatmul.msk.f32.gmra.mxu1 %vm908_vm2, %v3966_v54  ;;  %v3971_v34 = vadd.f32 %v7266_v30, %v3970_v52  ;;  %4625 = vadd.xlane.f32.xlu1 %v4624_v62  ;;  %v9754_v54 = vmul.f32 0.70710677, %v5231_v29  ;;  %v3993_v29 = vand.u32 2147483648, %v9715_v16 }
0x1575   : > { %5612 = vmax.xlane.f32.xlu2 %v5611_v25  ;;  %v7272_v37 = vpop.eup %7271  ;;  %5606 = vmax.xlane.f32.xlu0 %v5605_v7  ;;  %v3625_v59 = vadd.f32 %v7268_v22, %v3624_v39  ;;  %v3633_v39 = vor.u32 1.1754944e-38, %v3632_v50 }
0x1576   : > { %v3983_v3 = vmul.f32 %v7272_v37, %v9715_v16  ;;  %v3975_v52 = vsel %vm9735_vm13, %v7266_v30, %v3971_v34  ;;  %v4914_v5 = vpop.xlane.xlu0 %4913  ;;  %v9759_v41 = vpop.eup %7273  ;;  %vm3988_vm8 = vweird.f32 %v7272_v37 }
0x1577   : > { %v9750_v33 = vpop.xlane.xlu1 %3577  ;;  %v3629_v7 = vsel %vm9744_vm4, %v7268_v22, %v3625_v59  ;;  %v3980_v18 = vsel %vm3977_vm7, %v3979_v2, %v3975_v52  ;;  %11382 = vst [vmem:[#allocation17_spill] sm:$0xff] %v9759_v41  ;;  %v11383_v22 = vld [vmem:[#allocation20_spill] sm:$0xff]  ;;  %v9766_v2 = vpop.eup %7275  ;;  %v5263_v59 = vsel %vm908_vm2, %v9754_v54, -inf  ;;  %vm9773_vm12 = vmor %vm3987_vm11, %vm3988_vm8  ;;  %vm3656_vm11 = vweird.f32 %v9713_v8 }
0x1578   : > { %v3984_v62 = vsub.f32 1.0, %v3983_v3  ;;  %7277 = vrcp.f32 %v9750_v33  ;;  %v3634_v30 = vsel %vm3631_vm0, %v3633_v39, %v3629_v7  ;;  %v3981_v27 = vmul.f32 %v9326_v1, %v3980_v18 }
0x1579   : > { %v5270_v34 = vsub.f32 %v11383_v22, %v9639_v44  ;;  %7279 = vpow2.f32 %v4936_v43  ;;  %v3635_v50 = vmul.f32 %v9320_v13, %v3634_v30  ;;  %v3991_v1 = vand.u32 2147483647, %v9715_v16 }
0x157a   : > { %v3985_v31 = vmul.f32 %v7272_v37, %v3984_v62  ;;  %v4951_v13 = vsel %vm908_vm2, %v9759_v41, 0.0  ;;  %v3652_v43 = vmul.f32 %v9766_v2, %v9713_v8  ;;  %v3994_v16 = vor.u32 1.1754944e-38, %v3993_v29 }
0x157b   : > { %6736 = vmatmul.msk.f32.gmra.mxu0 %vm908_vm2, %v3635_v50  ;;  %v5279_v52 = vmul.f32 1.442695, %v5270_v34  ;;  %vm3992_vm13 = vcmp.eq.f32.partialorder %v3991_v1, 8.507059e+37  ;;  %v4928_v34 = vsub.f32 %v9391_v58, %v4914_v5  ;;  %vm3641_vm4 = vweird.f32 %v9750_v33 }
0x157c   : > { %6753 = vmatmul.msk.f32.gmra.mxu1 %vm908_vm2, %v3981_v27  ;;  %v3986_v49 = vadd.f32 %v7272_v37, %v3985_v31  ;;  %4952 = vadd.xlane.f32.xlu1 %v4951_v13  ;;  %v9792_v31 = vmul.f32 0.70710677, %v9649_v47  ;;  %v3653_v22 = vsub.f32 1.0, %v3652_v43  ;;  %v3645_v3 = vand.u32 2147483647, %v9750_v33 }
0x157d   : > { %5264 = vmax.xlane.f32.xlu0 %v5263_v59  ;;  %7281 = vpow2.f32 %v5279_v52  ;;  %v4940_v5 = vmul.f32 1.442695, %v4928_v34  ;;  %vm3657_vm0 = vweird.f32 %v9766_v2 }
0x157e   : > { %v7278_v44 = vpop.eup %7277  ;;  %v3990_v25 = vsel %vm9773_vm12, %v7272_v37, %v3986_v49  ;;  %v9787_v39 = vpop.xlane.xlu2 %3586  ;;  %11387 = vst [vmem:[#allocation21_spill] sm:$0xff] %v9792_v31  ;;  %v5608_v47 = vsel %vm908_vm2, %v9792_v31, -inf  ;;  %v3654_v58 = vmul.f32 %v9766_v2, %v3653_v22  ;;  %vm3646_vm8 = vcmp.eq.f32.partialorder %v3645_v3, 8.507059e+37  ;;  %vm9834_vm12 = vmor %vm3656_vm11, %vm3657_vm0 }
0x157f   : > { %v3637_v7 = vmul.f32 %v7278_v44, %v9750_v33  ;;  %v9785_v18 = vpop.xlane.xlu1 %4910  ;;  %v9789_v62 = vpop.eup %7279  ;;  %v3995_v27 = vsel %vm3992_vm13, %v3994_v16, %v3990_v25  ;;  %vm3642_vm3 = vweird.f32 %v7278_v44 }
0x1580   : > { %11386 = vst [vmem:[#allocation18_spill] sm:$0xff] %v9789_v62  ;;  %v3996_v37 = vmul.f32 %v9359_v9, %v3995_v27  ;;  %v9796_v50 = vpop.xlane.xlu0 %3929  ;;  %v4954_v59 = vsel %vm908_vm2, %v9789_v62, 0.0  ;;  %v5234_v49 = vpop.f32.mrf.mxu2  ;;  %v3647_v9 = vand.u32 2147483648, %v9750_v33  ;;  %vm3643_vm7 = vmor %vm3641_vm4, %vm3642_vm3  ;;  %v4929_v33 = vsub.f32 %v9386_v57, %v9756_v38 }
0x1581   : > { %v3638_v30 = vsub.f32 1.0, %v3637_v7  ;;  %7283 = vrcp.f32 %v9796_v50  ;;  %v9810_v25 = vmul.f32 0.70710677, %v5234_v49  ;;  %vm4017_vm11 = vweird.f32 %v9796_v50 }
0x1582   : > { %v3648_v16 = vor.u32 1.1754944e-38, %v3647_v9 }
0x1583   : > { %v3639_v29 = vmul.f32 %v7278_v44, %v3638_v30  ;;  %11388 = vst [vmem:[#allocation19_spill] sm:$0xff] %v9810_v25  ;;  %v9812_v52 = vpop.eup %7281  ;;  %v3655_v30 = vadd.f32 %v9766_v2, %v3654_v58 }
0x1584   : > { %6754 = vmatmul.msk.f32.gmra.mxu1 %vm908_vm2, %v3996_v37  ;;  %5609 = vmax.xlane.f32.xlu1 %v5608_v47  ;;  %11389 = vst [vmem:[#allocation20_spill] sm:$0xff] %v9812_v52  ;;  %v3662_v37 = vand.u32 2147483648, %v9713_v8  ;;  %v5296_v34 = vsel %vm908_vm2, %v9812_v52, 0.0 }
0x1585   : > { %v3640_v1 = vadd.f32 %v7278_v44, %v3639_v29  ;;  %4955 = vadd.xlane.f32.xlu0 %v4954_v59  ;;  %v3660_v29 = vand.u32 2147483647, %v9713_v8  ;;  %v3659_v47 = vsel %vm9834_vm12, %v9766_v2, %v3655_v30  ;;  %vm3686_vm12 = vweird.f32 %v9787_v39 }
0x1586   : > { %v9816_v7 = vpop.xlane.xlu2 %3932  ;;  %v3663_v9 = vor.u32 1.1754944e-38, %v3662_v37 }
0x1587   : > { %v9808_v13 = vpop.xlane.xlu1 %3926  ;;  %v3644_v43 = vsel %vm3643_vm7, %v7278_v44, %v3640_v1  ;;  %v9821_v27 = vpop.eup %7283  ;;  %v5266_v44 = vsel %vm908_vm2, %v9810_v25, -inf  ;;  %v4942_v1 = vmul.f32 1.442695, %v4929_v33  ;;  %vm3661_vm13 = vcmp.eq.f32.partialorder %v3660_v29, 8.507059e+37 }
0x1588   : > { %7285 = vrcp.f32 %v9808_v13  ;;  %v3649_v22 = vsel %vm3646_vm8, %v3648_v16, %v3644_v43  ;;  %v9838_v59 = vpop.xlane.xlu0 %4922  ;;  %v4013_v8 = vmul.f32 %v9821_v27, %v9796_v50  ;;  %v3664_v43 = vsel %vm3661_vm13, %v3663_v9, %v3659_v47 }
0x1589   : > { %7287 = vpow2.f32 %v4940_v5  ;;  %v3650_v57 = vmul.f32 %v9399_v19, %v3649_v22  ;;  %v3665_v2 = vmul.f32 %v9351_v53, %v3664_v43  ;;  %v4008_v29 = vand.u32 2147483648, %v9808_v13 }
0x158a   : > { %7289 = vrcp.f32 %v9816_v7  ;;  %v4014_v33 = vsub.f32 1.0, %v4013_v8  ;;  %vm4002_vm4 = vweird.f32 %v9808_v13  ;;  %v4023_v43 = vand.u32 2147483648, %v9796_v50 }
0x158b   : > { %7291 = vrcp.f32 %v9787_v39  ;;  %6737 = vmatmul.msk.f32.gmra.mxu0 %vm908_vm2, %v3650_v57  ;;  %vm4018_vm0 = vweird.f32 %v9821_v27 }
0x158c   : > { %5267 = vmax.xlane.f32.xlu1 %v5266_v44  ;;  %v4015_v38 = vmul.f32 %v9821_v27, %v4014_v33  ;;  %vm9890_vm13 = vmor %vm4017_vm11, %vm4018_vm0 }
0x158d   : > { %5297 = vadd.xlane.f32.xlu0 %v5296_v34 }
0x158e   : > { %v7286_v49 = vpop.eup %7285  ;;  %v4016_v52 = vadd.f32 %v9821_v27, %v4015_v38 }
0x158f   : > { %v9844_v19 = vpop.xlane.xlu1 %3583  ;;  %v3998_v58 = vmul.f32 %v7286_v49, %v9808_v13  ;;  %v9850_v5 = vpop.eup %7287  ;;  %vm4003_vm3 = vweird.f32 %v7286_v49 }
0x1590   : > { %11392 = vst [vmem:[#allocation29_spill] sm:$0xff] %v9850_v5  ;;  %7293 = vrcp.f32 %v9844_v19  ;;  %v9853_v16 = vpop.eup %7289  ;;  %v4960_v44 = vsel %vm908_vm2, %v9850_v5, 0.0  ;;  %v9873_v9 = vpop.xlane.xlu0 %4604  ;;  %vm4004_vm7 = vmor %vm4002_vm4, %vm4003_vm3 }
0x1591   : > { %v3999_v3 = vsub.f32 1.0, %v3998_v58  ;;  %7295 = vpow2.f32 %v4942_v1  ;;  %v9857_v34 = vpop.eup %7291  ;;  %v4028_v30 = vmul.f32 %v9853_v16, %v9816_v7  ;;  %v4006_v1 = vand.u32 2147483647, %v9808_v13 }
0x1592   : > { %v3682_v53 = vmul.f32 %v9857_v34, %v9787_v39  ;;  %vm3687_vm4 = vweird.f32 %v9857_v34 }
0x1593   : > { %v4000_v22 = vmul.f32 %v7286_v49, %v3999_v3  ;;  %6738 = vmatmul.msk.f32.gmra.mxu0 %vm908_vm2, %v3665_v2  ;;  %vm4007_vm8 = vcmp.eq.f32.partialorder %v4006_v1, 8.507059e+37  ;;  %v3675_v1 = vand.u32 2147483647, %v9844_v19 }
0x1594   : > { %v3683_v31 = vsub.f32 1.0, %v3682_v53 }
0x1595   : > { %4961 = vadd.xlane.f32.xlu0 %v4960_v44  ;;  %v4001_v37 = vadd.f32 %v7286_v49, %v4000_v22  ;;  %v4029_v22 = vsub.f32 1.0, %v4028_v30  ;;  %v4009_v44 = vor.u32 1.1754944e-38, %v4008_v29 }
0x1596   : > { %v9863_v57 = vpop.eup %7293  ;;  %v3684_v38 = vmul.f32 %v9857_v34, %v3683_v31 }
0x1597   : > { %v4920_v47 = vpop.xlane.xlu1 %4919  ;;  %v3667_v58 = vmul.f32 %v9863_v57, %v9844_v19  ;;  %v9877_v3 = vpop.eup %7295  ;;  %v4005_v5 = vsel %vm4004_vm7, %v7286_v49, %v4001_v37  ;;  %v4021_v49 = vand.u32 2147483647, %v9796_v50  ;;  %v4024_v37 = vor.u32 1.1754944e-38, %v4023_v43 }
0x1598   : > { %v9868_v8 = vpop.xlane.xlu2 %4259  ;;  %v4930_v33 = vsub.f32 %v9499_v48, %v4920_v47  ;;  %v4010_v41 = vsel %vm4007_vm8, %v4009_v44, %v4005_v5  ;;  %v4963_v25 = vsel %vm908_vm2, %v9877_v3, 0.0  ;;  %v4030_v5 = vmul.f32 %v9853_v16, %v4029_v22 }
0x1599   : > { %v3668_v2 = vsub.f32 1.0, %v3667_v58  ;;  %v4011_v48 = vmul.f32 %v9465_v45, %v4010_v41  ;;  %vm3672_vm3 = vweird.f32 %v9863_v57  ;;  %v3677_v45 = vand.u32 2147483648, %v9844_v19 }
0x159a   : > { %v4944_v13 = vmul.f32 1.442695, %v4930_v33  ;;  %vm3671_vm7 = vweird.f32 %v9844_v19  ;;  %vm4022_vm0 = vcmp.eq.f32.partialorder %v4021_v49, 8.507059e+37  ;;  %v4031_v53 = vadd.f32 %v9853_v16, %v4030_v5 }
0x159b   : > { %v3669_v62 = vmul.f32 %v9863_v57, %v3668_v2  ;;  %6755 = vmatmul.msk.f32.gmra.mxu1 %vm908_vm2, %v4011_v48  ;;  %vm4033_vm8 = vweird.f32 %v9853_v16  ;;  %vm9918_vm11 = vmor %vm3671_vm7, %vm3672_vm3  ;;  %v4038_v58 = vand.u32 2147483648, %v9816_v7  ;;  %v3678_v19 = vor.u32 1.1754944e-38, %v3677_v45 }
0x159c   : > { %7297 = vpow2.f32 %v4944_v13  ;;  %v3685_v22 = vadd.f32 %v9857_v34, %v3684_v38  ;;  %v4036_v44 = vand.u32 2147483647, %v9816_v7  ;;  %vm3676_vm3 = vcmp.eq.f32.partialorder %v3675_v1, 8.507059e+37 }
0x159d   : > { %4964 = vadd.xlane.f32.xlu0 %v4963_v25  ;;  %7299 = vrcp.f32 %v9868_v8  ;;  %v3670_v29 = vadd.f32 %v9863_v57, %v3669_v62  ;;  %v4020_v25 = vsel %vm9890_vm13, %v9821_v27, %v4016_v52  ;;  %vm4032_vm13 = vweird.f32 %v9816_v7 }
0x159e   : > { %v4025_v52 = vsel %vm4022_vm0, %v4024_v37, %v4020_v25  ;;  %v3692_v2 = vand.u32 2147483648, %v9787_v39  ;;  %vm9936_vm7 = vmor %vm4032_vm13, %vm4033_vm8  ;;  %v3690_v7 = vand.u32 2147483647, %v9787_v39  ;;  %v4039_v45 = vor.u32 1.1754944e-38, %v4038_v58 }
0x159f   : > { %v9900_v50 = vpop.xlane.xlu1 %3589  ;;  %v3674_v43 = vsel %vm9918_vm11, %v9863_v57, %v3670_v29  ;;  %v4026_v49 = vmul.f32 %v9430_v56, %v4025_v52  ;;  %v4035_v5 = vsel %vm9936_vm7, %v9853_v16, %v4031_v53  ;;  %vm9957_vm0 = vmor %vm3686_vm12, %vm3687_vm4  ;;  %vm4037_vm8 = vcmp.eq.f32.partialorder %v4036_v44, 8.507059e+37 }
0x15a0   : > { %v5592_v41 = vpop.xlane.xlu2 %5591  ;;  %v9908_v62 = vpop.xlane.xlu0 %4262  ;;  %7301 = vrcp.f32 %v9900_v50  ;;  %v3679_v48 = vsel %vm3676_vm3, %v3678_v19, %v3674_v43  ;;  %v3689_v39 = vsel %vm9957_vm0, %v9857_v34, %v3685_v22  ;;  %v3693_v38 = vor.u32 1.1754944e-38, %v3692_v2 }
0x15a1   : > { %v5614_v47 = vsub.f32 %v9518_v12, %v5592_v41  ;;  %7303 = vrcp.f32 %v9873_v9  ;;  %v3680_v37 = vmul.f32 %v9483_v60, %v3679_v48  ;;  %v4040_v53 = vsel %vm4037_vm8, %v4039_v45, %v4035_v5  ;;  %v9981_v34 = vpop.f32.mrf.mxu1 }
0x15a2   : > { %v9922_v27 = vpop.eup %7297  ;;  %vm3691_vm12 = vcmp.eq.f32.partialorder %v3690_v7, 8.507059e+37  ;;  %v4041_v22 = vmul.f32 %v9468_v6, %v4040_v53  ;;  %v3707_v13 = vand.u32 2147483648, %v9900_v50  ;;  %vm3701_vm11 = vweird.f32 %v9900_v50 }
0x15a3   : > { %v5622_v12 = vmul.f32 1.442695, %v5614_v47  ;;  %v9929_v33 = vpop.eup %7299  ;;  %v4966_v57 = vsel %vm908_vm2, %v9922_v27, 0.0  ;;  %6756 = vmatmul.msk.f32.gmra.mxu1 %vm908_vm2, %v4026_v49  ;;  %6739 = vmatmul.msk.f32.gmra.mxu0 %vm908_vm2, %v3680_v37  ;;  %v3694_v43 = vsel %vm3691_vm12, %v3693_v38, %v3689_v39  ;;  %vm4287_vm0 = vweird.f32 %v9868_v8 }
0x15a4   : > { %4967 = vadd.xlane.f32.xlu1 %v4966_v57  ;;  %v4283_v41 = vmul.f32 %v9929_v33, %v9868_v8  ;;  %v3705_v57 = vand.u32 2147483647, %v9900_v50  ;;  %v3695_v7 = vmul.f32 %v9444_v46, %v3694_v43  ;;  %vm4288_vm3 = vweird.f32 %v9929_v33 }
0x15a5   : > { %7305 = vpow2.f32 %v5622_v12  ;;  %vm4632_vm8 = vweird.f32 %v9873_v9 }
0x15a6   : > { %v9943_v30 = vpop.eup %7301  ;;  %7307 = vrcp.f32 %v9908_v62  ;;  %v4284_v52 = vsub.f32 1.0, %v4283_v41  ;;  %v3708_v41 = vor.u32 1.1754944e-38, %v3707_v13  ;;  %vm3706_vm7 = vcmp.eq.f32.partialorder %v3705_v57, 8.507059e+37 }
0x15a7   : > { %v9951_v29 = vpop.eup %7303  ;;  %v3697_v60 = vmul.f32 %v9943_v30, %v9900_v50  ;;  %v9966_v16 = vpop.xlane.xlu1 %3935  ;;  %vm3702_vm4 = vweird.f32 %v9943_v30  ;;  %v4306_v13 = vand.u32 2147483647, %v9908_v62 }
0x15a8   : > { %v5595_v25 = vpop.xlane.xlu0 %5594  ;;  %v4628_v12 = vmul.f32 %v9951_v29, %v9873_v9  ;;  %7309 = vrcp.f32 %v9966_v16  ;;  %v4285_v37 = vmul.f32 %v9929_v33, %v4284_v52  ;;  %vm9997_vm13 = vmor %vm3701_vm11, %vm3702_vm4  ;;  %vm4633_vm12 = vweird.f32 %v9951_v29 }
0x15a9   : > { %v3698_v1 = vsub.f32 1.0, %v3697_v60  ;;  %v5615_v47 = vsub.f32 %v9536_v14, %v5595_v25  ;;  %v9984_v14 = vpop.xlane.xlu2 %4607  ;;  %vm10039_vm4 = vmor %vm4287_vm0, %vm4288_vm3  ;;  %vm4047_vm0 = vweird.f32 %v9966_v16 }
0x15aa   : > { %v4629_v49 = vsub.f32 1.0, %v4628_v12  ;;  %v4286_v38 = vadd.f32 %v9929_v33, %v4285_v37  ;;  %v4053_v37 = vand.u32 2147483648, %v9966_v16 }
0x15ab   : > { %v9973_v31 = vpop.eup %7305  ;;  %v3699_v58 = vmul.f32 %v9943_v30, %v3698_v1  ;;  %v5624_v19 = vmul.f32 1.442695, %v5615_v47  ;;  %6757 = vmatmul.msk.f32.gmra.mxu1 %vm908_vm2, %v4041_v22  ;;  %6740 = vmatmul.msk.f32.gmra.mxu0 %vm908_vm2, %v3695_v7  ;;  %v4051_v7 = vand.u32 2147483647, %v9966_v16 }
0x15ac   : > { %v9979_v44 = vpop.eup %7307  ;;  %v5638_v48 = vsel %vm908_vm2, %v9973_v31, 0.0  ;;  %v4630_v25 = vmul.f32 %v9951_v29, %v4629_v49  ;;  %v4290_v49 = vsel %vm10039_vm4, %v9929_v33, %v4286_v38  ;;  %v4638_v38 = vand.u32 2147483648, %v9873_v9 }
0x15ad   : > { %v3700_v2 = vadd.f32 %v9943_v30, %v3699_v58  ;;  %7311 = vpow2.f32 %v5624_v19  ;;  %5639 = vadd.xlane.f32.xlu0 %v5638_v48  ;;  %v4298_v6 = vmul.f32 %v9979_v44, %v9908_v62  ;;  %v4636_v58 = vand.u32 2147483647, %v9873_v9 }
0x15ae   : > { %7313 = vrcp.f32 %v9984_v14  ;;  %v10005_v45 = vpop.eup %7309  ;;  %v4293_v19 = vand.u32 2147483648, %v9868_v8  ;;  %v4291_v48 = vand.u32 2147483647, %v9868_v8  ;;  %vm4052_vm4 = vcmp.eq.f32.partialorder %v4051_v7, 8.507059e+37 }
0x15af   : > { %v10003_v56 = vpop.xlane.xlu1 %4265  ;;  %v3704_v50 = vsel %vm9997_vm13, %v9943_v30, %v3700_v2  ;;  %v4043_v60 = vmul.f32 %v10005_v45, %v9966_v16  ;;  %v4299_v1 = vsub.f32 1.0, %v4298_v6  ;;  %v10032_v2 = vpop.f32.mrf.mxu1  ;;  %vm4048_vm11 = vweird.f32 %v10005_v45  ;;  %vm10067_vm13 = vmor %vm4632_vm8, %vm4633_vm12 }
0x15b0   : > { %v10008_v46 = vpop.xlane.xlu0 %4613  ;;  %7315 = vrcp.f32 %v10003_v56  ;;  %v3709_v53 = vsel %vm3706_vm7, %v3708_v41, %v3704_v50  ;;  %vm10071_vm3 = vcmp.eq.f32.partialorder %v4636_v58, 8.507059e+37  ;;  %vm4292_vm7 = vcmp.eq.f32.partialorder %v4291_v48, 8.507059e+37  ;;  %vm4049_vm12 = vmor %vm4047_vm0, %vm4048_vm11 }
0x15b1   : > { %v4044_v47 = vsub.f32 1.0, %v4043_v60  ;;  %v3710_v12 = vmul.f32 %v9516_v20, %v3709_v53  ;;  %v4631_v20 = vadd.f32 %v9951_v29, %v4630_v25  ;;  %v4300_v57 = vmul.f32 %v9979_v44, %v4299_v1 }
0x15b2   : > { %v4294_v1 = vor.u32 1.1754944e-38, %v4293_v19  ;;  %vm4303_vm8 = vweird.f32 %v9979_v44 }
0x15b3   : > { %v10018_v39 = vpop.eup %7311  ;;  %v4045_v43 = vmul.f32 %v10005_v45, %v4044_v47  ;;  %6741 = vmatmul.msk.f32.gmra.mxu0 %vm908_vm2, %v3710_v12  ;;  %v4635_v47 = vsel %vm10067_vm13, %v9951_v29, %v4631_v20  ;;  %v4054_v12 = vor.u32 1.1754944e-38, %v4053_v37  ;;  %v4308_v29 = vand.u32 2147483648, %v9908_v62 }
0x15b4   : > { %v5641_v30 = vsel %vm908_vm2, %v10018_v39, 0.0  ;;  %v10024_v52 = vpop.eup %7313  ;;  %v4295_v53 = vsel %vm4292_vm7, %v4294_v1, %v4290_v49  ;;  %vm4302_vm13 = vweird.f32 %v9908_v62  ;;  %vm4647_vm7 = vweird.f32 %v9984_v14 }
0x15b5   : > { %5642 = vadd.xlane.f32.xlu1 %v5641_v30  ;;  %v4643_v50 = vmul.f32 %v10024_v52, %v9984_v14  ;;  %v4046_v41 = vadd.f32 %v10005_v45, %v4045_v43  ;;  %v4301_v30 = vadd.f32 %v9979_v44, %v4300_v57  ;;  %v4639_v43 = vor.u32 1.1754944e-38, %v4638_v38  ;;  %vm10094_vm11 = vmor %vm4302_vm13, %vm4303_vm8 }
0x15b6   : > { %v10030_v22 = vpop.eup %7315  ;;  %v4296_v20 = vmul.f32 %v9507_v17, %v4295_v53  ;;  %v4309_v60 = vor.u32 1.1754944e-38, %v4308_v29  ;;  %vm4648_vm0 = vweird.f32 %v10024_v52 }
0x15b7   : > { %v10052_v5 = vpop.xlane.xlu1 %4610  ;;  %v4313_v8 = vmul.f32 %v10030_v22, %v10003_v56  ;;  %v4644_v58 = vsub.f32 1.0, %v4643_v50  ;;  %v4050_v19 = vsel %vm4049_vm12, %v10005_v45, %v4046_v41  ;;  %v4640_v49 = vsel %vm10071_vm3, %v4639_v43, %v4635_v47 }
0x15b8   : > { %v10050_v6 = vpop.xlane.xlu2 %4274  ;;  %v10061_v33 = vpop.xlane.xlu0 %5597  ;;  %7317 = vrcp.f32 %v10052_v5  ;;  %v4055_v16 = vsel %vm4052_vm4, %v4054_v12, %v4050_v19  ;;  %v4305_v50 = vsel %vm10094_vm11, %v9979_v44, %v4301_v30  ;;  %v4927_v41 = vsub.f32 %v9433_v23, %v9785_v18  ;;  %vm10133_vm4 = vmor %vm4647_vm7, %vm4648_vm0 }
0x15b9   : > { %v4314_v9 = vsub.f32 1.0, %v4313_v8  ;;  %7319 = vrcp.f32 %v10008_v46  ;;  %v4056_v48 = vmul.f32 %v9532_v15, %v4055_v16  ;;  %v4645_v37 = vmul.f32 %v10024_v52, %v4644_v58  ;;  %v10113_v8 = vpop.f32.mrf.mxu1  ;;  %v11415_v58 = vld [vmem:[#allocation13_spill] sm:$0xff] }
0x15ba   : > { %v4641_v1 = vmul.f32 %v9490_v4, %v4640_v49  ;;  %vm4307_vm3 = vcmp.eq.f32.partialorder %v4306_v13, 8.507059e+37  ;;  %v4651_v23 = vand.u32 2147483647, %v9984_v14  ;;  %vm4318_vm8 = vweird.f32 %v10030_v22 }
0x15bb   : > { %v4315_v62 = vmul.f32 %v10030_v22, %v4314_v9  ;;  %6758 = vmatmul.msk.f32.gmra.mxu1 %vm908_vm2, %v4056_v48  ;;  %6768 = vmatmul.msk.f32.vlgmr.msra.gmra.mxu0 %vm908_vm2, %v4296_v20  ;;  %v4310_v44 = vsel %vm4307_vm3, %v4309_v60, %v4305_v50  ;;  %v4646_v53 = vadd.f32 %v10024_v52, %v4645_v37  ;;  %vm4317_vm12 = vweird.f32 %v10003_v56 }
0x15bc   : > { %v4323_v30 = vand.u32 2147483648, %v10003_v56  ;;  %v4321_v19 = vand.u32 2147483647, %v10003_v56  ;;  %v4311_v43 = vmul.f32 %v9521_v42, %v4310_v44  ;;  %vm10142_vm13 = vmor %vm4317_vm12, %vm4318_vm8  ;;  %vm4652_vm11 = vcmp.eq.f32.partialorder %v4651_v23, 8.507059e+37 }
0x15bd   : > { %v4316_v12 = vadd.f32 %v10030_v22, %v4315_v62  ;;  %v4650_v48 = vsel %vm10133_vm4, %v10024_v52, %v4646_v53  ;;  %v4938_v62 = vmul.f32 1.442695, %v4927_v41  ;;  %vm4662_vm7 = vweird.f32 %v10052_v5 }
0x15be   : > { %v10102_v17 = vpop.eup %7317  ;;  %v4324_v45 = vor.u32 1.1754944e-38, %v4323_v30  ;;  %vm4322_vm3 = vcmp.eq.f32.partialorder %v4321_v19, 8.507059e+37  ;;  %v4666_v41 = vand.u32 2147483647, %v10052_v5 }
0x15bf   : > { %v10100_v7 = vpop.xlane.xlu1 %4268  ;;  %v4658_v25 = vmul.f32 %v10102_v17, %v10052_v5  ;;  %v10121_v47 = vpop.eup %7319  ;;  %v4320_v42 = vsel %vm10142_vm13, %v10030_v22, %v4316_v12  ;;  %vm4663_vm0 = vweird.f32 %v10102_v17 }
0x15c0   : > { %v10098_v57 = vpop.xlane.xlu2 %4619  ;;  %v5256_v15 = vpop.xlane.xlu0 %5255  ;;  %7321 = vrcp.f32 %v10100_v7  ;;  %v4673_v9 = vmul.f32 %v10121_v47, %v10008_v46  ;;  %v4338_v53 = vand.u32 2147483648, %v10100_v7  ;;  %vm10196_vm12 = vmor %vm4662_vm7, %vm4663_vm0  ;;  %vm4332_vm4 = vweird.f32 %v10100_v7 }
0x15c1   : > { %v5272_v38 = vsub.f32 %v9579_v10, %v5256_v15  ;;  %v4659_v4 = vsub.f32 1.0, %v4658_v25  ;;  %v4653_v10 = vand.u32 2147483648, %v9984_v14  ;;  %v10168_v60 = vpop.f32.mrf.mxu1  ;;  %v4325_v25 = vsel %vm4322_vm3, %v4324_v45, %v4320_v42 }
0x15c2   : > { %v4674_v15 = vsub.f32 1.0, %v4673_v9  ;;  %vm4678_vm7 = vweird.f32 %v10121_v47  ;;  %vm4677_vm0 = vweird.f32 %v10008_v46 }
0x15c3   : > { %v5283_v18 = vmul.f32 1.442695, %v5272_v38  ;;  %v4660_v13 = vmul.f32 %v10102_v17, %v4659_v4  ;;  %6769 = vmatmul.msk.f32.gmra.mxu0 %vm908_vm2, %v4311_v43  ;;  %6785 = vmatmul.msk.f32.vlgmr.msra.gmra.mxu1 %vm908_vm2, %v4641_v1  ;;  %v4654_v49 = vor.u32 1.1754944e-38, %v4653_v10  ;;  %v4336_v4 = vand.u32 2147483647, %v10100_v7 }
0x15c4   : > { %v4326_v10 = vmul.f32 %v9547_v40, %v4325_v25  ;;  %v4675_v29 = vmul.f32 %v10121_v47, %v4674_v15 }
0x15c5   : > { %7323 = vpow2.f32 %v5283_v18  ;;  %v4655_v38 = vsel %vm4652_vm11, %v4654_v49, %v4650_v48  ;;  %v4661_v52 = vadd.f32 %v10102_v17, %v4660_v13  ;;  %v4668_v18 = vand.u32 2147483648, %v10052_v5 }
0x15c6   : > { %7325 = vrcp.f32 %v10050_v6  ;;  %v10150_v20 = vpop.eup %7321  ;;  %v4656_v30 = vmul.f32 %v9534_v55, %v4655_v38  ;;  %v4339_v49 = vor.u32 1.1754944e-38, %v4338_v53  ;;  %vm4667_vm11 = vcmp.eq.f32.partialorder %v4666_v41, 8.507059e+37 }
0x15c7   : > { %v10148_v14 = vpop.xlane.xlu1 %4271  ;;  %v4328_v37 = vmul.f32 %v10150_v20, %v10100_v7  ;;  %vm4333_vm8 = vweird.f32 %v10150_v20  ;;  %v4665_v42 = vsel %vm10196_vm12, %v10102_v17, %v4661_v52  ;;  %v4669_v48 = vor.u32 1.1754944e-38, %v4668_v18  ;;  %vm10241_vm12 = vmor %vm4677_vm0, %vm4678_vm7 }
0x15c8   : > { %v10146_v16 = vpop.xlane.xlu2 %5603  ;;  %v10155_v56 = vpop.xlane.xlu0 %5600  ;;  %7327 = vrcp.f32 %v10148_v14  ;;  %vm4334_vm13 = vmor %vm4332_vm4, %vm4333_vm8  ;;  %vm4337_vm3 = vcmp.eq.f32.partialorder %v4336_v4, 8.507059e+37  ;;  %v4931_v38 = vsub.f32 %v9461_v51, %v9838_v59  ;;  %v4676_v52 = vadd.f32 %v10121_v47, %v4675_v29 }
0x15c9   : > { %v4329_v22 = vsub.f32 1.0, %v4328_v37  ;;  %7329 = vrcp.f32 %v10098_v57  ;;  %v4670_v25 = vsel %vm4667_vm11, %v4669_v48, %v4665_v42  ;;  %v10229_v18 = vpop.f32.mrf.mxu1  ;;  %vm4347_vm4 = vweird.f32 %v10148_v14 }
0x15ca   : > { %7331 = vpow2.f32 %v4938_v62  ;;  %v4366_v48 = vand.u32 2147483647, %v10050_v6  ;;  %vm4362_vm0 = vweird.f32 %v10050_v6 }
0x15cb   : > { %v10166_v50 = vpop.eup %7323  ;;  %v4330_v44 = vmul.f32 %v10150_v20, %v4329_v22  ;;  %6770 = vmatmul.msk.f32.gmra.mxu0 %vm908_vm2, %v4326_v10  ;;  %6786 = vmatmul.msk.f32.gmra.mxu1 %vm908_vm2, %v4656_v30  ;;  %v4351_v30 = vand.u32 2147483647, %v10148_v14 }
0x15cc   : > { %v10171_v1 = vpop.eup %7325  ;;  %v5302_v23 = vsel %vm908_vm2, %v10166_v50, 0.0 }
0x15cd   : > { %5303 = vadd.xlane.f32.xlu0 %v5302_v23  ;;  %v4358_v9 = vmul.f32 %v10171_v1, %v10050_v6  ;;  %v4331_v43 = vadd.f32 %v10150_v20, %v4330_v44  ;;  %v4683_v44 = vand.u32 2147483648, %v10008_v46  ;;  %vm4352_vm7 = vcmp.eq.f32.partialorder %v4351_v30, 8.507059e+37 }
0x15ce   : > { %v10182_v12 = vpop.eup %7327  ;;  %5437 = vrot.lane.b32.xlu1 %v11415_v58, %s11328_s25  ;;  %s11460_s25 = smov 10  }
0x15cf   : > { %v4343_v55 = vmul.f32 %v10182_v12, %v10148_v14  ;;  %v5253_v40 = vpop.xlane.xlu1 %5252  ;;  %v4335_v62 = vsel %vm4334_vm13, %v10150_v20, %v4331_v43  ;;  %v4359_v15 = vsub.f32 1.0, %v4358_v9  ;;  %v4681_v20 = vand.u32 2147483647, %v10008_v46 }
0x15d0   : > { %v10207_v13 = vpop.xlane.xlu0 %4616  ;;  %v5271_v5 = vsub.f32 %v9612_v24, %v5253_v40  ;;  %v10215_v37 = vpop.xlane.xlu2 %5261  ;;  %v4340_v22 = vsel %vm4337_vm3, %v4339_v49, %v4335_v62  ;;  %vm4348_vm8 = vweird.f32 %v10182_v12  ;;  %v4353_v46 = vand.u32 2147483648, %v10148_v14 }
0x15d1   : > { %v4344_v45 = vsub.f32 1.0, %v4343_v55  ;;  %7333 = vrcp.f32 %v10207_v13  ;;  %v10219_v24 = vpop.eup %7329  ;;  %v4341_v41 = vmul.f32 %v9575_v32, %v4340_v22  ;;  %v4671_v32 = vmul.f32 %v9560_v26, %v4670_v25  ;;  %vm10262_vm11 = vmor %vm4347_vm4, %vm4348_vm8 }
0x15d2   : > { %v5281_v7 = vmul.f32 1.442695, %v5271_v5  ;;  %v10227_v23 = vpop.eup %7331  ;;  %v4703_v51 = vmul.f32 %v10219_v24, %v10098_v57  ;;  %v4360_v10 = vmul.f32 %v10171_v1, %v4359_v15  ;;  %v4680_v43 = vsel %vm10241_vm12, %v10121_v47, %v4676_v52 }
0x15d3   : > { %v4345_v17 = vmul.f32 %v10182_v12, %v4344_v45  ;;  %6771 = vmatmul.msk.f32.gmra.mxu0 %vm908_vm2, %v4341_v41  ;;  %6787 = vmatmul.msk.f32.gmra.mxu1 %vm908_vm2, %v4671_v32  ;;  %v4946_v55 = vmul.f32 1.442695, %v4931_v38  ;;  %vm4682_vm13 = vcmp.eq.f32.partialorder %v4681_v20, 8.507059e+37  ;;  %v4684_v40 = vor.u32 1.1754944e-38, %v4683_v44 }
0x15d4   : > { %7335 = vpow2.f32 %v5281_v7  ;;  %v4704_v29 = vsub.f32 1.0, %v4703_v51  ;;  %v4368_v49 = vand.u32 2147483648, %v10050_v6  ;;  %v4354_v45 = vor.u32 1.1754944e-38, %v4353_v46  ;;  %v11430_v6 = vld [vmem:[#allocation26_spill] sm:$0xff] }
0x15d5   : > { %v4346_v59 = vadd.f32 %v10182_v12, %v4345_v17  ;;  %v4685_v62 = vsel %vm4682_vm13, %v4684_v40, %v4680_v43  ;;  %v4361_v15 = vadd.f32 %v10171_v1, %v4360_v10  ;;  %vm4363_vm3 = vweird.f32 %v10171_v1 }
0x15d6   : > { %v5616_v17 = vsub.f32 %v9562_v63, %v10061_v33  ;;  %v4705_v38 = vmul.f32 %v10219_v24, %v4704_v29  ;;  %v4686_v41 = vmul.f32 %v9550_v61, %v4685_v62  ;;  %v10291_v63 = vpop.f32.mrf.mxu1  ;;  %vm10295_vm8 = vmor %vm4362_vm0, %vm4363_vm3  ;;  %vm10299_vm12 = vcmp.eq.f32.partialorder %v4366_v48, 8.507059e+37 }
0x15d7   : > { %v10239_v53 = vpop.eup %7333  ;;  %v10255_v19 = vpop.xlane.xlu1 %4277  ;;  %v4350_v42 = vsel %vm10262_vm11, %v10182_v12, %v4346_v59  ;;  %v4369_v44 = vor.u32 1.1754944e-38, %v4368_v49  ;;  %v4957_v61 = vsel %vm908_vm2, %v10227_v23, 0.0  ;;  %vm4707_vm4 = vweird.f32 %v10098_v57 }
0x15d8   : > { %v4688_v9 = vmul.f32 %v10239_v53, %v10207_v13  ;;  %v10253_v26 = vpop.xlane.xlu0 %4622  ;;  %v10275_v7 = vpop.xlane.xlu2 %4949  ;;  %v4355_v22 = vsel %vm4352_vm7, %v4354_v45, %v4350_v42  ;;  %v5626_v51 = vmul.f32 1.442695, %v5616_v17  ;;  %v4698_v59 = vand.u32 2147483648, %v10207_v13 }
0x15d9   : > { %7337 = vrcp.f32 %v10253_v26  ;;  %v4356_v52 = vmul.f32 %v9594_v11, %v4355_v22  ;;  %v4365_v10 = vsel %vm10295_vm8, %v10171_v1, %v4361_v15  ;;  %vm4693_vm13 = vweird.f32 %v10239_v53 }
0x15da   : > { %v4689_v5 = vsub.f32 1.0, %v4688_v9  ;;  %7339 = vrcp.f32 %v10255_v19  ;;  %v10271_v47 = vpop.eup %7335  ;;  %v4696_v30 = vand.u32 2147483647, %v10207_v13  ;;  %v4706_v43 = vadd.f32 %v10219_v24, %v4705_v38 }
0x15db   : > { %v5299_v25 = vsel %vm908_vm2, %v10271_v47, 0.0  ;;  %7341 = vrcp.f32 %v10275_v7  ;;  %6772 = vmatmul.msk.f32.gmra.mxu0 %vm908_vm2, %v4356_v52  ;;  %6788 = vmatmul.msk.f32.gmra.mxu1 %vm908_vm2, %v4686_v41  ;;  %vm4708_vm11 = vweird.f32 %v10219_v24  ;;  %v5274_v1 = vsub.f32 %v9614_v28, %v10215_v37  ;;  %v11426_v28 = vld [vmem:[#allocation25_spill] sm:$0xff] }
0x15dc   : > { %v4690_v12 = vmul.f32 %v10239_v53, %v4689_v5  ;;  %5300 = vadd.xlane.f32.xlu2 %v5299_v25  ;;  %7343 = vpow2.f32 %v4946_v55  ;;  %vm4692_vm3 = vweird.f32 %v10207_v13  ;;  %v4370_v14 = vsel %vm10299_vm12, %v4369_v44, %v4365_v10  ;;  %vm10346_vm8 = vmor %vm4707_vm4, %vm4708_vm11 }
0x15dd   : > { %v4711_v5 = vand.u32 2147483647, %v10098_v57  ;;  %v4713_v42 = vand.u32 2147483648, %v10098_v57  ;;  %vm4694_vm7 = vmor %vm4692_vm3, %vm4693_vm13  ;;  %v4699_v48 = vor.u32 1.1754944e-38, %v4698_v59  ;;  %v5617_v37 = vsub.f32 %v11426_v28, %v10155_v56 }
0x15de   : > { %v4691_v46 = vadd.f32 %v10239_v53, %v4690_v12  ;;  %vm4697_vm0 = vcmp.eq.f32.partialorder %v4696_v30, 8.507059e+37  ;;  %v11429_v12 = vld [vmem:[#allocation22_spill] sm:$0xff]  ;;  %v5287_v56 = vmul.f32 1.442695, %v5274_v1  ;;  %v4710_v57 = vsel %vm10346_vm8, %v10219_v24, %v4706_v43  ;;  %v10367_v59 = vpop.f32.mrf.mxu1 }
0x15df   : > { %v10289_v20 = vpop.eup %7337  ;;  %v5259_v4 = vpop.xlane.xlu1 %5258  ;;  %v4371_v22 = vmul.f32 %v11429_v12, %v4370_v14  ;;  %v4381_v24 = vand.u32 2147483647, %v10255_v19  ;;  %vm4712_vm4 = vcmp.eq.f32.partialorder %v4711_v5, 8.507059e+37  ;;  %vm4377_vm13 = vweird.f32 %v10255_v19 }
0x15e0   : > { %v10305_v11 = vpop.eup %7339  ;;  %v10311_v32 = vpop.xlane.xlu0 %4280  ;;  %v4718_v55 = vmul.f32 %v10289_v20, %v10253_v26  ;;  %v5273_v49 = vsub.f32 %v9670_v36, %v5259_v4  ;;  %v4695_v62 = vsel %vm4694_vm7, %v10239_v53, %v4691_v46  ;;  %v4383_v53 = vand.u32 2147483648, %v10255_v19 }
0x15e1   : > { %v4373_v9 = vmul.f32 %v10305_v11, %v10255_v19  ;;  %7345 = vrcp.f32 %v10311_v32  ;;  %v10331_v29 = vpop.eup %7341  ;;  %v4700_v25 = vsel %vm4697_vm0, %v4699_v48, %v4695_v62  ;;  %vm4378_vm12 = vweird.f32 %v10305_v11  ;;  %v11433_v62 = vld [vmem:[#allocation27_spill] sm:$0xff] }
0x15e2   : > { %v10336_v45 = vpop.eup %7343  ;;  %v4719_v17 = vsub.f32 1.0, %v4718_v55  ;;  %v5285_v36 = vmul.f32 1.442695, %v5273_v49  ;;  %v4973_v38 = vmul.f32 %v10331_v29, %v10275_v7  ;;  %v4701_v33 = vmul.f32 %v11430_v6, %v4700_v25  ;;  %vm10378_vm11 = vmor %vm4377_vm13, %vm4378_vm12  ;;  %v11434_v25 = vld [vmem:[#allocation23_spill] sm:$0xff] }
0x15e3   : > { %v4374_v40 = vsub.f32 1.0, %v4373_v9  ;;  %6773 = vmatmul.msk.f32.gmra.mxu0 %vm908_vm2, %v4371_v22  ;;  %v4714_v4 = vor.u32 1.1754944e-38, %v4713_v42  ;;  %v5628_v30 = vmul.f32 1.442695, %v5617_v37  ;;  %v4969_v55 = vsel %vm908_vm2, %v10336_v45, 0.0 }
0x15e4   : > { %4958 = vadd.xlane.f32.xlu2 %v4957_v61  ;;  %7347 = vpow2.f32 %v5285_v36  ;;  %v4720_v46 = vmul.f32 %v10289_v20, %v4719_v17  ;;  %6789 = vmatmul.msk.f32.gmra.mxu1 %vm908_vm2, %v4701_v33  ;;  %v4974_v1 = vsub.f32 1.0, %v4973_v38  ;;  %vm4723_vm3 = vweird.f32 %v10289_v20 }
0x15e5   : > { %v4375_v13 = vmul.f32 %v10305_v11, %v4374_v40  ;;  %7349 = vpow2.f32 %v5626_v51  ;;  %v4715_v43 = vsel %vm4712_vm4, %v4714_v4, %v4710_v57  ;;  %v4384_v40 = vor.u32 1.1754944e-38, %v4383_v53 }
0x15e6   : > { %v4728_v14 = vand.u32 2147483648, %v10253_v26  ;;  %vm4382_vm7 = vcmp.eq.f32.partialorder %v4381_v24, 8.507059e+37  ;;  %v4721_v48 = vadd.f32 %v10289_v20, %v4720_v46  ;;  %v4396_v49 = vand.u32 2147483647, %v10311_v32  ;;  %v10431_v4 = vpop.f32.mrf.mxu1 }
0x15e7   : > { %v10357_v52 = vpop.eup %7345  ;;  %v4376_v41 = vadd.f32 %v10305_v11, %v4375_v13  ;;  %v10365_v61 = vpop.xlane.xlu1 %4625  ;;  %v4398_v28 = vand.u32 2147483648, %v10311_v32  ;;  %v4975_v12 = vmul.f32 %v10331_v29, %v4974_v1  ;;  %vm4722_vm8 = vweird.f32 %v10253_v26 }
0x15e8   : > { %v10363_v44 = vpop.xlane.xlu0 %5606  ;;  %v4388_v10 = vmul.f32 %v10357_v52, %v10311_v32  ;;  %7351 = vrcp.f32 %v10365_v61  ;;  %vm4393_vm0 = vweird.f32 %v10357_v52  ;;  %v4726_v22 = vand.u32 2147483647, %v10253_v26  ;;  %vm10410_vm12 = vmor %vm4722_vm8, %vm4723_vm3 }
0x15e9   : > { %7353 = vpow2.f32 %v5287_v56  ;;  %v4380_v19 = vsel %vm10378_vm11, %v10305_v11, %v4376_v41  ;;  %v4716_v56 = vmul.f32 %v11434_v25, %v4715_v43  ;;  %vm4392_vm4 = vweird.f32 %v10311_v32 }
0x15ea   : > { %v4389_v9 = vsub.f32 1.0, %v4388_v10  ;;  %v10390_v42 = vpop.eup %7347  ;;  %v4385_v37 = vsel %vm4382_vm7, %v4384_v40, %v4380_v19  ;;  %7355 = vpow2.f32 %v5628_v30  ;;  %vm4394_vm13 = vmor %vm4392_vm4, %vm4393_vm0  ;;  %v4399_v6 = vor.u32 1.1754944e-38, %v4398_v28 }
0x15eb   : > { %v10395_v13 = vpop.eup %7349  ;;  %v4386_v15 = vmul.f32 %v11433_v62, %v4385_v37  ;;  %v5305_v17 = vsel %vm908_vm2, %v10390_v42, 0.0  ;;  %v4725_v32 = vsel %vm10410_vm12, %v10289_v20, %v4721_v48  ;;  %v4729_v24 = vor.u32 1.1754944e-38, %v4728_v14 }
0x15ec   : > { %v4390_v5 = vmul.f32 %v10357_v52, %v4389_v9  ;;  %4970 = vadd.xlane.f32.xlu2 %v4969_v55  ;;  %5306 = vadd.xlane.f32.xlu0 %v5305_v17  ;;  %v5644_v33 = vsel %vm908_vm2, %v10395_v13, 0.0  ;;  %vm4397_vm11 = vcmp.eq.f32.partialorder %v4396_v49, 8.507059e+37  ;;  %v4976_v30 = vadd.f32 %v10331_v29, %v4975_v12 }
0x15ed   : > { %6774 = vmatmul.msk.f32.gmra.mxu0 %vm908_vm2, %v4386_v15  ;;  %6790 = vmatmul.msk.f32.gmra.mxu1 %vm908_vm2, %v4716_v56  ;;  %vm4978_vm3 = vweird.f32 %v10331_v29  ;;  %vm4727_vm7 = vcmp.eq.f32.partialorder %v4726_v22, 8.507059e+37  ;;  %v4743_v20 = vand.u32 2147483648, %v10365_v61  ;;  %v4983_v1 = vand.u32 2147483648, %v10275_v7 }
0x15ee   : > { %v4391_v11 = vadd.f32 %v10357_v52, %v4390_v5  ;;  %v10402_v36 = vpop.eup %7351  ;;  %v4730_v55 = vsel %vm4727_vm7, %v4729_v24, %v4725_v32  ;;  %v4741_v40 = vand.u32 2147483647, %v10365_v61  ;;  %vm4977_vm8 = vweird.f32 %v10275_v7  ;;  %v4101_v22 = vpop.f32.mrf.mxu1 }
0x15ef   : > { %v4733_v57 = vmul.f32 %v10402_v36, %v10365_v61  ;;  %v10418_v41 = vpop.xlane.xlu1 %4952  ;;  %v10420_v26 = vpop.eup %7353  ;;  %vm4738_vm0 = vweird.f32 %v10402_v36  ;;  %v4981_v14 = vand.u32 2147483647, %v10275_v7  ;;  %vm10452_vm12 = vmor %vm4977_vm8, %vm4978_vm3  ;;  %vm4737_vm4 = vweird.f32 %v10365_v61 }
0x15f0   : > { %v5265_v38 = vpop.xlane.xlu0 %5264  ;;  %7357 = vrcp.f32 %v10418_v41  ;;  %v4395_v46 = vsel %vm4394_vm13, %v10357_v52, %v4391_v11  ;;  %v10443_v19 = vpop.eup %7355  ;;  %v4980_v7 = vsel %vm10452_vm12, %v10331_v29, %v4976_v30  ;;  %vm4739_vm13 = vmor %vm4737_vm4, %vm4738_vm0  ;;  %v4744_v62 = vor.u32 1.1754944e-38, %v4743_v20 }
0x15f1   : > { %v4734_v10 = vsub.f32 1.0, %v4733_v57  ;;  %v4400_v51 = vsel %vm4397_vm11, %v4399_v6, %v4395_v46  ;;  %v5275_v52 = vsub.f32 %v9754_v54, %v5265_v38  ;;  %v11439_v54 = vld [vmem:[#allocation28_spill] sm:$0xff]  ;;  %v10463_v11 = vpop.f32.mrf.mxu0  ;;  %v4984_v17 = vor.u32 1.1754944e-38, %v4983_v1 }
0x15f2   : > { %v4401_v43 = vmul.f32 %v9667_v35, %v4400_v51  ;;  %v5308_v35 = vsel %vm908_vm2, %v10420_v26, 0.0  ;;  %v4731_v28 = vmul.f32 %v11439_v54, %v4730_v55  ;;  %vm4742_vm11 = vcmp.eq.f32.partialorder %v4741_v40, 8.507059e+37  ;;  %v11442_v54 = vld [vmem:[#allocation16_spill] sm:$0xff] }
0x15f3   : > { %v4735_v9 = vmul.f32 %v10402_v36, %v4734_v10  ;;  %v5289_v12 = vmul.f32 1.442695, %v5275_v52  ;;  %vm4982_vm3 = vcmp.eq.f32.partialorder %v4981_v14, 8.507059e+37  ;;  %v4998_v57 = vand.u32 2147483648, %v10418_v41 }
0x15f4   : > { %5645 = vadd.xlane.f32.xlu0 %v5644_v33  ;;  %v4985_v38 = vsel %vm4982_vm3, %v4984_v17, %v4980_v7  ;;  %v4996_v6 = vand.u32 2147483647, %v10418_v41  ;;  %vm4992_vm0 = vweird.f32 %v10418_v41  ;;  %v10499_v17 = vpop.xlane.xlu2 %5294 }
0x15f5   : > { %v4736_v5 = vadd.f32 %v10402_v36, %v4735_v9  ;;  %6775 = vmatmul.msk.f32.gmra.mxu0 %vm908_vm2, %v4401_v43  ;;  %6791 = vmatmul.msk.f32.gmra.mxu1 %vm908_vm2, %v4731_v28  ;;  %v4986_v24 = vmul.f32 %v9647_v0, %v4985_v38  ;;  %v4999_v30 = vor.u32 1.1754944e-38, %v4998_v57  ;;  %v5619_v28 = vsub.f32 %v11442_v54, %v10363_v44  ;;  %v11444_v38 = vld [vmem:[#allocation21_spill] sm:$0xff] }
0x15f6   : > { %v7358_v48 = vpop.eup %7357  ;;  %vm4997_vm12 = vcmp.eq.f32.partialorder %v4996_v6, 8.507059e+37  ;;  %v4104_v14 = vpop.f32.mrf.mxu1 }
0x15f7   : > { %v4988_v15 = vmul.f32 %v7358_v48, %v10418_v41  ;;  %v10470_v61 = vpop.xlane.xlu1 %5609  ;;  %v4740_v29 = vsel %vm4739_vm13, %v10402_v36, %v4736_v5  ;;  %vm4993_vm7 = vweird.f32 %v7358_v48  ;;  %v5647_v36 = vsel %vm908_vm2, %v10443_v19, 0.0 }
0x15f8   : > { %v10458_v37 = vpop.xlane.xlu0 %4955  ;;  %5309 = vadd.xlane.f32.xlu1 %v5308_v35  ;;  %v4745_v56 = vsel %vm4742_vm11, %v4744_v62, %v4740_v29  ;;  %vm4994_vm8 = vmor %vm4992_vm0, %vm4993_vm7  ;;  %v11441_v35 = vld [vmem:[#allocation17_spill] sm:$0xff]  ;;  %v5632_v44 = vmul.f32 1.442695, %v5619_v28  ;;  %vm5322_vm0 = vweird.f32 %v10499_v17 }
0x15f9   : > { %7359 = vrcp.f32 %v10458_v37  ;;  %v4989_v25 = vsub.f32 1.0, %v4988_v15  ;;  %v4746_v32 = vmul.f32 %v9719_v21, %v4745_v56  ;;  %v11440_v21 = vld [vmem:[#allocation19_spill] sm:$0xff]  ;;  %v10485_v43 = vpop.f32.mrf.mxu0  ;;  %v5013_v40 = vand.u32 2147483648, %v10458_v37 }
0x15fa   : > { %7361 = vpow2.f32 %v5289_v12  ;;  %v5011_v5 = vand.u32 2147483647, %v10458_v37  ;;  %vm5007_vm13 = vweird.f32 %v10458_v37 }
0x15fb   : > { %v4990_v53 = vmul.f32 %v7358_v48, %v4989_v25  ;;  %v5014_v62 = vor.u32 1.1754944e-38, %v5013_v40  ;;  %v11443_v25 = vld [vmem:[#allocation18_spill] sm:$0xff] }
0x15fc   : > { %5648 = vadd.xlane.f32.xlu0 %v5647_v36  ;;  %vm5012_vm3 = vcmp.eq.f32.partialorder %v5011_v5, 8.507059e+37 }
0x15fd   : > { %v4991_v10 = vadd.f32 %v7358_v48, %v4990_v53  ;;  %6802 = vmatmul.msk.f32.vlgmr.msrb.gmra.mxu0 %vm908_vm2, %v4986_v24  ;;  %6792 = vmatmul.msk.f32.gmra.mxu1 %vm908_vm2, %v4746_v32  ;;  %v5620_v53 = vsub.f32 %v11444_v38, %v10470_v61  ;;  %v5613_v32 = vpop.xlane.xlu2 %5612  ;;  %v5328_v38 = vand.u32 2147483648, %v10499_v17 }
0x15fe   : > { %v10509_v57 = vpop.f32.mrf.mxu1 }
0x15ff   : > { %v7360_v33 = vpop.eup %7359  ;;  %v5268_v51 = vpop.xlane.xlu1 %5267  ;;  %v4995_v20 = vsel %vm4994_vm8, %v7358_v48, %v4991_v10  ;;  %v5634_v6 = vmul.f32 1.442695, %v5620_v53  ;;  %v11445_v10 = vld [vmem:[#allocation14_spill] sm:$0xff]  ;;  %v5326_v53 = vand.u32 2147483647, %v10499_v17 }
0x1600   : > { %v5003_v46 = vmul.f32 %v7360_v33, %v10458_v37  ;;  %v5276_v0 = vsub.f32 %v11440_v21, %v5268_v51  ;;  %v5000_v55 = vsel %vm4997_vm12, %v4999_v30, %v4995_v20  ;;  %v10487_v1 = vpop.eup %7361  ;;  %vm5008_vm4 = vweird.f32 %v7360_v33 }
0x1601   : > { %v5001_v49 = vmul.f32 %v11441_v35, %v5000_v55  ;;  %vm5009_vm11 = vmor %vm5007_vm13, %vm5008_vm4  ;;  %v5311_v48 = vsel %vm908_vm2, %v10487_v1, 0.0  ;;  %v3762_v29 = vpop.f32.mrf.mxu0  ;;  %v5621_v36 = vsub.f32 %v11445_v10, %v5613_v32  ;;  %vm5327_vm12 = vcmp.eq.f32.partialorder %v5326_v53, 8.507059e+37 }
0x1602   : > { %v5004_v9 = vsub.f32 1.0, %v5003_v46  ;;  %v5291_v52 = vmul.f32 1.442695, %v5276_v0 }
0x1603   : > { %v5636_v30 = vmul.f32 1.442695, %v5621_v36  ;;  %v5329_v36 = vor.u32 1.1754944e-38, %v5328_v38 }
0x1604   : > { %v5005_v41 = vmul.f32 %v7360_v33, %v5004_v9  ;;  %7363 = vpow2.f32 %v5291_v52  ;;  %5782 = vrot.lane.b32.xlu2 %v11415_v58, %s11341_s4  ;;  %5312 = vadd.xlane.f32.xlu0 %v5311_v48  ;;  %v5298_v52 = vpop.xlane.xlu0 %5297 }
0x1605   : > { %6803 = vmatmul.msk.f32.gmra.mxu0 %vm908_vm2, %v5001_v49  ;;  %7365 = vpow2.f32 %v5632_v44  ;;  %vm5337_vm13 = vweird.f32 %v5298_v52 }
0x1606   : > { %v5006_v7 = vadd.f32 %v7360_v33, %v5005_v41  ;;  %7367 = vpow2.f32 %v5634_v6  ;;  %v10520_v61 = vpop.f32.mrf.mxu1 }
0x1607   : > { %7369 = vpow2.f32 %v5636_v30 }
0x1608   : > { %v5010_v15 = vsel %vm5009_vm11, %v7360_v33, %v5006_v7  ;;  %7371 = vrcp.f32 %v10499_v17 }
0x1609   : > { %v5015_v12 = vsel %vm5012_vm3, %v5014_v62, %v5010_v15  ;;  %v10513_v33 = vpop.f32.mrf.mxu0 }
0x160a   : > { %v10502_v37 = vpop.eup %7363  ;;  %v5016_v56 = vmul.f32 %v11443_v25, %v5015_v12 }
0x160b   : > { %v5314_v58 = vsel %vm908_vm2, %v10502_v37, 0.0  ;;  %v10515_v24 = vpop.eup %7365 }
0x160c   : > { %5315 = vadd.xlane.f32.xlu0 %v5314_v58  ;;  %v5653_v46 = vsel %vm908_vm2, %v10515_v24, 0.0  ;;  %v10523_v51 = vpop.eup %7367  ;;  %v10549_v15 = vpop.xlane.xlu0 %4961 }
0x160d   : > { %6804 = vmatmul.msk.f32.gmra.mxu0 %vm908_vm2, %v5016_v56  ;;  %v5656_v0 = vsel %vm908_vm2, %v10523_v51, 0.0  ;;  %v10533_v41 = vpop.eup %7369 }
0x1611   : > { %5890 = vrot.lane.b32.xlu1 %v4101_v22, %s11330_s26  ;;  %v11446_v22 = vld [vmem:[#allocation24_spill] sm:$0xff]  ;;  %v10527_v21 = vpop.f32.mrf.mxu0 }
0x1612   : > { %v5618_v9 = vsub.f32 %v11446_v22, %v10146_v16  ;;  %v5659_v16 = vsel %vm908_vm2, %v10533_v41, 0.0 }
0x1614   : > { %5654 = vadd.xlane.f32.xlu0 %v5653_v46  ;;  %v5630_v20 = vmul.f32 1.442695, %v5618_v9  ;;  %v10561_v46 = vpop.xlane.xlu0 %4964 }
0x1616   : > { %7373 = vpow2.f32 %v5630_v20  ;;  %v5343_v20 = vand.u32 2147483648, %v5298_v52 }
0x1617   : > { %7375 = vrcp.f32 %v5298_v52  ;;  %v10547_v62 = vpop.xlane.xlu1 %4967 }
0x1618   : > { %v4113_v55 = vpop.f32.mrf.mxu1 }
0x1619   : > { %5892 = vrot.lane.b32.xlu1 %v4104_v14, %s11330_s26  ;;  %v7372_v14 = vpop.eup %7371 }
0x161a   : > { %v5318_v5 = vmul.f32 %v7372_v14, %v10499_v17  ;;  %vm5323_vm7 = vweird.f32 %v7372_v14  ;;  %v11448_v17 = vld [vmem:[#allocation15_spill] sm:$0xff] }
0x161b   : > { %vm5324_vm8 = vmor %vm5322_vm0, %vm5323_vm7 }
0x161c   : > { %5657 = vadd.xlane.f32.xlu0 %v5656_v0  ;;  %v10539_v35 = vpop.eup %7373  ;;  %v5319_v28 = vsub.f32 1.0, %v5318_v5  ;;  %v5344_v5 = vor.u32 1.1754944e-38, %v5343_v20 }
0x161d   : > { %v5650_v7 = vsel %vm908_vm2, %v10539_v35, 0.0  ;;  %v7376_v48 = vpop.eup %7375 }
0x161e   : > { %v5320_v44 = vmul.f32 %v7372_v14, %v5319_v28  ;;  %v5333_v12 = vmul.f32 %v7376_v48, %v5298_v52  ;;  %vm5338_vm4 = vweird.f32 %v7376_v48 }
0x161f   : > { %vm5339_vm11 = vmor %vm5337_vm13, %vm5338_vm4 }
0x1620   : > { %v3771_v40 = vpop.f32.mrf.mxu0  ;;  %v10541_v49 = vpop.f32.mrf.mxu1  ;;  %v5321_v56 = vadd.f32 %v7372_v14, %v5320_v44  ;;  %v5334_v58 = vsub.f32 1.0, %v5333_v12 }
0x1621   : > { %5862 = vrot.lane.b32.xlu1 %v3762_v29, %s11447_s3  ;;  %v10569_v28 = vpop.xlane.xlu0 %5639 }
0x1622   : > { %v5325_v32 = vsel %vm5324_vm8, %v7372_v14, %v5321_v56  ;;  %v5335_v10 = vmul.f32 %v7376_v48, %v5334_v58 }
0x1623   : > { %v5330_v30 = vsel %vm5327_vm12, %v5329_v36, %v5325_v32 }
0x1624   : > { %5660 = vadd.xlane.f32.xlu0 %v5659_v16  ;;  %v5336_v0 = vadd.f32 %v7376_v48, %v5335_v10 }
0x1626   : > { %v5340_v16 = vsel %vm5339_vm11, %v7376_v48, %v5336_v0 }
0x1628   : > { %v10543_v54 = vpop.f32.mrf.mxu0  ;;  %v10552_v29 = vpop.f32.mrf.mxu1 }
0x1629   : > { %5898 = vrot.lane.b32.xlu1 %v4113_v55, %s11330_s26  ;;  %v10559_v6 = vpop.xlane.xlu1 %5642  ;;  %v5331_v55 = vmul.f32 %v11448_v17, %v5330_v30 }
0x162d   : > { %5651 = vadd.xlane.f32.xlu2 %v5650_v7 }
0x1630   : > { %v10554_v25 = vpop.f32.mrf.mxu0 }
0x1631   : > { %5868 = vrot.lane.b32.xlu1 %v3771_v40, %s11447_s3  ;;  %v5341_v40 = vand.u32 2147483647, %v5298_v52  ;;  %v11449_v52 = vld [vmem:[#allocation20_spill] sm:$0xff] }
0x1633   : > { %vm5342_vm3 = vcmp.eq.f32.partialorder %v5341_v40, 8.507059e+37 }
0x1634   : > { %v5345_v44 = vsel %vm5342_vm3, %v5344_v5, %v5340_v16 }
0x1635   : > { %v5346_v12 = vmul.f32 %v11449_v52, %v5345_v44 }
0x1638   : > { %5860 = vrot.lane.b32.xlu0 %v10485_v43, %s11447_s3  ;;  %v10565_v22 = vpop.f32.mrf.mxu1  ;;  %v4446_v9 = vpop.f32.mrf.mxu0 }
0x1640   : > { %v5438_v14 = vpop.permute.xlu1 %5437  ;;  %5896 = vrot.lane.b32.xlu0 %v10520_v61, %s11330_s26  ;;  %v10573_v43 = vpop.f32.mrf.mxu0 }
0x1641   : > { %5479 = vmatpush.msrb.mxu1 %v5438_v14  ;;  %v10575_v7 = vpop.f32.mrf.mxu1  ;;  %v10581_v48 = vpop.xlane.xlu0 %5303 }
0x1642   : > { %6819 = vmatmul.msk.f32.vlgmr.msrb.gmra.mxu1 %vm908_vm2, %v5331_v55  ;;  %7377 = vrcp.f32 %v10581_v48  ;;  %vm5367_vm12 = vweird.f32 %v10581_v48 }
0x1643   : > { %7379 = vrcp.f32 %v10549_v15 }
0x1645   : > { %5858 = vrot.lane.b32.xlu2 %v10463_v11, %s11447_s3 }
0x1648   : > { %5866 = vrot.lane.b32.xlu0 %v10527_v21, %s11447_s3  ;;  %v4452_v56 = vpop.f32.mrf.mxu0  ;;  %v10589_v11 = vpop.eup %7377 }
0x1649   : > { %v4794_v58 = vpop.f32.mrf.mxu1  ;;  %v10592_v32 = vpop.eup %7379  ;;  %v5363_v21 = vmul.f32 %v10589_v11, %v10581_v48  ;;  %vm5368_vm13 = vweird.f32 %v10589_v11 }
0x164a   : > { %6820 = vmatmul.msk.f32.gmra.mxu1 %vm908_vm2, %v5346_v12  ;;  %v5033_v10 = vmul.f32 %v10592_v32, %v10549_v15  ;;  %vm10633_vm3 = vmor %vm5367_vm12, %vm5368_vm13  ;;  %vm5037_vm13 = vweird.f32 %v10549_v15 }
0x164c   : > { %v5034_v20 = vsub.f32 1.0, %v5033_v10 }
0x164d   : > { %5894 = vrot.lane.b32.xlu2 %v10509_v57, %s11330_s26 }
0x164e   : > { %v5035_v12 = vmul.f32 %v10592_v32, %v5034_v20 }
0x164f   : > { %v5301_v61 = vpop.xlane.xlu2 %5300 }
0x1650   : > { %7381 = vrcp.f32 %v5301_v61  ;;  %5922 = vrot.lane.b32.xlu0 %v4446_v9, %s11450_s7  ;;  %v4455_v38 = vpop.f32.mrf.mxu0  ;;  %v5364_v9 = vsub.f32 1.0, %v5363_v21  ;;  %v5358_v55 = vand.u32 2147483648, %v5301_v61  ;;  %v5356_v14 = vand.u32 2147483647, %v5301_v61 }
0x1651   : > { %v4797_v53 = vpop.f32.mrf.mxu1  ;;  %7383 = vrcp.f32 %v10561_v46  ;;  %vm5352_vm0 = vweird.f32 %v5301_v61 }
0x1652   : > { %5958 = vrot.lane.b32.xlu1 %v4797_v53, %s11329_s1  ;;  %v5365_v5 = vmul.f32 %v10589_v11, %v5364_v9  ;;  %vm5357_vm4 = vcmp.eq.f32.partialorder %v5356_v14, 8.507059e+37 }
0x1655   : > { %5864 = vrot.lane.b32.xlu2 %v10513_v33, %s11447_s3 }
0x1656   : > { %v7382_v57 = vpop.eup %7381 }
0x1657   : > { %v5348_v36 = vmul.f32 %v7382_v57, %v5301_v61  ;;  %v4959_v30 = vpop.xlane.xlu2 %4958  ;;  %vm5353_vm7 = vweird.f32 %v7382_v57  ;;  %v10608_v16 = vpop.eup %7383  ;;  %v5366_v61 = vadd.f32 %v10589_v11, %v5365_v5 }
0x1658   : > { %7385 = vrcp.f32 %v4959_v30  ;;  %5956 = vrot.lane.b32.xlu0 %v4794_v58, %s11329_s1  ;;  %v10603_v40 = vpop.f32.mrf.mxu0  ;;  %vm5354_vm8 = vmor %vm5352_vm0, %vm5353_vm7  ;;  %v5359_v58 = vor.u32 1.1754944e-38, %v5358_v55  ;;  %v5028_v20 = vand.u32 2147483648, %v4959_v30  ;;  %v5026_v55 = vand.u32 2147483647, %v4959_v30 }
0x1659   : > { %v5349_v0 = vsub.f32 1.0, %v5348_v36  ;;  %v10605_v33 = vpop.f32.mrf.mxu1  ;;  %7387 = vrcp.f32 %v10547_v62  ;;  %vm5022_vm7 = vweird.f32 %v4959_v30  ;;  %vm5038_vm0 = vweird.f32 %v10592_v32 }
0x165a   : > { %5928 = vrot.lane.b32.xlu1 %v4455_v38, %s11450_s7  ;;  %v5048_v38 = vmul.f32 %v10608_v16, %v10561_v46 }
0x165b   : > { %v5350_v17 = vmul.f32 %v7382_v57, %v5349_v0  ;;  %v5371_v0 = vand.u32 2147483647, %v10581_v48 }
0x165d   : > { %v5351_v44 = vadd.f32 %v7382_v57, %v5350_v17  ;;  %5900 = vrot.lane.b32.xlu2 %v10541_v49, %s11330_s26  ;;  %vm5372_vm12 = vcmp.eq.f32.partialorder %v5371_v0, 8.507059e+37 }
0x165e   : > { %v7386_v52 = vpop.eup %7385 }
0x165f   : > { %v5018_v53 = vmul.f32 %v7386_v52, %v4959_v30  ;;  %v10614_v21 = vpop.xlane.xlu2 %4970  ;;  %v5355_v10 = vsel %vm5354_vm8, %v7382_v57, %v5351_v44  ;;  %v10622_v36 = vpop.xlane.xlu0 %5306  ;;  %v5373_v57 = vand.u32 2147483648, %v10581_v48  ;;  %vm5023_vm11 = vweird.f32 %v7386_v52 }
0x1660   : > { %v5360_v9 = vsel %vm5357_vm4, %v5359_v58, %v5355_v10  ;;  %7389 = vrcp.f32 %v10622_v36  ;;  %5926 = vrot.lane.b32.xlu0 %v4452_v56, %s11450_s7  ;;  %v10628_v14 = vpop.f32.mrf.mxu0  ;;  %v5370_v56 = vsel %vm10633_vm3, %v10589_v11, %v5366_v61  ;;  %v10643_v10 = vpop.eup %7387  ;;  %vm5024_vm8 = vmor %vm5022_vm7, %vm5023_vm11  ;;  %v5029_v30 = vor.u32 1.1754944e-38, %v5028_v20 }
0x1661   : > { %v5019_v49 = vsub.f32 1.0, %v5018_v53  ;;  %v5361_v5 = vmul.f32 %v10271_v47, %v5360_v9  ;;  %v4803_v53 = vpop.f32.mrf.mxu1  ;;  %v5036_v47 = vadd.f32 %v10592_v32, %v5035_v12  ;;  %v5374_v48 = vor.u32 1.1754944e-38, %v5373_v57  ;;  %vm10652_vm3 = vmor %vm5037_vm13, %vm5038_vm0 }
0x1662   : > { %vm5027_vm4 = vcmp.eq.f32.partialorder %v5026_v55, 8.507059e+37  ;;  %v5043_v11 = vand.u32 2147483648, %v10549_v15  ;;  %v5063_v55 = vmul.f32 %v10643_v10, %v10547_v62  ;;  %7391 = vrcp.f32 %v10614_v21 }
0x1663   : > { %v5020_v17 = vmul.f32 %v7386_v52, %v5019_v49  ;;  %6821 = vmatmul.msk.f32.gmra.mxu1 %vm908_vm2, %v5361_v5  ;;  %v5049_v49 = vsub.f32 1.0, %v5048_v38  ;;  %v5375_v5 = vsel %vm5372_vm12, %v5374_v48, %v5370_v56  ;;  %v5041_v38 = vand.u32 2147483647, %v10549_v15 }
0x1664   : > { %v5040_v44 = vsel %vm10652_vm3, %v10592_v32, %v5036_v47  ;;  %v5044_v56 = vor.u32 1.1754944e-38, %v5043_v11  ;;  %v5064_v32 = vsub.f32 1.0, %v5063_v55  ;;  %v5386_v47 = vand.u32 2147483647, %v10622_v36 }
0x1665   : > { %v5021_v58 = vadd.f32 %v7386_v52, %v5020_v17  ;;  %5954 = vrot.lane.b32.xlu2 %v10575_v7, %s11329_s1  ;;  %v5050_v15 = vmul.f32 %v10608_v16, %v5049_v49  ;;  %vm5042_vm11 = vcmp.eq.f32.partialorder %v5041_v38, 8.507059e+37  ;;  %vm5053_vm0 = vweird.f32 %v10608_v16 }
0x1666   : > { %v7390_v7 = vpop.eup %7389  ;;  %vm5052_vm12 = vweird.f32 %v10561_v46  ;;  %vm5387_vm3 = vcmp.eq.f32.partialorder %v5386_v47, 8.507059e+37 }
0x1667   : > { %v5783_v9 = vpop.permute.xlu2 %5782  ;;  %v5025_v17 = vsel %vm5024_vm8, %v7386_v52, %v5021_v58  ;;  %v5378_v0 = vmul.f32 %v7390_v7, %v10622_v36  ;;  %v10658_v57 = vpop.xlane.xlu0 %5645  ;;  %vm5383_vm7 = vweird.f32 %v7390_v7  ;;  %v5051_v49 = vadd.f32 %v10608_v16, %v5050_v15  ;;  %vm10695_vm13 = vmor %vm5052_vm12, %vm5053_vm0 }
0x1668   : > { %5824 = vmatpush.msra.mxu0 %v5783_v9  ;;  %v5030_v61 = vsel %vm5027_vm4, %v5029_v30, %v5025_v17  ;;  %5962 = vrot.lane.b32.xlu0 %v4803_v53, %s11329_s1  ;;  %v5388_v53 = vand.u32 2147483648, %v10622_v36  ;;  %vm5382_vm8 = vweird.f32 %v10622_v36  ;;  %v10685_v11 = vpop.eup %7391 }
0x1669   : > { %v5031_v20 = vmul.f32 %v10227_v23, %v5030_v61  ;;  %v5379_v58 = vsub.f32 1.0, %v5378_v0  ;;  %v5376_v23 = vmul.f32 %v10166_v50, %v5375_v5  ;;  %v5045_v50 = vsel %vm5042_vm11, %v5044_v56, %v5040_v44  ;;  %vm5384_vm4 = vmor %vm5382_vm8, %vm5383_vm7  ;;  %v11455_v0 = vld [vmem:[#allocation29_spill] sm:$0xff] }
0x166a   : > { %v10674_v48 = vpop.f32.mrf.mxu0  ;;  %v4806_v9 = vpop.f32.mrf.mxu1  ;;  %v5056_v61 = vand.u32 2147483647, %v10561_v46  ;;  %v5389_v12 = vor.u32 1.1754944e-38, %v5388_v53  ;;  %v5065_v44 = vmul.f32 %v10643_v10, %v5064_v32  ;;  %v5078_v15 = vmul.f32 %v10685_v11, %v10614_v21 }
0x166b   : > { %v10660_v52 = vpop.xlane.xlu1 %5309  ;;  %6805 = vmatmul.msk.f32.gmra.mxu0 %vm908_vm2, %v5031_v20  ;;  %v5380_v30 = vmul.f32 %v7390_v7, %v5379_v58  ;;  %6822 = vmatmul.msk.f32.gmra.mxu1 %vm908_vm2, %v5376_v23  ;;  %v5046_v20 = vmul.f32 %v11455_v0, %v5045_v50  ;;  %vm5068_vm7 = vweird.f32 %v10643_v10  ;;  %v5073_v50 = vand.u32 2147483648, %v10547_v62 }
0x166c   : > { %7393 = vrcp.f32 %v10660_v52  ;;  %5964 = vrot.lane.b32.xlu1 %v4806_v9, %s11329_s1  ;;  %vm5057_vm11 = vcmp.eq.f32.partialorder %v5056_v61, 8.507059e+37  ;;  %v5403_v32 = vand.u32 2147483648, %v10660_v52  ;;  %vm5067_vm8 = vweird.f32 %v10547_v62 }
0x166d   : > { %5924 = vrot.lane.b32.xlu2 %v10573_v43, %s11450_s7  ;;  %v5381_v17 = vadd.f32 %v7390_v7, %v5380_v30  ;;  %v5058_v43 = vand.u32 2147483648, %v10561_v46  ;;  %7395 = vrcp.f32 %v10569_v28  ;;  %vm10726_vm12 = vmor %vm5067_vm8, %vm5068_vm7  ;;  %vm5083_vm7 = vweird.f32 %v10685_v11 }
0x166e   : > { %7397 = vrcp.f32 %v10559_v6 }
0x166f   : > { %v10692_v38 = vpop.xlane.xlu0 %5648  ;;  %v5385_v55 = vsel %vm5384_vm4, %v7390_v7, %v5381_v17  ;;  %v5055_v7 = vsel %vm10695_vm13, %v10608_v16, %v5051_v49  ;;  %v5059_v23 = vor.u32 1.1754944e-38, %v5058_v43  ;;  %v5079_v49 = vsub.f32 1.0, %v5078_v15 }
0x1670   : > { %5932 = vrot.lane.b32.xlu0 %v10628_v14, %s11450_s7  ;;  %v5390_v58 = vsel %vm5387_vm3, %v5389_v12, %v5385_v55  ;;  %v5066_v14 = vadd.f32 %v10643_v10, %v5065_v44  ;;  %vm5397_vm4 = vweird.f32 %v10660_v52  ;;  %v5074_v55 = vor.u32 1.1754944e-38, %v5073_v50 }
0x1671   : > { %v5391_v53 = vmul.f32 %v10390_v42, %v5390_v58  ;;  %v5060_v16 = vsel %vm5057_vm11, %v5059_v23, %v5055_v7  ;;  %v5401_v42 = vand.u32 2147483647, %v10660_v52  ;;  %v5080_v36 = vmul.f32 %v10685_v11, %v5079_v49 }
0x1672   : > { %v7394_v5 = vpop.eup %7393  ;;  %v10709_v30 = vpop.f32.mrf.mxu0  ;;  %v5061_v12 = vmul.f32 %v9877_v3, %v5060_v16  ;;  %v5088_v23 = vand.u32 2147483648, %v10614_v21 }
0x1673   : > { %v5393_v46 = vmul.f32 %v7394_v5, %v10660_v52  ;;  %6806 = vmatmul.msk.f32.gmra.mxu0 %vm908_vm2, %v5046_v20  ;;  %6823 = vmatmul.msk.f32.gmra.mxu1 %vm908_vm2, %v5391_v53  ;;  %v10718_v47 = vpop.eup %7395  ;;  %vm5398_vm0 = vweird.f32 %v7394_v5  ;;  %v5070_v20 = vsel %vm10726_vm12, %v10643_v10, %v5066_v14  ;;  %vm5402_vm3 = vcmp.eq.f32.partialorder %v5401_v42, 8.507059e+37 }
0x1674   : > { %v5663_v0 = vmul.f32 %v10718_v47, %v10569_v28  ;;  %vm5399_vm13 = vmor %vm5397_vm4, %vm5398_vm0  ;;  %v10747_v10 = vpop.eup %7397  ;;  %v5081_v7 = vadd.f32 %v10685_v11, %v5080_v36  ;;  %vm5082_vm0 = vweird.f32 %v10614_v21 }
0x1675   : > { %v5394_v56 = vsub.f32 1.0, %v5393_v46  ;;  %5960 = vrot.lane.b32.xlu2 %v10605_v33, %s11329_s1  ;;  %v5071_v33 = vand.u32 2147483647, %v10547_v62  ;;  %v5404_v62 = vor.u32 1.1754944e-38, %v5403_v32  ;;  %vm5084_vm8 = vmor %vm5082_vm0, %vm5083_vm7 }
0x1676   : > { %v5664_v58 = vsub.f32 1.0, %v5663_v0  ;;  %v5671_v0 = vand.u32 2147483647, %v10569_v28 }
0x1677   : > { %v5395_v9 = vmul.f32 %v7394_v5, %v5394_v56  ;;  %v10732_v43 = vpop.xlane.xlu0 %5312  ;;  %vm5072_vm11 = vcmp.eq.f32.partialorder %v5071_v33, 8.507059e+37 }
0x1678   : > { %7399 = vrcp.f32 %v10732_v43  ;;  %v5075_v15 = vsel %vm5072_vm11, %v5074_v55, %v5070_v20  ;;  %v5665_v14 = vmul.f32 %v10718_v47, %v5664_v58  ;;  %v5418_v50 = vand.u32 2147483648, %v10732_v43 }
0x1679   : > { %v5396_v17 = vadd.f32 %v7394_v5, %v5395_v9  ;;  %v5076_v56 = vmul.f32 %v9922_v27, %v5075_v15  ;;  %7401 = vrcp.f32 %v10658_v57  ;;  %v5678_v9 = vmul.f32 %v10747_v10, %v10559_v6 }
0x167a   : > { %v5136_v3 = vpop.f32.mrf.mxu0  ;;  %v5085_v27 = vsel %vm5084_vm8, %v10685_v11, %v5081_v7  ;;  %v5666_v49 = vadd.f32 %v10718_v47, %v5665_v14  ;;  %v5416_v42 = vand.u32 2147483647, %v10732_v43  ;;  %vm5667_vm11 = vweird.f32 %v10569_v28 }
0x167b   : > { %6807 = vmatmul.msk.f32.gmra.mxu0 %vm908_vm2, %v5061_v12  ;;  %v5400_v52 = vsel %vm5399_vm13, %v7394_v5, %v5396_v17  ;;  %5986 = vrot.lane.b32.xlu0 %v5136_v3, %s11460_s25  ;;  %vm5668_vm13 = vweird.f32 %v10718_v47  ;;  %v5679_v61 = vsub.f32 1.0, %v5678_v9  ;;  %v5419_v55 = vor.u32 1.1754944e-38, %v5418_v50 }
0x167c   : > { %v5405_v44 = vsel %vm5402_vm3, %v5404_v62, %v5400_v52  ;;  %vm5412_vm3 = vweird.f32 %v10732_v43  ;;  %v5673_v62 = vand.u32 2147483648, %v10569_v28  ;;  %vm10776_vm0 = vmor %vm5667_vm11, %vm5668_vm13  ;;  %vm5417_vm8 = vcmp.eq.f32.partialorder %v5416_v42, 8.507059e+37 }
0x167d   : > { %5930 = vrot.lane.b32.xlu2 %v10603_v40, %s11450_s7  ;;  %v5406_v46 = vmul.f32 %v10420_v26, %v5405_v44  ;;  %v5086_v40 = vand.u32 2147483647, %v10614_v21  ;;  %v5089_v21 = vor.u32 1.1754944e-38, %v5088_v23  ;;  %v5680_v28 = vmul.f32 %v10747_v10, %v5679_v61 }
0x167e   : > { %v7400_v5 = vpop.eup %7399  ;;  %v5674_v58 = vor.u32 1.1754944e-38, %v5673_v62  ;;  %vm5683_vm13 = vweird.f32 %v10747_v10  ;;  %vm5682_vm11 = vweird.f32 %v10559_v6 }
0x167f   : > { %6824 = vmatmul.msk.f32.gmra.mxu1 %vm908_vm2, %v5406_v46  ;;  %v5408_v26 = vmul.f32 %v7400_v5, %v10732_v43  ;;  %v10758_v53 = vpop.xlane.xlu0 %5315  ;;  %vm5087_vm12 = vcmp.eq.f32.partialorder %v5086_v40, 8.507059e+37  ;;  %vm5413_vm4 = vweird.f32 %v7400_v5  ;;  %v10770_v17 = vpop.eup %7401  ;;  %v5670_v43 = vsel %vm10776_vm0, %v10718_v47, %v5666_v49  ;;  %vm5684_vm0 = vmor %vm5682_vm11, %vm5683_vm13 }
0x1680   : > { %7403 = vrcp.f32 %v10758_v53  ;;  %v5090_v33 = vsel %vm5087_vm12, %v5089_v21, %v5085_v27  ;;  %vm5414_vm7 = vmor %vm5412_vm3, %vm5413_vm4  ;;  %v5693_v44 = vmul.f32 %v10770_v17, %v10658_v57  ;;  %vm5672_vm12 = vcmp.eq.f32.partialorder %v5671_v0, 8.507059e+37 }
0x1681   : > { %v5409_v32 = vsub.f32 1.0, %v5408_v26  ;;  %v5091_v52 = vmul.f32 %v10336_v45, %v5090_v33  ;;  %7405 = vrcp.f32 %v10692_v38  ;;  %v5433_v47 = vand.u32 2147483648, %v10758_v53 }
0x1682   : > { %v5431_v23 = vand.u32 2147483647, %v10758_v53  ;;  %v5694_v40 = vsub.f32 1.0, %v5693_v44  ;;  %vm5427_vm3 = vweird.f32 %v10758_v53  ;;  %v5686_v27 = vand.u32 2147483647, %v10559_v6 }
0x1683   : > { %6808 = vmatmul.msk.f32.gmra.mxu0 %vm908_vm2, %v5076_v56  ;;  %v5410_v16 = vmul.f32 %v7400_v5, %v5409_v32  ;;  %v5681_v56 = vadd.f32 %v10747_v10, %v5680_v28  ;;  %v5434_v21 = vor.u32 1.1754944e-38, %v5433_v47  ;;  %v5703_v0 = vand.u32 2147483648, %v10658_v57 }
0x1684   : > { %vm5697_vm13 = vweird.f32 %v10658_v57  ;;  %v5716_v44 = vand.u32 2147483647, %v10692_v38 }
0x1685   : > { %v5411_v12 = vadd.f32 %v7400_v5, %v5410_v16  ;;  %v5685_v42 = vsel %vm5684_vm0, %v10747_v10, %v5681_v56  ;;  %v5701_v10 = vand.u32 2147483647, %v10658_v57  ;;  %vm5712_vm0 = vweird.f32 %v10692_v38 }
0x1686   : > { %v7404_v11 = vpop.eup %7403 }
0x1687   : > { %v5423_v36 = vmul.f32 %v7404_v11, %v10758_v53  ;;  %v5415_v3 = vsel %vm5414_vm7, %v7400_v5, %v5411_v12  ;;  %vm5428_vm4 = vweird.f32 %v7404_v11  ;;  %v5675_v5 = vsel %vm5672_vm12, %v5674_v58, %v5670_v43  ;;  %v7406_v14 = vpop.eup %7405  ;;  %v10799_v9 = vpop.xlane.xlu0 %5654 }
0x1688   : > { %v5420_v15 = vsel %vm5417_vm8, %v5419_v55, %v5415_v3  ;;  %vm5429_vm7 = vmor %vm5427_vm3, %vm5428_vm4  ;;  %v5676_v32 = vmul.f32 %v9973_v31, %v5675_v5  ;;  %vm5432_vm8 = vcmp.eq.f32.partialorder %v5431_v23, 8.507059e+37  ;;  %v5695_v53 = vmul.f32 %v10770_v17, %v5694_v40 }
0x1689   : > { %v5424_v46 = vsub.f32 1.0, %v5423_v36  ;;  %v5421_v45 = vmul.f32 %v10487_v1, %v5420_v15  ;;  %v5688_v1 = vand.u32 2147483648, %v10559_v6  ;;  %v5708_v50 = vmul.f32 %v7406_v14, %v10692_v38  ;;  %v10810_v6 = vpop.permute.xlu1 %5890 }
0x168a   : > { %vm5687_vm12 = vcmp.eq.f32.partialorder %v5686_v27, 8.507059e+37  ;;  %v5696_v12 = vadd.f32 %v10770_v17, %v5695_v53  ;;  %vm5698_vm4 = vweird.f32 %v10770_v17  ;;  %7407 = vrcp.f32 %v10799_v9 }
0x168b   : > { %6809 = vmatmul.msk.f32.gmra.mxu0 %vm908_vm2, %v5091_v52  ;;  %v5425_v7 = vmul.f32 %v7404_v11, %v5424_v46  ;;  %6825 = vmatmul.msk.f32.gmra.mxu1 %vm908_vm2, %v5421_v45  ;;  %v5689_v33 = vor.u32 1.1754944e-38, %v5688_v1  ;;  %vm5699_vm3 = vmor %vm5697_vm13, %vm5698_vm4  ;;  %v5704_v36 = vor.u32 1.1754944e-38, %v5703_v0  ;;  %vm5702_vm11 = vcmp.eq.f32.partialorder %v5701_v10, 8.507059e+37  ;;  %v10841_v1 = vpop.f32.mrf.mxu1 }
0x168c   : > { %v5700_v55 = vsel %vm5699_vm3, %v10770_v17, %v5696_v12 }
0x168d   : > { %v5426_v26 = vadd.f32 %v7404_v11, %v5425_v7  ;;  %v5690_v61 = vsel %vm5687_vm12, %v5689_v33, %v5685_v42  ;;  %v5705_v52 = vsel %vm5702_vm11, %v5704_v36, %v5700_v55  ;;  %vm5717_vm12 = vcmp.eq.f32.partialorder %v5716_v44, 8.507059e+37 }
0x168e   : > { %v5691_v62 = vmul.f32 %v10018_v39, %v5690_v61  ;;  %v5718_v39 = vand.u32 2147483648, %v10692_v38  ;;  %v5706_v46 = vmul.f32 %v10395_v13, %v5705_v52 }
0x168f   : > { %v5430_v16 = vsel %vm5429_vm7, %v7404_v11, %v5426_v26  ;;  %v5709_v11 = vsub.f32 1.0, %v5708_v50  ;;  %vm5713_vm7 = vweird.f32 %v7406_v14 }
0x1690   : > { %v5435_v49 = vsel %vm5432_vm8, %v5434_v21, %v5430_v16  ;;  %v10824_v28 = vpop.eup %7407  ;;  %vm5714_vm8 = vmor %vm5712_vm0, %vm5713_vm7  ;;  %v5719_v58 = vor.u32 1.1754944e-38, %v5718_v39  ;;  %vm5742_vm0 = vweird.f32 %v10799_v9 }
0x1691   : > { %v5436_v31 = vmul.f32 %v10502_v37, %v5435_v49  ;;  %v10820_v37 = vpop.xlane.xlu0 %5657  ;;  %v5710_v20 = vmul.f32 %v7406_v14, %v5709_v11  ;;  %v5893_v43 = vpop.permute.xlu1 %5892  ;;  %v5738_v17 = vmul.f32 %v10824_v28, %v10799_v9  ;;  %vm5743_vm3 = vweird.f32 %v10824_v28 }
0x1693   : > { %6836 = vmatmul.msk.f32.vlgmr.msra.gmra.mxu0 %vm908_vm2, %v5676_v32  ;;  %6826 = vmatmul.msk.f32.gmra.mxu1 %vm908_vm2, %v5436_v31  ;;  %v5711_v3 = vadd.f32 %v7406_v14, %v5710_v20  ;;  %v5739_v5 = vsub.f32 1.0, %v5738_v17  ;;  %v5746_v20 = vand.u32 2147483647, %v10799_v9  ;;  %v10870_v39 = vpop.f32.mrf.mxu1  ;;  %v5763_v17 = vand.u32 2147483648, %v10820_v37 }
0x1695   : > { %v5715_v15 = vsel %vm5714_vm8, %v7406_v14, %v5711_v3  ;;  %v5740_v14 = vmul.f32 %v10824_v28, %v5739_v5  ;;  %vm5744_vm8 = vmor %vm5742_vm0, %vm5743_vm3 }
0x1696   : > { %v5720_v7 = vsel %vm5717_vm12, %v5719_v58, %v5715_v15  ;;  %vm5747_vm12 = vcmp.eq.f32.partialorder %v5746_v20, 8.507059e+37 }
0x1697   : > { %v5721_v40 = vmul.f32 %v10443_v19, %v5720_v7  ;;  %v5741_v31 = vadd.f32 %v10824_v28, %v5740_v14 }
0x1699   : > { %v10834_v45 = vpop.xlane.xlu0 %5660  ;;  %v5863_v56 = vpop.permute.xlu1 %5862 }
0x169a   : > { %v6076_v42 = vsel %vm1797_vm5, %v10113_v8, %v5863_v56  ;;  %v5764_v56 = vor.u32 1.1754944e-38, %v5763_v17  ;;  %vm5772_vm0 = vweird.f32 %v10834_v45 }
0x169b   : > { %6837 = vmatmul.msk.f32.gmra.mxu0 %vm908_vm2, %v5691_v62 }
0x16a0   : > { %v5652_v57 = vpop.xlane.xlu2 %5651 }
0x16a1   : > { %7409 = vrcp.f32 %v5652_v57  ;;  %v5733_v32 = vand.u32 2147483648, %v5652_v57  ;;  %v5731_v16 = vand.u32 2147483647, %v5652_v57  ;;  %vm5727_vm13 = vweird.f32 %v5652_v57  ;;  %v5899_v55 = vpop.permute.xlu1 %5898 }
0x16a2   : > { %7411 = vrcp.f32 %v10820_v37 }
0x16a3   : > { %6838 = vmatmul.msk.f32.gmra.mxu0 %vm908_vm2, %v5706_v46  ;;  %7413 = vrcp.f32 %v10834_v45  ;;  %v5734_v33 = vor.u32 1.1754944e-38, %v5733_v32  ;;  %vm5732_vm7 = vcmp.eq.f32.partialorder %v5731_v16, 8.507059e+37 }
0x16a7   : > { %v7410_v47 = vpop.eup %7409 }
0x16a8   : > { %v5723_v38 = vmul.f32 %v7410_v47, %v5652_v57  ;;  %v10836_v23 = vpop.permute.xlu2 %5858  ;;  %v10838_v13 = vpop.eup %7411  ;;  %vm5728_vm4 = vweird.f32 %v7410_v47 }
0x16a9   : > { %v5753_v27 = vmul.f32 %v10838_v13, %v10820_v37  ;;  %vm5729_vm11 = vmor %vm5727_vm13, %vm5728_vm4  ;;  %v7414_v0 = vpop.eup %7413  ;;  %vm5758_vm4 = vweird.f32 %v10838_v13  ;;  %vm5757_vm13 = vweird.f32 %v10820_v37 }
0x16aa   : > { %v5724_v26 = vsub.f32 1.0, %v5723_v38  ;;  %v5861_v53 = vpop.permute.xlu0 %5860  ;;  %v5768_v52 = vmul.f32 %v7414_v0, %v10834_v45  ;;  %vm5759_vm3 = vmor %vm5757_vm13, %vm5758_vm4 }
0x16ab   : > { %6839 = vmatmul.msk.f32.gmra.mxu0 %vm908_vm2, %v5721_v40  ;;  %v6075_v19 = vsel %vm1797_vm5, %v10032_v2, %v5861_v53  ;;  %v5754_v61 = vsub.f32 1.0, %v5753_v27  ;;  %v5748_v2 = vand.u32 2147483648, %v10799_v9  ;;  %v5869_v40 = vpop.permute.xlu1 %5868  ;;  %v5139_v53 = vpop.f32.mrf.mxu0 }
0x16ac   : > { %v5725_v21 = vmul.f32 %v7410_v47, %v5724_v26  ;;  %v10851_v49 = vsel %vm880_vm1, %v6075_v19, %v5893_v43  ;;  %v5745_v43 = vsel %vm5744_vm8, %v10824_v28, %v5741_v31  ;;  %v5769_v44 = vsub.f32 1.0, %v5768_v52 }
0x16ad   : > { %v5755_v36 = vmul.f32 %v10838_v13, %v5754_v61  ;;  %v5749_v57 = vor.u32 1.1754944e-38, %v5748_v2  ;;  %v5761_v28 = vand.u32 2147483647, %v10820_v37  ;;  %v6079_v32 = vsel %vm1797_vm5, %v10291_v63, %v5869_v40 }
0x16ae   : > { %v5726_v50 = vadd.f32 %v7410_v47, %v5725_v21 }
0x16af   : > { %v5750_v9 = vsel %vm5747_vm12, %v5749_v57, %v5745_v43 }
0x16b0   : > { %v5895_v12 = vpop.permute.xlu2 %5894  ;;  %v5730_v11 = vsel %vm5729_vm11, %v7410_v47, %v5726_v50  ;;  %v5751_v58 = vmul.f32 %v10515_v24, %v5750_v9  ;;  %v5770_v47 = vmul.f32 %v7414_v0, %v5769_v44  ;;  %vm5762_vm11 = vcmp.eq.f32.partialorder %v5761_v28, 8.507059e+37 }
0x16b1   : > { %v10859_v10 = vsel %vm880_vm1, %v6076_v42, %v5895_v12  ;;  %v5735_v62 = vsel %vm5732_vm7, %v5734_v33, %v5730_v11  ;;  %vm5773_vm7 = vweird.f32 %v7414_v0 }
0x16b2   : > { %v5736_v8 = vmul.f32 %v10539_v35, %v5735_v62  ;;  %v5897_v3 = vpop.permute.xlu0 %5896  ;;  %v5756_v35 = vadd.f32 %v10838_v13, %v5755_v36  ;;  %v5771_v14 = vadd.f32 %v7414_v0, %v5770_v47  ;;  %vm5774_vm8 = vmor %vm5772_vm0, %vm5773_vm7 }
0x16b3   : > { %v5142_v12 = vpop.f32.mrf.mxu0 }
0x16b4   : > { %6840 = vmatmul.msk.f32.gmra.mxu0 %vm908_vm2, %v5736_v8  ;;  %v5760_v38 = vsel %vm5759_vm3, %v10838_v13, %v5756_v35  ;;  %v5778_v13 = vand.u32 2147483648, %v10834_v45  ;;  %v5775_v50 = vsel %vm5774_vm8, %v7414_v0, %v5771_v14 }
0x16b5   : > { %v5765_v37 = vsel %vm5762_vm11, %v5764_v56, %v5760_v38 }
0x16b6   : > { %v5766_v16 = vmul.f32 %v10523_v51, %v5765_v37  ;;  %v5779_v42 = vor.u32 1.1754944e-38, %v5778_v13 }
0x16b8   : > { %v5865_v46 = vpop.permute.xlu2 %5864 }
0x16b9   : > { %v6077_v15 = vsel %vm1797_vm5, %v10168_v60, %v5865_v46 }
0x16ba   : > { %v6085_v7 = vsel %vm880_vm1, %v6077_v15, %v5897_v3  ;;  %v5867_v5 = vpop.permute.xlu0 %5866 }
0x16bb   : > { %v6078_v60 = vsel %vm1797_vm5, %v10229_v18, %v5867_v5  ;;  %v5776_v18 = vand.u32 2147483647, %v10834_v45 }
0x16bc   : > { %6841 = vmatmul.msk.f32.gmra.mxu0 %vm908_vm2, %v5751_v58  ;;  %v6086_v24 = vsel %vm880_vm1, %v6078_v60, %v5899_v55 }
0x16bd   : > { %vm5777_vm12 = vcmp.eq.f32.partialorder %v5776_v18, 8.507059e+37 }
0x16be   : > { %v5780_v33 = vsel %vm5777_vm12, %v5779_v42, %v5775_v50 }
0x16bf   : > { %v5481_v26 = vpop.f32.mrf.mxu1  ;;  %v5781_v45 = vmul.f32 %v10533_v41, %v5780_v33 }
0x16c0   : > { %6018 = vrot.lane.b32.xlu1 %v5481_v26, %s11333_s0  ;;  %v5901_v27 = vpop.permute.xlu2 %5900 }
0x16c1   : > { %v6087_v21 = vsel %vm880_vm1, %v6079_v32, %v5901_v27  ;;  %v6074_v27 = vsel %vm1797_vm5, %v9981_v34, %v10836_v23 }
0x16c2   : > { %v10894_v19 = vpop.permute.xlu0 %5922  ;;  %v6082_v18 = vsel %vm880_vm1, %v6074_v27, %v10810_v6 }
0x16c3   : > { %v6090_v50 = vsel %vm2828_vm6, %v6082_v18, %v10894_v19 }
0x16c4   : > { %6842 = vmatmul.msk.f32.gmra.mxu0 %vm908_vm2, %v5766_v16  ;;  %v10902_v51 = vpop.permute.xlu1 %5958 }
0x16c7   : > { %v5484_v63 = vpop.f32.mrf.mxu1 }
0x16c8   : > { %5988 = vrot.lane.b32.xlu1 %v5139_v53, %s11460_s25  ;;  %6020 = vrot.lane.b32.xlu2 %v5484_v63, %s11333_s0  ;;  %v10899_v31 = vpop.permute.xlu2 %5954 }
0x16c9   : > { %v6098_v42 = vsel %vm908_vm2, %v6090_v50, %v10899_v31 }
0x16ca   : > { %v10904_v61 = vpop.permute.xlu0 %5956 }
0x16cc   : > { %6843 = vmatmul.msk.f32.gmra.mxu0 %vm908_vm2, %v5781_v45  ;;  %v5929_v62 = vpop.permute.xlu1 %5928 }
0x16cd   : > { %v6093_v20 = vsel %vm2828_vm6, %v6085_v7, %v5929_v62 }
0x16d0   : > { %5990 = vrot.lane.b32.xlu2 %v5142_v12, %s11460_s25  ;;  %v5925_v11 = vpop.permute.xlu2 %5924 }
0x16d1   : > { %v10910_v0 = vsel %vm2828_vm6, %v10851_v49, %v5925_v11 }
0x16d2   : > { %v10912_v2 = vpop.permute.xlu0 %5926  ;;  %v6099_v19 = vsel %vm908_vm2, %v10910_v0, %v10904_v61 }
0x16d8   : > { %v5961_v41 = vpop.permute.xlu2 %5960 }
0x16d9   : > { %v10916_v8 = vsel %vm908_vm2, %v6093_v20, %v5961_v41 }
0x16da   : > { %v5963_v55 = vpop.permute.xlu0 %5962 }
0x16de   : > { %v5965_v57 = vpop.permute.xlu1 %5964 }
0x16e0   : > { %v5931_v36 = vpop.permute.xlu2 %5930  ;;  %v5487_v3 = vpop.f32.mrf.mxu1 }
0x16e1   : > { %v6094_v52 = vsel %vm2828_vm6, %v6086_v24, %v5931_v36  ;;  %6022 = vrot.lane.b32.xlu0 %v5487_v3, %s11333_s0  ;;  %v6092_v36 = vsel %vm2828_vm6, %v10859_v10, %v10912_v2 }
0x16e2   : > { %v10920_v43 = vsel %vm908_vm2, %v6094_v52, %v5963_v55  ;;  %v5933_v49 = vpop.permute.xlu0 %5932  ;;  %v6100_v52 = vsel %vm908_vm2, %v6092_v36, %v10902_v51 }
0x16e3   : > { %v6095_v9 = vsel %vm2828_vm6, %v6087_v21, %v5933_v49 }
0x16e4   : > { %v10925_v35 = vsel %vm908_vm2, %v6095_v9, %v5965_v57 }
0x16e8   : > { %v5145_v44 = vpop.f32.mrf.mxu0  ;;  %v5490_v46 = vpop.f32.mrf.mxu1 }
0x16e9   : > { %5992 = vrot.lane.b32.xlu0 %v5145_v44, %s11460_s25  ;;  %6024 = vrot.lane.b32.xlu1 %v5490_v46, %s11333_s0 }
0x16ed   : > { %v5987_v16 = vpop.permute.xlu0 %5986 }
0x16ee   : > { %v6106_v63 = vsel %vm2831_vm14, %v6098_v42, %v5987_v16  ;;  %v7432_v16 = vld [vmem:[%s7942_s23] sm:$0xff] }
0x16f0   : > { %v5148_v17 = vpop.f32.mrf.mxu0  ;;  %v5493_v15 = vpop.f32.mrf.mxu1 }
0x16f1   : > { %5994 = vrot.lane.b32.xlu1 %v5148_v17, %s11460_s25  ;;  %6026 = vrot.lane.b32.xlu2 %v5493_v15, %s11333_s0 }
0x16f8   : > { %v5151_v28 = vpop.f32.mrf.mxu0 }
0x16fc   : > { %v5496_v58 = vpop.f32.mrf.mxu1 }
0x16fd   : > { %6028 = vrot.lane.b32.xlu0 %v5496_v58, %s11333_s0 }
0x1700   : > { %v5154_v7 = vpop.f32.mrf.mxu0 }
0x1708   : > { %v5157_v47 = vpop.f32.mrf.mxu0  ;;  %v5499_v60 = vpop.f32.mrf.mxu1 }
0x1710   : > { %v5826_v5 = vpop.f32.mrf.mxu0 }
0x1711   : > { %6050 = vrot.lane.b32.xlu2 %v5826_v5, %s11463_s11 }
0x1718   : > { %v5829_v38 = vpop.f32.mrf.mxu0 }
0x1719   : > { %5996 = vrot.lane.b32.xlu2 %v5151_v28, %s11460_s25  ;;  %6052 = vrot.lane.b32.xlu0 %v5829_v38, %s11463_s11 }
0x1720   : > { %v5832_v56 = vpop.f32.mrf.mxu0 }
0x1721   : > { %6054 = vrot.lane.b32.xlu1 %v5832_v56, %s11463_s11  ;;  %5870 = vrot.lane.b32.xlu2 %v10543_v54, %s11447_s3 }
0x1722   : > { %5902 = vrot.lane.b32.xlu0 %v10552_v29, %s11330_s26 }
0x1728   : > { %v5835_v40 = vpop.f32.mrf.mxu0 }
0x1729   : > { %5934 = vrot.lane.b32.xlu1 %v10674_v48, %s11450_s7  ;;  %6056 = vrot.lane.b32.xlu2 %v5835_v40, %s11463_s11  ;;  %v6131_v48 = vld [vmem:[%s11209_s14 + $0x8] sm:$0xff] }
0x172a   : > { %5998 = vrot.lane.b32.xlu0 %v5154_v7, %s11460_s25  ;;  %6174 = vmatpush.msrb.mxu2 %v6131_v48 }
0x1731   : > { %v5838_v26 = vpop.f32.mrf.mxu0  ;;  %5966 = vrot.lane.b32.xlu2 %v10841_v1, %s11329_s1  ;;  %6030 = vrot.lane.b32.xlu1 %v5499_v60, %s11333_s0 }
0x1732   : > { %6058 = vrot.lane.b32.xlu0 %v5838_v26, %s11463_s11 }
0x1739   : > { %v5841_v54 = vpop.f32.mrf.mxu0  ;;  %5936 = vrot.lane.b32.xlu2 %v10709_v30, %s11450_s7  ;;  %v5502_v30 = vpop.f32.mrf.mxu1  ;;  %s6415_s7 = scalar_lea.sflag [#allocation3], %s743_s8 }
0x173a   : > { %5872 = vrot.lane.b32.xlu0 %v10554_v25, %s11447_s3  ;;  %6060 = vrot.lane.b32.xlu1 %v5841_v54, %s11463_s11  ;;  %v6019_v25 = vpop.permute.xlu1 %6018 }
0x173b   : > { %v6114_v34 = vsel %vm1540_vm9, %v6106_v63, %v6019_v25 }
0x1741   : > { %v5844_v29 = vpop.f32.mrf.mxu0 }
0x1742   : > { %6062 = vrot.lane.b32.xlu2 %v5844_v29, %s11463_s11  ;;  %5968 = vrot.lane.b32.xlu0 %v10870_v39, %s11329_s1  ;;  %v6130_v39 = vld [vmem:[%s11209_s14] sm:$0xff]  ;;  %v5989_v24 = vpop.permute.xlu1 %5988 }
0x1743   : > { %5904 = vrot.lane.b32.xlu1 %v10565_v22, %s11330_s26  ;;  %6175 = vmatpush.msrb.mxu2 %v6130_v39  ;;  %v6021_v22 = vpop.permute.xlu2 %6020  ;;  %v6107_v62 = vsel %vm2831_vm14, %v6099_v19, %v5989_v24  ;;  %s6853_s26 = sshll.u32 %s7668_s5, 3 }
0x1744   : > { %v6115_v20 = vsel %vm1540_vm9, %v6107_v62, %v6021_v22  ;;  %s6430_s2 = scalar_lea.hbm %s11482_s27, %s6853_s26 }
0x1745   : > { %s6434_s3 = sshll.u32 %s6430_s2, 4  ;;  %s6435_s3 = int_to_ptr.hbm [resolvable:$true] %s6434_s3 }
0x1749   : > { %v5847_v1 = vpop.f32.mrf.mxu0 }
0x174a   : > { %6064 = vrot.lane.b32.xlu0 %v5847_v1, %s11463_s11  ;;  %6032 = vrot.lane.b32.xlu2 %v5502_v30, %s11333_s0 }
0x174b   : > { %6000 = vrot.lane.b32.xlu1 %v5157_v47, %s11460_s25  ;;  %v5991_v37 = vpop.permute.xlu2 %5990  ;;  %s7454_s25 = sshra.s32 %s6435_s3, 4  ;;  %s7455_s25 = int_to_ptr.hbm [resolvable:$true] %s7454_s25 }
0x174c   : > { %v6108_v3 = vsel %vm2831_vm14, %v6100_v52, %v5991_v37  ;;  %s7456_s11 = scalar_lea.hbm %s7455_s25, 8  ;;  %p7461_p0 = scmp.lt.s32.totalorder %s7455_s25, %s11482_s27 }
0x174d   : > { %p7457_p11 = scmp.ne.s32.totalorder %s7455_s25, %s7456_s11  ;;  %p7462_p1 = scmp.lt.s32.totalorder %s7460_s22, %s7456_s11 }
0x174f   : > { %p7458_p12 = pnand %p7457_p11, %p7685_p5  ;;  %p7463_p2 = por %p7462_p1, %p7461_p0 }
0x1751   : > { %p7459_p13 = pneg %p7458_p12 }
0x1753   : > { %v6027_v32 = vpop.permute.xlu2 %6026  ;;  %v6023_v45 = vpop.permute.xlu0 %6022  ;;  %p7464_p3 = pnand %p7463_p2, %p7459_p13 }
0x1754   : > { %v6116_v61 = vsel %vm1540_vm9, %v6108_v3, %v6023_v45  ;;  %v7436_v3 = vld [vmem:[%s7942_s23 + $0x20] sm:$0xff] }
0x175b   : > { %v6025_v14 = vpop.permute.xlu1 %6024  ;;  %v5993_v6 = vpop.permute.xlu0 %5992 }
0x175c   : > { %v6109_v9 = vsel %vm2831_vm14, %v10916_v8, %v5993_v6 }
0x175d   : > { %v6117_v44 = vsel %vm1540_vm9, %v6109_v9, %v6025_v14 }
0x1763   : > { %v5995_v13 = vpop.permute.xlu1 %5994 }
0x1764   : > { %v6110_v21 = vsel %vm2831_vm14, %v10920_v43, %v5995_v13 }
0x1765   : > { %v6118_v53 = vsel %vm1540_vm9, %v6110_v21, %v6027_v32 }
0x176b   : > { %v6051_v23 = vpop.permute.xlu2 %6050 }
0x176c   : > { %v6122_v33 = vsel %vm2834_vm15, %v6114_v34, %v6051_v23  ;;  %v7433_v34 = vld [vmem:[%s7942_s23 + $0x8] sm:$0xff] }
0x176d   : > { %6844 = vmatmul.msk.f32.vlgmr.msrb.gmra.mxu2 %vm1542_vm10, %v6122_v33 }
0x176f   : > { %v6029_v11 = vpop.permute.xlu0 %6028 }
0x1773   : > { %v5997_v12 = vpop.permute.xlu2 %5996 }
0x1774   : > { %v6111_v58 = vsel %vm2831_vm14, %v10925_v35, %v5997_v12  ;;  %v7434_v12 = vld [vmem:[%s7942_s23 + $0x10] sm:$0xff] }
0x1775   : > { %v6119_v56 = vsel %vm1540_vm9, %v6111_v58, %v6029_v11  ;;  %v7439_v58 = vld [vmem:[%s7942_s23 + $0x38] sm:$0xff] }
0x177b   : > { %v5871_v41 = vpop.permute.xlu2 %5870 }
0x177c   : > { %v6080_v8 = vsel %vm1797_vm5, %v10367_v59, %v5871_v41 }
0x1783   : > { %v6057_v57 = vpop.permute.xlu2 %6056 }
0x1784   : > { %v6125_v2 = vsel %vm2834_vm15, %v6117_v44, %v6057_v57  ;;  %v7437_v57 = vld [vmem:[%s7942_s23 + $0x28] sm:$0xff] }
0x178b   : > { %v6053_v31 = vpop.permute.xlu0 %6052  ;;  %v5967_v46 = vpop.permute.xlu2 %5966 }
0x178c   : > { %v6123_v55 = vsel %vm2834_vm15, %v6115_v20, %v6053_v31  ;;  %v7435_v20 = vld [vmem:[%s7942_s23 + $0x18] sm:$0xff] }
0x178d   : > { %6845 = vmatmul.msk.f32.gmra.mxu2 %vm1542_vm10, %v6123_v55 }
0x1793   : > { %v6055_v0 = vpop.permute.xlu1 %6054  ;;  %v5937_v7 = vpop.permute.xlu2 %5936 }
0x1794   : > { %v5903_v43 = vpop.permute.xlu0 %5902  ;;  %v6124_v49 = vsel %vm2834_vm15, %v6116_v61, %v6055_v0 }
0x1795   : > { %6846 = vmatmul.msk.f32.gmra.mxu2 %vm1542_vm10, %v6124_v49  ;;  %v6088_v47 = vsel %vm880_vm1, %v6080_v8, %v5903_v43 }
0x179b   : > { %v5935_v10 = vpop.permute.xlu1 %5934 }
0x179c   : > { %v5999_v51 = vpop.permute.xlu0 %5998  ;;  %v6096_v5 = vsel %vm2828_vm6, %v6088_v47, %v5935_v10  ;;  %v6063_v59 = vpop.permute.xlu2 %6062 }
0x179d   : > { %6847 = vmatmul.msk.f32.gmra.mxu2 %vm1542_vm10, %v6125_v2  ;;  %v6104_v26 = vsel %vm908_vm2, %v6096_v5, %v5967_v46  ;;  %v11472_v5 = vld [vmem:[#allocation12_spill] sm:$0xff] }
0x179e   : > { %v6112_v35 = vsel %vm2831_vm14, %v6104_v26, %v5999_v51  ;;  %v7438_v51 = vld [vmem:[%s7942_s23 + $0x30] sm:$0xff] }
0x17a3   : > { %v6031_v17 = vpop.permute.xlu1 %6030 }
0x17a4   : > { %v6059_v15 = vpop.permute.xlu0 %6058  ;;  %v6120_v54 = vsel %vm1540_vm9, %v6112_v35, %v6031_v17  ;;  %v6033_v37 = vpop.permute.xlu2 %6032 }
0x17a5   : > { %v6126_v28 = vsel %vm2834_vm15, %v6118_v53, %v6059_v15  ;;  %v6128_v30 = vsel %vm2834_vm15, %v6120_v54, %v6063_v59 }
0x17a6   : > { %6848 = vmatmul.msk.f32.gmra.mxu2 %vm1542_vm10, %v6126_v28 }
0x17ac   : > { %v5873_v38 = vpop.permute.xlu0 %5872  ;;  %v6061_v40 = vpop.permute.xlu1 %6060 }
0x17ad   : > { %v6127_v60 = vsel %vm2834_vm15, %v6119_v56, %v6061_v40  ;;  %v6081_v1 = vsel %vm1797_vm5, %v10431_v4, %v5873_v38  ;;  %v7084_v4 = vld [vmem:[%s11210_s15] ss:$0 sm:$0xff] }
0x17ae   : > { %6849 = vmatmul.msk.f32.gmra.mxu2 %vm1542_vm10, %v6127_v60 }
0x17b4   : > { %v5969_v29 = vpop.permute.xlu0 %5968 }
0x17b5   : > { %v5905_v48 = vpop.permute.xlu1 %5904 }
0x17b6   : > { %6850 = vmatmul.msk.f32.gmra.mxu2 %vm1542_vm10, %v6128_v30  ;;  %v6089_v25 = vsel %vm880_vm1, %v6081_v1, %v5905_v48  ;;  %vm11464_vm1 = vcmask 261120  }
0x17b7   : > { %v6097_v39 = vsel %vm2828_vm6, %v6089_v25, %v5937_v7  ;;  %vm11468_vm5 = vmmov %vm11464_vm1 }
0x17b8   : > { %v6105_v22 = vsel %vm908_vm2, %v6097_v39, %v5969_v29  ;;  %vm11465_vm2 = vmmov %vm11464_vm1 }
0x17b9   : > { %vm11469_vm6 = vmmov %vm11464_vm1 }
0x17ba   : > { %vm11473_vm4 = vmmov %vm11464_vm1 }
0x17bb   : > { %vm11474_vm13 = vmmov %vm11464_vm1 }
0x17bc   : > { %v6065_v32 = vpop.permute.xlu0 %6064  ;;  %vm11475_vm3 = vmmov %vm11464_vm1 }
0x17bd   : > { %v6001_v24 = vpop.permute.xlu1 %6000  ;;  %vm11476_vm11 = vmmov %vm11464_vm1 }
0x17be   : > { %v6113_v14 = vsel %vm2831_vm14, %v6105_v22, %v6001_v24  ;;  %vm11470_vm14 = vmmov %vm11464_vm1 }
0x17bf   : > { %v6121_v27 = vsel %vm1540_vm9, %v6113_v14, %v6033_v37  ;;  %vm11466_vm9 = vmmov %vm11464_vm1 }
0x17c0   : > { %v6129_v13 = vsel %vm2834_vm15, %v6121_v27, %v6065_v32  ;;  %vm11471_vm15 = vmmov %vm11464_vm1 }
0x17c1   : > { %6851 = vmatmul.msk.f32.gmra.mxu2 %vm1542_vm10, %v6129_v13  ;;  %vm11467_vm10 = vmmov %vm11464_vm1 }
0x17c2   : > { %vm11477_vm7 = vmmov %vm11464_vm1 }
0x17c3   : > { %vm11478_vm0 = vmmov %vm11464_vm1 }
0x17c4   : > { %vm11479_vm8 = vmmov %vm11478_vm0 }
0x17c5   : > { %vm11481_vm12 = vmmov %vm11478_vm0 }
0x17f0   : > { %v6177_v21 = vpop.f32.mrf.mxu2 }
0x17f1   : > { %v6178_v18 = vadd.f32 %v7084_v4, %v6177_v21 }
0x17f3   : > { %v6201_v53 = vadd.f32 %v7432_v16, %v6178_v18 }
0x17f5   : > { %v6211_v50 = vsel %vm11464_vm1, %v6201_v53, 0.0 }
0x17f6   : > { %6212 = vadd.xlane.f32.xlu1 %v6211_v50 }
0x1810   : > { %v6180_v42 = vpop.f32.mrf.mxu2 }
0x1811   : > { %v6181_v63 = vadd.f32 %v7084_v4, %v6180_v42 }
0x1813   : > { %v6202_v23 = vadd.f32 %v7433_v34, %v6181_v63 }
0x1815   : > { %v6214_v33 = vsel %vm11465_vm2, %v6202_v23, 0.0 }
0x1816   : > { %6215 = vadd.xlane.f32.xlu2 %v6214_v33 }
0x1818   : > { %v6183_v45 = vpop.f32.mrf.mxu2 }
0x1819   : > { %v6184_v6 = vadd.f32 %v7084_v4, %v6183_v45 }
0x181b   : > { %v6203_v11 = vadd.f32 %v7434_v12, %v6184_v6 }
0x181d   : > { %v6217_v19 = vsel %vm11466_vm9, %v6203_v11, 0.0 }
0x181e   : > { %6218 = vadd.xlane.f32.xlu0 %v6217_v19 }
0x1820   : > { %v6186_v62 = vpop.f32.mrf.mxu2 }
0x1821   : > { %v6187_v31 = vadd.f32 %v7084_v4, %v6186_v62 }
0x1823   : > { %v6204_v41 = vadd.f32 %v7435_v20, %v6187_v31 }
0x1825   : > { %v6220_v55 = vsel %vm11467_vm10, %v6204_v41, 0.0 }
0x1826   : > { %6221 = vadd.xlane.f32.xlu1 %v6220_v55 }
0x1829   : > { %v6189_v36 = vpop.f32.mrf.mxu2 }
0x182a   : > { %v6190_v52 = vadd.f32 %v7084_v4, %v6189_v36 }
0x182c   : > { %v6205_v61 = vadd.f32 %v7436_v3, %v6190_v52 }
0x182e   : > { %v6223_v0 = vsel %vm11468_vm5, %v6205_v61, 0.0 }
0x182f   : > { %6224 = vadd.xlane.f32.xlu2 %v6223_v0 }
0x1831   : > { %v6192_v43 = vpop.f32.mrf.mxu2 }
0x1832   : > { %v6193_v49 = vadd.f32 %v7084_v4, %v6192_v43 }
0x1834   : > { %v6206_v9 = vadd.f32 %v7437_v57, %v6193_v49 }
0x1836   : > { %v6226_v44 = vsel %vm11469_vm6, %v6206_v9, 0.0 }
0x1837   : > { %6227 = vadd.xlane.f32.xlu0 %v6226_v44 }
0x1839   : > { %v6195_v10 = vpop.f32.mrf.mxu2 }
0x183a   : > { %v6196_v2 = vadd.f32 %v7084_v4, %v6195_v10 }
0x183c   : > { %v6207_v46 = vadd.f32 %v7438_v51, %v6196_v2 }
0x183e   : > { %v6229_v17 = vsel %vm11470_vm14, %v6207_v46, 0.0 }
0x183f   : > { %6230 = vadd.xlane.f32.xlu1 %v6229_v17 }
0x1844   : > { %v6198_v15 = vpop.f32.mrf.mxu2 }
0x1845   : > { %v6199_v28 = vadd.f32 %v7084_v4, %v6198_v15 }
0x1847   : > { %v6208_v8 = vadd.f32 %v7439_v58, %v6199_v28 }
0x1849   : > { %v6232_v7 = vsel %vm11471_vm15, %v6208_v8, 0.0 }
0x184a   : > { %6233 = vadd.xlane.f32.xlu2 %v6232_v7 }
0x1869   : > { %v6213_v47 = vpop.xlane.xlu1 %6212 }
0x186a   : > { %v6235_v38 = vmul.f32 %v6213_v47, %v11472_v5 }
0x186c   : > { %v11049_v56 = vsub.f32 %v6201_v53, %v6235_v38 }
0x186e   : > { %v6251_v40 = vmul.f32 %v11049_v56, %v11049_v56 }
0x1870   : > { %v6259_v60 = vsel %vm11473_vm4, %v6251_v40, 0.0 }
0x1871   : > { %6260 = vadd.xlane.f32.xlu0 %v6259_v60 }
0x1889   : > { %v6216_v26 = vpop.xlane.xlu2 %6215 }
0x188a   : > { %v6236_v35 = vmul.f32 %v6216_v26, %v11472_v5 }
0x188c   : > { %v11055_v54 = vsub.f32 %v6202_v23, %v6236_v35 }
0x188e   : > { %v6252_v59 = vmul.f32 %v11055_v54, %v11055_v54 }
0x1890   : > { %v6262_v29 = vsel %vm11474_vm13, %v6252_v59, 0.0 }
0x1891   : > { %v6219_v48 = vpop.xlane.xlu0 %6218  ;;  %6263 = vadd.xlane.f32.xlu1 %v6262_v29 }
0x1892   : > { %v6237_v30 = vmul.f32 %v6219_v48, %v11472_v5 }
0x1894   : > { %v11061_v1 = vsub.f32 %v6203_v11, %v6237_v30 }
0x1896   : > { %v6253_v25 = vmul.f32 %v11061_v1, %v11061_v1 }
0x1898   : > { %v6265_v39 = vsel %vm11475_vm3, %v6253_v25, 0.0 }
0x1899   : > { %6266 = vadd.xlane.f32.xlu2 %v6265_v39  ;;  %v6222_v22 = vpop.xlane.xlu1 %6221 }
0x189a   : > { %v6238_v24 = vmul.f32 %v6222_v22, %v11472_v5 }
0x189c   : > { %v11067_v37 = vsub.f32 %v6204_v41, %v6238_v24 }
0x189e   : > { %v6254_v14 = vmul.f32 %v11067_v37, %v11067_v37 }
0x18a0   : > { %v6268_v32 = vsel %vm11476_vm11, %v6254_v14, 0.0 }
0x18a1   : > { %6269 = vadd.xlane.f32.xlu0 %v6268_v32 }
0x18a2   : > { %v6225_v27 = vpop.xlane.xlu2 %6224 }
0x18a3   : > { %v6239_v13 = vmul.f32 %v6225_v27, %v11472_v5 }
0x18a5   : > { %v11073_v4 = vsub.f32 %v6205_v61, %v6239_v13 }
0x18a7   : > { %v6255_v21 = vmul.f32 %v11073_v4, %v11073_v4 }
0x18a9   : > { %v6271_v18 = vsel %vm11477_vm7, %v6255_v21, 0.0 }
0x18aa   : > { %6272 = vadd.xlane.f32.xlu1 %v6271_v18  ;;  %v6228_v16 = vpop.xlane.xlu0 %6227 }
0x18ab   : > { %v6240_v53 = vmul.f32 %v6228_v16, %v11472_v5 }
0x18ad   : > { %v11079_v50 = vsub.f32 %v6206_v9, %v6240_v53 }
0x18af   : > { %v6256_v42 = vmul.f32 %v11079_v50, %v11079_v50 }
0x18b1   : > { %v6274_v63 = vsel %vm11478_vm0, %v6256_v42, 0.0 }
0x18b2   : > { %6275 = vadd.xlane.f32.xlu2 %v6274_v63  ;;  %v6231_v34 = vpop.xlane.xlu1 %6230 }
0x18b3   : > { %v6241_v23 = vmul.f32 %v6231_v34, %v11472_v5 }
0x18b5   : > { %v11085_v33 = vsub.f32 %v6207_v46, %v6241_v23 }
0x18b7   : > { %v6257_v45 = vmul.f32 %v11085_v33, %v11085_v33 }
0x18b9   : > { %v6277_v6 = vsel %vm11479_vm8, %v6257_v45, 0.0 }
0x18ba   : > { %6278 = vadd.xlane.f32.xlu0 %v6277_v6 }
0x18bd   : > { %v6234_v12 = vpop.xlane.xlu2 %6233 }
0x18be   : > { %v6242_v11 = vmul.f32 %v6234_v12, %v11472_v5 }
0x18c0   : > { %v11091_v19 = vsub.f32 %v6208_v8, %v6242_v11 }
0x18c2   : > { %v6258_v62 = vmul.f32 %v11091_v19, %v11091_v19 }
0x18c4   : > { %v6280_v31 = vsel %vm11481_vm12, %v6258_v62, 0.0 }
0x18c5   : > { %6281 = vadd.xlane.f32.xlu1 %v6280_v31 }
0x18c6   : > { %7467 = shalt.err (!%p7464_p3)
}
0x18c7   : > { %6863 = dma.vmem_to_hbm [thread:$0]  (%p7685_p5), %s6433_s9, 128, %s6435_s3, %s6415_s7   ;;  %v11118_v49 = vld [vmem:[%s11211_s16 + $0x3] ss:$0 sm:$0xff]  ;;  %vm11484_vm10 = vmmov %vm11478_vm0 }
0x18c8   : > { %v11123_v9 = vld [vmem:[%s11212_s17 + $0x3] ss:$0 sm:$0xff]  ;;  %s11483_s26 = sld [smem:[#allocation45_spill]]  ;;  %vm11485_vm13 = vmmov %vm11478_vm0 }
0x18ce   : > { %s11131_s18 = scalar_lea.vmem %s11483_s26, %s7936_s6 }
0x18e4   : > { %v6261_v20 = vpop.xlane.xlu0 %6260 }
0x18e5   : > { %v6283_v41 = vmul.f32 %v6261_v20, %v11472_v5 }
0x18e7   : > { %v6291_v55 = vadd.f32 1e-05, %v6283_v41 }
0x18e9   : > { %7415 = vrsqrt.f32 %v6291_v55  ;;  %vm6305_vm2 = vweird.f32 %v6291_v55 }
0x18ef   : > { %v7416_v36 = vpop.eup %7415 }
0x18f0   : > { %v6300_v52 = vmul.f32 %v7416_v36, %v6291_v55  ;;  %vm6306_vm1 = vweird.f32 %v7416_v36 }
0x18f1   : > { %vm6307_vm9 = vmor %vm6305_vm2, %vm6306_vm1 }
0x18f2   : > { %v6301_v3 = vmul.f32 %v7416_v36, %v6300_v52  ;;  %vm11486_vm1 = vmmov %vm11478_vm0 }
0x18f4   : > { %v6302_v61 = vmul.f32 0.5, %v6301_v3 }
0x18f6   : > { %v6303_v0 = vsub.f32 1.5, %v6302_v61 }
0x18f8   : > { %v6304_v43 = vmul.f32 %v7416_v36, %v6303_v0 }
0x18fa   : > { %v6308_v57 = vsel %vm6307_vm9, %v7416_v36, %v6304_v43 }
0x18fb   : > { %v6379_v44 = vmul.f32 %v6308_v57, %v11049_v56 }
0x18fd   : > { %v6388_v10 = vmul.f32 %v11118_v49, %v6379_v44 }
0x18ff   : > { %v6397_v2 = vadd.f32 %v11123_v9, %v6388_v10 }
0x1901   : > { %6406 = vst.msk [vmem:[%s11131_s18] sm:$0xff] %vm11484_vm10, %v6397_v2 }
0x1904   : > { %v6264_v51 = vpop.xlane.xlu1 %6263 }
0x1905   : > { %v6284_v46 = vmul.f32 %v6264_v51, %v11472_v5 }
0x1907   : > { %v6292_v17 = vadd.f32 1e-05, %v6284_v46 }
0x1909   : > { %7417 = vrsqrt.f32 %v6292_v17  ;;  %vm6315_vm6 = vweird.f32 %v6292_v17 }
0x190c   : > { %v6267_v15 = vpop.xlane.xlu2 %6266 }
0x190d   : > { %v6285_v28 = vmul.f32 %v6267_v15, %v11472_v5 }
0x190f   : > { %v7418_v58 = vpop.eup %7417  ;;  %v6293_v8 = vadd.f32 1e-05, %v6285_v28 }
0x1910   : > { %v6310_v7 = vmul.f32 %v7418_v58, %v6292_v17  ;;  %vm6316_vm5 = vweird.f32 %v7418_v58 }
0x1911   : > { %7419 = vrsqrt.f32 %v6293_v8  ;;  %vm6317_vm14 = vmor %vm6315_vm6, %vm6316_vm5  ;;  %vm6325_vm4 = vweird.f32 %v6293_v8 }
0x1912   : > { %v6311_v47 = vmul.f32 %v7418_v58, %v6310_v7  ;;  %vm11487_vm6 = vmmov %vm11478_vm0 }
0x1914   : > { %v6312_v38 = vmul.f32 0.5, %v6311_v47  ;;  %v6270_v56 = vpop.xlane.xlu0 %6269 }
0x1915   : > { %v6286_v40 = vmul.f32 %v6270_v56, %v11472_v5 }
0x1916   : > { %v6313_v60 = vsub.f32 1.5, %v6312_v38 }
0x1917   : > { %v7420_v26 = vpop.eup %7419  ;;  %v6294_v35 = vadd.f32 1e-05, %v6286_v40 }
0x1918   : > { %v6314_v59 = vmul.f32 %v7418_v58, %v6313_v60  ;;  %v6320_v29 = vmul.f32 %v7420_v26, %v6293_v8  ;;  %vm6326_vm15 = vweird.f32 %v7420_v26 }
0x1919   : > { %7421 = vrsqrt.f32 %v6294_v35  ;;  %vm6327_vm3 = vmor %vm6325_vm4, %vm6326_vm15  ;;  %vm6335_vm7 = vweird.f32 %v6294_v35 }
0x191a   : > { %v6318_v48 = vsel %vm6317_vm14, %v7418_v58, %v6314_v59  ;;  %v6321_v30 = vmul.f32 %v7420_v26, %v6320_v29 }
0x191b   : > { %v6380_v25 = vmul.f32 %v6318_v48, %v11055_v54 }
0x191c   : > { %v6322_v39 = vmul.f32 0.5, %v6321_v30 }
0x191d   : > { %v6389_v22 = vmul.f32 %v11118_v49, %v6380_v25  ;;  %v6273_v24 = vpop.xlane.xlu1 %6272 }
0x191e   : > { %v6323_v14 = vsub.f32 1.5, %v6322_v39  ;;  %v6287_v32 = vmul.f32 %v6273_v24, %v11472_v5 }
0x191f   : > { %v7422_v27 = vpop.eup %7421  ;;  %v6398_v13 = vadd.f32 %v11123_v9, %v6389_v22 }
0x1920   : > { %v6324_v21 = vmul.f32 %v7420_v26, %v6323_v14  ;;  %v6330_v18 = vmul.f32 %v7422_v27, %v6294_v35  ;;  %v6295_v16 = vadd.f32 1e-05, %v6287_v32  ;;  %vm6336_vm11 = vweird.f32 %v7422_v27 }
0x1921   : > { %6407 = vst.msk [vmem:[%s11131_s18 + $0x8] sm:$0xff] %vm11485_vm13, %v6398_v13  ;;  %vm6337_vm8 = vmor %vm6335_vm7, %vm6336_vm11 }
0x1922   : > { %v6328_v54 = vsel %vm6327_vm3, %v7420_v26, %v6324_v21  ;;  %v6331_v53 = vmul.f32 %v7422_v27, %v6330_v18  ;;  %7423 = vrsqrt.f32 %v6295_v16  ;;  %vm6345_vm2 = vweird.f32 %v6295_v16  ;;  %vm11488_vm13 = vmmov %vm11478_vm0 }
0x1923   : > { %v6381_v42 = vmul.f32 %v6328_v54, %v11061_v1  ;;  %vm11489_vm11 = vmmov %vm11478_vm0 }
0x1924   : > { %v6332_v63 = vmul.f32 0.5, %v6331_v53 }
0x1925   : > { %v6390_v34 = vmul.f32 %v11118_v49, %v6381_v42  ;;  %v6276_v23 = vpop.xlane.xlu2 %6275 }
0x1926   : > { %v6333_v45 = vsub.f32 1.5, %v6332_v63  ;;  %v6288_v6 = vmul.f32 %v6276_v23, %v11472_v5 }
0x1927   : > { %v6399_v12 = vadd.f32 %v11123_v9, %v6390_v34 }
0x1928   : > { %v7424_v11 = vpop.eup %7423  ;;  %v6334_v62 = vmul.f32 %v7422_v27, %v6333_v45  ;;  %v6296_v31 = vadd.f32 1e-05, %v6288_v6 }
0x1929   : > { %6408 = vst.msk [vmem:[%s11131_s18 + $0x10] sm:$0xff] %vm11478_vm0, %v6399_v12  ;;  %v6340_v20 = vmul.f32 %v7424_v11, %v6295_v16  ;;  %vm6346_vm12 = vweird.f32 %v7424_v11 }
0x192a   : > { %v6338_v1 = vsel %vm6337_vm8, %v7422_v27, %v6334_v62  ;;  %7425 = vrsqrt.f32 %v6296_v31  ;;  %vm6347_vm9 = vmor %vm6345_vm2, %vm6346_vm12  ;;  %vm6355_vm5 = vweird.f32 %v6296_v31 }
0x192b   : > { %v6382_v41 = vmul.f32 %v6338_v1, %v11067_v37  ;;  %v6341_v55 = vmul.f32 %v7424_v11, %v6340_v20  ;;  %vm11490_vm12 = vmmov %vm11486_vm1 }
0x192d   : > { %v6391_v36 = vmul.f32 %v11118_v49, %v6382_v41  ;;  %v6342_v52 = vmul.f32 0.5, %v6341_v55  ;;  %v6279_v3 = vpop.xlane.xlu0 %6278 }
0x192e   : > { %v6289_v61 = vmul.f32 %v6279_v3, %v11472_v5 }
0x192f   : > { %v6400_v0 = vadd.f32 %v11123_v9, %v6391_v36  ;;  %v6343_v43 = vsub.f32 1.5, %v6342_v52 }
0x1930   : > { %v7426_v57 = vpop.eup %7425  ;;  %v6297_v44 = vadd.f32 1e-05, %v6289_v61 }
0x1931   : > { %6409 = vst.msk [vmem:[%s11131_s18 + $0x18] sm:$0xff] %vm11486_vm1, %v6400_v0  ;;  %v6344_v10 = vmul.f32 %v7424_v11, %v6343_v43  ;;  %v6350_v2 = vmul.f32 %v7426_v57, %v6296_v31  ;;  %vm6356_vm10 = vweird.f32 %v7426_v57 }
0x1932   : > { %7427 = vrsqrt.f32 %v6297_v44  ;;  %vm6357_vm14 = vmor %vm6355_vm5, %vm6356_vm10  ;;  %vm6365_vm4 = vweird.f32 %v6297_v44 }
0x1933   : > { %v6348_v37 = vsel %vm6347_vm9, %v7424_v11, %v6344_v10  ;;  %v6351_v51 = vmul.f32 %v7426_v57, %v6350_v2 }
0x1934   : > { %v6383_v46 = vmul.f32 %v6348_v37, %v11073_v4 }
0x1935   : > { %v6352_v17 = vmul.f32 0.5, %v6351_v51 }
0x1936   : > { %v6392_v15 = vmul.f32 %v11118_v49, %v6383_v46 }
0x1937   : > { %v6353_v28 = vsub.f32 1.5, %v6352_v17 }
0x1938   : > { %v7428_v58 = vpop.eup %7427  ;;  %v6401_v8 = vadd.f32 %v11123_v9, %v6392_v15  ;;  %v6282_v7 = vpop.xlane.xlu1 %6281 }
0x1939   : > { %v6354_v47 = vmul.f32 %v7426_v57, %v6353_v28  ;;  %v6360_v38 = vmul.f32 %v7428_v58, %v6297_v44  ;;  %v6290_v56 = vmul.f32 %v6282_v7, %v11472_v5  ;;  %vm6366_vm15 = vweird.f32 %v7428_v58 }
0x193a   : > { %6410 = vst.msk [vmem:[%s11131_s18 + $0x20] sm:$0xff] %vm11487_vm6, %v6401_v8  ;;  %vm6367_vm3 = vmor %vm6365_vm4, %vm6366_vm15 }
0x193b   : > { %v6358_v40 = vsel %vm6357_vm14, %v7426_v57, %v6354_v47  ;;  %v6361_v4 = vmul.f32 %v7428_v58, %v6360_v38  ;;  %v6298_v60 = vadd.f32 1e-05, %v6290_v56 }
0x193c   : > { %v6384_v26 = vmul.f32 %v6358_v40, %v11079_v50 }
0x193d   : > { %v6362_v35 = vmul.f32 0.5, %v6361_v4  ;;  %7429 = vrsqrt.f32 %v6298_v60  ;;  %vm6375_vm0 = vweird.f32 %v6298_v60 }
0x193e   : > { %v6393_v59 = vmul.f32 %v11118_v49, %v6384_v26 }
0x193f   : > { %v6363_v29 = vsub.f32 1.5, %v6362_v35 }
0x1940   : > { %v6402_v48 = vadd.f32 %v11123_v9, %v6393_v59 }
0x1941   : > { %v6364_v30 = vmul.f32 %v7428_v58, %v6363_v29 }
0x1942   : > { %6411 = vst.msk [vmem:[%s11131_s18 + $0x28] sm:$0xff] %vm11488_vm13, %v6402_v48 }
0x1943   : > { %v7430_v5 = vpop.eup %7429  ;;  %v6368_v25 = vsel %vm6367_vm3, %v7428_v58, %v6364_v30 }
0x1944   : > { %v6385_v39 = vmul.f32 %v6368_v25, %v11085_v33  ;;  %v6370_v50 = vmul.f32 %v7430_v5, %v6298_v60  ;;  %vm6376_vm7 = vweird.f32 %v7430_v5 }
0x1945   : > { %vm6377_vm8 = vmor %vm6375_vm0, %vm6376_vm7 }
0x1946   : > { %v6394_v22 = vmul.f32 %v11118_v49, %v6385_v39  ;;  %v6371_v24 = vmul.f32 %v7430_v5, %v6370_v50 }
0x1948   : > { %v6403_v14 = vadd.f32 %v11123_v9, %v6394_v22  ;;  %v6372_v32 = vmul.f32 0.5, %v6371_v24 }
0x194a   : > { %6412 = vst.msk [vmem:[%s11131_s18 + $0x30] sm:$0xff] %vm11489_vm11, %v6403_v14  ;;  %v6373_v27 = vsub.f32 1.5, %v6372_v32 }
0x194c   : > { %v6374_v13 = vmul.f32 %v7430_v5, %v6373_v27 }
0x194e   : > { %v6378_v21 = vsel %vm6377_vm8, %v7430_v5, %v6374_v13 }
0x194f   : > { %v6386_v18 = vmul.f32 %v6378_v21, %v11091_v19 }
0x1951   : > { %v6395_v33 = vmul.f32 %v11118_v49, %v6386_v18 }
0x1953   : > { %v6404_v16 = vadd.f32 %v11123_v9, %v6395_v33 }
0x1955   : > { %6413 = vst.msk [vmem:[%s11131_s18 + $0x38] sm:$0xff] %vm11490_vm12, %v6404_v16 }
0x1956 PF: > { %s11491_s6 = sld [smem:[#allocation7_spill]] }
0x1957   : > { %s11492_s28 = sld [smem:[#allocation5_spill]] }
0x195c   : > { %p6869_p4 = scmp.ge.s32.totalorder %s11491_s6, 2 }
0x195d   : > { %s6449_s9 = sand.u32 1, %s11492_s28  }
0x195e   : > { %p6866_p5 = pnand %p6869_p4, %p7689_p6  ;;  %s6450_s3 = scalar_lea.sflag [#allocation3], %s6449_s9 }
0x1960   : > { %p6867_p7 = pneg %p6866_p5 }
0x1962   : > { %7485 = dma.done.wait (%p6867_p7), %s6450_s3, 128  }
0x1963   : > { %7487 = vsyncadd (%p6867_p7), %s6450_s3, 4294967168  ;;  %s11494_s25 = sld [smem:[#allocation8_spill]]  ;;  %s11497_s4 = smov %s7494_s30 }
0x1964   : > { %s11495_s7 = sld [smem:[#allocation6_spill]] }
0x1965   : > { %s11496_s24 = sld [smem:[#allocation9_spill]] }
0x1969   : > { %p34_p8 = scmp.ge.s32.totalorder %s11494_s25, 4  }
0x196a   : > { %s11498_s30 = smov %s11495_s7 }
0x196b   :  { %36 = sbr.rel (!%p34_p8) target bundleno = 20 (0x14), region = 164 }
0x1970   :  { %6464 = vsyncpa [#allocation3], 1 }
0x1971   :  { %6466 = vsyncpa [#allocation3 + $0x1], 1 }

</bundles_post_ra>
